<compile_context>
chip_gen: v7x
topology: tpu7x:2x2x1
jax: 0.10.0
libtpu: 0.0.40
codegen_flags: <defaults>
</compile_context>

<pallas_src>
import numpy as np
import jax
import jax.numpy as jnp
from jax import lax
from jax.experimental import pallas as pl
from jax.experimental.pallas import tpu as pltpu

# ----------------------- configuration (small, consistent with module) -------
INPUT_SIZE = 16            # word-embedding size given to WordCharEncoderBiRNN
HIDDEN_SIZE = 32           # LSTM hidden size
MAX_LENGTH = 8             # max sentence length (words)
CHAR_LENGTH = 16           # params.CHAR_LENGTH : max chars per word
CHAR_EMBED = INPUT_SIZE    # CNNWordFeature embedding_size = (2*input)/2
CHAR_FEATURE = INPUT_SIZE  # CNNWordFeature feature_size
B_SENT = 8                 # sentences batched into one pallas_call

CHARS = '!"$%&\'()*+,-./0123456789:;<>?[]abcdefghijklmnopqrstuvwxyz'
CHAR2IDX = {c: i for i, c in enumerate(CHARS)}   # build_char_lang equivalent
VOCAB = len(CHARS)

C2 = CHAR_FEATURE // 3 + CHAR_FEATURE % 3        # conv2 out channels
C3 = CHAR_FEATURE // 3                            # conv3 out channels
C4 = CHAR_FEATURE // 3                            # conv4 out channels
F_CHAR = C2 + C3 + C4                             # = CHAR_FEATURE

H = HIDDEN_SIZE
GW = 8 * H                                        # combined gate width, both dirs (=256)
D_IN = 2 * INPUT_SIZE                             # LSTM input feature size (=32)
E = CHAR_EMBED

NWORD = MAX_LENGTH * B_SENT                       # time-major flattened word rows (=64)
NWIN = NWORD * CHAR_LENGTH                        # flattened window-start rows (=1024)
EMB_ROWS = NWIN + 8                               # zero tail so emb[kh:kh+NWIN] stays in bounds
ROWS_OUT = NWORD + 2 * B_SENT                     # output slab rows: outputs + h + c (=80)
OUT_LANES = 128                                   # lane-dense output width (2H=64 padded)


# ----------------------------- fused encoder kernel --------------------------
def encoder_kernel(emb_ref, wemb_ref, cnnp_ref, lstmp_ref, pbig_ref, out_ref):
    f32 = jnp.float32

    # ---- char CNN: ONE fused im2col matmul over all words of all sentences ----
    emb = emb_ref[...]                                              # (EMB_ROWS, E)
    cols = jnp.concatenate([emb[kh:kh + NWIN, :] for kh in range(4)], axis=1)   # (NWIN, 4E)
    cnnp = cnnp_ref[...]
    wflat = cnnp[0:4 * E, :]                                        # (4E, F) zero-padded widths
    bconv = cnnp[4 * E:4 * E + 1, :]                                # (1, F)
    pre = jnp.dot(cols, wflat, preferred_element_type=f32) + bconv  # (NWIN, F)

    # window-validity mask generated in-kernel from iota (no DMA); ReLU-before-mask
    # keeps exact PyTorch semantics (max over non-negative valid scores).
    t_in_word = lax.broadcasted_iota(jnp.int32, (NWIN, F_CHAR), 0) % CHAR_LENGTH
    ch = lax.broadcasted_iota(jnp.int32, (NWIN, F_CHAR), 1)
    kwidth = jnp.where(ch < C2, 2, jnp.where(ch < C2 + C3, 3, 4))
    cmask = t_in_word <= (CHAR_LENGTH - kwidth)
    scores = jnp.where(cmask, jnp.maximum(pre, 0.0), 0.0)           # (NWIN, F)

    # single max-pool reduction over the char axis for every word
    feats = jnp.max(scores.reshape(NWORD, CHAR_LENGTH, F_CHAR), axis=1)   # (NWORD, F)

    # ---- LSTM gate inputs for BOTH directions, hoisted out of the recurrence ----
    lstmp = lstmp_ref[...]                                          # (D_IN+2H+1, GW)
    wih = lstmp[0:D_IN, :]
    whh = lstmp[D_IN:D_IN + 2 * H, :]                               # block-diag, permuted cols
    bcat = lstmp[D_IN + 2 * H:D_IN + 2 * H + 1, :]

    x = jnp.concatenate([wemb_ref[...], feats], axis=1)             # (NWORD, D_IN) time-major
    gx = jnp.dot(x, wih, preferred_element_type=f32) + bcat         # (NWORD, GW)

    # pre-reverse the reverse-direction gate inputs once (per-sentence permutation)
    pbig = pbig_ref[...]                                            # (NWORD, NWORD)
    gperm = jnp.dot(pbig, gx, preferred_element_type=f32)
    lane = lax.broadcasted_iota(jnp.int32, (1, GW), 1)
    fwd_lane = (lane % (2 * H)) < H                                 # fwd-direction columns
    gcomb = jnp.where(fwd_lane, gx, gperm)                          # (NWORD, GW)

    # validity of row (s, b): 1.0 iff s < n_b (derived from the permutation matrix)
    row_valid = jnp.sum(pbig, axis=1, keepdims=True)                # (NWORD, 1) in {0,1}
    valid_b = row_valid > 0.5

    # single sigmoid pass per step: tanh(x) = 2*sigmoid(2x) - 1 on the g-gate lanes
    is_g = (lane >= 4 * H) & (lane < 6 * H)
    gscale = jnp.where(is_g, 2.0, 1.0).astype(f32)                  # (1, GW)
    goffs = jnp.where(is_g, 1.0, 0.0).astype(f32)

    # ---- recurrence: B sentences advance together; carries are (B, 2H) ----
    h = jnp.zeros((B_SENT, 2 * H), f32)                             # [h_fwd | h_rev]
    c = jnp.zeros((B_SENT, 2 * H), f32)
    hs = []
    for s in range(MAX_LENGTH):                                     # fixed trip count
        gates = gcomb[s * B_SENT:(s + 1) * B_SENT, :] + jnp.dot(
            h, whh, preferred_element_type=f32)                     # (B, GW)
        act = jax.nn.sigmoid(gates * gscale) * gscale - goffs       # one EUP pass
        i_g = act[:, 0:2 * H]
        f_g = act[:, 2 * H:4 * H]
        g_g = act[:, 4 * H:6 * H]
        o_g = act[:, 6 * H:8 * H]
        c_new = f_g * c + i_g * g_g
        h_new = o_g * jnp.tanh(c_new)
        vb = valid_b[s * B_SENT:(s + 1) * B_SENT, :]                # (B, 1) freeze mask
        h = jnp.where(vb, h_new, h)
        c = jnp.where(vb, c_new, c)
        hs.append(h)                                                # vreg stack, no stores

    # ---- single lane-dense output store ----
    stacked = jnp.concatenate(hs, axis=0)                           # (NWORD, 2H) time-major
    fwd_half = stacked[:, 0:H] * row_valid                          # zero rows with s >= n_b
    rev_half = jnp.dot(pbig, stacked[:, H:2 * H],
                       preferred_element_type=f32)                  # un-reverse + zero pad rows
    outputs = jnp.concatenate([fwd_half, rev_half], axis=1)         # (NWORD, 2H)

    slab = jnp.concatenate([outputs, h, c], axis=0)                 # (ROWS_OUT, 2H)
    out_ref[...] = jnp.concatenate(
        [slab, jnp.zeros((ROWS_OUT, OUT_LANES - 2 * H), f32)], axis=1)


def _spec(shape):
    zeros = (0,) * len(shape)
    return pl.BlockSpec(shape, lambda i, zeros=zeros: zeros)


# ----------------------------- wrapper (single pallas_call) ------------------
@jax.jit
def encode(wemb_pad, char_idxs_pad, char_mask_pad, n_arr, kp):
    """wemb_pad: (B,L,IN), char_idxs/mask: (B,L,T), n_arr: (B,) sentence lengths."""
    n = jnp.clip(n_arr.astype(jnp.int32), 0, MAX_LENGTH)            # robustness: clamp

    # char embedding lookup (tiny gather, XLA glue) + time-major flatten
    emb = kp['char_table'][char_idxs_pad] * char_mask_pad[..., None]       # (B,L,T,E)
    emb_t = jnp.transpose(emb, (1, 0, 2, 3)).reshape(NWIN, E)
    emb_t = jnp.pad(emb_t, ((0, EMB_ROWS - NWIN), (0, 0)))                 # zero tail

    wemb_t = jnp.transpose(wemb_pad, (1, 0, 2)).reshape(NWORD, INPUT_SIZE)

    # per-sentence reverse permutation in time-major layout:
    #   Pbig[s*B+b, t*B+b] = 1  iff  t == n_b-1-s and s < n_b
    row = jnp.arange(NWORD)
    s_r = row // B_SENT
    b_r = row % B_SENT
    col = jnp.arange(NWORD)
    t_c = col // B_SENT
    b_c = col % B_SENT
    n_row = n[b_r]
    pbig = ((b_c[None, :] == b_r[:, None])
            & (t_c[None, :] == (n_row[:, None] - 1 - s_r[:, None]))
            & (s_r[:, None] < n_row[:, None])).astype(jnp.float32)         # (NWORD, NWORD)

    grid_spec = pltpu.PrefetchScalarGridSpec(
        num_scalar_prefetch=0,
        grid=(1,),
        in_specs=[
            _spec((EMB_ROWS, E)),                  # flattened char embeddings
            _spec((NWORD, INPUT_SIZE)),            # time-major word embeddings
            _spec((4 * E + 1, F_CHAR)),            # packed char-CNN params [wflat; bconv]
            _spec((D_IN + 2 * H + 1, GW)),         # packed LSTM params [wih; whh; b]
            _spec((NWORD, NWORD)),                 # reverse permutation matrix
        ],
        out_specs=_spec((ROWS_OUT, OUT_LANES)),
    )
    out = pl.pallas_call(
        encoder_kernel,
        out_shape=jax.ShapeDtypeStruct((ROWS_OUT, OUT_LANES), jnp.float32),
        grid_spec=grid_spec,
        compiler_params=pltpu.CompilerParams(dimension_semantics=("arbitrary",)),
    )(emb_t, wemb_t, kp['cnn_params'], kp['lstm_params'], pbig)

    res = out[:, :2 * H]
    outputs = jnp.transpose(res[:NWORD].reshape(MAX_LENGTH, B_SENT, 2 * H), (1, 0, 2))
    hidden = res[NWORD:NWORD + B_SENT].reshape(1, B_SENT, 2 * H)
    cell = res[NWORD + B_SENT:].reshape(1, B_SENT, 2 * H)
    return outputs, (hidden, cell), (hidden, cell)
    # TODO(synk): dropout is identity (dropout_p=0.0 / eval mode).


# ----------------------------- deterministic parameter init ------------------
def init_params(key):
    ks = jax.random.split(key, 13)
    u = lambda k, shape, s=0.1: jax.random.uniform(k, shape, jnp.float32, -s, s)
    p = {}
    p['char_table'] = u(ks[0], (VOCAB, E), 0.5)
    # conv weights flattened+transposed: (kh*E, Cout); biases (1, Cout)
    p['w2t'] = u(ks[1], (2 * E, C2)); p['b2'] = u(ks[2], (1, C2))
    p['w3t'] = u(ks[3], (3 * E, C3)); p['b3'] = u(ks[4], (1, C3))
    p['w4t'] = u(ks[5], (4 * E, C4)); p['b4'] = u(ks[6], (1, C4))
    # LSTM weights transposed: (D,4H), (H,4H); bias = b_ih+b_hh, gate order i,f,g,o
    p['wih_f'] = u(ks[7], (D_IN, 4 * H)); p['whh_f'] = u(ks[8], (H, 4 * H)); p['b_f'] = u(ks[9], (1, 4 * H))
    p['wih_r'] = u(ks[10], (D_IN, 4 * H)); p['whh_r'] = u(ks[11], (H, 4 * H)); p['b_r'] = u(ks[12], (1, 4 * H))
    return p


def prepare_kernel_params(p):
    # char-CNN: zero-pad the 3 conv widths into one (4, E, F) weight, flatten to (4E, F)
    wpad = jnp.zeros((4, E, F_CHAR), jnp.float32)
    wpad = wpad.at[0:2, :, 0:C2].set(p['w2t'].reshape(2, E, C2))
    wpad = wpad.at[0:3, :, C2:C2 + C3].set(p['w3t'].reshape(3, E, C3))
    wpad = wpad.at[0:4, :, C2 + C3:].set(p['w4t'].reshape(4, E, C4))
    wflat = wpad.reshape(4 * E, F_CHAR)
    bconv = jnp.concatenate([p['b2'], p['b3'], p['b4']], axis=1)
    cnn_params = jnp.concatenate([wflat, bconv], axis=0)                   # (4E+1, F)

    # LSTM: permute gate columns to [i_f i_r | f_f f_r | g_f g_r | o_f o_r]
    def permute_cols(m_f, m_r):
        chunks = []
        for blk in range(4):
            chunks.append(m_f[:, blk * H:(blk + 1) * H])
            chunks.append(m_r[:, blk * H:(blk + 1) * H])
        return jnp.concatenate(chunks, axis=1)

    wih_cat = permute_cols(p['wih_f'], p['wih_r'])                         # (D_IN, GW)
    b_cat = permute_cols(p['b_f'], p['b_r'])                               # (1, GW)
    whh_blk = jnp.zeros((2 * H, GW), jnp.float32)                          # block-diag
    for blk in range(4):
        whh_blk = whh_blk.at[0:H, blk * 2 * H:blk * 2 * H + H].set(
            p['whh_f'][:, blk * H:(blk + 1) * H])
        whh_blk = whh_blk.at[H:2 * H, blk * 2 * H + H:(blk + 1) * 2 * H].set(
            p['whh_r'][:, blk * H:(blk + 1) * H])
    lstm_params = jnp.concatenate([wih_cat, whh_blk, b_cat], axis=0)       # (D_IN+2H+1, GW)

    return {'char_table': p['char_table'],
            'cnn_params': cnn_params,
            'lstm_params': lstm_params}


# ----------------------------- pure-JAX reference (single sentence) ----------
def reference(word_embeddings, char_idxs, char_mask, p):
    emb = p['char_table'][char_idxs] * char_mask[..., None]

    def branch(e, w, b, k):
        T = e.shape[0]
        nwin = T - k + 1
        cols = jnp.concatenate([e[kh:kh + nwin] for kh in range(k)], axis=-1)
        s = cols @ w + b
        return jnp.max(jax.nn.relu(s), axis=0)

    feats = []
    for i in range(emb.shape[0]):
        feats.append(jnp.concatenate([branch(emb[i], p['w2t'], p['b2'], 2),
                                      branch(emb[i], p['w3t'], p['b3'], 3),
                                      branch(emb[i], p['w4t'], p['b4'], 4)], axis=-1))
    char_feats = jnp.stack(feats)
    x = jnp.concatenate([word_embeddings, char_feats], axis=-1)

    def lstm(xs, wih, whh, b):
        def step(carry, x_t):
            h, c = carry
            gates = x_t @ wih + h @ whh + b[0]
            i = jax.nn.sigmoid(gates[:H]); f = jax.nn.sigmoid(gates[H:2 * H])
            g = jnp.tanh(gates[2 * H:3 * H]); o = jax.nn.sigmoid(gates[3 * H:4 * H])
            c = f * c + i * g
            h = o * jnp.tanh(c)
            return (h, c), h
        (h, c), outs = lax.scan(step, (jnp.zeros(H), jnp.zeros(H)), xs)
        return outs, h, c

    nw = x.shape[0]
    fo, fh, fc = lstm(x, p['wih_f'], p['whh_f'], p['b_f'])
    ro_rev, rh, rc = lstm(x[::-1], p['wih_r'], p['whh_r'], p['b_r'])
    ro = ro_rev[::-1]
    fwd_out = jnp.zeros((MAX_LENGTH, H)).at[:nw].set(fo)
    rev_out = jnp.zeros((MAX_LENGTH, H)).at[:nw].set(ro)
    outputs = jnp.concatenate([fwd_out, rev_out], axis=1)
    hidden = jnp.concatenate([fh, rh]).reshape(1, 1, 2 * H)
    cell = jnp.concatenate([fc, rc]).reshape(1, 1, 2 * H)
    return outputs, hidden, cell


# ----------------------------- main -------------------------------------------
if __name__ == "__main__":
    key = jax.random.PRNGKey(0)
    pkey, ekey = jax.random.split(key)
    p = init_params(pkey)
    kp = prepare_kernel_params(p)

    sentences = [
        ["hello", "tpu", "pallas", "kernels", "go"],
        ["a"],
        ["bidirectional", "lstm"],
        ["char", "cnn", "word", "features", "fused", "in", "one", "kernel"],
        ["mosaic", "mxu", "vpu"],
        ["reverse", "direction", "state"],
        ["zero", "padded", "rows", "stay", "zero", "here"],
        ["batch", "of", "eight", "sentences"],
    ]
    assert len(sentences) == B_SENT
    idxs = np.zeros((B_SENT, MAX_LENGTH, CHAR_LENGTH), dtype=np.int32)
    mask = np.zeros((B_SENT, MAX_LENGTH, CHAR_LENGTH), dtype=np.float32)
    n_list = []
    for b, words in enumerate(sentences):
        n_list.append(len(words))
        for i, w in enumerate(words):
            for j, ch in enumerate(w):
                idxs[b, i, j] = CHAR2IDX[ch]
                mask[b, i, j] = 1.0
    n_arr = jnp.asarray(n_list, dtype=jnp.int32)

    word_valid = (np.arange(MAX_LENGTH)[None, :] < np.asarray(n_list)[:, None]).astype(np.float32)
    word_emb = jax.random.normal(ekey, (B_SENT, MAX_LENGTH, INPUT_SIZE), jnp.float32)
    word_emb = word_emb * jnp.asarray(word_valid)[:, :, None]

    outputs, (hidden, cell), projected = encode(
        word_emb, jnp.asarray(idxs), jnp.asarray(mask), n_arr, kp)
    jax.block_until_ready((outputs, hidden, cell))

    for b in range(B_SENT):
        nb = n_list[b]
        ref_out, ref_h, ref_c = reference(word_emb[b, :nb], jnp.asarray(idxs[b, :nb]),
                                          jnp.asarray(mask[b, :nb]), p)
        np.testing.assert_allclose(np.asarray(outputs[b]), np.asarray(ref_out),
                                   rtol=1e-3, atol=1e-3)
        np.testing.assert_allclose(np.asarray(hidden[0, b]), np.asarray(ref_h[0, 0]),
                                   rtol=1e-3, atol=1e-3)
        np.testing.assert_allclose(np.asarray(cell[0, b]), np.asarray(ref_c[0, 0]),
                                   rtol=1e-3, atol=1e-3)
    print("KERNEL_OK")
</pallas_src>

<mosaic_0001>
module attributes {stable_mosaic.version = 11 : i64} {
  func.func @encoder_kernel(%arg0: i32, %arg1: memref<1032x16xf32, #tpu.memory_space<vmem>>, %arg2: memref<64x16xf32, #tpu.memory_space<vmem>>, %arg3: memref<65x16xf32, #tpu.memory_space<vmem>>, %arg4: memref<97x256xf32, #tpu.memory_space<vmem>>, %arg5: memref<64x64xf32, #tpu.memory_space<vmem>>, %arg6: memref<80x128xf32, #tpu.memory_space<vmem>>) attributes {dimension_semantics = [#tpu.dimension_semantics<arbitrary>], iteration_bounds = array<i64: 1>, scalar_prefetch = 0 : i64, scratch_operands = 0 : i64, tpu.core_type = #tpu.core_type<tc>, window_params = [{pipeline_mode = #tpu.pipeline_mode<synchronous>, transform_indices = @transform_0, window_bounds = array<i64: 1032, 16>}, {pipeline_mode = #tpu.pipeline_mode<synchronous>, transform_indices = @transform_1, window_bounds = array<i64: 64, 16>}, {pipeline_mode = #tpu.pipeline_mode<synchronous>, transform_indices = @transform_2, window_bounds = array<i64: 65, 16>}, {pipeline_mode = #tpu.pipeline_mode<synchronous>, transform_indices = @transform_3, window_bounds = array<i64: 97, 256>}, {pipeline_mode = #tpu.pipeline_mode<synchronous>, transform_indices = @transform_4, window_bounds = array<i64: 64, 64>}, {pipeline_mode = #tpu.pipeline_mode<synchronous>, transform_indices = @transform_5, window_bounds = array<i64: 80, 128>}]} {
    %c0 = arith.constant 0 : index
    %c0_0 = arith.constant 0 : index
    %0 = vector.load %arg1[%c0, %c0_0] : memref<1032x16xf32, #tpu.memory_space<vmem>>, vector<1032x16xf32>
    %1 = vector.extract_strided_slice %0 {offsets = [0, 0], sizes = [1024, 16], strides = [1, 1]} : vector<1032x16xf32> to vector<1024x16xf32>
    %2 = vector.extract_strided_slice %0 {offsets = [1, 0], sizes = [1024, 16], strides = [1, 1]} : vector<1032x16xf32> to vector<1024x16xf32>
    %3 = vector.extract_strided_slice %0 {offsets = [2, 0], sizes = [1024, 16], strides = [1, 1]} : vector<1032x16xf32> to vector<1024x16xf32>
    %4 = vector.extract_strided_slice %0 {offsets = [3, 0], sizes = [1024, 16], strides = [1, 1]} : vector<1032x16xf32> to vector<1024x16xf32>
    %5 = tpu.concatenate %1, %2, %3, %4 in 1 : vector<1024x16xf32>, vector<1024x16xf32>, vector<1024x16xf32>, vector<1024x16xf32> -> vector<1024x64xf32>
    %c0_1 = arith.constant 0 : index
    %c0_2 = arith.constant 0 : index
    %6 = vector.load %arg3[%c0_1, %c0_2] : memref<65x16xf32, #tpu.memory_space<vmem>>, vector<65x16xf32>
    %7 = vector.extract_strided_slice %6 {offsets = [0, 0], sizes = [64, 16], strides = [1, 1]} : vector<65x16xf32> to vector<64x16xf32>
    %8 = vector.extract_strided_slice %6 {offsets = [64, 0], sizes = [1, 16], strides = [1, 1]} : vector<65x16xf32> to vector<1x16xf32>
    %cst = arith.constant dense<0.000000e+00> : vector<1024x16xf32>
    %9 = tpu.matmul %5, %7, %cst {dimension_numbers = #tpu.dot_dimension_numbers<[1], [0], [0], [1], [0, 0, 1, 1], [], []>} : vector<1024x64xf32>, vector<64x16xf32>, vector<1024x16xf32> -> vector<1024x16xf32>
    %10 = vector.broadcast %8 : vector<1x16xf32> to vector<1024x16xf32>
    %11 = arith.addf %9, %10 : vector<1024x16xf32>
    %12 = tpu.iota {dimensions = array<i32: 0>} : vector<1024x16xi32>
    %c16_i32 = arith.constant 16 : i32
    %c0_i32 = arith.constant 0 : i32
    %13 = arith.cmpi eq, %c16_i32, %c0_i32 : i32
    %c1_i32 = arith.constant 1 : i32
    %14 = arith.select %13, %c1_i32, %c16_i32 : i32
    %15 = vector.broadcast %14 : i32 to vector<1024x16xi32>
    %16 = arith.remsi %12, %15 : vector<1024x16xi32>
    %c0_i32_3 = arith.constant 0 : i32
    %17 = vector.broadcast %c0_i32_3 : i32 to vector<1024x16xi32>
    %18 = arith.cmpi ne, %16, %17 : vector<1024x16xi32>
    %c0_i32_4 = arith.constant 0 : i32
    %19 = vector.broadcast %c0_i32_4 : i32 to vector<1024x16xi32>
    %20 = arith.cmpi slt, %16, %19 : vector<1024x16xi32>
    %c0_i32_5 = arith.constant 0 : i32
    %21 = arith.cmpi slt, %14, %c0_i32_5 : i32
    %22 = vector.broadcast %21 : i1 to vector<1024x16xi1>
    %23 = vector.broadcast %22 : vector<1024x16xi1> to vector<1024x16xi1>
    %24 = arith.xori %20, %23 : vector<1024x16xi1>
    %25 = arith.andi %24, %18 : vector<1024x16xi1>
    %26 = vector.broadcast %14 : i32 to vector<1024x16xi32>
    %27 = arith.addi %16, %26 : vector<1024x16xi32>
    %28 = arith.select %25, %27, %16 : vector<1024x16xi1>, vector<1024x16xi32>
    %29 = tpu.iota {dimensions = array<i32: 1>} : vector<1024x16xi32>
    %c6_i32 = arith.constant 6 : i32
    %30 = vector.broadcast %c6_i32 : i32 to vector<1024x16xi32>
    %31 = arith.cmpi slt, %29, %30 : vector<1024x16xi32>
    %c11_i32 = arith.constant 11 : i32
    %32 = vector.broadcast %c11_i32 : i32 to vector<1024x16xi32>
    %33 = arith.cmpi slt, %29, %32 : vector<1024x16xi32>
    %c3_i32 = arith.constant 3 : i32
    %c4_i32 = arith.constant 4 : i32
    %34 = vector.broadcast %c3_i32 : i32 to vector<1024x16xi32>
    %35 = vector.broadcast %c4_i32 : i32 to vector<1024x16xi32>
    %36 = arith.select %33, %34, %35 : vector<1024x16xi1>, vector<1024x16xi32>
    %c2_i32 = arith.constant 2 : i32
    %37 = vector.broadcast %c2_i32 : i32 to vector<1024x16xi32>
    %38 = arith.select %31, %37, %36 : vector<1024x16xi1>, vector<1024x16xi32>
    %c16_i32_6 = arith.constant 16 : i32
    %39 = vector.broadcast %c16_i32_6 : i32 to vector<1024x16xi32>
    %40 = arith.subi %39, %38 : vector<1024x16xi32>
    %41 = arith.cmpi sle, %28, %40 : vector<1024x16xi32>
    %cst_7 = arith.constant 0.000000e+00 : f32
    %42 = vector.broadcast %cst_7 : f32 to vector<1024x16xf32>
    %43 = arith.maximumf %11, %42 : vector<1024x16xf32>
    %cst_8 = arith.constant 0.000000e+00 : f32
    %44 = vector.broadcast %cst_8 : f32 to vector<1024x16xf32>
    %45 = arith.select %41, %43, %44 : vector<1024x16xi1>, vector<1024x16xf32>
    %46 = vector.shape_cast %45 : vector<1024x16xf32> to vector<64x16x16xf32>
    %cst_9 = arith.constant dense<0xFF800000> : vector<64x16xf32>
    %47 = vector.multi_reduction <maximumf>, %46, %cst_9 [1] : vector<64x16x16xf32> to vector<64x16xf32>
    %c0_10 = arith.constant 0 : index
    %c0_11 = arith.constant 0 : index
    %48 = vector.load %arg4[%c0_10, %c0_11] : memref<97x256xf32, #tpu.memory_space<vmem>>, vector<97x256xf32>
    %49 = vector.extract_strided_slice %48 {offsets = [0, 0], sizes = [32, 256], strides = [1, 1]} : vector<97x256xf32> to vector<32x256xf32>
    %50 = vector.extract_strided_slice %48 {offsets = [32, 0], sizes = [64, 256], strides = [1, 1]} : vector<97x256xf32> to vector<64x256xf32>
    %51 = vector.extract_strided_slice %48 {offsets = [96, 0], sizes = [1, 256], strides = [1, 1]} : vector<97x256xf32> to vector<1x256xf32>
    %c0_12 = arith.constant 0 : index
    %c0_13 = arith.constant 0 : index
    %52 = vector.load %arg2[%c0_12, %c0_13] : memref<64x16xf32, #tpu.memory_space<vmem>>, vector<64x16xf32>
    %53 = tpu.concatenate %52, %47 in 1 : vector<64x16xf32>, vector<64x16xf32> -> vector<64x32xf32>
    %cst_14 = arith.constant dense<0.000000e+00> : vector<64x256xf32>
    %54 = tpu.matmul %53, %49, %cst_14 {dimension_numbers = #tpu.dot_dimension_numbers<[1], [0], [0], [1], [0, 0, 1, 1], [], []>} : vector<64x32xf32>, vector<32x256xf32>, vector<64x256xf32> -> vector<64x256xf32>
    %55 = vector.broadcast %51 : vector<1x256xf32> to vector<64x256xf32>
    %56 = arith.addf %54, %55 : vector<64x256xf32>
    %c0_15 = arith.constant 0 : index
    %c0_16 = arith.constant 0 : index
    %57 = vector.load %arg5[%c0_15, %c0_16] : memref<64x64xf32, #tpu.memory_space<vmem>>, vector<64x64xf32>
    %cst_17 = arith.constant dense<0.000000e+00> : vector<64x256xf32>
    %58 = tpu.matmul %57, %56, %cst_17 {dimension_numbers = #tpu.dot_dimension_numbers<[1], [0], [0], [1], [0, 0, 1, 1], [], []>} : vector<64x64xf32>, vector<64x256xf32>, vector<64x256xf32> -> vector<64x256xf32>
    %59 = tpu.iota {dimensions = array<i32: 1>} : vector<1x256xi32>
    %c64_i32 = arith.constant 64 : i32
    %c0_i32_18 = arith.constant 0 : i32
    %60 = arith.cmpi eq, %c64_i32, %c0_i32_18 : i32
    %c1_i32_19 = arith.constant 1 : i32
    %61 = arith.select %60, %c1_i32_19, %c64_i32 : i32
    %62 = vector.broadcast %61 : i32 to vector<1x256xi32>
    %63 = arith.remsi %59, %62 : vector<1x256xi32>
    %c0_i32_20 = arith.constant 0 : i32
    %64 = vector.broadcast %c0_i32_20 : i32 to vector<1x256xi32>
    %65 = arith.cmpi ne, %63, %64 : vector<1x256xi32>
    %c0_i32_21 = arith.constant 0 : i32
    %66 = vector.broadcast %c0_i32_21 : i32 to vector<1x256xi32>
    %67 = arith.cmpi slt, %63, %66 : vector<1x256xi32>
    %c0_i32_22 = arith.constant 0 : i32
    %68 = arith.cmpi slt, %61, %c0_i32_22 : i32
    %69 = vector.broadcast %68 : i1 to vector<1x256xi1>
    %70 = vector.broadcast %69 : vector<1x256xi1> to vector<1x256xi1>
    %71 = arith.xori %67, %70 : vector<1x256xi1>
    %72 = arith.andi %71, %65 : vector<1x256xi1>
    %73 = vector.broadcast %61 : i32 to vector<1x256xi32>
    %74 = arith.addi %63, %73 : vector<1x256xi32>
    %75 = arith.select %72, %74, %63 : vector<1x256xi1>, vector<1x256xi32>
    %c32_i32 = arith.constant 32 : i32
    %76 = vector.broadcast %c32_i32 : i32 to vector<1x256xi32>
    %77 = arith.cmpi slt, %75, %76 : vector<1x256xi32>
    %78 = vector.shape_cast %77 : vector<1x256xi1> to vector<1x256xi1>
    %79 = vector.broadcast %78 : vector<1x256xi1> to vector<64x256xi1>
    %80 = arith.select %79, %56, %58 : vector<64x256xi1>, vector<64x256xf32>
    %cst_23 = arith.constant dense<0.000000e+00> : vector<64xf32>
    %81 = vector.multi_reduction <add>, %57, %cst_23 [1] : vector<64x64xf32> to vector<64xf32>
    %82 = vector.shape_cast %81 : vector<64xf32> to vector<64x1xf32>
    %cst_24 = arith.constant 5.000000e-01 : f32
    %83 = vector.broadcast %cst_24 : f32 to vector<64x1xf32>
    %84 = arith.cmpf ogt, %82, %83 : vector<64x1xf32>
    %c128_i32 = arith.constant 128 : i32
    %85 = vector.broadcast %c128_i32 : i32 to vector<1x256xi32>
    %86 = arith.cmpi sge, %59, %85 : vector<1x256xi32>
    %c192_i32 = arith.constant 192 : i32
    %87 = vector.broadcast %c192_i32 : i32 to vector<1x256xi32>
    %88 = arith.cmpi slt, %59, %87 : vector<1x256xi32>
    %89 = arith.andi %86, %88 : vector<1x256xi1>
    %cst_25 = arith.constant 2.000000e+00 : f32
    %cst_26 = arith.constant 1.000000e+00 : f32
    %90 = vector.broadcast %cst_25 : f32 to vector<1x256xf32>
    %91 = vector.broadcast %cst_26 : f32 to vector<1x256xf32>
    %92 = arith.select %89, %90, %91 : vector<1x256xi1>, vector<1x256xf32>
    %cst_27 = arith.constant 1.000000e+00 : f32
    %cst_28 = arith.constant 0.000000e+00 : f32
    %93 = vector.broadcast %cst_27 : f32 to vector<1x256xf32>
    %94 = vector.broadcast %cst_28 : f32 to vector<1x256xf32>
    %95 = arith.select %89, %93, %94 : vector<1x256xi1>, vector<1x256xf32>
    %cst_29 = arith.constant 0.000000e+00 : f32
    %96 = vector.broadcast %cst_29 : f32 to vector<8x64xf32>
    %cst_30 = arith.constant 0.000000e+00 : f32
    %97 = vector.broadcast %cst_30 : f32 to vector<8x64xf32>
    %98 = vector.extract_strided_slice %80 {offsets = [0, 0], sizes = [8, 256], strides = [1, 1]} : vector<64x256xf32> to vector<8x256xf32>
    %cst_31 = arith.constant dense<0.000000e+00> : vector<8x256xf32>
    %99 = tpu.matmul %96, %50, %cst_31 {dimension_numbers = #tpu.dot_dimension_numbers<[1], [0], [0], [1], [0, 0, 1, 1], [], []>} : vector<8x64xf32>, vector<64x256xf32>, vector<8x256xf32> -> vector<8x256xf32>
    %100 = arith.addf %98, %99 : vector<8x256xf32>
    %101 = vector.broadcast %92 : vector<1x256xf32> to vector<8x256xf32>
    %102 = arith.mulf %100, %101 : vector<8x256xf32>
    %103 = arith.negf %102 : vector<8x256xf32>
    %104 = math.exp %103 : vector<8x256xf32>
    %cst_32 = arith.constant 1.000000e+00 : f32
    %105 = vector.broadcast %cst_32 : f32 to vector<8x256xf32>
    %106 = arith.addf %105, %104 : vector<8x256xf32>
    %107 = arith.divf %105, %106 : vector<8x256xf32>
    %108 = vector.broadcast %92 : vector<1x256xf32> to vector<8x256xf32>
    %109 = arith.mulf %107, %108 : vector<8x256xf32>
    %110 = vector.broadcast %95 : vector<1x256xf32> to vector<8x256xf32>
    %111 = arith.subf %109, %110 : vector<8x256xf32>
    %112 = vector.extract_strided_slice %111 {offsets = [0, 0], sizes = [8, 64], strides = [1, 1]} : vector<8x256xf32> to vector<8x64xf32>
    %113 = vector.extract_strided_slice %111 {offsets = [0, 64], sizes = [8, 64], strides = [1, 1]} : vector<8x256xf32> to vector<8x64xf32>
    %114 = vector.extract_strided_slice %111 {offsets = [0, 128], sizes = [8, 64], strides = [1, 1]} : vector<8x256xf32> to vector<8x64xf32>
    %115 = vector.extract_strided_slice %111 {offsets = [0, 192], sizes = [8, 64], strides = [1, 1]} : vector<8x256xf32> to vector<8x64xf32>
    %116 = arith.mulf %113, %97 : vector<8x64xf32>
    %117 = arith.mulf %112, %114 : vector<8x64xf32>
    %118 = arith.addf %116, %117 : vector<8x64xf32>
    %119 = math.tanh %118 : vector<8x64xf32>
    %120 = arith.mulf %115, %119 : vector<8x64xf32>
    %121 = vector.extract_strided_slice %84 {offsets = [0, 0], sizes = [8, 1], strides = [1, 1]} : vector<64x1xi1> to vector<8x1xi1>
    %122 = vector.shape_cast %121 : vector<8x1xi1> to vector<8x1xi1>
    %123 = vector.broadcast %122 : vector<8x1xi1> to vector<8x64xi1>
    %124 = arith.select %123, %120, %96 : vector<8x64xi1>, vector<8x64xf32>
    %125 = vector.shape_cast %121 : vector<8x1xi1> to vector<8x1xi1>
    %126 = vector.broadcast %125 : vector<8x1xi1> to vector<8x64xi1>
    %127 = arith.select %126, %118, %97 : vector<8x64xi1>, vector<8x64xf32>
    %128 = vector.extract_strided_slice %80 {offsets = [8, 0], sizes = [8, 256], strides = [1, 1]} : vector<64x256xf32> to vector<8x256xf32>
    %cst_33 = arith.constant dense<0.000000e+00> : vector<8x256xf32>
    %129 = tpu.matmul %124, %50, %cst_33 {dimension_numbers = #tpu.dot_dimension_numbers<[1], [0], [0], [1], [0, 0, 1, 1], [], []>} : vector<8x64xf32>, vector<64x256xf32>, vector<8x256xf32> -> vector<8x256xf32>
    %130 = arith.addf %128, %129 : vector<8x256xf32>
    %131 = vector.broadcast %92 : vector<1x256xf32> to vector<8x256xf32>
    %132 = arith.mulf %130, %131 : vector<8x256xf32>
    %133 = arith.negf %132 : vector<8x256xf32>
    %134 = math.exp %133 : vector<8x256xf32>
    %cst_34 = arith.constant 1.000000e+00 : f32
    %135 = vector.broadcast %cst_34 : f32 to vector<8x256xf32>
    %136 = arith.addf %135, %134 : vector<8x256xf32>
    %137 = arith.divf %135, %136 : vector<8x256xf32>
    %138 = vector.broadcast %92 : vector<1x256xf32> to vector<8x256xf32>
    %139 = arith.mulf %137, %138 : vector<8x256xf32>
    %140 = vector.broadcast %95 : vector<1x256xf32> to vector<8x256xf32>
    %141 = arith.subf %139, %140 : vector<8x256xf32>
    %142 = vector.extract_strided_slice %141 {offsets = [0, 0], sizes = [8, 64], strides = [1, 1]} : vector<8x256xf32> to vector<8x64xf32>
    %143 = vector.extract_strided_slice %141 {offsets = [0, 64], sizes = [8, 64], strides = [1, 1]} : vector<8x256xf32> to vector<8x64xf32>
    %144 = vector.extract_strided_slice %141 {offsets = [0, 128], sizes = [8, 64], strides = [1, 1]} : vector<8x256xf32> to vector<8x64xf32>
    %145 = vector.extract_strided_slice %141 {offsets = [0, 192], sizes = [8, 64], strides = [1, 1]} : vector<8x256xf32> to vector<8x64xf32>
    %146 = arith.mulf %143, %127 : vector<8x64xf32>
    %147 = arith.mulf %142, %144 : vector<8x64xf32>
    %148 = arith.addf %146, %147 : vector<8x64xf32>
    %149 = math.tanh %148 : vector<8x64xf32>
    %150 = arith.mulf %145, %149 : vector<8x64xf32>
    %151 = vector.extract_strided_slice %84 {offsets = [8, 0], sizes = [8, 1], strides = [1, 1]} : vector<64x1xi1> to vector<8x1xi1>
    %152 = vector.shape_cast %151 : vector<8x1xi1> to vector<8x1xi1>
    %153 = vector.broadcast %152 : vector<8x1xi1> to vector<8x64xi1>
    %154 = arith.select %153, %150, %124 : vector<8x64xi1>, vector<8x64xf32>
    %155 = vector.shape_cast %151 : vector<8x1xi1> to vector<8x1xi1>
    %156 = vector.broadcast %155 : vector<8x1xi1> to vector<8x64xi1>
    %157 = arith.select %156, %148, %127 : vector<8x64xi1>, vector<8x64xf32>
    %158 = vector.extract_strided_slice %80 {offsets = [16, 0], sizes = [8, 256], strides = [1, 1]} : vector<64x256xf32> to vector<8x256xf32>
    %cst_35 = arith.constant dense<0.000000e+00> : vector<8x256xf32>
    %159 = tpu.matmul %154, %50, %cst_35 {dimension_numbers = #tpu.dot_dimension_numbers<[1], [0], [0], [1], [0, 0, 1, 1], [], []>} : vector<8x64xf32>, vector<64x256xf32>, vector<8x256xf32> -> vector<8x256xf32>
    %160 = arith.addf %158, %159 : vector<8x256xf32>
    %161 = vector.broadcast %92 : vector<1x256xf32> to vector<8x256xf32>
    %162 = arith.mulf %160, %161 : vector<8x256xf32>
    %163 = arith.negf %162 : vector<8x256xf32>
    %164 = math.exp %163 : vector<8x256xf32>
    %cst_36 = arith.constant 1.000000e+00 : f32
    %165 = vector.broadcast %cst_36 : f32 to vector<8x256xf32>
    %166 = arith.addf %165, %164 : vector<8x256xf32>
    %167 = arith.divf %165, %166 : vector<8x256xf32>
    %168 = vector.broadcast %92 : vector<1x256xf32> to vector<8x256xf32>
    %169 = arith.mulf %167, %168 : vector<8x256xf32>
    %170 = vector.broadcast %95 : vector<1x256xf32> to vector<8x256xf32>
    %171 = arith.subf %169, %170 : vector<8x256xf32>
    %172 = vector.extract_strided_slice %171 {offsets = [0, 0], sizes = [8, 64], strides = [1, 1]} : vector<8x256xf32> to vector<8x64xf32>
    %173 = vector.extract_strided_slice %171 {offsets = [0, 64], sizes = [8, 64], strides = [1, 1]} : vector<8x256xf32> to vector<8x64xf32>
    %174 = vector.extract_strided_slice %171 {offsets = [0, 128], sizes = [8, 64], strides = [1, 1]} : vector<8x256xf32> to vector<8x64xf32>
    %175 = vector.extract_strided_slice %171 {offsets = [0, 192], sizes = [8, 64], strides = [1, 1]} : vector<8x256xf32> to vector<8x64xf32>
    %176 = arith.mulf %173, %157 : vector<8x64xf32>
    %177 = arith.mulf %172, %174 : vector<8x64xf32>
    %178 = arith.addf %176, %177 : vector<8x64xf32>
    %179 = math.tanh %178 : vector<8x64xf32>
    %180 = arith.mulf %175, %179 : vector<8x64xf32>
    %181 = vector.extract_strided_slice %84 {offsets = [16, 0], sizes = [8, 1], strides = [1, 1]} : vector<64x1xi1> to vector<8x1xi1>
    %182 = vector.shape_cast %181 : vector<8x1xi1> to vector<8x1xi1>
    %183 = vector.broadcast %182 : vector<8x1xi1> to vector<8x64xi1>
    %184 = arith.select %183, %180, %154 : vector<8x64xi1>, vector<8x64xf32>
    %185 = vector.shape_cast %181 : vector<8x1xi1> to vector<8x1xi1>
    %186 = vector.broadcast %185 : vector<8x1xi1> to vector<8x64xi1>
    %187 = arith.select %186, %178, %157 : vector<8x64xi1>, vector<8x64xf32>
    %188 = vector.extract_strided_slice %80 {offsets = [24, 0], sizes = [8, 256], strides = [1, 1]} : vector<64x256xf32> to vector<8x256xf32>
    %cst_37 = arith.constant dense<0.000000e+00> : vector<8x256xf32>
    %189 = tpu.matmul %184, %50, %cst_37 {dimension_numbers = #tpu.dot_dimension_numbers<[1], [0], [0], [1], [0, 0, 1, 1], [], []>} : vector<8x64xf32>, vector<64x256xf32>, vector<8x256xf32> -> vector<8x256xf32>
    %190 = arith.addf %188, %189 : vector<8x256xf32>
    %191 = vector.broadcast %92 : vector<1x256xf32> to vector<8x256xf32>
    %192 = arith.mulf %190, %191 : vector<8x256xf32>
    %193 = arith.negf %192 : vector<8x256xf32>
    %194 = math.exp %193 : vector<8x256xf32>
    %cst_38 = arith.constant 1.000000e+00 : f32
    %195 = vector.broadcast %cst_38 : f32 to vector<8x256xf32>
    %196 = arith.addf %195, %194 : vector<8x256xf32>
    %197 = arith.divf %195, %196 : vector<8x256xf32>
    %198 = vector.broadcast %92 : vector<1x256xf32> to vector<8x256xf32>
    %199 = arith.mulf %197, %198 : vector<8x256xf32>
    %200 = vector.broadcast %95 : vector<1x256xf32> to vector<8x256xf32>
    %201 = arith.subf %199, %200 : vector<8x256xf32>
    %202 = vector.extract_strided_slice %201 {offsets = [0, 0], sizes = [8, 64], strides = [1, 1]} : vector<8x256xf32> to vector<8x64xf32>
    %203 = vector.extract_strided_slice %201 {offsets = [0, 64], sizes = [8, 64], strides = [1, 1]} : vector<8x256xf32> to vector<8x64xf32>
    %204 = vector.extract_strided_slice %201 {offsets = [0, 128], sizes = [8, 64], strides = [1, 1]} : vector<8x256xf32> to vector<8x64xf32>
    %205 = vector.extract_strided_slice %201 {offsets = [0, 192], sizes = [8, 64], strides = [1, 1]} : vector<8x256xf32> to vector<8x64xf32>
    %206 = arith.mulf %203, %187 : vector<8x64xf32>
    %207 = arith.mulf %202, %204 : vector<8x64xf32>
    %208 = arith.addf %206, %207 : vector<8x64xf32>
    %209 = math.tanh %208 : vector<8x64xf32>
    %210 = arith.mulf %205, %209 : vector<8x64xf32>
    %211 = vector.extract_strided_slice %84 {offsets = [24, 0], sizes = [8, 1], strides = [1, 1]} : vector<64x1xi1> to vector<8x1xi1>
    %212 = vector.shape_cast %211 : vector<8x1xi1> to vector<8x1xi1>
    %213 = vector.broadcast %212 : vector<8x1xi1> to vector<8x64xi1>
    %214 = arith.select %213, %210, %184 : vector<8x64xi1>, vector<8x64xf32>
    %215 = vector.shape_cast %211 : vector<8x1xi1> to vector<8x1xi1>
    %216 = vector.broadcast %215 : vector<8x1xi1> to vector<8x64xi1>
    %217 = arith.select %216, %208, %187 : vector<8x64xi1>, vector<8x64xf32>
    %218 = vector.extract_strided_slice %80 {offsets = [32, 0], sizes = [8, 256], strides = [1, 1]} : vector<64x256xf32> to vector<8x256xf32>
    %cst_39 = arith.constant dense<0.000000e+00> : vector<8x256xf32>
    %219 = tpu.matmul %214, %50, %cst_39 {dimension_numbers = #tpu.dot_dimension_numbers<[1], [0], [0], [1], [0, 0, 1, 1], [], []>} : vector<8x64xf32>, vector<64x256xf32>, vector<8x256xf32> -> vector<8x256xf32>
    %220 = arith.addf %218, %219 : vector<8x256xf32>
    %221 = vector.broadcast %92 : vector<1x256xf32> to vector<8x256xf32>
    %222 = arith.mulf %220, %221 : vector<8x256xf32>
    %223 = arith.negf %222 : vector<8x256xf32>
    %224 = math.exp %223 : vector<8x256xf32>
    %cst_40 = arith.constant 1.000000e+00 : f32
    %225 = vector.broadcast %cst_40 : f32 to vector<8x256xf32>
    %226 = arith.addf %225, %224 : vector<8x256xf32>
    %227 = arith.divf %225, %226 : vector<8x256xf32>
    %228 = vector.broadcast %92 : vector<1x256xf32> to vector<8x256xf32>
    %229 = arith.mulf %227, %228 : vector<8x256xf32>
    %230 = vector.broadcast %95 : vector<1x256xf32> to vector<8x256xf32>
    %231 = arith.subf %229, %230 : vector<8x256xf32>
    %232 = vector.extract_strided_slice %231 {offsets = [0, 0], sizes = [8, 64], strides = [1, 1]} : vector<8x256xf32> to vector<8x64xf32>
    %233 = vector.extract_strided_slice %231 {offsets = [0, 64], sizes = [8, 64], strides = [1, 1]} : vector<8x256xf32> to vector<8x64xf32>
    %234 = vector.extract_strided_slice %231 {offsets = [0, 128], sizes = [8, 64], strides = [1, 1]} : vector<8x256xf32> to vector<8x64xf32>
    %235 = vector.extract_strided_slice %231 {offsets = [0, 192], sizes = [8, 64], strides = [1, 1]} : vector<8x256xf32> to vector<8x64xf32>
    %236 = arith.mulf %233, %217 : vector<8x64xf32>
    %237 = arith.mulf %232, %234 : vector<8x64xf32>
    %238 = arith.addf %236, %237 : vector<8x64xf32>
    %239 = math.tanh %238 : vector<8x64xf32>
    %240 = arith.mulf %235, %239 : vector<8x64xf32>
    %241 = vector.extract_strided_slice %84 {offsets = [32, 0], sizes = [8, 1], strides = [1, 1]} : vector<64x1xi1> to vector<8x1xi1>
    %242 = vector.shape_cast %241 : vector<8x1xi1> to vector<8x1xi1>
    %243 = vector.broadcast %242 : vector<8x1xi1> to vector<8x64xi1>
    %244 = arith.select %243, %240, %214 : vector<8x64xi1>, vector<8x64xf32>
    %245 = vector.shape_cast %241 : vector<8x1xi1> to vector<8x1xi1>
    %246 = vector.broadcast %245 : vector<8x1xi1> to vector<8x64xi1>
    %247 = arith.select %246, %238, %217 : vector<8x64xi1>, vector<8x64xf32>
    %248 = vector.extract_strided_slice %80 {offsets = [40, 0], sizes = [8, 256], strides = [1, 1]} : vector<64x256xf32> to vector<8x256xf32>
    %cst_41 = arith.constant dense<0.000000e+00> : vector<8x256xf32>
    %249 = tpu.matmul %244, %50, %cst_41 {dimension_numbers = #tpu.dot_dimension_numbers<[1], [0], [0], [1], [0, 0, 1, 1], [], []>} : vector<8x64xf32>, vector<64x256xf32>, vector<8x256xf32> -> vector<8x256xf32>
    %250 = arith.addf %248, %249 : vector<8x256xf32>
    %251 = vector.broadcast %92 : vector<1x256xf32> to vector<8x256xf32>
    %252 = arith.mulf %250, %251 : vector<8x256xf32>
    %253 = arith.negf %252 : vector<8x256xf32>
    %254 = math.exp %253 : vector<8x256xf32>
    %cst_42 = arith.constant 1.000000e+00 : f32
    %255 = vector.broadcast %cst_42 : f32 to vector<8x256xf32>
    %256 = arith.addf %255, %254 : vector<8x256xf32>
    %257 = arith.divf %255, %256 : vector<8x256xf32>
    %258 = vector.broadcast %92 : vector<1x256xf32> to vector<8x256xf32>
    %259 = arith.mulf %257, %258 : vector<8x256xf32>
    %260 = vector.broadcast %95 : vector<1x256xf32> to vector<8x256xf32>
    %261 = arith.subf %259, %260 : vector<8x256xf32>
    %262 = vector.extract_strided_slice %261 {offsets = [0, 0], sizes = [8, 64], strides = [1, 1]} : vector<8x256xf32> to vector<8x64xf32>
    %263 = vector.extract_strided_slice %261 {offsets = [0, 64], sizes = [8, 64], strides = [1, 1]} : vector<8x256xf32> to vector<8x64xf32>
    %264 = vector.extract_strided_slice %261 {offsets = [0, 128], sizes = [8, 64], strides = [1, 1]} : vector<8x256xf32> to vector<8x64xf32>
    %265 = vector.extract_strided_slice %261 {offsets = [0, 192], sizes = [8, 64], strides = [1, 1]} : vector<8x256xf32> to vector<8x64xf32>
    %266 = arith.mulf %263, %247 : vector<8x64xf32>
    %267 = arith.mulf %262, %264 : vector<8x64xf32>
    %268 = arith.addf %266, %267 : vector<8x64xf32>
    %269 = math.tanh %268 : vector<8x64xf32>
    %270 = arith.mulf %265, %269 : vector<8x64xf32>
    %271 = vector.extract_strided_slice %84 {offsets = [40, 0], sizes = [8, 1], strides = [1, 1]} : vector<64x1xi1> to vector<8x1xi1>
    %272 = vector.shape_cast %271 : vector<8x1xi1> to vector<8x1xi1>
    %273 = vector.broadcast %272 : vector<8x1xi1> to vector<8x64xi1>
    %274 = arith.select %273, %270, %244 : vector<8x64xi1>, vector<8x64xf32>
    %275 = vector.shape_cast %271 : vector<8x1xi1> to vector<8x1xi1>
    %276 = vector.broadcast %275 : vector<8x1xi1> to vector<8x64xi1>
    %277 = arith.select %276, %268, %247 : vector<8x64xi1>, vector<8x64xf32>
    %278 = vector.extract_strided_slice %80 {offsets = [48, 0], sizes = [8, 256], strides = [1, 1]} : vector<64x256xf32> to vector<8x256xf32>
    %cst_43 = arith.constant dense<0.000000e+00> : vector<8x256xf32>
    %279 = tpu.matmul %274, %50, %cst_43 {dimension_numbers = #tpu.dot_dimension_numbers<[1], [0], [0], [1], [0, 0, 1, 1], [], []>} : vector<8x64xf32>, vector<64x256xf32>, vector<8x256xf32> -> vector<8x256xf32>
    %280 = arith.addf %278, %279 : vector<8x256xf32>
    %281 = vector.broadcast %92 : vector<1x256xf32> to vector<8x256xf32>
    %282 = arith.mulf %280, %281 : vector<8x256xf32>
    %283 = arith.negf %282 : vector<8x256xf32>
    %284 = math.exp %283 : vector<8x256xf32>
    %cst_44 = arith.constant 1.000000e+00 : f32
    %285 = vector.broadcast %cst_44 : f32 to vector<8x256xf32>
    %286 = arith.addf %285, %284 : vector<8x256xf32>
    %287 = arith.divf %285, %286 : vector<8x256xf32>
    %288 = vector.broadcast %92 : vector<1x256xf32> to vector<8x256xf32>
    %289 = arith.mulf %287, %288 : vector<8x256xf32>
    %290 = vector.broadcast %95 : vector<1x256xf32> to vector<8x256xf32>
    %291 = arith.subf %289, %290 : vector<8x256xf32>
    %292 = vector.extract_strided_slice %291 {offsets = [0, 0], sizes = [8, 64], strides = [1, 1]} : vector<8x256xf32> to vector<8x64xf32>
    %293 = vector.extract_strided_slice %291 {offsets = [0, 64], sizes = [8, 64], strides = [1, 1]} : vector<8x256xf32> to vector<8x64xf32>
    %294 = vector.extract_strided_slice %291 {offsets = [0, 128], sizes = [8, 64], strides = [1, 1]} : vector<8x256xf32> to vector<8x64xf32>
    %295 = vector.extract_strided_slice %291 {offsets = [0, 192], sizes = [8, 64], strides = [1, 1]} : vector<8x256xf32> to vector<8x64xf32>
    %296 = arith.mulf %293, %277 : vector<8x64xf32>
    %297 = arith.mulf %292, %294 : vector<8x64xf32>
    %298 = arith.addf %296, %297 : vector<8x64xf32>
    %299 = math.tanh %298 : vector<8x64xf32>
    %300 = arith.mulf %295, %299 : vector<8x64xf32>
    %301 = vector.extract_strided_slice %84 {offsets = [48, 0], sizes = [8, 1], strides = [1, 1]} : vector<64x1xi1> to vector<8x1xi1>
    %302 = vector.shape_cast %301 : vector<8x1xi1> to vector<8x1xi1>
    %303 = vector.broadcast %302 : vector<8x1xi1> to vector<8x64xi1>
    %304 = arith.select %303, %300, %274 : vector<8x64xi1>, vector<8x64xf32>
    %305 = vector.shape_cast %301 : vector<8x1xi1> to vector<8x1xi1>
    %306 = vector.broadcast %305 : vector<8x1xi1> to vector<8x64xi1>
    %307 = arith.select %306, %298, %277 : vector<8x64xi1>, vector<8x64xf32>
    %308 = vector.extract_strided_slice %80 {offsets = [56, 0], sizes = [8, 256], strides = [1, 1]} : vector<64x256xf32> to vector<8x256xf32>
    %cst_45 = arith.constant dense<0.000000e+00> : vector<8x256xf32>
    %309 = tpu.matmul %304, %50, %cst_45 {dimension_numbers = #tpu.dot_dimension_numbers<[1], [0], [0], [1], [0, 0, 1, 1], [], []>} : vector<8x64xf32>, vector<64x256xf32>, vector<8x256xf32> -> vector<8x256xf32>
    %310 = arith.addf %308, %309 : vector<8x256xf32>
    %311 = vector.broadcast %92 : vector<1x256xf32> to vector<8x256xf32>
    %312 = arith.mulf %310, %311 : vector<8x256xf32>
    %313 = arith.negf %312 : vector<8x256xf32>
    %314 = math.exp %313 : vector<8x256xf32>
    %cst_46 = arith.constant 1.000000e+00 : f32
    %315 = vector.broadcast %cst_46 : f32 to vector<8x256xf32>
    %316 = arith.addf %315, %314 : vector<8x256xf32>
    %317 = arith.divf %315, %316 : vector<8x256xf32>
    %318 = vector.broadcast %92 : vector<1x256xf32> to vector<8x256xf32>
    %319 = arith.mulf %317, %318 : vector<8x256xf32>
    %320 = vector.broadcast %95 : vector<1x256xf32> to vector<8x256xf32>
    %321 = arith.subf %319, %320 : vector<8x256xf32>
    %322 = vector.extract_strided_slice %321 {offsets = [0, 0], sizes = [8, 64], strides = [1, 1]} : vector<8x256xf32> to vector<8x64xf32>
    %323 = vector.extract_strided_slice %321 {offsets = [0, 64], sizes = [8, 64], strides = [1, 1]} : vector<8x256xf32> to vector<8x64xf32>
    %324 = vector.extract_strided_slice %321 {offsets = [0, 128], sizes = [8, 64], strides = [1, 1]} : vector<8x256xf32> to vector<8x64xf32>
    %325 = vector.extract_strided_slice %321 {offsets = [0, 192], sizes = [8, 64], strides = [1, 1]} : vector<8x256xf32> to vector<8x64xf32>
    %326 = arith.mulf %323, %307 : vector<8x64xf32>
    %327 = arith.mulf %322, %324 : vector<8x64xf32>
    %328 = arith.addf %326, %327 : vector<8x64xf32>
    %329 = math.tanh %328 : vector<8x64xf32>
    %330 = arith.mulf %325, %329 : vector<8x64xf32>
    %331 = vector.extract_strided_slice %84 {offsets = [56, 0], sizes = [8, 1], strides = [1, 1]} : vector<64x1xi1> to vector<8x1xi1>
    %332 = vector.shape_cast %331 : vector<8x1xi1> to vector<8x1xi1>
    %333 = vector.broadcast %332 : vector<8x1xi1> to vector<8x64xi1>
    %334 = arith.select %333, %330, %304 : vector<8x64xi1>, vector<8x64xf32>
    %335 = vector.shape_cast %331 : vector<8x1xi1> to vector<8x1xi1>
    %336 = vector.broadcast %335 : vector<8x1xi1> to vector<8x64xi1>
    %337 = arith.select %336, %328, %307 : vector<8x64xi1>, vector<8x64xf32>
    %338 = tpu.concatenate %124, %154, %184, %214, %244, %274, %304, %334 in 0 : vector<8x64xf32>, vector<8x64xf32>, vector<8x64xf32>, vector<8x64xf32>, vector<8x64xf32>, vector<8x64xf32>, vector<8x64xf32>, vector<8x64xf32> -> vector<64x64xf32>
    %339 = vector.extract_strided_slice %338 {offsets = [0, 0], sizes = [64, 32], strides = [1, 1]} : vector<64x64xf32> to vector<64x32xf32>
    %340 = vector.broadcast %82 : vector<64x1xf32> to vector<64x32xf32>
    %341 = arith.mulf %339, %340 : vector<64x32xf32>
    %342 = vector.extract_strided_slice %338 {offsets = [0, 32], sizes = [64, 32], strides = [1, 1]} : vector<64x64xf32> to vector<64x32xf32>
    %cst_47 = arith.constant dense<0.000000e+00> : vector<64x32xf32>
    %343 = tpu.matmul %57, %342, %cst_47 {dimension_numbers = #tpu.dot_dimension_numbers<[1], [0], [0], [1], [0, 0, 1, 1], [], []>} : vector<64x64xf32>, vector<64x32xf32>, vector<64x32xf32> -> vector<64x32xf32>
    %344 = tpu.concatenate %341, %343 in 1 : vector<64x32xf32>, vector<64x32xf32> -> vector<64x64xf32>
    %345 = tpu.concatenate %344, %334, %337 in 0 : vector<64x64xf32>, vector<8x64xf32>, vector<8x64xf32> -> vector<80x64xf32>
    %cst_48 = arith.constant 0.000000e+00 : f32
    %346 = vector.broadcast %cst_48 : f32 to vector<80x64xf32>
    %347 = tpu.concatenate %345, %346 in 1 : vector<80x64xf32>, vector<80x64xf32> -> vector<80x128xf32>
    %c0_49 = arith.constant 0 : index
    %c0_50 = arith.constant 0 : index
    %348 = vector.load %arg6[%c0_49, %c0_50] : memref<80x128xf32, #tpu.memory_space<vmem>>, vector<80x128xf32>
    tpu.vector_store %arg6[%c0_49, %c0_50], %347 {strides = array<i32>} : memref<80x128xf32, #tpu.memory_space<vmem>>, vector<80x128xf32>,
    return
  }
  func.func @transform_0(%arg0: i32) -> (i32, i32) {
    %c0_i32 = arith.constant 0 : i32
    %c0_i32_0 = arith.constant 0 : i32
    %c0_i32_1 = arith.constant 0 : i32
    return %c0_i32, %c0_i32_0 : i32, i32
  }
  func.func @transform_1(%arg0: i32) -> (i32, i32) {
    %c0_i32 = arith.constant 0 : i32
    %c0_i32_0 = arith.constant 0 : i32
    %c0_i32_1 = arith.constant 0 : i32
    return %c0_i32, %c0_i32_0 : i32, i32
  }
  func.func @transform_2(%arg0: i32) -> (i32, i32) {
    %c0_i32 = arith.constant 0 : i32
    %c0_i32_0 = arith.constant 0 : i32
    %c0_i32_1 = arith.constant 0 : i32
    return %c0_i32, %c0_i32_0 : i32, i32
  }
  func.func @transform_3(%arg0: i32) -> (i32, i32) {
    %c0_i32 = arith.constant 0 : i32
    %c0_i32_0 = arith.constant 0 : i32
    %c0_i32_1 = arith.constant 0 : i32
    return %c0_i32, %c0_i32_0 : i32, i32
  }
  func.func @transform_4(%arg0: i32) -> (i32, i32) {
    %c0_i32 = arith.constant 0 : i32
    %c0_i32_0 = arith.constant 0 : i32
    %c0_i32_1 = arith.constant 0 : i32
    return %c0_i32, %c0_i32_0 : i32, i32
  }
  func.func @transform_5(%arg0: i32) -> (i32, i32) {
    %c0_i32 = arith.constant 0 : i32
    %c0_i32_0 = arith.constant 0 : i32
    %c0_i32_1 = arith.constant 0 : i32
    return %c0_i32, %c0_i32_0 : i32, i32
  }
}

</mosaic_0001>

<bundles_post_ra>
// kernel: encode.1
= control target key start
LH: loop header
LB: loop body
LE: loop exit
PB: predicated region body
PF: predicated region fallthrough
CT: control target
= control target key end

     0   :  { %vm920_vm0 = vcmask 1045504   ;;  %vm278_vm1 = vcmask 1046528   ;;  %s8959_s24 = smov 32   ;;  %s8960_s25 = smov 16   ;;  %vm1562_vm2 = vcmask 1044480   ;;  %vm2204_vm3 = vcmask 130048   ;;  %s13924_s0 = inlined_call_operand.vmem [shape: f32[1032,16], index: 0, kind: input, shape index: {}]   ;;  %s13925_s2 = inlined_call_operand.vmem [shape: f32[65,16], index: 2, kind: input, shape index: {}]   ;;  %s13926_s3 = inlined_call_operand.vmem [shape: f32[97,256], index: 3, kind: input, shape index: {}]   ;;  %s13927_s1 = inlined_call_operand.vmem [shape: f32[64,16], index: 1, kind: input, shape index: {}]   ;;  %s13928_s4 = inlined_call_operand.vmem [shape: f32[64,64], index: 4, kind: input, shape index: {}]   ;;  %s13929_s5 = inlined_call_operand.vmem [shape: f32[80,128], index: 5, kind: output, shape index: {}]  }
   0x1   :  { %v8999_v0 = vld [vmem:[%s13924_s0] sm:$0xff]  ;;  %v9004_v1 = vld [vmem:[%s13924_s0 + $0x8] sm:$0xff]  ;;  %v9009_v2 = vld [vmem:[%s13924_s0 + $0x10] sm:$0xff]  ;;  %s8961_s30 = smov 48   ;;  %vm2333_vm4 = vcmask 261120   ;;  %vm2462_vm5 = vcmask 392192  }
   0x2   :  { %v921_v3 = vrot.slane %v8999_v0, 2  ;;  %v922_v4 = vrot.slane %v9004_v1, 2  ;;  %v279_v5 = vrot.slane %v8999_v0, 1  ;;  %v280_v6 = vrot.slane %v9004_v1, 1  ;;  %v9029_v16 = vld [vmem:[%s13924_s0 + $0x18] sm:$0xff]  ;;  %v9034_v17 = vld [vmem:[%s13924_s0 + $0x20] sm:$0xff] }
   0x3   :  { %v924_v7 = vrot.slane %v9009_v2, 2  ;;  %v282_v8 = vrot.slane %v9009_v2, 1  ;;  %v1564_v11 = vrot.slane %v9004_v1, 3  ;;  %v1566_v14 = vrot.slane %v9009_v2, 3  ;;  %v9057_v30 = vld [vmem:[%s13924_s0 + $0x28] sm:$0xff]  ;;  %v9062_v31 = vld [vmem:[%s13924_s0 + $0x30] sm:$0xff] }
   0x4   :  { %v923_v9 = vsel %vm920_vm0, %v921_v3, %v922_v4  ;;  %v281_v10 = vsel %vm278_vm1, %v279_v5, %v280_v6  ;;  %v1563_v15 = vrot.slane %v8999_v0, 3  ;;  %v284_v20 = vrot.slane %v9029_v16, 1  ;;  %v2591_v40 = vld [vmem:[%s13925_s2] sm:$0xff]  ;;  %v2592_v41 = vld [vmem:[%s13925_s2 + $0x8] sm:$0xff]  ;;  %v2593_v42 = vld [vmem:[%s13925_s2 + $0x10] sm:$0xff] }
   0x5   :  { %1178 = vrot.lane.b32.xlu1 %v923_v9, %s8959_s24  ;;  %536 = vrot.lane.b32.xlu0 %v281_v10, %s8960_s25  ;;  %v925_v12 = vsel %vm920_vm0, %v922_v4, %v924_v7  ;;  %v283_v13 = vsel %vm278_vm1, %v280_v6, %v282_v8  ;;  %v1567_v18 = vsel %vm1562_vm2, %v1564_v11, %v1566_v14  ;;  %v286_v21 = vrot.slane %v9034_v17, 1  ;;  %v2594_v43 = vld [vmem:[%s13925_s2 + $0x18] sm:$0xff]  ;;  %v9102_v50 = vld [vmem:[%s13924_s0 + $0x40] sm:$0xff] }
   0x6   :  { %v1565_v19 = vsel %vm1562_vm2, %v1563_v15, %v1564_v11  ;;  %v285_v23 = vsel %vm278_vm1, %v282_v8, %v284_v20  ;;  %v926_v24 = vrot.slane %v9029_v16, 2  ;;  %v928_v25 = vrot.slane %v9034_v17, 2  ;;  %v9097_v49 = vld [vmem:[%s13924_s0 + $0x38] sm:$0xff]  ;;  %v2595_v52 = vld [vmem:[%s13925_s2 + $0x20] sm:$0xff]  ;;  %v2596_v53 = vld [vmem:[%s13925_s2 + $0x28] sm:$0xff] }
   0x7   :  { %v287_v22 = vsel %vm278_vm1, %v284_v20, %v286_v21  ;;  %v1568_v28 = vrot.slane %v9029_v16, 3  ;;  %v1570_v29 = vrot.slane %v9034_v17, 3  ;;  %v288_v34 = vrot.slane %v9057_v30, 1  ;;  %v2597_v59 = vld [vmem:[%s13925_s2 + $0x30] sm:$0xff]  ;;  %v2598_v60 = vld [vmem:[%s13925_s2 + $0x38] sm:$0xff]  ;;  %v9137_v9 = vld [vmem:[%s13924_s0 + $0x48] sm:$0xff] }
   0x8   :  { %v929_v26 = vsel %vm920_vm0, %v926_v24, %v928_v25  ;;  %v927_v27 = vsel %vm920_vm0, %v924_v7, %v926_v24  ;;  %v290_v35 = vrot.slane %v9062_v31, 1  ;;  %v930_v36 = vrot.slane %v9057_v30, 2  ;;  %v9142_v10 = vld [vmem:[%s13924_s0 + $0x50] sm:$0xff] }
   0x9   :  { %1180 = vrot.lane.b32.xlu1 %v925_v12, %s8959_s24  ;;  %538 = vrot.lane.b32.xlu0 %v283_v13, %s8960_s25  ;;  %v1571_v32 = vsel %vm1562_vm2, %v1568_v28, %v1570_v29  ;;  %v1569_v33 = vsel %vm1562_vm2, %v1566_v14, %v1568_v28  ;;  %v289_v38 = vsel %vm278_vm1, %v286_v21, %v288_v34  ;;  %v932_v39 = vrot.slane %v9062_v31, 2 }
   0xa   :  { %v291_v37 = vsel %vm278_vm1, %v288_v34, %v290_v35  ;;  %v931_v44 = vsel %vm920_vm0, %v928_v25, %v930_v36  ;;  %v1572_v46 = vrot.slane %v9057_v30, 3  ;;  %v1574_v47 = vrot.slane %v9062_v31, 3  ;;  %v9165_v25 = vld [vmem:[%s13924_s0 + $0x58] sm:$0xff] }
   0xb   :  { %v933_v45 = vsel %vm920_vm0, %v930_v36, %v932_v39  ;;  %v8575_v48 = vpack.c.bf16 %v2592_v41, %v2591_v40  ;;  %v8579_v51 = vpack.c.bf16 %v2594_v43, %v2593_v42  ;;  %v292_v56 = vrot.slane %v9097_v49, 1  ;;  %v9193_v41 = vld [vmem:[%s13924_s0 + $0x68] sm:$0xff]  ;;  %v9198_v42 = vld [vmem:[%s13924_s0 + $0x70] sm:$0xff] }
   0xc   :  { %v1575_v54 = vsel %vm1562_vm2, %v1572_v46, %v1574_v47  ;;  %v1573_v55 = vsel %vm1562_vm2, %v1570_v29, %v1572_v46  ;;  %v294_v57 = vrot.slane %v9102_v50, 1  ;;  %v8583_v58 = vpack.c.bf16 %v2596_v53, %v2595_v52 }
   0xd   :  { %1822 = vrot.lane.b32.xlu1 %v1567_v18, %s8961_s30  ;;  %1820 = vrot.lane.b32.xlu0 %v1565_v19, %s8961_s30  ;;  %v293_v62 = vsel %vm278_vm1, %v290_v35, %v292_v56  ;;  %v934_v63 = vrot.slane %v9097_v49, 2  ;;  %v936_v3 = vrot.slane %v9102_v50, 2  ;;  %v8587_v4 = vpack.c.bf16 %v2598_v60, %v2597_v59 }
   0xe   :  { %8576 = vmatprep.subr.bf16.mxu0 %v8575_v48  ;;  %8759 = vmatprep.subr.bf16.mxu1 %v8575_v48  ;;  %v295_v61 = vsel %vm278_vm1, %v292_v56, %v294_v57  ;;  %v1576_v7 = vrot.slane %v9097_v49, 3  ;;  %v1578_v8 = vrot.slane %v9102_v50, 3  ;;  %v296_v13 = vrot.slane %v9137_v9, 1 }
   0xf   :  { %8578 = vmatpush3.bf16.msra.mxu0 %v8575_v48  ;;  %8763 = vmatpush3.bf16.msra.mxu1 %v8575_v48  ;;  %v937_v5 = vsel %vm920_vm0, %v934_v63, %v936_v3  ;;  %v935_v6 = vsel %vm920_vm0, %v932_v39, %v934_v63  ;;  %v298_v14 = vrot.slane %v9142_v10, 1  ;;  %v938_v19 = vrot.slane %v9137_v9, 2 }
  0x10   :  { %8580 = vmatprep.subr.bf16.mxu0 %v8579_v51  ;;  %8760 = vmatprep.subr.bf16.mxu1 %v8579_v51  ;;  %v1579_v11 = vsel %vm1562_vm2, %v1576_v7, %v1578_v8  ;;  %v1577_v12 = vsel %vm1562_vm2, %v1574_v47, %v1576_v7  ;;  %v297_v18 = vsel %vm278_vm1, %v294_v57, %v296_v13  ;;  %v940_v20 = vrot.slane %v9142_v10, 2  ;;  %v9221_v57 = vld [vmem:[%s13924_s0 + $0x78] sm:$0xff] }
  0x11   :  { %542 = vrot.lane.b32.xlu1 %v287_v22, %s8960_s25  ;;  %540 = vrot.lane.b32.xlu0 %v285_v23, %s8960_s25  ;;  %v299_v15 = vsel %vm278_vm1, %v296_v13, %v298_v14  ;;  %v939_v22 = vsel %vm920_vm0, %v936_v3, %v938_v19  ;;  %v1580_v23 = vrot.slane %v9137_v9, 3  ;;  %v1582_v24 = vrot.slane %v9142_v10, 3  ;;  %v9254_v13 = vld [vmem:[%s13924_s0 + $0x90] sm:$0xff] }
  0x12   :  { %v941_v21 = vsel %vm920_vm0, %v938_v19, %v940_v20  ;;  %v300_v29 = vrot.slane %v9165_v25, 1  ;;  %v942_v35 = vrot.slane %v9165_v25, 2  ;;  %v1584_v39 = vrot.slane %v9165_v25, 3 }
  0x13   :  { %8582 = vmatpush3.bf16.msra.mxu0 %v8579_v51  ;;  %8764 = vmatpush3.bf16.msra.mxu1 %v8579_v51  ;;  %v1581_v28 = vsel %vm1562_vm2, %v1578_v8, %v1580_v23  ;;  %v306_v46 = vrot.slane %v9198_v42, 1  ;;  %v946_v51 = vrot.slane %v9193_v41, 2  ;;  %v948_v52 = vrot.slane %v9198_v42, 2 }
  0x14   :  { %8584 = vmatprep.subr.bf16.mxu0 %v8583_v58  ;;  %8761 = vmatprep.subr.bf16.mxu1 %v8583_v58  ;;  %v301_v34 = vsel %vm278_vm1, %v298_v14, %v300_v29  ;;  %v1590_v56 = vrot.slane %v9198_v42, 3  ;;  %v1592_v8 = vrot.slane %v9221_v57, 3  ;;  %v314_v19 = vrot.slane %v9254_v13, 1 }
  0x15   :  { %1184 = vrot.lane.b32.xlu1 %v929_v26, %s8959_s24  ;;  %1182 = vrot.lane.b32.xlu0 %v927_v27, %s8959_s24  ;;  %v9170_v26 = vld [vmem:[%s13924_s0 + $0x60] sm:$0xff]  ;;  %v1583_v27 = vsel %vm1562_vm2, %v1580_v23, %v1582_v24  ;;  %v949_v53 = vsel %vm920_vm0, %v946_v51, %v948_v52  ;;  %v956_v23 = vrot.slane %v9254_v13, 2  ;;  %vm2604_vm6 = vcmask 523264  }
  0x16   :  { %v944_v36 = vrot.slane %v9170_v26, 2  ;;  %v1586_v40 = vrot.slane %v9170_v26, 3  ;;  %vm6424_vm15 = vcmask 1041409  }
  0x17   :  { %8586 = vmatpush3.bf16.msra.mxu0 %v8583_v58  ;;  %8765 = vmatpush3.bf16.msra.mxu1 %v8583_v58  ;;  %v9226_v58 = vld [vmem:[%s13924_s0 + $0x80] sm:$0xff] }
  0x18   :  { %8588 = vmatprep.subr.bf16.mxu0 %v8587_v4  ;;  %8762 = vmatprep.subr.bf16.mxu1 %v8587_v4  ;;  %v1587_v43 = vsel %vm1562_vm2, %v1584_v39, %v1586_v40 }
  0x19   :  { %1826 = vrot.lane.b32.xlu1 %v1571_v32, %s8961_s30  ;;  %1824 = vrot.lane.b32.xlu0 %v1569_v33, %s8961_s30  ;;  %v302_v32 = vrot.slane %v9170_v26, 1 }
  0x1b   :  { %8590 = vmatpush3.bf16.msra.mxu0 %v8587_v4  ;;  %8766 = vmatpush3.bf16.msra.mxu1 %v8587_v4  ;;  %v303_v33 = vsel %vm278_vm1, %v300_v29, %v302_v32  ;;  %v950_v4 = vrot.slane %v9221_v57, 2  ;;  %v1598_v29 = vrot.slane %v9254_v13, 3 }
  0x1d   :  { %546 = vrot.lane.b32.xlu1 %v291_v37, %s8960_s25  ;;  %544 = vrot.lane.b32.xlu0 %v289_v38, %s8960_s25  ;;  %v945_v37 = vsel %vm920_vm0, %v942_v35, %v944_v36  ;;  %v943_v38 = vsel %vm920_vm0, %v940_v20, %v942_v35  ;;  %v951_v7 = vsel %vm920_vm0, %v948_v52, %v950_v4 }
  0x21   :  { %1188 = vrot.lane.b32.xlu1 %v933_v45, %s8959_s24  ;;  %1186 = vrot.lane.b32.xlu0 %v931_v44, %s8959_s24  ;;  %v1585_v44 = vsel %vm1562_vm2, %v1582_v24, %v1584_v39  ;;  %v304_v45 = vrot.slane %v9193_v41, 1 }
  0x23   :  { %v307_v47 = vsel %vm278_vm1, %v304_v45, %v306_v46  ;;  %v305_v48 = vsel %vm278_vm1, %v302_v32, %v304_v45  ;;  %v9277_v32 = vld [vmem:[%s13924_s0 + $0x98] sm:$0xff] }
  0x25   :  { %1830 = vrot.lane.b32.xlu1 %v1575_v54, %s8961_s30  ;;  %1828 = vrot.lane.b32.xlu0 %v1573_v55, %s8961_s30  ;;  %v947_v54 = vsel %vm920_vm0, %v944_v36, %v946_v51  ;;  %v1588_v55 = vrot.slane %v9193_v41, 3  ;;  %v316_v36 = vrot.slane %v9277_v32, 1  ;;  %v9310_v51 = vld [vmem:[%s13924_s0 + $0xb0] sm:$0xff] }
  0x27   :  { %v1591_v59 = vsel %vm1562_vm2, %v1588_v55, %v1590_v56  ;;  %v1589_v60 = vsel %vm1562_vm2, %v1586_v40, %v1588_v55  ;;  %v317_v39 = vsel %vm278_vm1, %v314_v19, %v316_v36  ;;  %v958_v40 = vrot.slane %v9277_v32, 2 }
  0x28   :  { %v322_v55 = vrot.slane %v9310_v51, 1 }
  0x29   :  { %550 = vrot.lane.b32.xlu1 %v295_v61, %s8960_s25  ;;  %548 = vrot.lane.b32.xlu0 %v293_v62, %s8960_s25  ;;  %v308_v61 = vrot.slane %v9221_v57, 1  ;;  %v310_v62 = vrot.slane %v9226_v58, 1  ;;  %v959_v45 = vsel %vm920_vm0, %v956_v23, %v958_v40 }
  0x2b   :  { %v311_v63 = vsel %vm278_vm1, %v308_v61, %v310_v62  ;;  %v309_v3 = vsel %vm278_vm1, %v306_v46, %v308_v61  ;;  %v1600_v46 = vrot.slane %v9277_v32, 3 }
  0x2d   :  { %1192 = vrot.lane.b32.xlu1 %v937_v5, %s8959_s24  ;;  %1190 = vrot.lane.b32.xlu0 %v935_v6, %s8959_s24  ;;  %v952_v5 = vrot.slane %v9226_v58, 2 }
  0x2f   :  { %v953_v6 = vsel %vm920_vm0, %v950_v4, %v952_v5 }
  0x31   :  { %1834 = vrot.lane.b32.xlu1 %v1579_v11, %s8961_s30  ;;  %1832 = vrot.lane.b32.xlu0 %v1577_v12, %s8961_s30  ;;  %v1594_v11 = vrot.slane %v9226_v58, 3  ;;  %v9249_v12 = vld [vmem:[%s13924_s0 + $0x88] sm:$0xff] }
  0x33   :  { %v1595_v14 = vsel %vm1562_vm2, %v1592_v8, %v1594_v11 }
  0x35   :  { %554 = vrot.lane.b32.xlu1 %v299_v15, %s8960_s25  ;;  %552 = vrot.lane.b32.xlu0 %v297_v18, %s8960_s25  ;;  %v1593_v15 = vsel %vm1562_vm2, %v1590_v56, %v1592_v8  ;;  %v312_v18 = vrot.slane %v9249_v12, 1 }
  0x37   :  { %v315_v20 = vsel %vm278_vm1, %v312_v18, %v314_v19  ;;  %v9339_v19 = vld [vmem:[%s13924_s0 + $0xb8] sm:$0xff] }
  0x39   :  { %1196 = vrot.lane.b32.xlu1 %v941_v21, %s8959_s24  ;;  %1194 = vrot.lane.b32.xlu0 %v939_v22, %s8959_s24  ;;  %v313_v21 = vsel %vm278_vm1, %v310_v62, %v312_v18  ;;  %v954_v22 = vrot.slane %v9249_v12, 2 }
  0x3b   :  { %v957_v24 = vsel %vm920_vm0, %v954_v22, %v956_v23 }
  0x3d   :  { %1838 = vrot.lane.b32.xlu1 %v1583_v27, %s8961_s30  ;;  %1836 = vrot.lane.b32.xlu0 %v1581_v28, %s8961_s30  ;;  %v955_v27 = vsel %vm920_vm0, %v952_v5, %v954_v22  ;;  %v1596_v28 = vrot.slane %v9249_v12, 3 }
  0x3f   :  { %v1597_v35 = vsel %vm1562_vm2, %v1594_v11, %v1596_v28 }
  0x41   :  { %558 = vrot.lane.b32.xlu1 %v303_v33, %s8960_s25  ;;  %556 = vrot.lane.b32.xlu0 %v301_v34, %s8960_s25  ;;  %v9282_v33 = vld [vmem:[%s13924_s0 + $0xa0] sm:$0xff]  ;;  %v1599_v34 = vsel %vm1562_vm2, %v1596_v28, %v1598_v29 }
  0x45   :  { %1200 = vrot.lane.b32.xlu1 %v945_v37, %s8959_s24  ;;  %1198 = vrot.lane.b32.xlu0 %v943_v38, %s8959_s24  ;;  %v318_v37 = vrot.slane %v9282_v33, 1 }
  0x47   :  { %v319_v38 = vsel %vm278_vm1, %v316_v36, %v318_v37 }
  0x49   :  { %1842 = vrot.lane.b32.xlu1 %v1587_v43, %s8961_s30  ;;  %1840 = vrot.lane.b32.xlu0 %v1585_v44, %s8961_s30  ;;  %v960_v43 = vrot.slane %v9282_v33, 2 }
  0x4b   :  { %v961_v44 = vsel %vm920_vm0, %v958_v40, %v960_v43 }
  0x4d   :  { %562 = vrot.lane.b32.xlu1 %v307_v47, %s8960_s25  ;;  %560 = vrot.lane.b32.xlu0 %v305_v48, %s8960_s25  ;;  %v1602_v47 = vrot.slane %v9282_v33, 3  ;;  %v9305_v48 = vld [vmem:[%s13924_s0 + $0xa8] sm:$0xff] }
  0x4e   :  { %v962_v62 = vrot.slane %v9305_v48, 2  ;;  %v1604_v11 = vrot.slane %v9305_v48, 3 }
  0x4f   :  { %v1603_v52 = vsel %vm1562_vm2, %v1600_v46, %v1602_v47 }
  0x50   :  { %v963_v8 = vsel %vm920_vm0, %v960_v43, %v962_v62  ;;  %v1608_v43 = vrot.slane %v9339_v19, 3 }
  0x51   :  { %1204 = vrot.lane.b32.xlu1 %v949_v53, %s8959_s24  ;;  %1202 = vrot.lane.b32.xlu0 %v947_v54, %s8959_s24  ;;  %v1601_v53 = vsel %vm1562_vm2, %v1598_v29, %v1600_v46  ;;  %v320_v54 = vrot.slane %v9305_v48, 1 }
  0x53   :  { %v321_v61 = vsel %vm278_vm1, %v318_v37, %v320_v54  ;;  %v966_v37 = vrot.slane %v9339_v19, 2 }
  0x55   :  { %1846 = vrot.lane.b32.xlu1 %v1591_v59, %s8961_s30  ;;  %1844 = vrot.lane.b32.xlu0 %v1589_v60, %s8961_s30  ;;  %v323_v60 = vsel %vm278_vm1, %v320_v54, %v322_v55 }
  0x59   :  { %566 = vrot.lane.b32.xlu1 %v311_v63, %s8960_s25  ;;  %564 = vrot.lane.b32.xlu0 %v309_v3, %s8960_s25  ;;  %v964_v63 = vrot.slane %v9310_v51, 2 }
  0x5d   :  { %1208 = vrot.lane.b32.xlu1 %v953_v6, %s8959_s24  ;;  %1206 = vrot.lane.b32.xlu0 %v951_v7, %s8959_s24  ;;  %v965_v7 = vsel %vm920_vm0, %v962_v62, %v964_v63 }
  0x61   :  { %1850 = vrot.lane.b32.xlu1 %v1595_v14, %s8961_s30  ;;  %1848 = vrot.lane.b32.xlu0 %v1593_v15, %s8961_s30  ;;  %v1606_v14 = vrot.slane %v9310_v51, 3 }
  0x63   :  { %v1607_v23 = vsel %vm1562_vm2, %v1604_v11, %v1606_v14  ;;  %v1609_v62 = vsel %vm1562_vm2, %v1606_v14, %v1608_v43 }
  0x65   :  { %570 = vrot.lane.b32.xlu1 %v315_v20, %s8960_s25  ;;  %568 = vrot.lane.b32.xlu0 %v313_v21, %s8960_s25  ;;  %v9344_v20 = vld [vmem:[%s13924_s0 + $0xc0] sm:$0xff] }
  0x66   :  { %v326_v28 = vrot.slane %v9344_v20, 1 }
  0x69   :  { %1212 = vrot.lane.b32.xlu1 %v957_v24, %s8959_s24  ;;  %1210 = vrot.lane.b32.xlu0 %v955_v27, %s8959_s24  ;;  %v1605_v24 = vsel %vm1562_vm2, %v1602_v47, %v1604_v11  ;;  %v324_v27 = vrot.slane %v9339_v19, 1 }
  0x6b   :  { %v325_v36 = vsel %vm278_vm1, %v322_v55, %v324_v27 }
  0x6d   :  { %1854 = vrot.lane.b32.xlu1 %v1599_v34, %s8961_s30  ;;  %1852 = vrot.lane.b32.xlu0 %v1597_v35, %s8961_s30  ;;  %v327_v35 = vsel %vm278_vm1, %v324_v27, %v326_v28 }
  0x71   :  { %574 = vrot.lane.b32.xlu1 %v319_v38, %s8960_s25  ;;  %572 = vrot.lane.b32.xlu0 %v317_v39, %s8960_s25  ;;  %v968_v38 = vrot.slane %v9344_v20, 2 }
  0x73   :  { %v969_v47 = vsel %vm920_vm0, %v966_v37, %v968_v38 }
  0x75   :  { %1216 = vrot.lane.b32.xlu1 %v961_v44, %s8959_s24  ;;  %1214 = vrot.lane.b32.xlu0 %v959_v45, %s8959_s24  ;;  %v1610_v44 = vrot.slane %v9344_v20, 3 }
  0x77   :  { %v1179_v56 = vpop.permute.xlu1 %1178  ;;  %v537_v59 = vpop.permute.xlu0 %536 }
  0x78   :  { %v2205_v5 = vsel %vm2204_vm3, %v8999_v0, %v537_v59  ;;  %v9377_v59 = vld [vmem:[%s13924_s0 + $0xc8] sm:$0xff] }
  0x79   :  { %1858 = vrot.lane.b32.xlu1 %v1603_v52, %s8961_s30  ;;  %1856 = vrot.lane.b32.xlu0 %v1601_v53, %s8961_s30  ;;  %v967_v52 = vsel %vm920_vm0, %v964_v63, %v966_v37  ;;  %v328_v63 = vrot.slane %v9377_v59, 1 }
  0x7b   :  { %v1181_v3 = vpop.permute.xlu1 %1180  ;;  %v539_v4 = vpop.permute.xlu0 %538 }
  0x7c   :  { %v2206_v6 = vsel %vm2204_vm3, %v9004_v1, %v539_v4  ;;  %v2334_v1 = vsel %vm2333_vm4, %v2205_v5, %v1179_v56 }
  0x7d   :  { %578 = vrot.lane.b32.xlu1 %v323_v60, %s8960_s25  ;;  %576 = vrot.lane.b32.xlu0 %v321_v61, %s8960_s25  ;;  %v2335_v0 = vsel %vm2333_vm4, %v2206_v6, %v1181_v3  ;;  %v1611_v61 = vsel %vm1562_vm2, %v1608_v43, %v1610_v44 }
  0x7f   :  { %v1823_v15 = vpop.permute.xlu1 %1822  ;;  %v1821_v18 = vpop.permute.xlu0 %1820 }
  0x80   :  { %v2464_v21 = vsel %vm2462_vm5, %v2335_v0, %v1823_v15  ;;  %v2463_v22 = vsel %vm2462_vm5, %v2334_v1, %v1821_v18  ;;  %v1612_v0 = vrot.slane %v9377_v59, 3 }
  0x81   :  { %1220 = vrot.lane.b32.xlu1 %v965_v7, %s8959_s24  ;;  %1218 = vrot.lane.b32.xlu0 %v963_v8, %s8959_s24  ;;  %v329_v7 = vsel %vm278_vm1, %v326_v28, %v328_v63  ;;  %v970_v8 = vrot.slane %v9377_v59, 2 }
  0x82   :  { %8355 = vmatprep.mubr.msk.f32.mxu0 %vm2604_vm6, %v2463_v22  ;;  %v1613_v37 = vsel %vm1562_vm2, %v1610_v44, %v1612_v0 }
  0x83   :  { %8356 = vmatmul.mubr.msk.f32.vlgmr.msra.gmra.mrb[0].mxu0 %vm2604_vm6, %v2464_v21  ;;  %v543_v29 = vpop.permute.xlu1 %542  ;;  %v541_v34 = vpop.permute.xlu0 %540 }
  0x84   :  { %v2208_v45 = vsel %vm2204_vm3, %v9029_v16, %v543_v29  ;;  %v2207_v46 = vsel %vm2204_vm3, %v9009_v2, %v541_v34  ;;  %v9382_v16 = vld [vmem:[%s13924_s0 + $0xd0] sm:$0xff]  ;;  %v9415_v34 = vld [vmem:[%s13924_s0 + $0xd8] sm:$0xff] }
  0x85   :  { %1862 = vrot.lane.b32.xlu1 %v1607_v23, %s8961_s30  ;;  %1860 = vrot.lane.b32.xlu0 %v1605_v24, %s8961_s30  ;;  %v330_v3 = vrot.slane %v9382_v16, 1  ;;  %v972_v11 = vrot.slane %v9382_v16, 2  ;;  %v1614_v18 = vrot.slane %v9382_v16, 3  ;;  %v971_v23 = vsel %vm920_vm0, %v968_v38, %v970_v8 }
  0x86   :  { %v332_v38 = vrot.slane %v9415_v34, 1 }
  0x87   :  { %v1185_v39 = vpop.permute.xlu1 %1184  ;;  %v1183_v40 = vpop.permute.xlu0 %1182  ;;  %v331_v6 = vsel %vm278_vm1, %v328_v63, %v330_v3  ;;  %v973_v22 = vsel %vm920_vm0, %v970_v8, %v972_v11 }
  0x88   :  { %v2337_v53 = vsel %vm2333_vm4, %v2208_v45, %v1185_v39  ;;  %v2336_v54 = vsel %vm2333_vm4, %v2207_v46, %v1183_v40  ;;  %v333_v46 = vsel %vm278_vm1, %v330_v3, %v332_v38 }
  0x89   :  { %582 = vrot.lane.b32.xlu1 %v327_v35, %s8960_s25  ;;  %580 = vrot.lane.b32.xlu0 %v325_v36, %s8960_s25  ;;  %v1615_v36 = vsel %vm1562_vm2, %v1612_v0, %v1614_v18 }
  0x8b   :  { %v1827_v55 = vpop.permute.xlu1 %1826  ;;  %v1825_v56 = vpop.permute.xlu0 %1824 }
  0x8c   :  { %v2466_v2 = vsel %vm2462_vm5, %v2337_v53, %v1827_v55  ;;  %v2465_v60 = vsel %vm2462_vm5, %v2336_v54, %v1825_v56  ;;  %v1616_v54 = vrot.slane %v9415_v34, 3 }
  0x8d   :  { %1224 = vrot.lane.b32.xlu1 %v969_v47, %s8959_s24  ;;  %1222 = vrot.lane.b32.xlu0 %v967_v52, %s8959_s24  ;;  %v974_v47 = vrot.slane %v9415_v34, 2 }
  0x8e   :  { %8358 = vmatprep.mubr.msk.f32.mxu0 %vm2604_vm6, %v2465_v60  ;;  %v1617_v8 = vsel %vm1562_vm2, %v1614_v18, %v1616_v54 }
  0x8f   :  { %8359 = vmatmul.mubr.msk.f32.gmra.mrb[2].mxu0 %vm2604_vm6, %v2466_v2  ;;  %v547_v4 = vpop.permute.xlu1 %546  ;;  %v545_v5 = vpop.permute.xlu0 %544 }
  0x90   :  { %v2210_v1 = vsel %vm2204_vm3, %v9057_v30, %v547_v4  ;;  %v2209_v21 = vsel %vm2204_vm3, %v9034_v17, %v545_v5  ;;  %v9420_v30 = vld [vmem:[%s13924_s0 + $0xe0] sm:$0xff]  ;;  %v9453_v5 = vld [vmem:[%s13924_s0 + $0xe8] sm:$0xff] }
  0x91   :  { %1866 = vrot.lane.b32.xlu1 %v1611_v61, %s8961_s30  ;;  %1864 = vrot.lane.b32.xlu0 %v1609_v62, %s8961_s30  ;;  %v334_v39 = vrot.slane %v9420_v30, 1  ;;  %v976_v44 = vrot.slane %v9420_v30, 2  ;;  %v1618_v55 = vrot.slane %v9420_v30, 3  ;;  %v975_v61 = vsel %vm920_vm0, %v972_v11, %v974_v47 }
  0x92   :  { %v336_v11 = vrot.slane %v9453_v5, 1 }
  0x93   :  { %v1189_v14 = vpop.permute.xlu1 %1188  ;;  %v1187_v15 = vpop.permute.xlu0 %1186  ;;  %v335_v45 = vsel %vm278_vm1, %v332_v38, %v334_v39  ;;  %v977_v60 = vsel %vm920_vm0, %v974_v47, %v976_v44 }
  0x94   :  { %v2339_v24 = vsel %vm2333_vm4, %v2210_v1, %v1189_v14  ;;  %v2338_v27 = vsel %vm2333_vm4, %v2209_v21, %v1187_v15  ;;  %v978_v1 = vrot.slane %v9453_v5, 2  ;;  %v337_v18 = vsel %vm278_vm1, %v334_v39, %v336_v11 }
  0x95   :  { %586 = vrot.lane.b32.xlu1 %v331_v6, %s8960_s25  ;;  %584 = vrot.lane.b32.xlu0 %v329_v7, %s8960_s25  ;;  %v1619_v7 = vsel %vm1562_vm2, %v1616_v54, %v1618_v55 }
  0x97   :  { %v1831_v28 = vpop.permute.xlu1 %1830  ;;  %v1829_v29 = vpop.permute.xlu0 %1828 }
  0x98   :  { %v2468_v17 = vsel %vm2462_vm5, %v2339_v24, %v1831_v28  ;;  %v2467_v35 = vsel %vm2462_vm5, %v2338_v27, %v1829_v29  ;;  %v979_v28 = vsel %vm920_vm0, %v976_v44, %v978_v1 }
  0x99   :  { %1228 = vrot.lane.b32.xlu1 %v973_v22, %s8959_s24  ;;  %1226 = vrot.lane.b32.xlu0 %v971_v23, %s8959_s24 }
  0x9a   :  { %8361 = vmatprep.mubr.msk.f32.mxu0 %vm2604_vm6, %v2467_v35  ;;  %v1620_v35 = vrot.slane %v9453_v5, 3 }
  0x9b   :  { %8362 = vmatmul.mubr.msk.f32.gmra.mrb[4].mxu0 %vm2604_vm6, %v2468_v17  ;;  %v551_v40 = vpop.permute.xlu1 %550  ;;  %v549_v43 = vpop.permute.xlu0 %548 }
  0x9c   :  { %v2212_v56 = vsel %vm2204_vm3, %v9097_v49, %v551_v40  ;;  %v2211_v2 = vsel %vm2204_vm3, %v9062_v31, %v549_v43  ;;  %v9458_v49 = vld [vmem:[%s13924_s0 + $0xf0] sm:$0xff]  ;;  %v9491_v43 = vld [vmem:[%s13924_s0 + $0xf8] sm:$0xff]  ;;  %v1621_v47 = vsel %vm1562_vm2, %v1618_v55, %v1620_v35 }
  0x9d   :  { %1870 = vrot.lane.b32.xlu1 %v1615_v36, %s8961_s30  ;;  %1868 = vrot.lane.b32.xlu0 %v1613_v37, %s8961_s30  ;;  %v338_v14 = vrot.slane %v9458_v49, 1  ;;  %v980_v21 = vrot.slane %v9458_v49, 2  ;;  %v1622_v36 = vrot.slane %v9458_v49, 3  ;;  %v340_v44 = vrot.slane %v9491_v43, 1 }
  0x9f   :  { %v1193_v52 = vpop.permute.xlu1 %1192  ;;  %v1191_v53 = vpop.permute.xlu0 %1190  ;;  %v339_v22 = vsel %vm278_vm1, %v336_v11, %v338_v14  ;;  %v981_v27 = vsel %vm920_vm0, %v978_v1, %v980_v21  ;;  %v341_v55 = vsel %vm278_vm1, %v338_v14, %v340_v44 }
  0xa0   :  { %v2341_v62 = vsel %vm2333_vm4, %v2212_v56, %v1193_v52  ;;  %v2340_v63 = vsel %vm2333_vm4, %v2211_v2, %v1191_v53  ;;  %v982_v56 = vrot.slane %v9491_v43, 2 }
  0xa1   :  { %590 = vrot.lane.b32.xlu1 %v335_v45, %s8960_s25  ;;  %588 = vrot.lane.b32.xlu0 %v333_v46, %s8960_s25  ;;  %v1623_v46 = vsel %vm1562_vm2, %v1620_v35, %v1622_v36 }
  0xa3   :  { %v1835_v3 = vpop.permute.xlu1 %1834  ;;  %v1833_v4 = vpop.permute.xlu0 %1832 }
  0xa4   :  { %v2470_v31 = vsel %vm2462_vm5, %v2341_v62, %v1835_v3  ;;  %v2469_v6 = vsel %vm2462_vm5, %v2340_v63, %v1833_v4  ;;  %v983_v3 = vsel %vm920_vm0, %v980_v21, %v982_v56 }
  0xa5   :  { %1232 = vrot.lane.b32.xlu1 %v977_v60, %s8959_s24  ;;  %1230 = vrot.lane.b32.xlu0 %v975_v61, %s8959_s24 }
  0xa6   :  { %8364 = vmatprep.mubr.msk.f32.mxu0 %vm2604_vm6, %v2469_v6  ;;  %v1624_v6 = vrot.slane %v9491_v43, 3 }
  0xa7   :  { %8365 = vmatmul.mubr.msk.f32.gmra.mrb[6].mxu0 %vm2604_vm6, %v2470_v31  ;;  %v555_v15 = vpop.permute.xlu1 %554  ;;  %v553_v0 = vpop.permute.xlu0 %552 }
  0xa8   :  { %v2214_v29 = vsel %vm2204_vm3, %v9137_v9, %v555_v15  ;;  %v2213_v17 = vsel %vm2204_vm3, %v9102_v50, %v553_v0  ;;  %v9496_v9 = vld [vmem:[%s13924_s0 + $0x100] sm:$0xff]  ;;  %v9529_v0 = vld [vmem:[%s13924_s0 + $0x108] sm:$0xff] }
  0xa9   :  { %1874 = vrot.lane.b32.xlu1 %v1619_v7, %s8961_s30  ;;  %1872 = vrot.lane.b32.xlu0 %v1617_v8, %s8961_s30  ;;  %v342_v52 = vrot.slane %v9496_v9, 1  ;;  %v984_v2 = vrot.slane %v9496_v9, 2  ;;  %v1626_v7 = vrot.slane %v9496_v9, 3 }
  0xab   :  { %v1197_v23 = vpop.permute.xlu1 %1196  ;;  %v1195_v24 = vpop.permute.xlu0 %1194  ;;  %v343_v60 = vsel %vm278_vm1, %v340_v44, %v342_v52  ;;  %v985_v63 = vsel %vm920_vm0, %v982_v56, %v984_v2  ;;  %v1627_v21 = vsel %vm1562_vm2, %v1624_v6, %v1626_v7 }
  0xac   :  { %v2343_v37 = vsel %vm2333_vm4, %v2214_v29, %v1197_v23  ;;  %v2342_v38 = vsel %vm2333_vm4, %v2213_v17, %v1195_v24 }
  0xad   :  { %594 = vrot.lane.b32.xlu1 %v339_v22, %s8960_s25  ;;  %592 = vrot.lane.b32.xlu0 %v337_v18, %s8960_s25  ;;  %v1625_v22 = vsel %vm1562_vm2, %v1622_v36, %v1624_v6  ;;  %v344_v18 = vrot.slane %v9529_v0, 1 }
  0xaf   :  { %v1839_v39 = vpop.permute.xlu1 %1838  ;;  %v1837_v40 = vpop.permute.xlu0 %1836  ;;  %v345_v35 = vsel %vm278_vm1, %v342_v52, %v344_v18 }
  0xb0   :  { %v2472_v50 = vsel %vm2462_vm5, %v2343_v37, %v1839_v39  ;;  %v2471_v45 = vsel %vm2462_vm5, %v2342_v38, %v1837_v40 }
  0xb1   :  { %1236 = vrot.lane.b32.xlu1 %v981_v27, %s8959_s24  ;;  %1234 = vrot.lane.b32.xlu0 %v979_v28, %s8959_s24  ;;  %v986_v28 = vrot.slane %v9529_v0, 2 }
  0xb2   :  { %8367 = vmatprep.mubr.msk.f32.mxu0 %vm2604_vm6, %v2471_v45  ;;  %v1628_v45 = vrot.slane %v9529_v0, 3 }
  0xb3   :  { %8368 = vmatmul.mubr.msk.f32.gmra.mrb[8].mxu0 %vm2604_vm6, %v2472_v50  ;;  %v559_v53 = vpop.permute.xlu1 %558  ;;  %v557_v54 = vpop.permute.xlu0 %556  ;;  %v987_v39 = vsel %vm920_vm0, %v984_v2, %v986_v28 }
  0xb4   :  { %v2216_v4 = vsel %vm2204_vm3, %v9165_v25, %v559_v53  ;;  %v2215_v31 = vsel %vm2204_vm3, %v9142_v10, %v557_v54  ;;  %v9534_v25 = vld [vmem:[%s13924_s0 + $0x110] sm:$0xff]  ;;  %v9567_v54 = vld [vmem:[%s13924_s0 + $0x118] sm:$0xff] }
  0xb5   :  { %1878 = vrot.lane.b32.xlu1 %v1623_v46, %s8961_s30  ;;  %1876 = vrot.lane.b32.xlu0 %v1621_v47, %s8961_s30  ;;  %v346_v23 = vrot.slane %v9534_v25, 1  ;;  %v988_v29 = vrot.slane %v9534_v25, 2  ;;  %v1630_v46 = vrot.slane %v9534_v25, 3 }
  0xb7   :  { %v1201_v61 = vpop.permute.xlu1 %1200  ;;  %v1199_v62 = vpop.permute.xlu0 %1198  ;;  %v347_v17 = vsel %vm278_vm1, %v344_v18, %v346_v23  ;;  %v989_v38 = vsel %vm920_vm0, %v986_v28, %v988_v29  ;;  %v1631_v2 = vsel %vm1562_vm2, %v1628_v45, %v1630_v46 }
  0xb8   :  { %v2345_v8 = vsel %vm2333_vm4, %v2216_v4, %v1201_v61  ;;  %v2344_v11 = vsel %vm2333_vm4, %v2215_v31, %v1199_v62 }
  0xb9   :  { %598 = vrot.lane.b32.xlu1 %v343_v60, %s8960_s25  ;;  %596 = vrot.lane.b32.xlu0 %v341_v55, %s8960_s25  ;;  %v1629_v60 = vsel %vm1562_vm2, %v1626_v7, %v1628_v45  ;;  %v348_v55 = vrot.slane %v9567_v54, 1 }
  0xbb   :  { %v1843_v14 = vpop.permute.xlu1 %1842  ;;  %v1841_v15 = vpop.permute.xlu0 %1840  ;;  %v349_v6 = vsel %vm278_vm1, %v346_v23, %v348_v55 }
  0xbc   :  { %v2474_v10 = vsel %vm2462_vm5, %v2345_v8, %v1843_v14  ;;  %v2473_v1 = vsel %vm2462_vm5, %v2344_v11, %v1841_v15 }
  0xbd   :  { %1240 = vrot.lane.b32.xlu1 %v985_v63, %s8959_s24  ;;  %1238 = vrot.lane.b32.xlu0 %v983_v3, %s8959_s24  ;;  %v990_v3 = vrot.slane %v9567_v54, 2 }
  0xbe   :  { %8370 = vmatprep.mubr.msk.f32.mxu0 %vm2604_vm6, %v2473_v1  ;;  %v1632_v1 = vrot.slane %v9567_v54, 3 }
  0xbf   :  { %8371 = vmatmul.mubr.msk.f32.gmra.mrb[10].mxu0 %vm2604_vm6, %v2474_v10  ;;  %v563_v24 = vpop.permute.xlu1 %562  ;;  %v561_v27 = vpop.permute.xlu0 %560  ;;  %v991_v14 = vsel %vm920_vm0, %v988_v29, %v990_v3 }
  0xc0   :  { %v2218_v40 = vsel %vm2204_vm3, %v9193_v41, %v563_v24  ;;  %v2217_v50 = vsel %vm2204_vm3, %v9170_v26, %v561_v27  ;;  %v9572_v41 = vld [vmem:[%s13924_s0 + $0x120] sm:$0xff]  ;;  %v9605_v27 = vld [vmem:[%s13924_s0 + $0x128] sm:$0xff] }
  0xc1   :  { %1882 = vrot.lane.b32.xlu1 %v1627_v21, %s8961_s30  ;;  %1880 = vrot.lane.b32.xlu0 %v1625_v22, %s8961_s30  ;;  %v350_v61 = vrot.slane %v9572_v41, 1  ;;  %v992_v4 = vrot.slane %v9572_v41, 2  ;;  %v1634_v21 = vrot.slane %v9572_v41, 3 }
  0xc3   :  { %v1205_v36 = vpop.permute.xlu1 %1204  ;;  %v1203_v37 = vpop.permute.xlu0 %1202  ;;  %v351_v31 = vsel %vm278_vm1, %v348_v55, %v350_v61  ;;  %v993_v11 = vsel %vm920_vm0, %v990_v3, %v992_v4  ;;  %v1635_v29 = vsel %vm1562_vm2, %v1632_v1, %v1634_v21 }
  0xc4   :  { %v2347_v47 = vsel %vm2333_vm4, %v2218_v40, %v1205_v36  ;;  %v2346_v44 = vsel %vm2333_vm4, %v2217_v50, %v1203_v37 }
  0xc5   :  { %602 = vrot.lane.b32.xlu1 %v347_v17, %s8960_s25  ;;  %600 = vrot.lane.b32.xlu0 %v345_v35, %s8960_s25  ;;  %v1633_v17 = vsel %vm1562_vm2, %v1630_v46, %v1632_v1  ;;  %v352_v35 = vrot.slane %v9605_v27, 1 }
  0xc7   :  { %v1847_v52 = vpop.permute.xlu1 %1846  ;;  %v1845_v53 = vpop.permute.xlu0 %1844  ;;  %v353_v45 = vsel %vm278_vm1, %v350_v61, %v352_v35 }
  0xc8   :  { %v2476_v26 = vsel %vm2462_vm5, %v2347_v47, %v1847_v52  ;;  %v2475_v56 = vsel %vm2462_vm5, %v2346_v44, %v1845_v53 }
  0xc9   :  { %1244 = vrot.lane.b32.xlu1 %v989_v38, %s8959_s24  ;;  %1242 = vrot.lane.b32.xlu0 %v987_v39, %s8959_s24  ;;  %v994_v39 = vrot.slane %v9605_v27, 2 }
  0xca   :  { %8373 = vmatprep.mubr.msk.f32.mxu0 %vm2604_vm6, %v2475_v56  ;;  %v1636_v56 = vrot.slane %v9605_v27, 3 }
  0xcb   :  { %8374 = vmatmul.mubr.msk.f32.gmra.mrb[12].mxu0 %vm2604_vm6, %v2476_v26  ;;  %v567_v62 = vpop.permute.xlu1 %566  ;;  %v565_v63 = vpop.permute.xlu0 %564  ;;  %v995_v52 = vsel %vm920_vm0, %v992_v4, %v994_v39 }
  0xcc   :  { %v2220_v15 = vsel %vm2204_vm3, %v9221_v57, %v567_v62  ;;  %v2219_v10 = vsel %vm2204_vm3, %v9198_v42, %v565_v63  ;;  %v9610_v57 = vld [vmem:[%s13924_s0 + $0x130] sm:$0xff]  ;;  %v9643_v63 = vld [vmem:[%s13924_s0 + $0x138] sm:$0xff] }
  0xcd   :  { %1886 = vrot.lane.b32.xlu1 %v1631_v2, %s8961_s30  ;;  %1884 = vrot.lane.b32.xlu0 %v1629_v60, %s8961_s30  ;;  %v354_v36 = vrot.slane %v9610_v57, 1  ;;  %v996_v40 = vrot.slane %v9610_v57, 2  ;;  %v1638_v2 = vrot.slane %v9610_v57, 3 }
  0xcf   :  { %v1209_v7 = vpop.permute.xlu1 %1208  ;;  %v1207_v8 = vpop.permute.xlu0 %1206  ;;  %v355_v50 = vsel %vm278_vm1, %v352_v35, %v354_v36  ;;  %v997_v44 = vsel %vm920_vm0, %v994_v39, %v996_v40  ;;  %v1639_v4 = vsel %vm1562_vm2, %v1636_v56, %v1638_v2 }
  0xd0   :  { %v2349_v22 = vsel %vm2333_vm4, %v2220_v15, %v1209_v7  ;;  %v2348_v18 = vsel %vm2333_vm4, %v2219_v10, %v1207_v8 }
  0xd1   :  { %606 = vrot.lane.b32.xlu1 %v351_v31, %s8960_s25  ;;  %604 = vrot.lane.b32.xlu0 %v349_v6, %s8960_s25  ;;  %v1637_v31 = vsel %vm1562_vm2, %v1634_v21, %v1636_v56  ;;  %v356_v6 = vrot.slane %v9643_v63, 1 }
  0xd3   :  { %v1851_v23 = vpop.permute.xlu1 %1850  ;;  %v1849_v24 = vpop.permute.xlu0 %1848  ;;  %v357_v1 = vsel %vm278_vm1, %v354_v36, %v356_v6 }
  0xd4   :  { %v2478_v42 = vsel %vm2462_vm5, %v2349_v22, %v1851_v23  ;;  %v2477_v28 = vsel %vm2462_vm5, %v2348_v18, %v1849_v24 }
  0xd5   :  { %1248 = vrot.lane.b32.xlu1 %v993_v11, %s8959_s24  ;;  %1246 = vrot.lane.b32.xlu0 %v991_v14, %s8959_s24  ;;  %v998_v14 = vrot.slane %v9643_v63, 2 }
  0xd6   :  { %8376 = vmatprep.mubr.msk.f32.mxu0 %vm2604_vm6, %v2477_v28  ;;  %v1640_v28 = vrot.slane %v9643_v63, 3 }
  0xd7   :  { %8377 = vmatmul.mubr.msk.f32.gmra.mrb[14].mxu0 %vm2604_vm6, %v2478_v42  ;;  %v571_v37 = vpop.permute.xlu1 %570  ;;  %v569_v38 = vpop.permute.xlu0 %568  ;;  %v999_v23 = vsel %vm920_vm0, %v996_v40, %v998_v14 }
  0xd8   :  { %v2222_v53 = vsel %vm2204_vm3, %v9249_v12, %v571_v37  ;;  %v2221_v26 = vsel %vm2204_vm3, %v9226_v58, %v569_v38  ;;  %v9648_v12 = vld [vmem:[%s13924_s0 + $0x140] sm:$0xff]  ;;  %v9681_v38 = vld [vmem:[%s13924_s0 + $0x148] sm:$0xff] }
  0xd9   :  { %1890 = vrot.lane.b32.xlu1 %v1635_v29, %s8961_s30  ;;  %1888 = vrot.lane.b32.xlu0 %v1633_v17, %s8961_s30  ;;  %v358_v7 = vrot.slane %v9648_v12, 1  ;;  %v1000_v15 = vrot.slane %v9648_v12, 2  ;;  %v1642_v29 = vrot.slane %v9648_v12, 3 }
  0xdb   :  { %v1213_v46 = vpop.permute.xlu1 %1212  ;;  %v1211_v47 = vpop.permute.xlu0 %1210  ;;  %v359_v10 = vsel %vm278_vm1, %v356_v6, %v358_v7  ;;  %v1001_v18 = vsel %vm920_vm0, %v998_v14, %v1000_v15  ;;  %v1643_v40 = vsel %vm1562_vm2, %v1640_v28, %v1642_v29 }
  0xdc   :  { %v2351_v60 = vsel %vm2333_vm4, %v2222_v53, %v1213_v46  ;;  %v2350_v55 = vsel %vm2333_vm4, %v2221_v26, %v1211_v47 }
  0xdd   :  { %610 = vrot.lane.b32.xlu1 %v355_v50, %s8960_s25  ;;  %608 = vrot.lane.b32.xlu0 %v353_v45, %s8960_s25  ;;  %v1641_v50 = vsel %vm1562_vm2, %v1638_v2, %v1640_v28  ;;  %v360_v45 = vrot.slane %v9681_v38, 1 }
  0xdf   :  { %v1855_v61 = vpop.permute.xlu1 %1854  ;;  %v1853_v62 = vpop.permute.xlu0 %1852  ;;  %v361_v56 = vsel %vm278_vm1, %v358_v7, %v360_v45 }
  0xe0   :  { %v2480_v58 = vsel %vm2462_vm5, %v2351_v60, %v1855_v61  ;;  %v2479_v3 = vsel %vm2462_vm5, %v2350_v55, %v1853_v62 }
  0xe1   :  { %1252 = vrot.lane.b32.xlu1 %v997_v44, %s8959_s24  ;;  %1250 = vrot.lane.b32.xlu0 %v995_v52, %s8959_s24  ;;  %v1002_v52 = vrot.slane %v9681_v38, 2 }
  0xe2   :  { %8379 = vmatprep.mubr.msk.f32.mxu0 %vm2604_vm6, %v2479_v3  ;;  %v1644_v3 = vrot.slane %v9681_v38, 3 }
  0xe3   :  { %8380 = vmatmul.mubr.msk.f32.gmra.mrb[16].mxu0 %vm2604_vm6, %v2480_v58  ;;  %v575_v8 = vpop.permute.xlu1 %574  ;;  %v573_v11 = vpop.permute.xlu0 %572  ;;  %v1003_v61 = vsel %vm920_vm0, %v1000_v15, %v1002_v52 }
  0xe4   :  { %v2224_v24 = vsel %vm2204_vm3, %v9277_v32, %v575_v8  ;;  %v2223_v42 = vsel %vm2204_vm3, %v9254_v13, %v573_v11  ;;  %v9686_v32 = vld [vmem:[%s13924_s0 + $0x150] sm:$0xff]  ;;  %v9719_v11 = vld [vmem:[%s13924_s0 + $0x158] sm:$0xff] }
  0xe5   :  { %1894 = vrot.lane.b32.xlu1 %v1639_v4, %s8961_s30  ;;  %1892 = vrot.lane.b32.xlu0 %v1637_v31, %s8961_s30  ;;  %v362_v46 = vrot.slane %v9686_v32, 1  ;;  %v1004_v53 = vrot.slane %v9686_v32, 2  ;;  %v1646_v4 = vrot.slane %v9686_v32, 3 }
  0xe7   :  { %v1217_v21 = vpop.permute.xlu1 %1216  ;;  %v1215_v22 = vpop.permute.xlu0 %1214  ;;  %v363_v26 = vsel %vm278_vm1, %v360_v45, %v362_v46  ;;  %v1005_v55 = vsel %vm920_vm0, %v1002_v52, %v1004_v53  ;;  %v1647_v15 = vsel %vm1562_vm2, %v1644_v3, %v1646_v4 }
  0xe8   :  { %v2353_v17 = vsel %vm2333_vm4, %v2224_v24, %v1217_v21  ;;  %v2352_v35 = vsel %vm2333_vm4, %v2223_v42, %v1215_v22 }
  0xe9   :  { %614 = vrot.lane.b32.xlu1 %v359_v10, %s8960_s25  ;;  %612 = vrot.lane.b32.xlu0 %v357_v1, %s8960_s25  ;;  %v1645_v10 = vsel %vm1562_vm2, %v1642_v29, %v1644_v3  ;;  %v364_v1 = vrot.slane %v9719_v11, 1 }
  0xeb   :  { %v1859_v36 = vpop.permute.xlu1 %1858  ;;  %v1857_v37 = vpop.permute.xlu0 %1856  ;;  %v365_v28 = vsel %vm278_vm1, %v362_v46, %v364_v1 }
  0xec   :  { %v2482_v13 = vsel %vm2462_vm5, %v2353_v17, %v1859_v36  ;;  %v2481_v39 = vsel %vm2462_vm5, %v2352_v35, %v1857_v37 }
  0xed   :  { %1256 = vrot.lane.b32.xlu1 %v1001_v18, %s8959_s24  ;;  %1254 = vrot.lane.b32.xlu0 %v999_v23, %s8959_s24  ;;  %v1006_v23 = vrot.slane %v9719_v11, 2 }
  0xee   :  { %8382 = vmatprep.mubr.msk.f32.mxu0 %vm2604_vm6, %v2481_v39  ;;  %v1648_v39 = vrot.slane %v9719_v11, 3 }
  0xef   :  { %8383 = vmatmul.mubr.msk.f32.gmra.mrb[18].mxu0 %vm2604_vm6, %v2482_v13  ;;  %v579_v47 = vpop.permute.xlu1 %578  ;;  %v577_v44 = vpop.permute.xlu0 %576  ;;  %v1007_v36 = vsel %vm920_vm0, %v1004_v53, %v1006_v23 }
  0xf0   :  { %v2226_v62 = vsel %vm2204_vm3, %v9305_v48, %v579_v47  ;;  %v2225_v58 = vsel %vm2204_vm3, %v9282_v33, %v577_v44  ;;  %v9724_v48 = vld [vmem:[%s13924_s0 + $0x160] sm:$0xff]  ;;  %v9757_v44 = vld [vmem:[%s13924_s0 + $0x168] sm:$0xff] }
  0xf1   :  { %1898 = vrot.lane.b32.xlu1 %v1643_v40, %s8961_s30  ;;  %1896 = vrot.lane.b32.xlu0 %v1641_v50, %s8961_s30  ;;  %v366_v21 = vrot.slane %v9724_v48, 1  ;;  %v1008_v24 = vrot.slane %v9724_v48, 2  ;;  %v1650_v40 = vrot.slane %v9724_v48, 3 }
  0xf3   :  { %v1221_v2 = vpop.permute.xlu1 %1220  ;;  %v1219_v60 = vpop.permute.xlu0 %1218  ;;  %v367_v42 = vsel %vm278_vm1, %v364_v1, %v366_v21  ;;  %v1009_v35 = vsel %vm920_vm0, %v1006_v23, %v1008_v24  ;;  %v1651_v53 = vsel %vm1562_vm2, %v1648_v39, %v1650_v40 }
  0xf4   :  { %v2355_v31 = vsel %vm2333_vm4, %v2226_v62, %v1221_v2  ;;  %v2354_v6 = vsel %vm2333_vm4, %v2225_v58, %v1219_v60 }
  0xf5   :  { %618 = vrot.lane.b32.xlu1 %v363_v26, %s8960_s25  ;;  %616 = vrot.lane.b32.xlu0 %v361_v56, %s8960_s25  ;;  %v1649_v26 = vsel %vm1562_vm2, %v1646_v4, %v1648_v39  ;;  %v368_v56 = vrot.slane %v9757_v44, 1 }
  0xf7   :  { %v1863_v7 = vpop.permute.xlu1 %1862  ;;  %v1861_v8 = vpop.permute.xlu0 %1860  ;;  %v369_v3 = vsel %vm278_vm1, %v366_v21, %v368_v56 }
  0xf8   :  { %v2484_v33 = vsel %vm2462_vm5, %v2355_v31, %v1863_v7  ;;  %v2483_v14 = vsel %vm2462_vm5, %v2354_v6, %v1861_v8 }
  0xf9   :  { %1260 = vrot.lane.b32.xlu1 %v1005_v55, %s8959_s24  ;;  %1258 = vrot.lane.b32.xlu0 %v1003_v61, %s8959_s24  ;;  %v1010_v61 = vrot.slane %v9757_v44, 2 }
  0xfa   :  { %8385 = vmatprep.mubr.msk.f32.mxu0 %vm2604_vm6, %v2483_v14 }
  0xfb   :  { %8386 = vmatmul.mubr.msk.f32.gmra.mrb[20].mxu0 %vm2604_vm6, %v2484_v33  ;;  %v583_v22 = vpop.permute.xlu1 %582  ;;  %v581_v18 = vpop.permute.xlu0 %580  ;;  %v1011_v7 = vsel %vm920_vm0, %v1008_v24, %v1010_v61  ;;  %v1652_v33 = vrot.slane %v9757_v44, 3 }
  0xfc   :  { %v2228_v37 = vsel %vm2204_vm3, %v9339_v19, %v583_v22  ;;  %v2227_v13 = vsel %vm2204_vm3, %v9310_v51, %v581_v18  ;;  %v9762_v19 = vld [vmem:[%s13924_s0 + $0x170] sm:$0xff]  ;;  %v9795_v22 = vld [vmem:[%s13924_s0 + $0x178] sm:$0xff] }
  0xfd   :  { %1902 = vrot.lane.b32.xlu1 %v1647_v15, %s8961_s30  ;;  %1900 = vrot.lane.b32.xlu0 %v1645_v10, %s8961_s30  ;;  %v370_v2 = vrot.slane %v9762_v19, 1  ;;  %v1012_v62 = vrot.slane %v9762_v19, 2  ;;  %v1654_v14 = vrot.slane %v9762_v19, 3  ;;  %v1653_v24 = vsel %vm1562_vm2, %v1650_v40, %v1652_v33 }
  0xfe   :  { %v1656_v19 = vrot.slane %v9795_v22, 3 }
  0xff   :  { %v1225_v29 = vpop.permute.xlu1 %1224  ;;  %v1223_v17 = vpop.permute.xlu0 %1222  ;;  %v371_v58 = vsel %vm278_vm1, %v368_v56, %v370_v2  ;;  %v1013_v6 = vsel %vm920_vm0, %v1010_v61, %v1012_v62  ;;  %v1655_v23 = vsel %vm1562_vm2, %v1652_v33, %v1654_v14 }
 0x100   :  { %v2357_v50 = vsel %vm2333_vm4, %v2228_v37, %v1225_v29  ;;  %v2356_v45 = vsel %vm2333_vm4, %v2227_v13, %v1223_v17  ;;  %v1657_v61 = vsel %vm1562_vm2, %v1654_v14, %v1656_v19 }
 0x101   :  { %622 = vrot.lane.b32.xlu1 %v367_v42, %s8960_s25  ;;  %620 = vrot.lane.b32.xlu0 %v365_v28, %s8960_s25  ;;  %v372_v42 = vrot.slane %v9795_v22, 1 }
 0x103   :  { %v1867_v46 = vpop.permute.xlu1 %1866  ;;  %v1865_v47 = vpop.permute.xlu0 %1864  ;;  %v373_v13 = vsel %vm278_vm1, %v370_v2, %v372_v42  ;;  %v69_v2 = vld [vmem:[%s13924_s0 + $0x188] sm:$0xff] }
 0x104   :  { %v2486_v51 = vsel %vm2462_vm5, %v2357_v50, %v1867_v46  ;;  %v2485_v52 = vsel %vm2462_vm5, %v2356_v45, %v1865_v47 }
 0x105   :  { %1264 = vrot.lane.b32.xlu1 %v1009_v35, %s8959_s24  ;;  %1262 = vrot.lane.b32.xlu0 %v1007_v36, %s8959_s24  ;;  %v1014_v35 = vrot.slane %v9795_v22, 2 }
 0x106   :  { %8388 = vmatprep.mubr.msk.f32.mxu0 %vm2604_vm6, %v2485_v52 }
 0x107   :  { %8389 = vmatmul.mubr.msk.f32.gmra.mrb[22].mxu0 %vm2604_vm6, %v2486_v51  ;;  %v587_v60 = vpop.permute.xlu1 %586  ;;  %v585_v55 = vpop.permute.xlu0 %584  ;;  %v1015_v45 = vsel %vm920_vm0, %v1012_v62, %v1014_v35  ;;  %v376_v62 = vrot.slane %v69_v2, 1 }
 0x108   :  { %v2230_v8 = vsel %vm2204_vm3, %v9377_v59, %v587_v60  ;;  %v2229_v48 = vsel %vm2204_vm3, %v9344_v20, %v585_v55  ;;  %v9800_v59 = vld [vmem:[%s13924_s0 + $0x180] sm:$0xff] }
 0x109   :  { %1906 = vrot.lane.b32.xlu1 %v1651_v53, %s8961_s30  ;;  %1904 = vrot.lane.b32.xlu0 %v1649_v26, %s8961_s30  ;;  %v374_v28 = vrot.slane %v9800_v59, 1  ;;  %v1016_v36 = vrot.slane %v9800_v59, 2  ;;  %v1658_v51 = vrot.slane %v9800_v59, 3 }
 0x10b   :  { %v1229_v4 = vpop.permute.xlu1 %1228  ;;  %v1227_v31 = vpop.permute.xlu0 %1226  ;;  %v375_v37 = vsel %vm278_vm1, %v372_v42, %v374_v28  ;;  %v1017_v50 = vsel %vm920_vm0, %v1014_v35, %v1016_v36  ;;  %v1659_v55 = vsel %vm1562_vm2, %v1656_v19, %v1658_v51  ;;  %v71_v42 = vld [vmem:[%s13924_s0 + $0x198] sm:$0xff] }
 0x10c   :  { %v2359_v15 = vsel %vm2333_vm4, %v2230_v8, %v1229_v4  ;;  %v2358_v10 = vsel %vm2333_vm4, %v2229_v48, %v1227_v31  ;;  %v1018_v31 = vrot.slane %v69_v2, 2  ;;  %v377_v8 = vsel %vm278_vm1, %v374_v28, %v376_v62 }
 0x10d   :  { %626 = vrot.lane.b32.xlu1 %v371_v58, %s8960_s25  ;;  %624 = vrot.lane.b32.xlu0 %v369_v3, %s8960_s25  ;;  %v380_v35 = vrot.slane %v71_v42, 1 }
 0x10f   :  { %v1871_v1 = vpop.permute.xlu1 %1870  ;;  %v1869_v21 = vpop.permute.xlu0 %1868 }
 0x110   :  { %v2488_v20 = vsel %vm2462_vm5, %v2359_v15, %v1871_v1  ;;  %v2487_v18 = vsel %vm2462_vm5, %v2358_v10, %v1869_v21  ;;  %v1019_v15 = vsel %vm920_vm0, %v1016_v36, %v1018_v31  ;;  %v1660_v21 = vrot.slane %v69_v2, 3 }
 0x111   :  { %1268 = vrot.lane.b32.xlu1 %v1013_v6, %s8959_s24  ;;  %1266 = vrot.lane.b32.xlu0 %v1011_v7, %s8959_s24 }
 0x112   :  { %8391 = vmatprep.mubr.msk.f32.mxu0 %vm2604_vm6, %v2487_v18 }
 0x113   :  { %8392 = vmatmul.mubr.msk.f32.gmra.mrb[24].mxu0 %vm2604_vm6, %v2488_v20  ;;  %v591_v29 = vpop.permute.xlu1 %590  ;;  %v589_v17 = vpop.permute.xlu0 %588 }
 0x114   :  { %v2232_v46 = vsel %vm2204_vm3, %v9415_v34, %v591_v29  ;;  %v2231_v47 = vsel %vm2204_vm3, %v9382_v16, %v589_v17  ;;  %v9836_v34 = vld [vmem:[%s13924_s0 + $0x190] sm:$0xff]  ;;  %v1661_v17 = vsel %vm1562_vm2, %v1658_v51, %v1660_v21 }
 0x115   :  { %1910 = vrot.lane.b32.xlu1 %v1655_v23, %s8961_s30  ;;  %1908 = vrot.lane.b32.xlu0 %v1653_v24, %s8961_s30  ;;  %v378_v58 = vrot.slane %v9836_v34, 1  ;;  %v1020_v6 = vrot.slane %v9836_v34, 2  ;;  %v1662_v59 = vrot.slane %v9836_v34, 3 }
 0x117   :  { %v1233_v39 = vpop.permute.xlu1 %1232  ;;  %v1231_v40 = vpop.permute.xlu0 %1230  ;;  %v379_v7 = vsel %vm278_vm1, %v376_v62, %v378_v58  ;;  %v1021_v14 = vsel %vm920_vm0, %v1018_v31, %v1020_v6  ;;  %v1663_v29 = vsel %vm1562_vm2, %v1660_v21, %v1662_v59 }
 0x118   :  { %v2361_v52 = vsel %vm2333_vm4, %v2232_v46, %v1233_v39  ;;  %v2360_v53 = vsel %vm2333_vm4, %v2231_v47, %v1231_v40  ;;  %v1022_v39 = vrot.slane %v71_v42, 2 }
 0x119   :  { %630 = vrot.lane.b32.xlu1 %v375_v37, %s8960_s25  ;;  %628 = vrot.lane.b32.xlu0 %v373_v13, %s8960_s25 }
 0x11a   :  { %v1023_v51 = vsel %vm920_vm0, %v1020_v6, %v1022_v39 }
 0x11b   :  { %v1875_v26 = vpop.permute.xlu1 %1874  ;;  %v1873_v56 = vpop.permute.xlu0 %1872 }
 0x11c   :  { %v2490_v16 = vsel %vm2462_vm5, %v2361_v52, %v1875_v26  ;;  %v2489_v60 = vsel %vm2462_vm5, %v2360_v53, %v1873_v56  ;;  %v1664_v26 = vrot.slane %v71_v42, 3 }
 0x11d   :  { %1272 = vrot.lane.b32.xlu1 %v1017_v50, %s8959_s24  ;;  %1270 = vrot.lane.b32.xlu0 %v1015_v45, %s8959_s24  ;;  %v381_v45 = vsel %vm278_vm1, %v378_v58, %v380_v35 }
 0x11e   :  { %8394 = vmatprep.mubr.msk.f32.mxu0 %vm2604_vm6, %v2489_v60  ;;  %v1665_v58 = vsel %vm1562_vm2, %v1662_v59, %v1664_v26 }
 0x11f   :  { %8395 = vmatmul.mubr.msk.f32.gmra.mrb[26].mxu0 %vm2604_vm6, %v2490_v16  ;;  %v595_v3 = vpop.permute.xlu1 %594  ;;  %v593_v4 = vpop.permute.xlu0 %592 }
 0x120   :  { %v2234_v10 = vsel %vm2204_vm3, %v9453_v5, %v595_v3  ;;  %v2233_v1 = vsel %vm2204_vm3, %v9420_v30, %v593_v4  ;;  %v9869_v5 = vld [vmem:[%s13924_s0 + $0x1a0] sm:$0xff] }
 0x121   :  { %1914 = vrot.lane.b32.xlu1 %v1659_v55, %s8961_s30  ;;  %1912 = vrot.lane.b32.xlu0 %v1657_v61, %s8961_s30  ;;  %v382_v36 = vrot.slane %v9869_v5, 1  ;;  %v1024_v40 = vrot.slane %v9869_v5, 2  ;;  %v1666_v56 = vrot.slane %v9869_v5, 3  ;;  %v73_v55 = vld [vmem:[%s13924_s0 + $0x1a8] sm:$0xff] }
 0x122   :  { %v384_v3 = vrot.slane %v73_v55, 1 }
 0x123   :  { %v1237_v48 = vpop.permute.xlu1 %1236  ;;  %v1235_v33 = vpop.permute.xlu0 %1234  ;;  %v383_v50 = vsel %vm278_vm1, %v380_v35, %v382_v36  ;;  %v1025_v19 = vsel %vm920_vm0, %v1022_v39, %v1024_v40  ;;  %v1667_v62 = vsel %vm1562_vm2, %v1664_v26, %v1666_v56 }
 0x124   :  { %v2363_v20 = vsel %vm2333_vm4, %v2234_v10, %v1237_v48  ;;  %v2362_v18 = vsel %vm2333_vm4, %v2233_v1, %v1235_v33  ;;  %v385_v33 = vsel %vm278_vm1, %v382_v36, %v384_v3 }
 0x125   :  { %634 = vrot.lane.b32.xlu1 %v379_v7, %s8960_s25  ;;  %632 = vrot.lane.b32.xlu0 %v377_v8, %s8960_s25  ;;  %v1026_v7 = vrot.slane %v73_v55, 2 }
 0x127   :  { %v1879_v23 = vpop.permute.xlu1 %1878  ;;  %v1877_v24 = vpop.permute.xlu0 %1876  ;;  %v1027_v1 = vsel %vm920_vm0, %v1024_v40, %v1026_v7 }
 0x128   :  { %v2492_v30 = vsel %vm2462_vm5, %v2363_v20, %v1879_v23  ;;  %v2491_v28 = vsel %vm2462_vm5, %v2362_v18, %v1877_v24  ;;  %v1668_v20 = vrot.slane %v73_v55, 3 }
 0x129   :  { %1276 = vrot.lane.b32.xlu1 %v1021_v14, %s8959_s24  ;;  %1274 = vrot.lane.b32.xlu0 %v1019_v15, %s8959_s24 }
 0x12a   :  { %8397 = vmatprep.mubr.msk.f32.mxu0 %vm2604_vm6, %v2491_v28  ;;  %v1669_v35 = vsel %vm1562_vm2, %v1666_v56, %v1668_v20 }
 0x12b   :  { %8398 = vmatmul.mubr.msk.f32.gmra.mrb[28].mxu0 %vm2604_vm6, %v2492_v30  ;;  %v599_v37 = vpop.permute.xlu1 %598  ;;  %v597_v13 = vpop.permute.xlu0 %596  ;;  %v75_v30 = vld [vmem:[%s13924_s0 + $0x1b8] sm:$0xff] }
 0x12c   :  { %v2236_v52 = vsel %vm2204_vm3, %v9491_v43, %v599_v37  ;;  %v2235_v53 = vsel %vm2204_vm3, %v9458_v49, %v597_v13  ;;  %v9902_v43 = vld [vmem:[%s13924_s0 + $0x1b0] sm:$0xff]  ;;  %v388_v36 = vrot.slane %v75_v30, 1  ;;  %v1030_v40 = vrot.slane %v75_v30, 2 }
 0x12d   :  { %1918 = vrot.lane.b32.xlu1 %v1663_v29, %s8961_s30  ;;  %1916 = vrot.lane.b32.xlu0 %v1661_v17, %s8961_s30  ;;  %v386_v4 = vrot.slane %v9902_v43, 1  ;;  %v1028_v8 = vrot.slane %v9902_v43, 2  ;;  %v1670_v18 = vrot.slane %v9902_v43, 3  ;;  %v3694_v29 = vlaneseq }
 0x12e   :  { %v1672_v26 = vrot.slane %v75_v30, 3 }
 0x12f   :  { %v1241_v46 = vpop.permute.xlu1 %1240  ;;  %v1239_v47 = vpop.permute.xlu0 %1238  ;;  %v387_v48 = vsel %vm278_vm1, %v384_v3, %v386_v4  ;;  %v1029_v10 = vsel %vm920_vm0, %v1026_v7, %v1028_v8  ;;  %v1671_v17 = vsel %vm1562_vm2, %v1668_v20, %v1670_v18  ;;  %v9973_v55 = vshrl.u32 %v3694_v29, 7 }
 0x130   :  { %v2365_v2 = vsel %vm2333_vm4, %v2236_v52, %v1241_v46  ;;  %v2364_v34 = vsel %vm2333_vm4, %v2235_v53, %v1239_v47  ;;  %v389_v47 = vsel %vm278_vm1, %v386_v4, %v388_v36  ;;  %v1031_v53 = vsel %vm920_vm0, %v1028_v8, %v1030_v40 }
 0x131   :  { %638 = vrot.lane.b32.xlu1 %v383_v50, %s8960_s25  ;;  %636 = vrot.lane.b32.xlu0 %v381_v45, %s8960_s25  ;;  %v9949_v45 = vand.u32 127, %v3694_v29  ;;  %v1673_v7 = vsel %vm1562_vm2, %v1670_v18, %v1672_v26  ;;  %v3696_v8 = vadd.s32 8, %v9973_v55 }
 0x133   :  { %v1883_v16 = vpop.permute.xlu1 %1882  ;;  %v1881_v60 = vpop.permute.xlu0 %1880  ;;  %vm5362_vm7 = vcmp.lt.s32.totalorder %v9949_v45, 11  ;;  %vm5361_vm8 = vcmp.lt.s32.totalorder %v9949_v45, 6 }
 0x134   :  { %v2494_v49 = vsel %vm2462_vm5, %v2365_v2, %v1883_v16  ;;  %v2493_v61 = vsel %vm2462_vm5, %v2364_v34, %v1881_v60  ;;  %v9966_v16 = vld [vmem:[%s13924_s0 + $0x1c8] sm:$0xff]  ;;  %v9971_v60 = vld [vmem:[%s13924_s0 + $0x1d0] sm:$0xff] }
 0x135   :  { %1280 = vrot.lane.b32.xlu1 %v1025_v19, %s8959_s24  ;;  %1278 = vrot.lane.b32.xlu0 %v1023_v51, %s8959_s24  ;;  %v392_v4 = vrot.slane %v9966_v16, 1  ;;  %v1036_v20 = vrot.slane %v9971_v60, 2  ;;  %v1678_v30 = vrot.slane %v9971_v60, 3 }
 0x136   :  { %8400 = vmatprep.mubr.msk.f32.mxu0 %vm2604_vm6, %v2493_v61 }
 0x137   :  { %8401 = vmatmul.mubr.msk.f32.gmra.mrb[30].mxu0 %vm2604_vm6, %v2494_v49  ;;  %v603_v31 = vpop.permute.xlu1 %602  ;;  %v601_v6 = vpop.permute.xlu0 %600 }
 0x138   :  { %v2238_v21 = vsel %vm2204_vm3, %v9529_v0, %v603_v31  ;;  %v2237_v59 = vsel %vm2204_vm3, %v9496_v9, %v601_v6  ;;  %v9935_v0 = vld [vmem:[%s13924_s0 + $0x1c0] sm:$0xff]  ;;  %v394_v31 = vrot.slane %v9971_v60, 1 }
 0x139   :  { %1922 = vrot.lane.b32.xlu1 %v1667_v62, %s8961_s30  ;;  %1920 = vrot.lane.b32.xlu0 %v1665_v58, %s8961_s30  ;;  %v390_v37 = vrot.slane %v9935_v0, 1  ;;  %v1032_v50 = vrot.slane %v9935_v0, 2  ;;  %v1674_v34 = vrot.slane %v9935_v0, 3  ;;  %v8962_v58 = vmov 4  }
 0x13a   :  { %v5363_v3 = vsel %vm5362_vm7, 3, %v8962_v58 }
 0x13b   :  { %v1245_v14 = vpop.permute.xlu1 %1244  ;;  %v1243_v15 = vpop.permute.xlu0 %1242  ;;  %v391_v46 = vsel %vm278_vm1, %v388_v36, %v390_v37  ;;  %v1033_v52 = vsel %vm920_vm0, %v1030_v40, %v1032_v50  ;;  %v1675_v6 = vsel %vm1562_vm2, %v1672_v26, %v1674_v34  ;;  %v10023_v36 = vld [vmem:[%s13924_s0 + $0x1d8] sm:$0xff] }
 0x13c   :  { %v2367_v23 = vsel %vm2333_vm4, %v2238_v21, %v1245_v14  ;;  %v2366_v24 = vsel %vm2333_vm4, %v2237_v59, %v1243_v15  ;;  %v5364_v14 = vsel %vm5361_vm8, 2, %v5363_v3  ;;  %v395_v15 = vsel %vm278_vm1, %v392_v4, %v394_v31 }
 0x13d   :  { %642 = vrot.lane.b32.xlu1 %v387_v48, %s8960_s25  ;;  %640 = vrot.lane.b32.xlu0 %v385_v33, %s8960_s25  ;;  %v9997_v21 = vsub.s32 16, %v5364_v14  ;;  %v1034_v59 = vrot.slane %v9966_v16, 2 }
 0x13f   :  { %v1887_v42 = vpop.permute.xlu1 %1886  ;;  %v1885_v5 = vpop.permute.xlu0 %1884 }
 0x140   :  { %v2496_v9 = vsel %vm2462_vm5, %v2367_v23, %v1887_v42  ;;  %v2495_v28 = vsel %vm2462_vm5, %v2366_v24, %v1885_v5  ;;  %v3827_v24 = vand.u32 15, %v9973_v55  ;;  %v10005_v42 = vld [vmem:[%s13925_s2 + $0x40] ss:$0 sm:$0xff]  ;;  %v1676_v5 = vrot.slane %v9966_v16, 3 }
 0x141   :  { %1284 = vrot.lane.b32.xlu1 %v1029_v10, %s8959_s24  ;;  %1282 = vrot.lane.b32.xlu0 %v1027_v1, %s8959_s24  ;;  %v393_v10 = vsel %vm278_vm1, %v390_v37, %v392_v4  ;;  %v3834_v1 = vand.u32 15, %v3696_v8  ;;  %v10028_v37 = vld [vmem:[%s13924_s0 + $0x1e0] sm:$0xff]  ;;  %v1038_v4 = vrot.slane %v10023_v36, 2 }
 0x142   :  { %8403 = vmatprep.mubr.msk.f32.mxu0 %vm2604_vm6, %v2495_v28  ;;  %vm10035_vm10 = vcmp.le.s32.totalorder %v3827_v24, %v9997_v21 }
 0x143   :  { %8404 = vmatmul.mubr.msk.f32.gmra.mrb[32].mxu0 %vm2604_vm6, %v2496_v9  ;;  %v607_v13 = vpop.permute.xlu1 %606  ;;  %v605_v39 = vpop.permute.xlu0 %604  ;;  %vm10014_vm9 = vcmp.le.s32.totalorder %v3834_v1, %v9997_v21 }
 0x144   :  { %v2240_v56 = vsel %vm2204_vm3, %v9567_v54, %v607_v13  ;;  %v2239_v2 = vsel %vm2204_vm3, %v9534_v25, %v605_v39 }
 0x145   :  { %1926 = vrot.lane.b32.xlu1 %v1671_v17, %s8961_s30  ;;  %1924 = vrot.lane.b32.xlu0 %v1669_v35, %s8961_s30  ;;  %v1037_v17 = vsel %vm920_vm0, %v1034_v59, %v1036_v20  ;;  %v1035_v35 = vsel %vm920_vm0, %v1032_v50, %v1034_v59  ;;  %v3700_v50 = vadd.s32 40, %v9973_v55 }
 0x147   :  { %v1249_v19 = vpop.permute.xlu1 %1248  ;;  %v1247_v51 = vpop.permute.xlu0 %1246 }
 0x148   :  { %v2369_v43 = vsel %vm2333_vm4, %v2240_v56, %v1249_v19  ;;  %v2368_v54 = vsel %vm2333_vm4, %v2239_v2, %v1247_v51  ;;  %v396_v56 = vrot.slane %v10023_v36, 1  ;;  %v398_v2 = vrot.slane %v10028_v37, 1 }
 0x149   :  { %646 = vrot.lane.b32.xlu1 %v391_v46, %s8960_s25  ;;  %644 = vrot.lane.b32.xlu0 %v389_v47, %s8960_s25 }
 0x14b   :  { %v1891_v49 = vpop.permute.xlu1 %1890  ;;  %v1889_v25 = vpop.permute.xlu0 %1888 }
 0x14c   :  { %v2498_v61 = vsel %vm2462_vm5, %v2369_v43, %v1891_v49  ;;  %v2497_v62 = vsel %vm2462_vm5, %v2368_v54, %v1889_v25  ;;  %v1677_v43 = vsel %vm1562_vm2, %v1674_v34, %v1676_v5  ;;  %v3698_v54 = vadd.s32 24, %v9973_v55 }
 0x14d   :  { %1288 = vrot.lane.b32.xlu1 %v1033_v52, %s8959_s24  ;;  %1286 = vrot.lane.b32.xlu0 %v1031_v53, %s8959_s24  ;;  %v3697_v49 = vadd.s32 16, %v9973_v55  ;;  %v399_v34 = vsel %vm278_vm1, %v396_v56, %v398_v2 }
 0x14e   :  { %8406 = vmatprep.mubr.msk.f32.mxu0 %vm2604_vm6, %v2497_v62  ;;  %v3848_v8 = vand.u32 15, %v3698_v54 }
 0x14f   :  { %8407 = vmatmul.mubr.msk.f32.gmra.mrb[34].mxu0 %vm2604_vm6, %v2498_v61  ;;  %v611_v48 = vpop.permute.xlu1 %610  ;;  %v609_v33 = vpop.permute.xlu0 %608 }
 0x150   :  { %v2242_v9 = vsel %vm2204_vm3, %v9605_v27, %v611_v48  ;;  %v2241_v27 = vsel %vm2204_vm3, %v9572_v41, %v609_v33  ;;  %v1679_v41 = vsel %vm1562_vm2, %v1676_v5, %v1678_v30  ;;  %v397_v48 = vsel %vm278_vm1, %v394_v31, %v396_v56 }
 0x151   :  { %1930 = vrot.lane.b32.xlu1 %v1675_v6, %s8961_s30  ;;  %1928 = vrot.lane.b32.xlu0 %v1673_v7, %s8961_s30  ;;  %v1040_v6 = vrot.slane %v10028_v37, 2  ;;  %v3841_v33 = vand.u32 15, %v3697_v49  ;;  %vm10084_vm11 = vcmp.le.s32.totalorder %v3848_v8, %v9997_v21  ;;  %v3862_v49 = vand.u32 15, %v3700_v50 }
 0x152   :  { %v3701_v50 = vadd.s32 48, %v9973_v55 }
 0x153   :  { %v1253_v18 = vpop.permute.xlu1 %1252  ;;  %v1251_v23 = vpop.permute.xlu0 %1250  ;;  %v1041_v59 = vsel %vm920_vm0, %v1038_v4, %v1040_v6  ;;  %vm10089_vm12 = vcmp.le.s32.totalorder %v3841_v33, %v9997_v21  ;;  %vm10144_vm13 = vcmp.le.s32.totalorder %v3862_v49, %v9997_v21 }
 0x154   :  { %v2371_v13 = vsel %vm2333_vm4, %v2242_v9, %v1253_v18  ;;  %v2370_v47 = vsel %vm2333_vm4, %v2241_v27, %v1251_v23  ;;  %v1039_v18 = vsel %vm920_vm0, %v1036_v20, %v1038_v4  ;;  %v10106_v27 = vld [vmem:[%s13924_s0 + $0x1f0] sm:$0xff] }
 0x155   :  { %650 = vrot.lane.b32.xlu1 %v395_v15, %s8960_s25  ;;  %648 = vrot.lane.b32.xlu0 %v393_v10, %s8960_s25  ;;  %v1680_v15 = vrot.slane %v10023_v36, 3  ;;  %v1682_v10 = vrot.slane %v10028_v37, 3  ;;  %v81_v36 = vld [vmem:[%s13924_s0 + $0x1e8] sm:$0xff] }
 0x156   :  { %v8357_v28 = vpop.f32.mrb[0].mxu0 }
 0x157   :  { %v3061_v39 = vadd.f32 %v8357_v28, %v10005_v42  ;;  %v3055_v40 = vpop.f32.mrb[1].mxu0  ;;  %v1895_v46 = vpop.permute.xlu1 %1894 }
 0x158   :  { %v3056_v19 = vadd.f32 %v10005_v42, %v3055_v40  ;;  %v2500_v51 = vsel %vm2462_vm5, %v2371_v13, %v1895_v46  ;;  %v1893_v52 = vpop.permute.xlu0 %1892 }
 0x159   :  { %v5495_v53 = vmax.f32 %v3061_v39, 0.0  ;;  %v2499_v26 = vsel %vm2462_vm5, %v2370_v47, %v1893_v52  ;;  %1292 = vrot.lane.b32.xlu1 %v1037_v17, %s8959_s24  ;;  %1290 = vrot.lane.b32.xlu0 %v1035_v35, %s8959_s24  ;;  %v1683_v35 = vsel %vm1562_vm2, %v1680_v15, %v1682_v10 }
 0x15a   :  { %v5494_v16 = vmax.f32 %v3056_v19, 0.0  ;;  %8409 = vmatprep.mubr.msk.f32.mxu0 %vm2604_vm6, %v2499_v26  ;;  %v1681_v19 = vsel %vm1562_vm2, %v1678_v30, %v1680_v15  ;;  %v402_v26 = vrot.slane %v10106_v27, 1 }
 0x15b   :  { %v5623_v25 = vsel %vm10014_vm9, %v5495_v53, 0.0  ;;  %8410 = vmatmul.mubr.msk.f32.gmra.mrb[36].mxu0 %vm2604_vm6, %v2500_v51  ;;  %v615_v61 = vpop.permute.xlu1 %614  ;;  %v3699_v51 = vadd.s32 32, %v9973_v55  ;;  %v400_v53 = vrot.slane %v81_v36, 1  ;;  %vm6426_vm9 = vcmask 1042434  }
 0x15c   :  { %v5751_v62 = vsel %vm2204_vm3, %v5623_v25, -inf  ;;  %v5622_v58 = vsel %vm10035_vm10, %v5494_v16, 0.0  ;;  %v613_v3 = vpop.permute.xlu0 %612  ;;  %v2244_v31 = vsel %vm2204_vm3, %v9643_v63, %v615_v61  ;;  %v1044_v25 = vrot.slane %v10106_v27, 2 }
 0x15d   :  { %v5750_v0 = vsel %vm2204_vm3, %v5622_v58, -inf  ;;  %1934 = vrot.lane.b32.xlu1 %v1679_v41, %s8961_s30  ;;  %1932 = vrot.lane.b32.xlu0 %v1677_v43, %s8961_s30  ;;  %v2243_v28 = vsel %vm2204_vm3, %v9610_v57, %v613_v3  ;;  %v1042_v43 = vrot.slane %v81_v36, 2  ;;  %v1684_v58 = vrot.slane %v81_v36, 3 }
 0x15e   :  { %v5752_v7 = vmax.f32 %v5750_v0, %v5751_v62  ;;  %v3855_v62 = vand.u32 15, %v3699_v51  ;;  %v1686_v3 = vrot.slane %v10106_v27, 3  ;;  %v403_v4 = vsel %vm278_vm1, %v400_v53, %v402_v26 }
 0x15f   :  { %v1257_v14 = vpop.permute.xlu1 %1256 }
 0x160   :  { %v1255_v1 = vpop.permute.xlu0 %1254  ;;  %v5753_v23 = vrot.slane %v5752_v7, 4  ;;  %v2373_v20 = vsel %vm2333_vm4, %v2244_v31, %v1257_v14  ;;  %vm10162_vm14 = vcmp.le.s32.totalorder %v3855_v62, %v9997_v21  ;;  %v3869_v62 = vand.u32 15, %v3701_v50 }
 0x161   :  { %654 = vrot.lane.b32.xlu1 %v399_v34, %s8960_s25  ;;  %652 = vrot.lane.b32.xlu0 %v397_v48, %s8960_s25  ;;  %v2372_v57 = vsel %vm2333_vm4, %v2243_v28, %v1255_v1  ;;  %v10141_v48 = vld [vmem:[%s13924_s0 + $0x1f8] sm:$0xff]  ;;  %v1045_v1 = vsel %vm920_vm0, %v1042_v43, %v1044_v25 }
 0x162   :  { %v8360_v24 = vpop.f32.mrb[2].mxu0  ;;  %v5754_v52 = vmax.f32 %v5752_v7, %v5753_v23  ;;  %v401_v7 = vsel %vm278_vm1, %v398_v2, %v400_v53  ;;  %v1043_v2 = vsel %vm920_vm0, %v1040_v6, %v1042_v43  ;;  %v1687_v23 = vsel %vm1562_vm2, %v1684_v58, %v1686_v3 }
 0x163   :  { %v3071_v29 = vadd.f32 %v8360_v24, %v10005_v42  ;;  %v3065_v17 = vpop.f32.mrb[3].mxu0  ;;  %v1899_v63 = vpop.permute.xlu1 %1898  ;;  %v1685_v6 = vsel %vm1562_vm2, %v1682_v10, %v1684_v58  ;;  %v404_v28 = vrot.slane %v10141_v48, 1  ;;  %vm10227_vm8 = vcmp.le.s32.totalorder %v3869_v62, %v9997_v21  ;;  %v10282_v62 = vld [vmem:[%s13924_s0 + $0x218] sm:$0xff] }
 0x164   :  { %v3066_v13 = vadd.f32 %v10005_v42, %v3065_v17  ;;  %v2502_v39 = vsel %vm2462_vm5, %v2373_v20, %v1899_v63  ;;  %v1897_v40 = vpop.permute.xlu0 %1896  ;;  %v5755_v0 = vrot.slane %v5754_v52, 2 }
 0x165   :  { %v5497_v46 = vmax.f32 %v3071_v29, 0.0  ;;  %v2501_v47 = vsel %vm2462_vm5, %v2372_v57, %v1897_v40  ;;  %1296 = vrot.lane.b32.xlu1 %v1041_v59, %s8959_s24  ;;  %1294 = vrot.lane.b32.xlu0 %v1039_v18, %s8959_s24  ;;  %v10157_v59 = vld [vmem:[%s13924_s0 + $0x200] sm:$0xff]  ;;  %v405_v53 = vsel %vm278_vm1, %v402_v26, %v404_v28  ;;  %v1688_v26 = vrot.slane %v10141_v48, 3 }
 0x166   :  { %v5496_v41 = vmax.f32 %v3066_v13, 0.0  ;;  %8412 = vmatprep.mubr.msk.f32.mxu0 %vm2604_vm6, %v2501_v47  ;;  %v5756_v31 = vmax.f32 %v5754_v52, %v5755_v0  ;;  %v406_v37 = vrot.slane %v10157_v59, 1 }
 0x167   :  { %v5625_v56 = vsel %vm10084_vm11, %v5497_v46, 0.0  ;;  %8413 = vmatmul.mubr.msk.f32.gmra.mrb[38].mxu0 %vm2604_vm6, %v2502_v39  ;;  %v619_v16 = vpop.permute.xlu1 %618 }
 0x168   :  { %v5760_v60 = vsel %vm2204_vm3, %v5625_v56, -inf  ;;  %v5624_v30 = vsel %vm10089_vm12, %v5496_v41, 0.0  ;;  %v617_v54 = vpop.permute.xlu0 %616  ;;  %v2246_v5 = vsel %vm2204_vm3, %v9681_v38, %v619_v16  ;;  %v5757_v46 = vrot.slane %v5756_v31, 1 }
 0x169   :  { %v5759_v61 = vsel %vm2204_vm3, %v5624_v30, -inf  ;;  %1938 = vrot.lane.b32.xlu1 %v1683_v35, %s8961_s30  ;;  %1936 = vrot.lane.b32.xlu0 %v1681_v19, %s8961_s30  ;;  %v2245_v20 = vsel %vm2204_vm3, %v9648_v12, %v617_v54  ;;  %v3702_v12 = vadd.s32 56, %v9973_v55  ;;  %v407_v41 = vsel %vm278_vm1, %v404_v28, %v406_v37 }
 0x16a   :  { %v5761_v34 = vmax.f32 %v5759_v61, %v5760_v60  ;;  %v1046_v56 = vrot.slane %v10141_v48, 2  ;;  %v1048_v54 = vrot.slane %v10157_v59, 2  ;;  %v5758_v58 = vmax.f32 %v5756_v31, %v5757_v46 }
 0x16b   :  { %v1261_v8 = vpop.permute.xlu1 %1260  ;;  %v3876_v61 = vand.u32 15, %v3702_v12  ;;  %vm6428_vm12 = vcmask 1043459  }
 0x16c   :  { %v5762_v33 = vrot.slane %v5761_v34, 4  ;;  %v1259_v14 = vpop.permute.xlu0 %1258  ;;  %v2375_v29 = vsel %vm2333_vm4, %v2246_v5, %v1261_v8  ;;  %v1049_v48 = vsel %vm920_vm0, %v1046_v56, %v1048_v54 }
 0x16d   :  { %658 = vrot.lane.b32.xlu1 %v403_v4, %s8960_s25  ;;  %656 = vrot.lane.b32.xlu0 %v401_v7, %s8960_s25  ;;  %v2374_v36 = vsel %vm2333_vm4, %v2245_v20, %v1259_v14  ;;  %v1690_v4 = vrot.slane %v10157_v59, 3  ;;  %vm10213_vm7 = vcmp.le.s32.totalorder %v3876_v61, %v9997_v21  ;;  %v10244_v20 = vld [vmem:[%s13924_s0 + $0x208] sm:$0xff] }
 0x16e   :  { %v5763_v24 = vmax.f32 %v5761_v34, %v5762_v33  ;;  %v8363_v9 = vpop.f32.mrb[4].mxu0  ;;  %v1050_v46 = vrot.slane %v10244_v20, 2 }
 0x16f   :  { %v3081_v17 = vadd.f32 %v8363_v9, %v10005_v42  ;;  %v3075_v63 = vpop.f32.mrb[5].mxu0  ;;  %v1903_v35 = vpop.permute.xlu1 %1902  ;;  %v1691_v31 = vsel %vm1562_vm2, %v1688_v26, %v1690_v4 }
 0x170   :  { %v5764_v10 = vrot.slane %v5763_v24, 2  ;;  %v3076_v57 = vadd.f32 %v10005_v42, %v3075_v63  ;;  %v2504_v38 = vsel %vm2462_vm5, %v2375_v29, %v1903_v35  ;;  %v1901_v13 = vpop.permute.xlu0 %1900  ;;  %v10249_v29 = vld [vmem:[%s13924_s0 + $0x210] sm:$0xff] }
 0x171   :  { %v5499_v39 = vmax.f32 %v3081_v17, 0.0  ;;  %v2503_v40 = vsel %vm2462_vm5, %v2374_v36, %v1901_v13  ;;  %1300 = vrot.lane.b32.xlu1 %v1045_v1, %s8959_s24  ;;  %1298 = vrot.lane.b32.xlu0 %v1043_v2, %s8959_s24  ;;  %v1047_v1 = vsel %vm920_vm0, %v1044_v25, %v1046_v56  ;;  %v3704_v36 = vadd.s32 72, %v9973_v55 }
 0x172   :  { %v5765_v47 = vmax.f32 %v5763_v24, %v5764_v10  ;;  %v5498_v19 = vmax.f32 %v3076_v57, 0.0  ;;  %8415 = vmatprep.mubr.msk.f32.mxu0 %vm2604_vm6, %v2503_v40  ;;  %v3703_v57 = vadd.s32 64, %v9973_v55  ;;  %v410_v40 = vrot.slane %v10249_v29, 1 }
 0x173   :  { %v5627_v51 = vsel %vm10144_vm13, %v5499_v39, 0.0  ;;  %8416 = vmatmul.mubr.msk.f32.gmra.mrb[40].mxu0 %vm2604_vm6, %v2504_v38  ;;  %v623_v52 = vpop.permute.xlu1 %622  ;;  %v408_v39 = vrot.slane %v10244_v20, 1  ;;  %v3890_v56 = vand.u32 15, %v3704_v36 }
 0x174   :  { %v5766_v16 = vrot.slane %v5765_v47, 1  ;;  %v5769_v43 = vsel %vm2204_vm3, %v5627_v51, -inf  ;;  %v5626_v60 = vsel %vm10162_vm14, %v5498_v19, 0.0  ;;  %v621_v30 = vpop.permute.xlu0 %620  ;;  %v2248_v18 = vsel %vm2204_vm3, %v9719_v11, %v623_v52 }
 0x175   :  { %v5768_v49 = vsel %vm2204_vm3, %v5626_v60, -inf  ;;  %1942 = vrot.lane.b32.xlu1 %v1687_v23, %s8961_s30  ;;  %1940 = vrot.lane.b32.xlu0 %v1685_v6, %s8961_s30  ;;  %v2247_v24 = vsel %vm2204_vm3, %v9686_v32, %v621_v30  ;;  %v1689_v11 = vsel %vm1562_vm2, %v1686_v3, %v1688_v26  ;;  %v411_v30 = vsel %vm278_vm1, %v408_v39, %v410_v40 }
 0x176   :  { %v5767_v0 = vmax.f32 %v5765_v47, %v5766_v16  ;;  %v5770_v34 = vmax.f32 %v5768_v49, %v5769_v43  ;;  %v3883_v16 = vand.u32 15, %v3703_v57  ;;  %v409_v49 = vsel %vm278_vm1, %v406_v37, %v408_v39 }
 0x177   :  { %v1265_v7 = vpop.permute.xlu1 %1264  ;;  %vm10296_vm10 = vcmp.le.s32.totalorder %v3890_v56, %v9997_v21  ;;  %v1696_v56 = vrot.slane %v10282_v62, 3 }
 0x178   :  { %v10209_v8 = vsel %vm6424_vm15, %v5767_v0, %v5758_v58  ;;  %v5771_v33 = vrot.slane %v5770_v34, 4  ;;  %v1263_v14 = vpop.permute.xlu0 %1262  ;;  %v2377_v5 = vsel %vm2333_vm4, %v2248_v18, %v1265_v7  ;;  %vm10302_vm11 = vcmp.le.s32.totalorder %v3883_v16, %v9997_v21 }
 0x179   :  { %662 = vrot.lane.b32.xlu1 %v407_v41, %s8960_s25  ;;  %660 = vrot.lane.b32.xlu0 %v405_v53, %s8960_s25  ;;  %v2376_v17 = vsel %vm2333_vm4, %v2247_v24, %v1263_v14  ;;  %v1052_v41 = vrot.slane %v10249_v29, 2  ;;  %v1051_v14 = vsel %vm920_vm0, %v1048_v54, %v1050_v46  ;;  %v412_v18 = vrot.slane %v10282_v62, 1 }
 0x17a   :  { %v5772_v2 = vmax.f32 %v5770_v34, %v5771_v33  ;;  %v8366_v23 = vpop.f32.mrb[6].mxu0  ;;  %v10290_v34 = vld [vmem:[%s13924_s0 + $0x220] sm:$0xff] }
 0x17b   :  { %v3091_v25 = vadd.f32 %v8366_v23, %v10005_v42  ;;  %v3085_v9 = vpop.f32.mrb[7].mxu0  ;;  %v1907_v28 = vpop.permute.xlu1 %1906  ;;  %v1053_v0 = vsel %vm920_vm0, %v1050_v46, %v1052_v41  ;;  %v8874_v23 = vld [vmem:[%s13924_s0 + $0x160] sm:$0xff]  ;;  %v413_v39 = vsel %vm278_vm1, %v410_v40, %v412_v18  ;;  %v1054_v46 = vrot.slane %v10282_v62, 2 }
 0x17c   :  { %v5773_v32 = vrot.slane %v5772_v2, 2  ;;  %v3086_v63 = vadd.f32 %v10005_v42, %v3085_v9  ;;  %v2506_v35 = vsel %vm2462_vm5, %v2377_v5, %v1907_v28  ;;  %v1905_v27 = vpop.permute.xlu0 %1904  ;;  %v1056_v40 = vrot.slane %v10290_v34, 2 }
 0x17d   :  { %v5501_v10 = vmax.f32 %v3091_v25, 0.0  ;;  %v2505_v3 = vsel %vm2462_vm5, %v2376_v17, %v1905_v27  ;;  %1304 = vrot.lane.b32.xlu1 %v1049_v48, %s8959_s24  ;;  %1302 = vrot.lane.b32.xlu0 %v1047_v1, %s8959_s24  ;;  %v414_v25 = vrot.slane %v10290_v34, 1  ;;  %v1698_v16 = vrot.slane %v10290_v34, 3 }
 0x17e   :  { %v5774_v38 = vmax.f32 %v5772_v2, %v5773_v32  ;;  %v5500_v13 = vmax.f32 %v3086_v63, 0.0  ;;  %8418 = vmatprep.mubr.msk.f32.mxu0 %vm2604_vm6, %v2505_v3  ;;  %v1694_v2 = vrot.slane %v10249_v29, 3  ;;  %v3706_v63 = vadd.s32 88, %v9973_v55 }
 0x17f   :  { %v5629_v12 = vsel %vm10213_vm7, %v5501_v10, 0.0  ;;  %8419 = vmatmul.mubr.msk.f32.gmra.mrb[42].mxu0 %vm2604_vm6, %v2506_v35  ;;  %v627_v50 = vpop.permute.xlu1 %626  ;;  %v3705_v35 = vadd.s32 80, %v9973_v55  ;;  %v1057_v62 = vsel %vm920_vm0, %v1054_v46, %v1056_v40  ;;  %v1699_v33 = vsel %vm1562_vm2, %v1696_v56, %v1698_v16 }
 0x180   :  { %v5775_v47 = vrot.slane %v5774_v38, 1  ;;  %v5778_v19 = vsel %vm2204_vm3, %v5629_v12, -inf  ;;  %v5628_v51 = vsel %vm10227_vm8, %v5500_v13, 0.0  ;;  %v625_v52 = vpop.permute.xlu0 %624  ;;  %v2250_v48 = vsel %vm2204_vm3, %v9757_v44, %v627_v50 }
 0x181   :  { %v5777_v53 = vsel %vm2204_vm3, %v5628_v51, -inf  ;;  %1946 = vrot.lane.b32.xlu1 %v1691_v31, %s8961_s30  ;;  %1944 = vrot.lane.b32.xlu0 %v1689_v11, %s8961_s30  ;;  %v2249_v6 = vsel %vm2204_vm3, %v8874_v23, %v625_v52  ;;  %v415_v13 = vsel %vm278_vm1, %v412_v18, %v414_v25  ;;  %v3897_v51 = vand.u32 15, %v3705_v35  ;;  %v10391_v18 = vld [vmem:[%s13924_s0 + $0x228] sm:$0xff]  ;;  %v10396_v23 = vld [vmem:[%s13924_s0 + $0x230] sm:$0xff] }
 0x182   :  { %v5776_v43 = vmax.f32 %v5774_v38, %v5775_v47  ;;  %v5779_v60 = vmax.f32 %v5777_v53, %v5778_v19  ;;  %v3904_v19 = vand.u32 15, %v3706_v63  ;;  %v1058_v35 = vrot.slane %v10391_v18, 2 }
 0x183   :  { %v1269_v61 = vpop.permute.xlu1 %1268  ;;  %vm10372_vm14 = vcmp.le.s32.totalorder %v3897_v51, %v9997_v21  ;;  %vm6430_vm7 = vcmask 1044484  }
 0x184   :  { %v5780_v26 = vrot.slane %v5779_v60, 4  ;;  %v1267_v58 = vpop.permute.xlu0 %1266  ;;  %v6427_v37 = vsel %vm6426_vm9, %v5776_v43, %v10209_v8  ;;  %v1692_v8 = vrot.slane %v10244_v20, 3  ;;  %v2379_v31 = vsel %vm2333_vm4, %v2250_v48, %v1269_v61  ;;  %v8876_v61 = vld [vmem:[%s13924_s0 + $0x188] sm:$0xff] }
 0x185   :  { %666 = vrot.lane.b32.xlu1 %v411_v30, %s8960_s25  ;;  %664 = vrot.lane.b32.xlu0 %v409_v49, %s8960_s25  ;;  %v2378_v9 = vsel %vm2333_vm4, %v2249_v6, %v1267_v58  ;;  %vm10358_vm13 = vcmp.le.s32.totalorder %v3904_v19, %v9997_v21 }
 0x186   :  { %v5781_v15 = vmax.f32 %v5779_v60, %v5780_v26  ;;  %v8369_v1 = vpop.f32.mrb[8].mxu0  ;;  %v1695_v3 = vsel %vm1562_vm2, %v1692_v8, %v1694_v2  ;;  %v1693_v36 = vsel %vm1562_vm2, %v1690_v4, %v1692_v8  ;;  %v1055_v26 = vsel %vm920_vm0, %v1052_v41, %v1054_v46 }
 0x187   :  { %v3101_v54 = vadd.f32 %v8369_v1, %v10005_v42  ;;  %v3095_v24 = vpop.f32.mrb[9].mxu0  ;;  %v1911_v5 = vpop.permute.xlu1 %1910  ;;  %v1697_v1 = vsel %vm1562_vm2, %v1694_v2, %v1696_v56 }
 0x188   :  { %v5782_v44 = vrot.slane %v5781_v15, 2  ;;  %v3096_v28 = vadd.f32 %v10005_v42, %v3095_v24  ;;  %v2508_v11 = vsel %vm2462_vm5, %v2379_v31, %v1911_v5  ;;  %v1909_v20 = vpop.permute.xlu0 %1908 }
 0x189   :  { %v5503_v32 = vmax.f32 %v3101_v54, 0.0  ;;  %v2507_v17 = vsel %vm2462_vm5, %v2378_v9, %v1909_v20  ;;  %1308 = vrot.lane.b32.xlu1 %v1053_v0, %s8959_s24  ;;  %1306 = vrot.lane.b32.xlu0 %v1051_v14, %s8959_s24  ;;  %v8875_v14 = vld [vmem:[%s13924_s0 + $0x170] sm:$0xff]  ;;  %v3707_v9 = vadd.s32 96, %v9973_v55  ;;  %v416_v20 = vrot.slane %v10391_v18, 1 }
 0x18a   :  { %v5783_v27 = vmax.f32 %v5781_v15, %v5782_v44  ;;  %v5502_v10 = vmax.f32 %v3096_v28, 0.0  ;;  %8421 = vmatprep.mubr.msk.f32.mxu0 %vm2604_vm6, %v2507_v17  ;;  %v3708_v44 = vadd.s32 104, %v9973_v55 }
 0x18b   :  { %v5631_v57 = vsel %vm10296_vm10, %v5503_v32, 0.0  ;;  %8422 = vmatmul.mubr.msk.f32.gmra.mrb[44].mxu0 %vm2604_vm6, %v2508_v11  ;;  %v631_v38 = vpop.permute.xlu1 %630  ;;  %v418_v32 = vrot.slane %v10396_v23, 1 }
 0x18c   :  { %v5784_v12 = vrot.slane %v5783_v27, 1  ;;  %v5787_v59 = vsel %vm2204_vm3, %v5631_v57, -inf  ;;  %v5630_v4 = vsel %vm10302_vm11, %v5502_v10, 0.0  ;;  %v629_v50 = vpop.permute.xlu0 %628  ;;  %v2252_v0 = vsel %vm2204_vm3, %v9795_v22, %v631_v38 }
 0x18d   :  { %v5786_v47 = vsel %vm2204_vm3, %v5630_v4, -inf  ;;  %1950 = vrot.lane.b32.xlu1 %v1695_v3, %s8961_s30  ;;  %1948 = vrot.lane.b32.xlu0 %v1693_v36, %s8961_s30  ;;  %v2251_v41 = vsel %vm2204_vm3, %v8875_v14, %v629_v50  ;;  %v1060_v57 = vrot.slane %v10396_v23, 2  ;;  %v419_v4 = vsel %vm278_vm1, %v416_v20, %v418_v32 }
 0x18e   :  { %v5785_v52 = vmax.f32 %v5783_v27, %v5784_v12  ;;  %v5788_v53 = vmax.f32 %v5786_v47, %v5787_v59  ;;  %v417_v50 = vsel %vm278_vm1, %v414_v25, %v416_v20  ;;  %v10429_v47 = vld [vmem:[%s13924_s0 + $0x238] sm:$0xff]  ;;  %vm6432_vm11 = vcmask 1045509  }
 0x18f   :  { %v1273_v43 = vpop.permute.xlu1 %1272 }
 0x190   :  { %v5789_v60 = vrot.slane %v5788_v53, 4  ;;  %v1271_v30 = vpop.permute.xlu0 %1270  ;;  %v6429_v49 = vsel %vm6428_vm12, %v5785_v52, %v6427_v37  ;;  %v2381_v8 = vsel %vm2333_vm4, %v2252_v0, %v1273_v43  ;;  %v1061_v52 = vsel %vm920_vm0, %v1058_v35, %v1060_v57 }
 0x191   :  { %670 = vrot.lane.b32.xlu1 %v415_v13, %s8960_s25  ;;  %668 = vrot.lane.b32.xlu0 %v413_v39, %s8960_s25  ;;  %v2380_v31 = vsel %vm2333_vm4, %v2251_v41, %v1271_v30  ;;  %v3918_v13 = vand.u32 15, %v3708_v44  ;;  %v3911_v39 = vand.u32 15, %v3707_v9  ;;  %v1700_v30 = vrot.slane %v10391_v18, 3 }
 0x192   :  { %v5790_v58 = vmax.f32 %v5788_v53, %v5789_v60  ;;  %v8372_v37 = vpop.f32.mrb[10].mxu0  ;;  %v10437_v53 = vld [vmem:[%s13924_s0 + $0x240] sm:$0xff]  ;;  %v1059_v60 = vsel %vm920_vm0, %v1056_v40, %v1058_v35  ;;  %v420_v0 = vrot.slane %v10429_v47, 1  ;;  %v1062_v35 = vrot.slane %v10429_v47, 2 }
 0x193   :  { %v3111_v22 = vadd.f32 %v8372_v37, %v10005_v42  ;;  %v3105_v15 = vpop.f32.mrb[11].mxu0  ;;  %v1915_v48 = vpop.permute.xlu1 %1914  ;;  %vm10442_vm8 = vcmp.le.s32.totalorder %v3918_v13, %v9997_v21  ;;  %vm10448_vm10 = vcmp.le.s32.totalorder %v3911_v39, %v9997_v21  ;;  %v8877_v37 = vld [vmem:[%s13924_s0 + $0x180] sm:$0xff]  ;;  %v1701_v44 = vsel %vm1562_vm2, %v1698_v16, %v1700_v30 }
 0x194   :  { %v5791_v6 = vrot.slane %v5790_v58, 2  ;;  %v3106_v54 = vadd.f32 %v10005_v42, %v3105_v15  ;;  %v2510_v24 = vsel %vm2462_vm5, %v2381_v8, %v1915_v48  ;;  %v1913_v29 = vpop.permute.xlu0 %1912  ;;  %v422_v8 = vrot.slane %v10437_v53, 1 }
 0x195   :  { %v5505_v5 = vmax.f32 %v3111_v22, 0.0  ;;  %v2509_v2 = vsel %vm2462_vm5, %v2380_v31, %v1913_v29  ;;  %1312 = vrot.lane.b32.xlu1 %v1057_v62, %s8959_s24  ;;  %1310 = vrot.lane.b32.xlu0 %v1055_v26, %s8959_s24  ;;  %v421_v20 = vsel %vm278_vm1, %v418_v32, %v420_v0  ;;  %v1064_v32 = vrot.slane %v10437_v53, 2 }
 0x196   :  { %v5792_v28 = vmax.f32 %v5790_v58, %v5791_v6  ;;  %v5504_v11 = vmax.f32 %v3106_v54, 0.0  ;;  %8424 = vmatprep.mubr.msk.f32.mxu0 %vm2604_vm6, %v2509_v2  ;;  %v1702_v58 = vrot.slane %v10396_v23, 3  ;;  %v3710_v54 = vadd.s32 120, %v9973_v55 }
 0x197   :  { %v5633_v17 = vsel %vm10358_vm13, %v5505_v5, 0.0  ;;  %8425 = vmatmul.mubr.msk.f32.gmra.mrb[46].mxu0 %vm2604_vm6, %v2510_v24  ;;  %v635_v63 = vpop.permute.xlu1 %634  ;;  %v3709_v24 = vadd.s32 112, %v9973_v55  ;;  %v1704_v13 = vrot.slane %v10429_v47, 3  ;;  %v1706_v39 = vrot.slane %v10437_v53, 3 }
 0x198   :  { %v5793_v27 = vrot.slane %v5792_v28, 1  ;;  %v5796_v10 = vsel %vm2204_vm3, %v5633_v17, -inf  ;;  %v5632_v3 = vsel %vm10372_vm14, %v5504_v11, 0.0  ;;  %v633_v36 = vpop.permute.xlu0 %632  ;;  %v2254_v62 = vsel %vm2204_vm3, %v8876_v61, %v635_v63 }
 0x199   :  { %v5795_v38 = vsel %vm2204_vm3, %v5632_v3, -inf  ;;  %1954 = vrot.lane.b32.xlu1 %v1699_v33, %s8961_s30  ;;  %1952 = vrot.lane.b32.xlu0 %v1697_v1, %s8961_s30  ;;  %v2253_v40 = vsel %vm2204_vm3, %v8877_v37, %v633_v36  ;;  %v1703_v2 = vsel %vm1562_vm2, %v1700_v30, %v1702_v58  ;;  %v423_v11 = vsel %vm278_vm1, %v420_v0, %v422_v8 }
 0x19a   :  { %v5794_v12 = vmax.f32 %v5792_v28, %v5793_v27  ;;  %v5797_v59 = vmax.f32 %v5795_v38, %v5796_v10  ;;  %v3932_v10 = vand.u32 15, %v3710_v54  ;;  %v3925_v3 = vand.u32 15, %v3709_v24 }
 0x19b   :  { %v1277_v46 = vpop.permute.xlu1 %1276  ;;  %v1065_v47 = vsel %vm920_vm0, %v1062_v35, %v1064_v32  ;;  %v1707_v30 = vsel %vm1562_vm2, %v1704_v13, %v1706_v39  ;;  %v1705_v54 = vsel %vm1562_vm2, %v1702_v58, %v1704_v13  ;;  %v3711_v24 = vadd.s32 128, %v9973_v55  ;;  %v10587_v13 = vld [vmem:[%s13924_s0 + $0x260] sm:$0xff] }
 0x19c   :  { %v5798_v19 = vrot.slane %v5797_v59, 4  ;;  %v1275_v51 = vpop.permute.xlu0 %1274  ;;  %v6431_v56 = vsel %vm6430_vm7, %v5794_v12, %v6429_v49  ;;  %v2383_v7 = vsel %vm2333_vm4, %v2254_v62, %v1277_v46  ;;  %vm10511_vm13 = vcmp.le.s32.totalorder %v3932_v10, %v9997_v21  ;;  %v10579_v10 = vld [vmem:[%s13924_s0 + $0x258] sm:$0xff] }
 0x19d   :  { %674 = vrot.lane.b32.xlu1 %v419_v4, %s8960_s25  ;;  %672 = vrot.lane.b32.xlu0 %v417_v50, %s8960_s25  ;;  %v2382_v15 = vsel %vm2333_vm4, %v2253_v40, %v1275_v51  ;;  %v10506_v50 = vld [vmem:[%s13924_s0 + $0x248] sm:$0xff]  ;;  %v1063_v51 = vsel %vm920_vm0, %v1060_v57, %v1062_v35  ;;  %vm10527_vm14 = vcmp.le.s32.totalorder %v3925_v3, %v9997_v21  ;;  %v10537_v57 = vld [vmem:[%s13924_s0 + $0x250] sm:$0xff] }
 0x19e   :  { %v5799_v49 = vmax.f32 %v5797_v59, %v5798_v19  ;;  %v8375_v26 = vpop.f32.mrb[12].mxu0  ;;  %v424_v40 = vrot.slane %v10506_v50, 1  ;;  %v1068_v23 = vrot.slane %v10537_v57, 2  ;;  %v1710_v19 = vrot.slane %v10537_v57, 3 }
 0x19f   :  { %v3121_v33 = vadd.f32 %v8375_v26, %v10005_v42  ;;  %v3115_v14 = vpop.f32.mrb[13].mxu0  ;;  %v1919_v41 = vpop.permute.xlu1 %1918 }
 0x1a0   :  { %v5800_v22 = vrot.slane %v5799_v49, 2  ;;  %v3116_v48 = vadd.f32 %v10005_v42, %v3115_v14  ;;  %v2512_v1 = vsel %vm2462_vm5, %v2383_v7, %v1919_v41  ;;  %v1917_v18 = vpop.permute.xlu0 %1916 }
 0x1a1   :  { %v5507_v6 = vmax.f32 %v3121_v33, 0.0  ;;  %v2511_v31 = vsel %vm2462_vm5, %v2382_v15, %v1917_v18  ;;  %1316 = vrot.lane.b32.xlu1 %v1061_v52, %s8959_s24  ;;  %1314 = vrot.lane.b32.xlu0 %v1059_v60, %s8959_s24  ;;  %v3712_v18 = vadd.s32 136, %v9973_v55 }
 0x1a2   :  { %v5801_v29 = vmax.f32 %v5799_v49, %v5800_v22  ;;  %v5506_v5 = vmax.f32 %v3116_v48, 0.0  ;;  %8427 = vmatprep.mubr.msk.f32.mxu0 %vm2604_vm6, %v2511_v31  ;;  %v8879_v49 = vld [vmem:[%s13924_s0 + $0x190] sm:$0xff] }
 0x1a3   :  { %v5635_v9 = vsel %vm10442_vm8, %v5507_v6, 0.0  ;;  %8428 = vmatmul.mubr.msk.f32.gmra.mrb[48].mxu0 %vm2604_vm6, %v2512_v1  ;;  %v639_v28 = vpop.permute.xlu1 %638  ;;  %v426_v1 = vrot.slane %v10537_v57, 1  ;;  %vm6434_vm8 = vcmask 1046534  }
 0x1a4   :  { %v5802_v17 = vrot.slane %v5801_v29, 1  ;;  %v5805_v34 = vsel %vm2204_vm3, %v5635_v9, -inf  ;;  %v5634_v16 = vsel %vm10448_vm10, %v5506_v5, 0.0  ;;  %v637_v63 = vpop.permute.xlu0 %636 }
 0x1a5   :  { %v5804_v27 = vsel %vm2204_vm3, %v5634_v16, -inf  ;;  %1958 = vrot.lane.b32.xlu1 %v1703_v2, %s8961_s30  ;;  %1956 = vrot.lane.b32.xlu0 %v1701_v44, %s8961_s30  ;;  %v2255_v61 = vsel %vm2204_vm3, %v8879_v49, %v637_v63  ;;  %v1066_v2 = vrot.slane %v10506_v50, 2  ;;  %v425_v16 = vsel %vm278_vm1, %v422_v8, %v424_v40 }
 0x1a6   :  { %v5803_v36 = vmax.f32 %v5801_v29, %v5802_v17  ;;  %v5806_v38 = vmax.f32 %v5804_v27, %v5805_v34  ;;  %v3946_v17 = vand.u32 15, %v3712_v18  ;;  %v3939_v63 = vand.u32 15, %v3711_v24 }
 0x1a7   :  { %v1281_v12 = vpop.permute.xlu1 %1280 }
 0x1a8   :  { %v5807_v59 = vrot.slane %v5806_v38, 4  ;;  %v1279_v4 = vpop.permute.xlu0 %1278  ;;  %v6433_v46 = vsel %vm6432_vm11, %v5803_v36, %v6431_v56  ;;  %v8878_v56 = vld [vmem:[%s13924_s0 + $0x198] sm:$0xff]  ;;  %vm10594_vm10 = vcmp.le.s32.totalorder %v3946_v17, %v9997_v21  ;;  %v1714_v17 = vrot.slane %v10587_v13, 3 }
 0x1a9   :  { %678 = vrot.lane.b32.xlu1 %v423_v11, %s8960_s25  ;;  %676 = vrot.lane.b32.xlu0 %v421_v20, %s8960_s25  ;;  %v2256_v25 = vsel %vm2204_vm3, %v8878_v56, %v639_v28  ;;  %v2384_v33 = vsel %vm2333_vm4, %v2255_v61, %v1279_v4  ;;  %v427_v20 = vsel %vm278_vm1, %v424_v40, %v426_v1  ;;  %v1708_v4 = vrot.slane %v10506_v50, 3  ;;  %v10698_v56 = vld [vmem:[%s13924_s0 + $0x268] sm:$0xff] }
 0x1aa   :  { %v5808_v52 = vmax.f32 %v5806_v38, %v5807_v59  ;;  %v8378_v43 = vpop.f32.mrb[14].mxu0  ;;  %v2385_v62 = vsel %vm2333_vm4, %v2256_v25, %v1281_v12  ;;  %v1069_v38 = vsel %vm920_vm0, %v1066_v2, %v1068_v23  ;;  %v1067_v59 = vsel %vm920_vm0, %v1064_v32, %v1066_v2  ;;  %v8881_v32 = vld [vmem:[%s13924_s0 + $0x1a0] sm:$0xff] }
 0x1ab   :  { %v3131_v26 = vadd.f32 %v8378_v43, %v10005_v42  ;;  %v3125_v0 = vpop.f32.mrb[15].mxu0  ;;  %v1923_v37 = vpop.permute.xlu1 %1922  ;;  %v428_v25 = vrot.slane %v10579_v10, 1  ;;  %v430_v61 = vrot.slane %v10587_v13, 1  ;;  %v1072_v2 = vrot.slane %v10587_v13, 2 }
 0x1ac   :  { %v5809_v7 = vrot.slane %v5808_v52, 2  ;;  %v3126_v14 = vadd.f32 %v10005_v42, %v3125_v0  ;;  %v2514_v41 = vsel %vm2462_vm5, %v2385_v62, %v1923_v37  ;;  %v1921_v22 = vpop.permute.xlu0 %1920  ;;  %v1074_v57 = vrot.slane %v10698_v56, 2 }
 0x1ad   :  { %v5509_v15 = vmax.f32 %v3131_v26, 0.0  ;;  %v2513_v48 = vsel %vm2462_vm5, %v2384_v33, %v1921_v22  ;;  %1320 = vrot.lane.b32.xlu1 %v1065_v47, %s8959_s24  ;;  %1318 = vrot.lane.b32.xlu0 %v1063_v51, %s8959_s24  ;;  %v431_v53 = vsel %vm278_vm1, %v428_v25, %v430_v61 }
 0x1ae   :  { %v5810_v6 = vmax.f32 %v5808_v52, %v5809_v7  ;;  %v5508_v31 = vmax.f32 %v3126_v14, 0.0  ;;  %8430 = vmatprep.mubr.msk.f32.mxu0 %vm2604_vm6, %v2513_v48  ;;  %v1711_v14 = vsel %vm1562_vm2, %v1708_v4, %v1710_v19  ;;  %v3713_v48 = vadd.s32 144, %v9973_v55 }
 0x1af   :  { %v5637_v29 = vsel %vm10511_vm13, %v5509_v15, 0.0  ;;  %8431 = vmatmul.mubr.msk.f32.gmra.mrb[50].mxu0 %vm2604_vm6, %v2514_v41  ;;  %v643_v5 = vpop.permute.xlu1 %642  ;;  %vm10609_vm13 = vcmp.le.s32.totalorder %v3939_v63, %v9997_v21  ;;  %v3714_v41 = vadd.s32 152, %v9973_v55 }
 0x1b0   :  { %v5811_v44 = vrot.slane %v5810_v6, 1  ;;  %v5814_v9 = vsel %vm2204_vm3, %v5637_v29, -inf  ;;  %v5636_v28 = vsel %vm10527_vm14, %v5508_v31, 0.0  ;;  %v641_v11 = vpop.permute.xlu0 %640  ;;  %vm6436_vm14 = vcmask 1047559  }
 0x1b1   :  { %v5813_v58 = vsel %vm2204_vm3, %v5636_v28, -inf  ;;  %1962 = vrot.lane.b32.xlu1 %v1707_v30, %s8961_s30  ;;  %1960 = vrot.lane.b32.xlu0 %v1705_v54, %s8961_s30  ;;  %v2257_v50 = vsel %vm2204_vm3, %v8881_v32, %v641_v11  ;;  %v3960_v29 = vand.u32 15, %v3714_v41  ;;  %v3953_v28 = vand.u32 15, %v3713_v48 }
 0x1b2   :  { %v5815_v34 = vmax.f32 %v5813_v58, %v5814_v9  ;;  %v5812_v35 = vmax.f32 %v5810_v6, %v5811_v44  ;;  %v429_v9 = vsel %vm278_vm1, %v426_v1, %v428_v25  ;;  %v10703_v25 = vld [vmem:[%s13924_s0 + $0x270] sm:$0xff] }
 0x1b3   :  { %v1285_v27 = vpop.permute.xlu1 %1284  ;;  %v1076_v48 = vrot.slane %v10703_v25, 2 }
 0x1b4   :  { %v5816_v3 = vrot.slane %v5815_v34, 4  ;;  %v1283_v36 = vpop.permute.xlu0 %1282  ;;  %v10590_v8 = vsel %vm6434_vm8, %v5812_v35, %v6433_v46  ;;  %v8880_v46 = vld [vmem:[%s13924_s0 + $0x1a8] sm:$0xff] }
 0x1b5   :  { %682 = vrot.lane.b32.xlu1 %v427_v20, %s8960_s25  ;;  %680 = vrot.lane.b32.xlu0 %v425_v16, %s8960_s25  ;;  %v2258_v51 = vsel %vm2204_vm3, %v8880_v46, %v643_v5  ;;  %v2386_v26 = vsel %vm2333_vm4, %v2257_v50, %v1283_v36  ;;  %v1070_v5 = vrot.slane %v10579_v10, 2  ;;  %v1712_v20 = vrot.slane %v10579_v10, 3  ;;  %v8882_v10 = vld [vmem:[%s13924_s0 + $0x1b8] sm:$0xff] }
 0x1b6   :  { %v5817_v47 = vmax.f32 %v5815_v34, %v5816_v3  ;;  %v8381_v52 = vpop.f32.mrb[16].mxu0  ;;  %v2387_v43 = vsel %vm2333_vm4, %v2258_v51, %v1285_v27 }
 0x1b7   :  { %v3141_v60 = vadd.f32 %v8381_v52, %v10005_v42  ;;  %v3135_v30 = vpop.f32.mrb[17].mxu0  ;;  %v1927_v49 = vpop.permute.xlu1 %1926  ;;  %v1073_v1 = vsel %vm920_vm0, %v1070_v5, %v1072_v2  ;;  %v1071_v35 = vsel %vm920_vm0, %v1068_v23, %v1070_v5  ;;  %v8883_v23 = vld [vmem:[%s13924_s0 + $0x1b0] sm:$0xff] }
 0x1b8   :  { %v5818_v62 = vrot.slane %v5817_v47, 2  ;;  %v3136_v0 = vadd.f32 %v10005_v42, %v3135_v30  ;;  %v2516_v37 = vsel %vm2462_vm5, %v2387_v43, %v1927_v49  ;;  %v1925_v40 = vpop.permute.xlu0 %1924  ;;  %v1709_v42 = vsel %vm1562_vm2, %v1706_v39, %v1708_v4 }
 0x1b9   :  { %v5511_v7 = vmax.f32 %v3141_v60, 0.0  ;;  %v2515_v33 = vsel %vm2462_vm5, %v2386_v26, %v1925_v40  ;;  %1324 = vrot.lane.b32.xlu1 %v1069_v38, %s8959_s24  ;;  %1322 = vrot.lane.b32.xlu0 %v1067_v59, %s8959_s24  ;;  %v3716_v30 = vadd.s32 168, %v9973_v55  ;;  %v1713_v26 = vsel %vm1562_vm2, %v1710_v19, %v1712_v20 }
 0x1ba   :  { %v5819_v22 = vmax.f32 %v5817_v47, %v5818_v62  ;;  %v5510_v15 = vmax.f32 %v3136_v0, 0.0  ;;  %8433 = vmatprep.mubr.msk.f32.mxu0 %vm2604_vm6, %v2515_v33  ;;  %v10689_v47 = vld [vmem:[%s13925_s2 + $0x40] ss:$0 sm:$0xff]  ;;  %v3715_v0 = vadd.s32 160, %v9973_v55  ;;  %v434_v33 = vrot.slane %v10703_v25, 1 }
 0x1bb   :  { %v5639_v18 = vsel %vm10594_vm10, %v5511_v7, 0.0  ;;  %8434 = vmatmul.mubr.msk.f32.gmra.mrb[52].mxu0 %vm2604_vm6, %v2516_v37  ;;  %v647_v6 = vpop.permute.xlu1 %646  ;;  %vm10657_vm10 = vcmp.le.s32.totalorder %v3960_v29, %v9997_v21  ;;  %v432_v7 = vrot.slane %v10698_v56, 1 }
 0x1bc   :  { %v5823_v31 = vsel %vm2204_vm3, %v5639_v18, -inf  ;;  %v5638_v54 = vsel %vm10609_vm13, %v5510_v15, 0.0  ;;  %v645_v24 = vpop.permute.xlu0 %644  ;;  %v5820_v11 = vrot.slane %v5819_v22, 1  ;;  %v2260_v3 = vsel %vm2204_vm3, %v8882_v10, %v647_v6 }
 0x1bd   :  { %v5822_v39 = vsel %vm2204_vm3, %v5638_v54, -inf  ;;  %1966 = vrot.lane.b32.xlu1 %v1711_v14, %s8961_s30  ;;  %1964 = vrot.lane.b32.xlu0 %v1709_v42, %s8961_s30  ;;  %vm10673_vm13 = vcmp.le.s32.totalorder %v3953_v28, %v9997_v21  ;;  %v2259_v59 = vsel %vm2204_vm3, %v8883_v23, %v645_v24  ;;  %v3974_v42 = vand.u32 15, %v3716_v30 }
 0x1be   :  { %v5824_v44 = vmax.f32 %v5822_v39, %v5823_v31  ;;  %v5821_v16 = vmax.f32 %v5819_v22, %v5820_v11  ;;  %v3967_v6 = vand.u32 15, %v3715_v0  ;;  %v1716_v31 = vrot.slane %v10698_v56, 3 }
 0x1bf   :  { %v1289_v58 = vpop.permute.xlu1 %1288  ;;  %v1718_v54 = vrot.slane %v10703_v25, 3  ;;  %v435_v39 = vsel %vm278_vm1, %v432_v7, %v434_v33  ;;  %v433_v29 = vsel %vm278_vm1, %v430_v61, %v432_v7  ;;  %v1077_v11 = vsel %vm920_vm0, %v1074_v57, %v1076_v48  ;;  %v10752_v61 = vld [vmem:[%s13924_s0 + $0x280] sm:$0xff] }
 0x1c0   :  { %v1287_v34 = vpop.permute.xlu0 %1286  ;;  %v5825_v27 = vrot.slane %v5824_v44, 4  ;;  %v10679_v12 = vsel %vm6436_vm14, %v5821_v16, %v10590_v8  ;;  %v2389_v4 = vsel %vm2333_vm4, %v2260_v3, %v1289_v58  ;;  %v1715_v8 = vsel %vm1562_vm2, %v1712_v20, %v1714_v17  ;;  %v8886_v3 = vld [vmem:[%s13924_s0 + $0x1c0] sm:$0xff]  ;;  %v8887_v20 = vld [vmem:[%s13924_s0 + $0x1d8] sm:$0xff] }
 0x1c1   :  { %686 = vrot.lane.b32.xlu1 %v431_v53, %s8960_s25  ;;  %684 = vrot.lane.b32.xlu0 %v429_v9, %s8960_s25  ;;  %v2388_v32 = vsel %vm2333_vm4, %v2259_v59, %v1287_v34  ;;  %v1075_v58 = vsel %vm920_vm0, %v1072_v2, %v1074_v57  ;;  %v1719_v2 = vsel %vm1562_vm2, %v1716_v31, %v1718_v54  ;;  %v3717_v30 = vadd.s32 176, %v9973_v55 }
 0x1c2   :  { %v8384_v36 = vpop.f32.mrb[18].mxu0  ;;  %v5826_v37 = vmax.f32 %v5824_v44, %v5825_v27  ;;  %v10741_v44 = vld [vmem:[%s13924_s0 + $0x278] sm:$0xff]  ;;  %v1717_v0 = vsel %vm1562_vm2, %v1714_v17, %v1716_v31 }
 0x1c3   :  { %v3151_v46 = vadd.f32 %v10689_v47, %v8384_v36  ;;  %v3145_v51 = vpop.f32.mrb[19].mxu0  ;;  %v1931_v52 = vpop.permute.xlu1 %1930  ;;  %v436_v10 = vrot.slane %v10741_v44, 1 }
 0x1c4   :  { %v3146_v50 = vadd.f32 %v10689_v47, %v3145_v51  ;;  %v2518_v43 = vsel %vm2462_vm5, %v2389_v4, %v1931_v52  ;;  %v1929_v60 = vpop.permute.xlu0 %1928  ;;  %v5827_v24 = vrot.slane %v5826_v37, 2 }
 0x1c5   :  { %v5513_v49 = vmax.f32 %v3151_v46, 0.0  ;;  %v2517_v62 = vsel %vm2462_vm5, %v2388_v32, %v1929_v60  ;;  %1328 = vrot.lane.b32.xlu1 %v1073_v1, %s8959_s24  ;;  %1326 = vrot.lane.b32.xlu0 %v1071_v35, %s8959_s24  ;;  %v8885_v1 = vld [vmem:[%s13924_s0 + $0x1c8] sm:$0xff]  ;;  %v438_v46 = vrot.slane %v10752_v61, 1  ;;  %v3718_v60 = vadd.s32 184, %v9973_v55 }
 0x1c6   :  { %v5512_v40 = vmax.f32 %v3146_v50, 0.0  ;;  %8436 = vmatprep.mubr.msk.f32.mxu0 %vm2604_vm6, %v2517_v62  ;;  %v5828_v16 = vmax.f32 %v5826_v37, %v5827_v24 }
 0x1c7   :  { %v5641_v14 = vsel %vm10657_vm10, %v5513_v49, 0.0  ;;  %8437 = vmatmul.mubr.msk.f32.gmra.mrb[54].mxu0 %vm2604_vm6, %v2518_v43  ;;  %v651_v41 = vpop.permute.xlu1 %650  ;;  %vm10756_vm10 = vcmp.le.s32.totalorder %v3974_v42, %v9997_v21  ;;  %v439_v7 = vsel %vm278_vm1, %v436_v10, %v438_v46  ;;  %v3988_v42 = vand.u32 15, %v3718_v60 }
 0x1c8   :  { %v5832_v19 = vsel %vm2204_vm3, %v5641_v14, -inf  ;;  %v5640_v22 = vsel %vm10673_vm13, %v5512_v40, 0.0  ;;  %v649_v15 = vpop.permute.xlu0 %648  ;;  %vm10762_vm13 = vcmp.le.s32.totalorder %v3967_v6, %v9997_v21  ;;  %v2262_v35 = vsel %vm2204_vm3, %v8885_v1, %v651_v41 }
 0x1c9   :  { %v5831_v18 = vsel %vm2204_vm3, %v5640_v22, -inf  ;;  %1970 = vrot.lane.b32.xlu1 %v1715_v8, %s8961_s30  ;;  %1968 = vrot.lane.b32.xlu0 %v1713_v26, %s8961_s30  ;;  %v2261_v36 = vsel %vm2204_vm3, %v8886_v3, %v649_v15  ;;  %v5829_v49 = vrot.slane %v5828_v16, 1  ;;  %v437_v14 = vsel %vm278_vm1, %v434_v33, %v436_v10 }
 0x1ca   :  { %v5833_v53 = vmax.f32 %v5831_v18, %v5832_v19  ;;  %v1078_v41 = vrot.slane %v10741_v44, 2  ;;  %v1080_v22 = vrot.slane %v10752_v61, 2  ;;  %v3981_v18 = vand.u32 15, %v3717_v30 }
 0x1cb   :  { %v1293_v5 = vpop.permute.xlu1 %1292  ;;  %v1720_v33 = vrot.slane %v10741_v44, 3  ;;  %v5830_v6 = vmax.f32 %v5828_v16, %v5829_v49  ;;  %v8890_v16 = vld [vmem:[%s13924_s0 + $0x1e0] sm:$0xff] }
 0x1cc   :  { %v5834_v9 = vrot.slane %v5833_v53, 4  ;;  %v1291_v28 = vpop.permute.xlu0 %1290  ;;  %v2391_v38 = vsel %vm2333_vm4, %v2262_v35, %v1293_v5  ;;  %v1081_v44 = vsel %vm920_vm0, %v1078_v41, %v1080_v22 }
 0x1cd   :  { %690 = vrot.lane.b32.xlu1 %v435_v39, %s8960_s25  ;;  %688 = vrot.lane.b32.xlu0 %v433_v29, %s8960_s25  ;;  %v2390_v52 = vsel %vm2333_vm4, %v2261_v36, %v1291_v28  ;;  %v1721_v36 = vsel %vm1562_vm2, %v1718_v54, %v1720_v33 }
 0x1ce   :  { %v5835_v63 = vmax.f32 %v5833_v53, %v5834_v9  ;;  %v8387_v27 = vpop.f32.mrb[20].mxu0  ;;  %v1722_v53 = vrot.slane %v10752_v61, 3 }
 0x1cf   :  { %v3161_v23 = vadd.f32 %v10689_v47, %v8387_v27  ;;  %v3155_v59 = vpop.f32.mrb[21].mxu0  ;;  %v1935_v4 = vpop.permute.xlu1 %1934 }
 0x1d0   :  { %v5836_v51 = vrot.slane %v5835_v63, 2  ;;  %v3156_v8 = vadd.f32 %v10689_v47, %v3155_v59  ;;  %v2520_v56 = vsel %vm2462_vm5, %v2391_v38, %v1935_v4  ;;  %v1933_v32 = vpop.permute.xlu0 %1932  ;;  %v10852_v38 = vld [vmem:[%s13924_s0 + $0x288] sm:$0xff] }
 0x1d1   :  { %v5515_v50 = vmax.f32 %v3161_v23, 0.0  ;;  %v2519_v43 = vsel %vm2462_vm5, %v2390_v52, %v1933_v32  ;;  %1332 = vrot.lane.b32.xlu1 %v1077_v11, %s8959_s24  ;;  %1330 = vrot.lane.b32.xlu0 %v1075_v58, %s8959_s24  ;;  %v1079_v11 = vsel %vm920_vm0, %v1076_v48, %v1078_v41  ;;  %v8888_v48 = vld [vmem:[%s13924_s0 + $0x1d0] sm:$0xff]  ;;  %v3719_v32 = vadd.s32 192, %v9973_v55 }
 0x1d2   :  { %v5837_v62 = vmax.f32 %v5835_v63, %v5836_v51  ;;  %v5514_v26 = vmax.f32 %v3156_v8, 0.0  ;;  %8439 = vmatprep.mubr.msk.f32.mxu0 %vm2604_vm6, %v2519_v43  ;;  %v1723_v63 = vsel %vm1562_vm2, %v1720_v33, %v1722_v53  ;;  %v10857_v23 = vld [vmem:[%s13924_s0 + $0x290] sm:$0xff]  ;;  %v440_v60 = vrot.slane %v10852_v38, 1  ;;  %v10890_v33 = vld [vmem:[%s13924_s0 + $0x298] sm:$0xff] }
 0x1d3   :  { %v5643_v37 = vsel %vm10756_vm10, %v5515_v50, 0.0  ;;  %8440 = vmatmul.mubr.msk.f32.gmra.mrb[56].mxu0 %vm2604_vm6, %v2520_v56  ;;  %v655_v40 = vpop.permute.xlu1 %654  ;;  %vm10817_vm10 = vcmp.le.s32.totalorder %v3988_v42, %v9997_v21  ;;  %v3720_v56 = vadd.s32 200, %v9973_v55  ;;  %v442_v30 = vrot.slane %v10857_v23, 1 }
 0x1d4   :  { %v5838_v57 = vrot.slane %v5837_v62, 1  ;;  %v5841_v13 = vsel %vm2204_vm3, %v5643_v37, -inf  ;;  %v5642_v17 = vsel %vm10762_vm13, %v5514_v26, 0.0  ;;  %v653_v19 = vpop.permute.xlu0 %652  ;;  %v2264_v34 = vsel %vm2204_vm3, %v8887_v20, %v655_v40 }
 0x1d5   :  { %v5840_v15 = vsel %vm2204_vm3, %v5642_v17, -inf  ;;  %1974 = vrot.lane.b32.xlu1 %v1719_v2, %s8961_s30  ;;  %1972 = vrot.lane.b32.xlu0 %v1717_v0, %s8961_s30  ;;  %vm10833_vm13 = vcmp.le.s32.totalorder %v3981_v18, %v9997_v21  ;;  %v2263_v1 = vsel %vm2204_vm3, %v8888_v48, %v653_v19  ;;  %v1082_v26 = vrot.slane %v10852_v38, 2 }
 0x1d6   :  { %v5839_v31 = vmax.f32 %v5837_v62, %v5838_v57  ;;  %v5842_v24 = vmax.f32 %v5840_v15, %v5841_v13  ;;  %v4002_v57 = vand.u32 15, %v3720_v56  ;;  %v3995_v13 = vand.u32 15, %v3719_v32 }
 0x1d7   :  { %v1297_v39 = vpop.permute.xlu1 %1296  ;;  %v443_v15 = vsel %vm278_vm1, %v440_v60, %v442_v30  ;;  %v441_v42 = vsel %vm278_vm1, %v438_v46, %v440_v60  ;;  %v1083_v28 = vsel %vm920_vm0, %v1080_v22, %v1082_v26 }
 0x1d8   :  { %v10813_v29 = vsel %vm6424_vm15, %v5839_v31, %v5830_v6  ;;  %v5843_v5 = vrot.slane %v5842_v24, 4  ;;  %v1295_v9 = vpop.permute.xlu0 %1294  ;;  %v2393_v35 = vsel %vm2333_vm4, %v2264_v34, %v1297_v39  ;;  %v10898_v39 = vld [vmem:[%s13924_s0 + $0x2a0] sm:$0xff]  ;;  %v1726_v34 = vrot.slane %v10857_v23, 3 }
 0x1d9   :  { %694 = vrot.lane.b32.xlu1 %v439_v7, %s8960_s25  ;;  %692 = vrot.lane.b32.xlu0 %v437_v14, %s8960_s25  ;;  %v2392_v4 = vsel %vm2333_vm4, %v2263_v1, %v1295_v9  ;;  %v1084_v14 = vrot.slane %v10857_v23, 2 }
 0x1da   :  { %v5844_v58 = vmax.f32 %v5842_v24, %v5843_v5  ;;  %v8390_v2 = vpop.f32.mrb[22].mxu0 }
 0x1db   :  { %v3171_v27 = vadd.f32 %v10689_v47, %v8390_v2  ;;  %v3165_v10 = vpop.f32.mrb[23].mxu0  ;;  %v1939_v3 = vpop.permute.xlu1 %1938  ;;  %v1085_v24 = vsel %vm920_vm0, %v1082_v26, %v1084_v14  ;;  %v444_v2 = vrot.slane %v10890_v33, 1 }
 0x1dc   :  { %v5845_v59 = vrot.slane %v5844_v58, 2  ;;  %v3166_v51 = vadd.f32 %v10689_v47, %v3165_v10  ;;  %v2522_v52 = vsel %vm2462_vm5, %v2393_v35, %v1939_v3  ;;  %v1937_v25 = vpop.permute.xlu0 %1936 }
 0x1dd   :  { %v5517_v8 = vmax.f32 %v3171_v27, 0.0  ;;  %v2521_v54 = vsel %vm2462_vm5, %v2392_v4, %v1937_v25  ;;  %1336 = vrot.lane.b32.xlu1 %v1081_v44, %s8959_s24  ;;  %1334 = vrot.lane.b32.xlu0 %v1079_v11, %s8959_s24  ;;  %v8889_v11 = vld [vmem:[%s13924_s0 + $0x1e8] sm:$0xff]  ;;  %v446_v27 = vrot.slane %v10898_v39, 1  ;;  %v3721_v25 = vadd.s32 208, %v9973_v55 }
 0x1de   :  { %v5846_v50 = vmax.f32 %v5844_v58, %v5845_v59  ;;  %v5516_v43 = vmax.f32 %v3166_v51, 0.0  ;;  %8442 = vmatprep.mubr.msk.f32.mxu0 %vm2604_vm6, %v2521_v54 }
 0x1df   :  { %v5645_v49 = vsel %vm10817_vm10, %v5517_v8, 0.0  ;;  %8443 = vmatmul.mubr.msk.f32.gmra.mrb[58].mxu0 %vm2604_vm6, %v2522_v52  ;;  %v659_v62 = vpop.permute.xlu1 %658  ;;  %vm10904_vm10 = vcmp.le.s32.totalorder %v4002_v57, %v9997_v21  ;;  %v3722_v52 = vadd.s32 216, %v9973_v55  ;;  %v447_v60 = vsel %vm278_vm1, %v444_v2, %v446_v27 }
 0x1e0   :  { %v5847_v0 = vrot.slane %v5846_v50, 1  ;;  %v5850_v37 = vsel %vm2204_vm3, %v5645_v49, -inf  ;;  %v5644_v40 = vsel %vm10833_vm13, %v5516_v43, 0.0  ;;  %v657_v7 = vpop.permute.xlu0 %656  ;;  %vm10910_vm13 = vcmp.le.s32.totalorder %v3995_v13, %v9997_v21 }
 0x1e1   :  { %v5849_v41 = vsel %vm2204_vm3, %v5644_v40, -inf  ;;  %1978 = vrot.lane.b32.xlu1 %v1723_v63, %s8961_s30  ;;  %1976 = vrot.lane.b32.xlu0 %v1721_v36, %s8961_s30  ;;  %v2266_v58 = vsel %vm2204_vm3, %v8889_v11, %v659_v62  ;;  %v2265_v22 = vsel %vm2204_vm3, %v8890_v16, %v657_v7  ;;  %v445_v49 = vsel %vm278_vm1, %v442_v30, %v444_v2 }
 0x1e2   :  { %v5848_v17 = vmax.f32 %v5846_v50, %v5847_v0  ;;  %v5851_v19 = vmax.f32 %v5849_v41, %v5850_v37  ;;  %v1086_v0 = vrot.slane %v10890_v33, 2  ;;  %v4016_v40 = vand.u32 15, %v3722_v52 }
 0x1e3   :  { %v1301_v18 = vpop.permute.xlu1 %1300  ;;  %v4009_v7 = vand.u32 15, %v3721_v25  ;;  %v1088_v41 = vrot.slane %v10898_v39, 2  ;;  %v1728_v13 = vrot.slane %v10890_v33, 3 }
 0x1e4   :  { %v5852_v6 = vrot.slane %v5851_v19, 4  ;;  %v1299_v31 = vpop.permute.xlu0 %1298  ;;  %v6439_v46 = vsel %vm6426_vm9, %v5848_v17, %v10813_v29  ;;  %v1724_v29 = vrot.slane %v10852_v38, 3  ;;  %v2395_v63 = vsel %vm2333_vm4, %v2266_v58, %v1301_v18 }
 0x1e5   :  { %698 = vrot.lane.b32.xlu1 %v443_v15, %s8960_s25  ;;  %696 = vrot.lane.b32.xlu0 %v441_v42, %s8960_s25  ;;  %v2394_v3 = vsel %vm2333_vm4, %v2265_v22, %v1299_v31  ;;  %v1730_v17 = vrot.slane %v10898_v39, 3  ;;  %v1089_v33 = vsel %vm920_vm0, %v1086_v0, %v1088_v41  ;;  %v1087_v31 = vsel %vm920_vm0, %v1084_v14, %v1086_v0  ;;  %v8892_v14 = vld [vmem:[%s13924_s0 + $0x1f0] sm:$0xff]  ;;  %v11003_v22 = vld [vmem:[%s13924_s0 + $0x2a8] sm:$0xff] }
 0x1e6   :  { %v5853_v44 = vmax.f32 %v5851_v19, %v5852_v6  ;;  %v8393_v20 = vpop.f32.mrb[24].mxu0  ;;  %v1727_v56 = vsel %vm1562_vm2, %v1724_v29, %v1726_v34  ;;  %v1725_v32 = vsel %vm1562_vm2, %v1722_v53, %v1724_v29  ;;  %v1729_v16 = vsel %vm1562_vm2, %v1726_v34, %v1728_v13 }
 0x1e7   :  { %v3181_v48 = vadd.f32 %v10689_v47, %v8393_v20  ;;  %v3175_v1 = vpop.f32.mrb[25].mxu0  ;;  %v1943_v35 = vpop.permute.xlu1 %1942  ;;  %v1731_v29 = vsel %vm1562_vm2, %v1728_v13, %v1730_v17 }
 0x1e8   :  { %v5854_v10 = vrot.slane %v5853_v44, 2  ;;  %v3176_v36 = vadd.f32 %v10689_v47, %v3175_v1  ;;  %v2524_v38 = vsel %vm2462_vm5, %v2395_v63, %v1943_v35  ;;  %v1941_v59 = vpop.permute.xlu0 %1940  ;;  %v11008_v63 = vld [vmem:[%s13924_s0 + $0x2b0] sm:$0xff] }
 0x1e9   :  { %v5519_v4 = vmax.f32 %v3181_v48, 0.0  ;;  %v2523_v51 = vsel %vm2462_vm5, %v2394_v3, %v1941_v59  ;;  %1340 = vrot.lane.b32.xlu1 %v1085_v24, %s8959_s24  ;;  %1338 = vrot.lane.b32.xlu0 %v1083_v28, %s8959_s24  ;;  %v450_v52 = vrot.slane %v11008_v63, 1  ;;  %v8894_v28 = vld [vmem:[%s13924_s0 + $0x200] sm:$0xff] }
 0x1ea   :  { %v5855_v8 = vmax.f32 %v5853_v44, %v5854_v10  ;;  %v5518_v54 = vmax.f32 %v3176_v36, 0.0  ;;  %8445 = vmatprep.mubr.msk.f32.mxu0 %vm2604_vm6, %v2523_v51  ;;  %v3724_v36 = vadd.s32 232, %v9973_v55  ;;  %v448_v51 = vrot.slane %v11003_v22, 1 }
 0x1eb   :  { %v5647_v50 = vsel %vm10904_vm10, %v5519_v4, 0.0  ;;  %8446 = vmatmul.mubr.msk.f32.gmra.mrb[60].mxu0 %vm2604_vm6, %v2524_v38  ;;  %v663_v43 = vpop.permute.xlu1 %662  ;;  %vm10968_vm10 = vcmp.le.s32.totalorder %v4016_v40, %v9997_v21  ;;  %v3723_v38 = vadd.s32 224, %v9973_v55 }
 0x1ec   :  { %v5856_v62 = vrot.slane %v5855_v8, 1  ;;  %v5859_v26 = vsel %vm2204_vm3, %v5647_v50, -inf  ;;  %v5646_v61 = vsel %vm10910_vm13, %v5518_v54, 0.0  ;;  %v661_v53 = vpop.permute.xlu0 %660  ;;  %vm10984_vm13 = vcmp.le.s32.totalorder %v4009_v7, %v9997_v21  ;;  %v11041_v7 = vld [vmem:[%s13924_s0 + $0x2b8] sm:$0xff] }
 0x1ed   :  { %v5858_v37 = vsel %vm2204_vm3, %v5646_v61, -inf  ;;  %1982 = vrot.lane.b32.xlu1 %v1727_v56, %s8961_s30  ;;  %1980 = vrot.lane.b32.xlu0 %v1725_v32, %s8961_s30  ;;  %v2267_v44 = vsel %vm2204_vm3, %v8892_v14, %v661_v53  ;;  %v1090_v54 = vrot.slane %v11003_v22, 2  ;;  %v451_v0 = vsel %vm278_vm1, %v448_v51, %v450_v52 }
 0x1ee   :  { %v5857_v30 = vmax.f32 %v5855_v8, %v5856_v62  ;;  %v5860_v57 = vmax.f32 %v5858_v37, %v5859_v26  ;;  %v4030_v62 = vand.u32 15, %v3724_v36  ;;  %v4023_v26 = vand.u32 15, %v3723_v38 }
 0x1ef   :  { %v1305_v19 = vpop.permute.xlu1 %1304  ;;  %v449_v37 = vsel %vm278_vm1, %v446_v27, %v448_v51  ;;  %v1091_v6 = vsel %vm920_vm0, %v1088_v41, %v1090_v54 }
 0x1f0   :  { %v5861_v15 = vrot.slane %v5860_v57, 4  ;;  %v1303_v42 = vpop.permute.xlu0 %1302  ;;  %v6440_v18 = vsel %vm6428_vm12, %v5857_v30, %v6439_v46  ;;  %v8891_v46 = vld [vmem:[%s13924_s0 + $0x1f8] sm:$0xff] }
 0x1f1   :  { %702 = vrot.lane.b32.xlu1 %v447_v60, %s8960_s25  ;;  %700 = vrot.lane.b32.xlu0 %v445_v49, %s8960_s25  ;;  %v2268_v5 = vsel %vm2204_vm3, %v8891_v46, %v663_v43  ;;  %v2396_v1 = vsel %vm2333_vm4, %v2267_v44, %v1303_v42  ;;  %v1092_v60 = vrot.slane %v11008_v63, 2 }
 0x1f2   :  { %v5862_v24 = vmax.f32 %v5860_v57, %v5861_v15  ;;  %v8396_v9 = vpop.f32.mrb[26].mxu0  ;;  %v2397_v11 = vsel %vm2333_vm4, %v2268_v5, %v1305_v19  ;;  %v11049_v19 = vld [vmem:[%s13924_s0 + $0x2c0] sm:$0xff]  ;;  %v1734_v5 = vrot.slane %v11008_v63, 3 }
 0x1f3   :  { %v3191_v58 = vadd.f32 %v10689_v47, %v8396_v9  ;;  %v3185_v20 = vpop.f32.mrb[27].mxu0  ;;  %v1947_v2 = vpop.permute.xlu1 %1946  ;;  %v1093_v13 = vsel %vm920_vm0, %v1090_v54, %v1092_v60  ;;  %v452_v9 = vrot.slane %v11041_v7, 1 }
 0x1f4   :  { %v5863_v48 = vrot.slane %v5862_v24, 2  ;;  %v3186_v35 = vadd.f32 %v10689_v47, %v3185_v20  ;;  %v2526_v10 = vsel %vm2462_vm5, %v2397_v11, %v1947_v2  ;;  %v1945_v23 = vpop.permute.xlu0 %1944 }
 0x1f5   :  { %v5521_v3 = vmax.f32 %v3191_v58, 0.0  ;;  %v2525_v34 = vsel %vm2462_vm5, %v2396_v1, %v1945_v23  ;;  %1344 = vrot.lane.b32.xlu1 %v1089_v33, %s8959_s24  ;;  %1342 = vrot.lane.b32.xlu0 %v1087_v31, %s8959_s24  ;;  %v8893_v31 = vld [vmem:[%s13924_s0 + $0x208] sm:$0xff]  ;;  %v454_v58 = vrot.slane %v11049_v19, 1  ;;  %v3725_v23 = vadd.s32 240, %v9973_v55 }
 0x1f6   :  { %v5864_v59 = vmax.f32 %v5862_v24, %v5863_v48  ;;  %v5520_v4 = vmax.f32 %v3186_v35, 0.0  ;;  %8448 = vmatprep.mubr.msk.f32.mxu0 %vm2604_vm6, %v2525_v34 }
 0x1f7   :  { %v5649_v25 = vsel %vm10968_vm10, %v5521_v3, 0.0  ;;  %8449 = vmatmul.mubr.msk.f32.gmra.mrb[62].mxu0 %vm2604_vm6, %v2526_v10  ;;  %v667_v8 = vpop.permute.xlu1 %666  ;;  %vm11054_vm10 = vcmp.le.s32.totalorder %v4030_v62, %v9997_v21  ;;  %v3726_v10 = vadd.s32 248, %v9973_v55  ;;  %v455_v51 = vsel %vm278_vm1, %v452_v9, %v454_v58 }
 0x1f8   :  { %v5865_v56 = vrot.slane %v5864_v59, 1  ;;  %v5868_v32 = vsel %vm2204_vm3, %v5649_v25, -inf  ;;  %v5648_v50 = vsel %vm10984_vm13, %v5520_v4, 0.0  ;;  %v665_v43 = vpop.permute.xlu0 %664  ;;  %vm11060_vm13 = vcmp.le.s32.totalorder %v4023_v26, %v9997_v21 }
 0x1f9   :  { %v5867_v49 = vsel %vm2204_vm3, %v5648_v50, -inf  ;;  %1986 = vrot.lane.b32.xlu1 %v1731_v29, %s8961_s30  ;;  %1984 = vrot.lane.b32.xlu0 %v1729_v16, %s8961_s30  ;;  %v2270_v24 = vsel %vm2204_vm3, %v8893_v31, %v667_v8  ;;  %v2269_v41 = vsel %vm2204_vm3, %v8894_v28, %v665_v43  ;;  %v453_v25 = vsel %vm278_vm1, %v450_v52, %v452_v9  ;;  %v8896_v31 = vld [vmem:[%s13924_s0 + $0x210] sm:$0xff] }
 0x1fa   :  { %v5866_v61 = vmax.f32 %v5864_v59, %v5865_v56  ;;  %v5869_v53 = vmax.f32 %v5867_v49, %v5868_v32  ;;  %v1094_v56 = vrot.slane %v11041_v7, 2  ;;  %v4044_v50 = vand.u32 15, %v3726_v10 }
 0x1fb   :  { %v1309_v40 = vpop.permute.xlu1 %1308  ;;  %v4037_v43 = vand.u32 15, %v3725_v23  ;;  %v1096_v49 = vrot.slane %v11049_v19, 2  ;;  %v1736_v26 = vrot.slane %v11041_v7, 3 }
 0x1fc   :  { %v5870_v30 = vrot.slane %v5869_v53, 4  ;;  %v1307_v57 = vpop.permute.xlu0 %1306  ;;  %v6441_v15 = vsel %vm6430_vm7, %v5866_v61, %v6440_v18  ;;  %v1732_v18 = vrot.slane %v11003_v22, 3  ;;  %v2399_v29 = vsel %vm2333_vm4, %v2270_v24, %v1309_v40  ;;  %v11118_v40 = vld [vmem:[%s13924_s0 + $0x2c8] sm:$0xff] }
 0x1fd   :  { %706 = vrot.lane.b32.xlu1 %v451_v0, %s8960_s25  ;;  %704 = vrot.lane.b32.xlu0 %v449_v37, %s8960_s25  ;;  %v2398_v2 = vsel %vm2333_vm4, %v2269_v41, %v1307_v57  ;;  %v1738_v61 = vrot.slane %v11049_v19, 3  ;;  %v1097_v7 = vsel %vm920_vm0, %v1094_v56, %v1096_v49  ;;  %v1737_v23 = vsel %vm1562_vm2, %v1734_v5, %v1736_v26 }
 0x1fe   :  { %v5871_v33 = vmax.f32 %v5869_v53, %v5870_v30  ;;  %v8399_v46 = vpop.f32.mrb[28].mxu0  ;;  %v1735_v36 = vsel %vm1562_vm2, %v1732_v18, %v1734_v5  ;;  %v1733_v38 = vsel %vm1562_vm2, %v1730_v17, %v1732_v18  ;;  %v1740_v57 = vrot.slane %v11118_v40, 3 }
 0x1ff   :  { %v3201_v14 = vadd.f32 %v10689_v47, %v8399_v46  ;;  %v3195_v44 = vpop.f32.mrb[29].mxu0  ;;  %v1951_v11 = vpop.permute.xlu1 %1950 }
 0x200   :  { %v5872_v20 = vrot.slane %v5871_v33, 2  ;;  %v3196_v16 = vadd.f32 %v10689_v47, %v3195_v44  ;;  %v2528_v22 = vsel %vm2462_vm5, %v2399_v29, %v1951_v11  ;;  %v1949_v48 = vpop.permute.xlu0 %1948  ;;  %v456_v29 = vrot.slane %v11118_v40, 1 }
 0x201   :  { %v5523_v1 = vmax.f32 %v3201_v14, 0.0  ;;  %v2527_v35 = vsel %vm2462_vm5, %v2398_v2, %v1949_v48  ;;  %1348 = vrot.lane.b32.xlu1 %v1093_v13, %s8959_s24  ;;  %1346 = vrot.lane.b32.xlu0 %v1091_v6, %s8959_s24  ;;  %v1095_v13 = vsel %vm920_vm0, %v1092_v60, %v1094_v56  ;;  %v11149_v60 = vld [vmem:[%s13924_s0 + $0x2d0] sm:$0xff] }
 0x202   :  { %v5873_v3 = vmax.f32 %v5871_v33, %v5872_v20  ;;  %v5522_v34 = vmax.f32 %v3196_v16, 0.0  ;;  %8451 = vmatprep.mubr.msk.f32.mxu0 %vm2604_vm6, %v2527_v35  ;;  %v1739_v33 = vsel %vm1562_vm2, %v1736_v26, %v1738_v61  ;;  %v458_v48 = vrot.slane %v11149_v60, 1 }
 0x203   :  { %v5651_v59 = vsel %vm11054_vm10, %v5523_v1, 0.0  ;;  %8452 = vmatmul.mubr.msk.f32.gmra.mrb[64].mxu0 %vm2604_vm6, %v2528_v22  ;;  %v671_v4 = vpop.permute.xlu1 %670  ;;  %vm11123_vm10 = vcmp.le.s32.totalorder %v4044_v50, %v9997_v21  ;;  %v3728_v1 = vadd.s32 264, %v9973_v55  ;;  %v1100_v63 = vrot.slane %v11149_v60, 2 }
 0x204   :  { %v5874_v8 = vrot.slane %v5873_v3, 1  ;;  %v5877_v54 = vsel %vm2204_vm3, %v5651_v59, -inf  ;;  %v5650_v39 = vsel %vm11060_vm13, %v5522_v34, 0.0  ;;  %v669_v17 = vpop.permute.xlu0 %668  ;;  %vm11139_vm13 = vcmp.le.s32.totalorder %v4037_v43, %v9997_v21  ;;  %v11191_v43 = vld [vmem:[%s13924_s0 + $0x2d8] sm:$0xff] }
 0x205   :  { %v5876_v32 = vsel %vm2204_vm3, %v5650_v39, -inf  ;;  %1990 = vrot.lane.b32.xlu1 %v1735_v36, %s8961_s30  ;;  %1988 = vrot.lane.b32.xlu0 %v1733_v38, %s8961_s30  ;;  %v2271_v24 = vsel %vm2204_vm3, %v8896_v31, %v669_v17  ;;  %v1098_v38 = vrot.slane %v11118_v40, 2  ;;  %v457_v17 = vsel %vm278_vm1, %v454_v58, %v456_v29 }
 0x206   :  { %v5875_v52 = vmax.f32 %v5873_v3, %v5874_v8  ;;  %v5878_v62 = vmax.f32 %v5876_v32, %v5877_v54  ;;  %v3727_v3 = vadd.s32 256, %v9973_v55  ;;  %v459_v8 = vsel %vm278_vm1, %v456_v29, %v458_v48 }
 0x207   :  { %v1313_v53 = vpop.permute.xlu1 %1312  ;;  %v4058_v54 = vand.u32 15, %v3728_v1  ;;  %v1101_v26 = vsel %vm920_vm0, %v1098_v38, %v1100_v63  ;;  %v1741_v1 = vsel %vm1562_vm2, %v1738_v61, %v1740_v57 }
 0x208   :  { %v5879_v0 = vrot.slane %v5878_v62, 4  ;;  %v1311_v37 = vpop.permute.xlu0 %1310  ;;  %v6442_v30 = vsel %vm6432_vm11, %v5875_v52, %v6441_v15  ;;  %v8895_v15 = vld [vmem:[%s13924_s0 + $0x218] sm:$0xff]  ;;  %v4051_v56 = vand.u32 15, %v3727_v3 }
 0x209   :  { %710 = vrot.lane.b32.xlu1 %v455_v51, %s8960_s25  ;;  %708 = vrot.lane.b32.xlu0 %v453_v25, %s8960_s25  ;;  %v2272_v42 = vsel %vm2204_vm3, %v8895_v15, %v671_v4  ;;  %v2400_v44 = vsel %vm2333_vm4, %v2271_v24, %v1311_v37  ;;  %v1099_v37 = vsel %vm920_vm0, %v1096_v49, %v1098_v38  ;;  %v8898_v49 = vld [vmem:[%s13924_s0 + $0x220] sm:$0xff] }
 0x20a   :  { %v5880_v27 = vmax.f32 %v5878_v62, %v5879_v0  ;;  %v8402_v6 = vpop.f32.mrb[30].mxu0  ;;  %v2401_v46 = vsel %vm2333_vm4, %v2272_v42, %v1313_v53  ;;  %v11199_v53 = vld [vmem:[%s13924_s0 + $0x2e0] sm:$0xff] }
 0x20b   :  { %v3211_v9 = vadd.f32 %v10689_v47, %v8402_v6  ;;  %v3205_v28 = vpop.f32.mrb[31].mxu0  ;;  %v1955_v41 = vpop.permute.xlu1 %1954  ;;  %v460_v6 = vrot.slane %v11191_v43, 1 }
 0x20c   :  { %v5881_v14 = vrot.slane %v5880_v27, 2  ;;  %v3206_v11 = vadd.f32 %v10689_v47, %v3205_v28  ;;  %v2530_v20 = vsel %vm2462_vm5, %v2401_v46, %v1955_v41  ;;  %v1953_v2 = vpop.permute.xlu0 %1952  ;;  %v462_v46 = vrot.slane %v11199_v53, 1 }
 0x20d   :  { %v5525_v16 = vmax.f32 %v3211_v9, 0.0  ;;  %v2529_v22 = vsel %vm2462_vm5, %v2400_v44, %v1953_v2  ;;  %1352 = vrot.lane.b32.xlu1 %v1097_v7, %s8959_s24  ;;  %1350 = vrot.lane.b32.xlu0 %v1095_v13, %s8959_s24  ;;  %v1742_v7 = vrot.slane %v11149_v60, 3  ;;  %v3730_v2 = vadd.s32 280, %v9973_v55 }
 0x20e   :  { %v5882_v35 = vmax.f32 %v5880_v27, %v5881_v14  ;;  %v5524_v10 = vmax.f32 %v3206_v11, 0.0  ;;  %8454 = vmatprep.mubr.msk.f32.mxu0 %vm2604_vm6, %v2529_v22  ;;  %v463_v19 = vsel %vm278_vm1, %v460_v6, %v462_v46 }
 0x20f   :  { %v5653_v34 = vsel %vm11123_vm10, %v5525_v16, 0.0  ;;  %8455 = vmatmul.mubr.msk.f32.gmra.mrb[66].mxu0 %vm2604_vm6, %v2530_v20  ;;  %v675_v36 = vpop.permute.xlu1 %674  ;;  %vm11206_vm10 = vcmp.le.s32.totalorder %v4058_v54, %v9997_v21  ;;  %v1743_v20 = vsel %vm1562_vm2, %v1740_v57, %v1742_v7  ;;  %v4072_v38 = vand.u32 15, %v3730_v2 }
 0x210   :  { %v5883_v59 = vrot.slane %v5882_v35, 1  ;;  %v5886_v4 = vsel %vm2204_vm3, %v5653_v34, -inf  ;;  %v5652_v51 = vsel %vm11139_vm13, %v5524_v10, 0.0  ;;  %v673_v25 = vpop.permute.xlu0 %672  ;;  %vm11221_vm13 = vcmp.le.s32.totalorder %v4051_v56, %v9997_v21 }
 0x211   :  { %v5885_v5 = vsel %vm2204_vm3, %v5652_v51, -inf  ;;  %1994 = vrot.lane.b32.xlu1 %v1739_v33, %s8961_s30  ;;  %1992 = vrot.lane.b32.xlu0 %v1737_v23, %s8961_s30  ;;  %v2273_v40 = vsel %vm2204_vm3, %v8898_v49, %v673_v25  ;;  %v461_v25 = vsel %vm278_vm1, %v458_v48, %v460_v6  ;;  %v11310_v49 = vld [vmem:[%s13924_s0 + $0x2f0] sm:$0xff] }
 0x212   :  { %v5887_v39 = vmax.f32 %v5885_v5, %v5886_v4  ;;  %v5884_v32 = vmax.f32 %v5882_v35, %v5883_v59  ;;  %v3729_v35 = vadd.s32 272, %v9973_v55  ;;  %v1102_v59 = vrot.slane %v11191_v43, 2 }
 0x213   :  { %v1317_v50 = vpop.permute.xlu1 %1316  ;;  %v1104_v4 = vrot.slane %v11199_v53, 2 }
 0x214   :  { %v5888_v52 = vrot.slane %v5887_v39, 4  ;;  %v1315_v62 = vpop.permute.xlu0 %1314  ;;  %v11202_v58 = vsel %vm6434_vm8, %v5884_v32, %v6442_v30  ;;  %v8897_v30 = vld [vmem:[%s13924_s0 + $0x228] sm:$0xff]  ;;  %v4065_v5 = vand.u32 15, %v3729_v35  ;;  %v1108_v35 = vrot.slane %v11310_v49, 2 }
 0x215   :  { %714 = vrot.lane.b32.xlu1 %v459_v8, %s8960_s25  ;;  %712 = vrot.lane.b32.xlu0 %v457_v17, %s8960_s25  ;;  %v2274_v27 = vsel %vm2204_vm3, %v8897_v30, %v675_v36  ;;  %v2402_v28 = vsel %vm2333_vm4, %v2273_v40, %v1315_v62  ;;  %v1746_v17 = vrot.slane %v11199_v53, 3  ;;  %v1105_v48 = vsel %vm920_vm0, %v1102_v59, %v1104_v4  ;;  %v8899_v62 = vld [vmem:[%s13924_s0 + $0x238] sm:$0xff] }
 0x216   :  { %v5889_v13 = vmax.f32 %v5887_v39, %v5888_v52  ;;  %v8405_v15 = vpop.f32.mrb[32].mxu0  ;;  %v2403_v18 = vsel %vm2333_vm4, %v2274_v27, %v1317_v50  ;;  %v1744_v39 = vrot.slane %v11191_v43, 3  ;;  %v1103_v43 = vsel %vm920_vm0, %v1100_v63, %v1102_v59  ;;  %v8900_v63 = vld [vmem:[%s13924_s0 + $0x230] sm:$0xff] }
 0x217   :  { %v3221_v33 = vadd.f32 %v10689_v47, %v8405_v15  ;;  %v3215_v31 = vpop.f32.mrb[33].mxu0  ;;  %v1959_v24 = vpop.permute.xlu1 %1958 }
 0x218   :  { %v5890_v9 = vrot.slane %v5889_v13, 2  ;;  %v3216_v41 = vadd.f32 %v10689_v47, %v3215_v31  ;;  %v2532_v29 = vsel %vm2462_vm5, %v2403_v18, %v1959_v24  ;;  %v1957_v14 = vpop.permute.xlu0 %1956  ;;  %v1747_v6 = vsel %vm1562_vm2, %v1744_v39, %v1746_v17 }
 0x219   :  { %v5527_v44 = vmax.f32 %v3221_v33, 0.0  ;;  %v2531_v11 = vsel %vm2462_vm5, %v2402_v28, %v1957_v14  ;;  %1356 = vrot.lane.b32.xlu1 %v1101_v26, %s8959_s24  ;;  %1354 = vrot.lane.b32.xlu0 %v1099_v37, %s8959_s24  ;;  %v3732_v24 = vadd.s32 296, %v9973_v55 }
 0x21a   :  { %v5891_v16 = vmax.f32 %v5889_v13, %v5890_v9  ;;  %v5526_v22 = vmax.f32 %v3216_v41, 0.0  ;;  %8457 = vmatprep.mubr.msk.f32.mxu0 %vm2604_vm6, %v2531_v11  ;;  %v1745_v41 = vsel %vm1562_vm2, %v1742_v7, %v1744_v39  ;;  %v466_v11 = vrot.slane %v11310_v49, 1 }
 0x21b   :  { %v5655_v10 = vsel %vm11206_vm10, %v5527_v44, 0.0  ;;  %8458 = vmatmul.mubr.msk.f32.gmra.mrb[68].mxu0 %vm2604_vm6, %v2532_v29  ;;  %v679_v23 = vpop.permute.xlu1 %678  ;;  %vm11269_vm10 = vcmp.le.s32.totalorder %v4072_v38, %v9997_v21  ;;  %v3731_v29 = vadd.s32 288, %v9973_v55 }
 0x21c   :  { %v5895_v3 = vsel %vm2204_vm3, %v5655_v10, -inf  ;;  %v5654_v34 = vsel %vm11221_vm13, %v5526_v22, 0.0  ;;  %v677_v36 = vpop.permute.xlu0 %676  ;;  %v5892_v8 = vrot.slane %v5891_v16, 1  ;;  %v2276_v26 = vsel %vm2204_vm3, %v8899_v62, %v679_v23 }
 0x21d   :  { %v5894_v61 = vsel %vm2204_vm3, %v5654_v34, -inf  ;;  %1998 = vrot.lane.b32.xlu1 %v1743_v20, %s8961_s30  ;;  %1996 = vrot.lane.b32.xlu0 %v1741_v1, %s8961_s30  ;;  %vm11285_vm13 = vcmp.le.s32.totalorder %v4065_v5, %v9997_v21  ;;  %v2275_v13 = vsel %vm2204_vm3, %v8900_v63, %v677_v36  ;;  %v4086_v1 = vand.u32 15, %v3732_v24  ;;  %v11389_v63 = vld [vmem:[%s13925_s2 + $0x40] ss:$0 sm:$0xff] }
 0x21e   :  { %v5896_v51 = vmax.f32 %v5894_v61, %v5895_v3  ;;  %v5893_v32 = vmax.f32 %v5891_v16, %v5892_v8  ;;  %v4079_v23 = vand.u32 15, %v3731_v29  ;;  %v1750_v34 = vrot.slane %v11310_v49, 3 }
 0x21f   :  { %v1321_v54 = vpop.permute.xlu1 %1320  ;;  %v3734_v24 = vadd.s32 312, %v9973_v55 }
 0x220   :  { %v1319_v56 = vpop.permute.xlu0 %1318  ;;  %v5897_v52 = vrot.slane %v5896_v51, 4  ;;  %v11291_v57 = vsel %vm6436_vm14, %v5893_v32, %v11202_v58  ;;  %v2405_v30 = vsel %vm2333_vm4, %v2276_v26, %v1321_v54  ;;  %v11305_v58 = vld [vmem:[%s13924_s0 + $0x2e8] sm:$0xff]  ;;  %v8902_v26 = vld [vmem:[%s13924_s0 + $0x240] sm:$0xff] }
 0x221   :  { %718 = vrot.lane.b32.xlu1 %v463_v19, %s8960_s25  ;;  %716 = vrot.lane.b32.xlu0 %v461_v25, %s8960_s25  ;;  %v2404_v40 = vsel %vm2333_vm4, %v2275_v13, %v1319_v56  ;;  %v464_v44 = vrot.slane %v11305_v58, 1  ;;  %v1106_v60 = vrot.slane %v11305_v58, 2  ;;  %v1748_v3 = vrot.slane %v11305_v58, 3 }
 0x222   :  { %v8408_v0 = vpop.f32.mrb[34].mxu0  ;;  %v5898_v14 = vmax.f32 %v5896_v51, %v5897_v52  ;;  %v11348_v51 = vld [vmem:[%s13924_s0 + $0x2f8] sm:$0xff] }
 0x223   :  { %v3231_v27 = vadd.f32 %v10689_v47, %v8408_v0  ;;  %v3225_v15 = vpop.f32.mrb[35].mxu0  ;;  %v1963_v42 = vpop.permute.xlu1 %1962  ;;  %v467_v61 = vsel %vm278_vm1, %v464_v44, %v466_v11  ;;  %v465_v38 = vsel %vm278_vm1, %v462_v46, %v464_v44  ;;  %v1109_v8 = vsel %vm920_vm0, %v1106_v60, %v1108_v35  ;;  %v11359_v46 = vld [vmem:[%s13924_s0 + $0x300] sm:$0xff] }
 0x224   :  { %v3226_v18 = vadd.f32 %v10689_v47, %v3225_v15  ;;  %v2534_v33 = vsel %vm2462_vm5, %v2405_v30, %v1963_v42  ;;  %v1961_v31 = vpop.permute.xlu0 %1960  ;;  %v5899_v36 = vrot.slane %v5898_v14, 2  ;;  %v1107_v54 = vsel %vm920_vm0, %v1104_v4, %v1106_v60 }
 0x225   :  { %v5529_v9 = vmax.f32 %v3231_v27, 0.0  ;;  %v2533_v28 = vsel %vm2462_vm5, %v2404_v40, %v1961_v31  ;;  %1360 = vrot.lane.b32.xlu1 %v1105_v48, %s8959_s24  ;;  %1358 = vrot.lane.b32.xlu0 %v1103_v43, %s8959_s24  ;;  %v1751_v4 = vsel %vm1562_vm2, %v1748_v3, %v1750_v34  ;;  %v8901_v48 = vld [vmem:[%s13924_s0 + $0x248] sm:$0xff]  ;;  %v468_v62 = vrot.slane %v11348_v51, 1 }
 0x226   :  { %v5528_v47 = vmax.f32 %v3226_v18, 0.0  ;;  %8460 = vmatprep.mubr.msk.f32.mxu0 %vm2604_vm6, %v2533_v28  ;;  %v5900_v32 = vmax.f32 %v5898_v14, %v5899_v36  ;;  %v470_v15 = vrot.slane %v11359_v46, 1  ;;  %v1749_v14 = vsel %vm1562_vm2, %v1746_v17, %v1748_v3 }
 0x227   :  { %v5657_v20 = vsel %vm11269_vm10, %v5529_v9, 0.0  ;;  %8461 = vmatmul.mubr.msk.f32.gmra.mrb[70].mxu0 %vm2604_vm6, %v2534_v33  ;;  %v683_v2 = vpop.permute.xlu1 %682  ;;  %vm11363_vm10 = vcmp.le.s32.totalorder %v4086_v1, %v9997_v21  ;;  %v3733_v9 = vadd.s32 304, %v9973_v55  ;;  %v4100_v1 = vand.u32 15, %v3734_v24 }
 0x228   :  { %v5904_v7 = vsel %vm2204_vm3, %v5657_v20, -inf  ;;  %v5656_v16 = vsel %vm11285_vm13, %v5528_v47, 0.0  ;;  %v681_v22 = vpop.permute.xlu0 %680  ;;  %vm11369_vm13 = vcmp.le.s32.totalorder %v4079_v23, %v9997_v21  ;;  %v2278_v43 = vsel %vm2204_vm3, %v8901_v48, %v683_v2 }
 0x229   :  { %v5903_v10 = vsel %vm2204_vm3, %v5656_v16, -inf  ;;  %2002 = vrot.lane.b32.xlu1 %v1747_v6, %s8961_s30  ;;  %2000 = vrot.lane.b32.xlu0 %v1745_v41, %s8961_s30  ;;  %v2277_v0 = vsel %vm2204_vm3, %v8902_v26, %v681_v22  ;;  %v5901_v28 = vrot.slane %v5900_v32, 1  ;;  %v1110_v20 = vrot.slane %v11348_v51, 2  ;;  %v8905_v26 = vld [vmem:[%s13924_s0 + $0x250] sm:$0xff] }
 0x22a   :  { %v5905_v19 = vmax.f32 %v5903_v10, %v5904_v7  ;;  %v1112_v22 = vrot.slane %v11359_v46, 2  ;;  %v471_v17 = vsel %vm278_vm1, %v468_v62, %v470_v15  ;;  %v4093_v10 = vand.u32 15, %v3733_v9 }
 0x22b   :  { %v1325_v59 = vpop.permute.xlu1 %1324  ;;  %v5902_v23 = vmax.f32 %v5900_v32, %v5901_v28  ;;  %v1111_v56 = vsel %vm920_vm0, %v1108_v35, %v1110_v20  ;;  %v3735_v24 = vadd.s32 320, %v9973_v55 }
 0x22c   :  { %v5906_v25 = vrot.slane %v5905_v19, 4  ;;  %v1323_v5 = vpop.permute.xlu0 %1322  ;;  %v2407_v37 = vsel %vm2333_vm4, %v2278_v43, %v1325_v59 }
 0x22d   :  { %722 = vrot.lane.b32.xlu1 %v467_v61, %s8960_s25  ;;  %720 = vrot.lane.b32.xlu0 %v465_v38, %s8960_s25  ;;  %v2406_v6 = vsel %vm2333_vm4, %v2277_v0, %v1323_v5  ;;  %v11425_v38 = vld [vmem:[%s13924_s0 + $0x308] sm:$0xff] }
 0x22e   :  { %v5907_v50 = vmax.f32 %v5905_v19, %v5906_v25  ;;  %v8411_v52 = vpop.f32.mrb[36].mxu0  ;;  %v469_v19 = vsel %vm278_vm1, %v466_v11, %v468_v62  ;;  %v472_v62 = vrot.slane %v11425_v38, 1 }
 0x22f   :  { %v3241_v13 = vadd.f32 %v11389_v63, %v8411_v52  ;;  %v3235_v30 = vpop.f32.mrb[37].mxu0  ;;  %v1967_v27 = vpop.permute.xlu1 %1966  ;;  %v1754_v52 = vrot.slane %v11359_v46, 3 }
 0x230   :  { %v5908_v42 = vrot.slane %v5907_v50, 2  ;;  %v3236_v58 = vadd.f32 %v11389_v63, %v3235_v30  ;;  %v2536_v40 = vsel %vm2462_vm5, %v2407_v37, %v1967_v27  ;;  %v1965_v18 = vpop.permute.xlu0 %1964 }
 0x231   :  { %v5531_v33 = vmax.f32 %v3241_v13, 0.0  ;;  %v2535_v31 = vsel %vm2462_vm5, %v2406_v6, %v1965_v18  ;;  %1364 = vrot.lane.b32.xlu1 %v1109_v8, %s8959_s24  ;;  %1362 = vrot.lane.b32.xlu0 %v1107_v54, %s8959_s24  ;;  %v1113_v8 = vsel %vm920_vm0, %v1110_v20, %v1112_v22  ;;  %v11436_v54 = vld [vmem:[%s13924_s0 + $0x310] sm:$0xff]  ;;  %v473_v20 = vsel %vm278_vm1, %v470_v15, %v472_v62 }
 0x232   :  { %v5909_v41 = vmax.f32 %v5907_v50, %v5908_v42  ;;  %v5530_v29 = vmax.f32 %v3236_v58, 0.0  ;;  %8463 = vmatprep.mubr.msk.f32.mxu0 %vm2604_vm6, %v2535_v31  ;;  %v8904_v50 = vld [vmem:[%s13924_s0 + $0x258] sm:$0xff]  ;;  %v474_v30 = vrot.slane %v11436_v54, 1  ;;  %v3736_v31 = vadd.s32 328, %v9973_v55 }
 0x233   :  { %v5659_v47 = vsel %vm11363_vm10, %v5531_v33, 0.0  ;;  %8464 = vmatmul.mubr.msk.f32.gmra.mrb[72].mxu0 %vm2604_vm6, %v2536_v40  ;;  %v687_v44 = vpop.permute.xlu1 %686  ;;  %vm11440_vm10 = vcmp.le.s32.totalorder %v4100_v1, %v9997_v21  ;;  %v1116_v1 = vrot.slane %v11436_v54, 2 }
 0x234   :  { %v5910_v2 = vrot.slane %v5909_v41, 1  ;;  %v5913_v60 = vsel %vm2204_vm3, %v5659_v47, -inf  ;;  %v5658_v7 = vsel %vm11369_vm13, %v5530_v29, 0.0  ;;  %v685_v16 = vpop.permute.xlu0 %684  ;;  %vm11446_vm13 = vcmp.le.s32.totalorder %v4093_v10, %v9997_v21 }
 0x235   :  { %v5912_v53 = vsel %vm2204_vm3, %v5658_v7, -inf  ;;  %2006 = vrot.lane.b32.xlu1 %v1751_v4, %s8961_s30  ;;  %2004 = vrot.lane.b32.xlu0 %v1749_v14, %s8961_s30  ;;  %v1752_v4 = vrot.slane %v11348_v51, 3  ;;  %v2280_v48 = vsel %vm2204_vm3, %v8904_v50, %v687_v44  ;;  %v2279_v35 = vsel %vm2204_vm3, %v8905_v26, %v685_v16 }
 0x236   :  { %v5911_v3 = vmax.f32 %v5909_v41, %v5910_v2  ;;  %v5914_v36 = vmax.f32 %v5912_v53, %v5913_v60  ;;  %v475_v44 = vsel %vm278_vm1, %v472_v62, %v474_v30  ;;  %v1114_v7 = vrot.slane %v11425_v38, 2 }
 0x237   :  { %v1329_v61 = vpop.permute.xlu1 %1328  ;;  %v1755_v41 = vsel %vm1562_vm2, %v1752_v4, %v1754_v52  ;;  %v1753_v29 = vsel %vm1562_vm2, %v1750_v34, %v1752_v4  ;;  %v4114_v53 = vand.u32 15, %v3736_v31 }
 0x238   :  { %v11428_v59 = vsel %vm6424_vm15, %v5911_v3, %v5902_v23  ;;  %v5915_v25 = vrot.slane %v5914_v36, 4  ;;  %v1327_v5 = vpop.permute.xlu0 %1326  ;;  %v2409_v51 = vsel %vm2333_vm4, %v2280_v48, %v1329_v61  ;;  %v1756_v23 = vrot.slane %v11425_v38, 3 }
 0x239   :  { %726 = vrot.lane.b32.xlu1 %v471_v17, %s8960_s25  ;;  %724 = vrot.lane.b32.xlu0 %v469_v19, %s8960_s25  ;;  %v2408_v42 = vsel %vm2333_vm4, %v2279_v35, %v1327_v5  ;;  %v4107_v17 = vand.u32 15, %v3735_v24  ;;  %v1758_v3 = vrot.slane %v11436_v54, 3  ;;  %v1117_v38 = vsel %vm920_vm0, %v1114_v7, %v1116_v1 }
 0x23a   :  { %v5916_v32 = vmax.f32 %v5914_v36, %v5915_v25  ;;  %v8414_v43 = vpop.f32.mrb[38].mxu0  ;;  %v1757_v35 = vsel %vm1562_vm2, %v1754_v52, %v1756_v23 }
 0x23b   :  { %v3251_v0 = vadd.f32 %v11389_v63, %v8414_v43  ;;  %v3245_v37 = vpop.f32.mrb[39].mxu0  ;;  %v1971_v13 = vpop.permute.xlu1 %1970 }
 0x23c   :  { %v5917_v27 = vrot.slane %v5916_v32, 2  ;;  %v3246_v6 = vadd.f32 %v11389_v63, %v3245_v37  ;;  %v2538_v58 = vsel %vm2462_vm5, %v2409_v51, %v1971_v13  ;;  %v1969_v40 = vpop.permute.xlu0 %1968  ;;  %v11540_v51 = vld [vmem:[%s13924_s0 + $0x318] sm:$0xff] }
 0x23d   :  { %v5533_v18 = vmax.f32 %v3251_v0, 0.0  ;;  %v2537_v33 = vsel %vm2462_vm5, %v2408_v42, %v1969_v40  ;;  %1368 = vrot.lane.b32.xlu1 %v1113_v8, %s8959_s24  ;;  %1366 = vrot.lane.b32.xlu0 %v1111_v56, %s8959_s24  ;;  %v1115_v8 = vsel %vm920_vm0, %v1112_v22, %v1114_v7  ;;  %v8907_v22 = vld [vmem:[%s13924_s0 + $0x260] sm:$0xff]  ;;  %v3737_v40 = vadd.s32 336, %v9973_v55 }
 0x23e   :  { %v5918_v9 = vmax.f32 %v5916_v32, %v5917_v27  ;;  %v5532_v28 = vmax.f32 %v3246_v6, 0.0  ;;  %8466 = vmatprep.mubr.msk.f32.mxu0 %vm2604_vm6, %v2537_v33  ;;  %v1759_v32 = vsel %vm1562_vm2, %v1756_v23, %v1758_v3  ;;  %v11545_v0 = vld [vmem:[%s13924_s0 + $0x320] sm:$0xff]  ;;  %v476_v31 = vrot.slane %v11540_v51, 1 }
 0x23f   :  { %v5661_v14 = vsel %vm11440_vm10, %v5533_v18, 0.0  ;;  %8467 = vmatmul.mubr.msk.f32.gmra.mrb[74].mxu0 %vm2604_vm6, %v2538_v58  ;;  %v691_v47 = vpop.permute.xlu1 %690  ;;  %vm11505_vm10 = vcmp.le.s32.totalorder %v4114_v53, %v9997_v21  ;;  %v3738_v58 = vadd.s32 344, %v9973_v55  ;;  %v478_v24 = vrot.slane %v11545_v0, 1 }
 0x240   :  { %v5919_v2 = vrot.slane %v5918_v9, 1  ;;  %v5922_v60 = vsel %vm2204_vm3, %v5661_v14, -inf  ;;  %v5660_v49 = vsel %vm11446_vm13, %v5532_v28, 0.0  ;;  %v689_v34 = vpop.permute.xlu0 %688  ;;  %vm11521_vm13 = vcmp.le.s32.totalorder %v4107_v17, %v9997_v21 }
 0x241   :  { %v5921_v16 = vsel %vm2204_vm3, %v5660_v49, -inf  ;;  %2010 = vrot.lane.b32.xlu1 %v1755_v41, %s8961_s30  ;;  %2008 = vrot.lane.b32.xlu0 %v1753_v29, %s8961_s30  ;;  %v2281_v50 = vsel %vm2204_vm3, %v8907_v22, %v689_v34  ;;  %v1118_v41 = vrot.slane %v11540_v51, 2  ;;  %v4121_v49 = vand.u32 15, %v3737_v40 }
 0x242   :  { %v5920_v15 = vmax.f32 %v5918_v9, %v5919_v2  ;;  %v5923_v10 = vmax.f32 %v5921_v16, %v5922_v60  ;;  %v4128_v60 = vand.u32 15, %v3738_v58  ;;  %v479_v16 = vsel %vm278_vm1, %v476_v31, %v478_v24 }
 0x243   :  { %v1333_v36 = vpop.permute.xlu1 %1332  ;;  %v477_v53 = vsel %vm278_vm1, %v474_v30, %v476_v31 }
 0x244   :  { %v5924_v19 = vrot.slane %v5923_v10, 4  ;;  %v1331_v61 = vpop.permute.xlu0 %1330  ;;  %v6446_v25 = vsel %vm6426_vm9, %v5920_v15, %v11428_v59  ;;  %v8906_v59 = vld [vmem:[%s13924_s0 + $0x268] sm:$0xff] }
 0x245   :  { %730 = vrot.lane.b32.xlu1 %v475_v44, %s8960_s25  ;;  %728 = vrot.lane.b32.xlu0 %v473_v20, %s8960_s25  ;;  %v2282_v39 = vsel %vm2204_vm3, %v8906_v59, %v691_v47  ;;  %v2410_v13 = vsel %vm2333_vm4, %v2281_v50, %v1331_v61  ;;  %v1120_v20 = vrot.slane %v11545_v0, 2  ;;  %v11578_v15 = vld [vmem:[%s13924_s0 + $0x328] sm:$0xff] }
 0x246   :  { %v5925_v11 = vmax.f32 %v5923_v10, %v5924_v19  ;;  %v8417_v56 = vpop.f32.mrb[40].mxu0  ;;  %v2411_v48 = vsel %vm2333_vm4, %v2282_v39, %v1333_v36  ;;  %v11586_v19 = vld [vmem:[%s13924_s0 + $0x330] sm:$0xff]  ;;  %v480_v4 = vrot.slane %v11578_v15, 1 }
 0x247   :  { %v3261_v43 = vadd.f32 %v11389_v63, %v8417_v56  ;;  %v3255_v62 = vpop.f32.mrb[41].mxu0  ;;  %v1975_v26 = vpop.permute.xlu1 %1974  ;;  %v1121_v36 = vsel %vm920_vm0, %v1118_v41, %v1120_v20  ;;  %v1762_v56 = vrot.slane %v11545_v0, 3 }
 0x248   :  { %v5926_v37 = vrot.slane %v5925_v11, 2  ;;  %v3256_v27 = vadd.f32 %v11389_v63, %v3255_v62  ;;  %v2540_v42 = vsel %vm2462_vm5, %v2411_v48, %v1975_v26  ;;  %v1973_v46 = vpop.permute.xlu0 %1972  ;;  %v482_v62 = vrot.slane %v11586_v19, 1 }
 0x249   :  { %v5535_v6 = vmax.f32 %v3261_v43, 0.0  ;;  %v2539_v52 = vsel %vm2462_vm5, %v2410_v13, %v1973_v46  ;;  %1372 = vrot.lane.b32.xlu1 %v1117_v38, %s8959_s24  ;;  %1370 = vrot.lane.b32.xlu0 %v1115_v8, %s8959_s24  ;;  %v1119_v38 = vsel %vm920_vm0, %v1116_v1, %v1118_v41  ;;  %v3740_v46 = vadd.s32 360, %v9973_v55 }
 0x24a   :  { %v5927_v18 = vmax.f32 %v5925_v11, %v5926_v37  ;;  %v5534_v33 = vmax.f32 %v3256_v27, 0.0  ;;  %8469 = vmatprep.mubr.msk.f32.mxu0 %vm2604_vm6, %v2539_v52  ;;  %v8908_v11 = vld [vmem:[%s13924_s0 + $0x278] sm:$0xff] }
 0x24b   :  { %v5663_v9 = vsel %vm11505_vm10, %v5535_v6, 0.0  ;;  %8470 = vmatmul.mubr.msk.f32.gmra.mrb[76].mxu0 %vm2604_vm6, %v2540_v42  ;;  %v695_v28 = vpop.permute.xlu1 %694  ;;  %vm11591_vm10 = vcmp.le.s32.totalorder %v4128_v60, %v9997_v21  ;;  %v3739_v6 = vadd.s32 352, %v9973_v55  ;;  %v1124_v60 = vrot.slane %v11586_v19, 2 }
 0x24c   :  { %v5928_v29 = vrot.slane %v5927_v18, 1  ;;  %v5931_v14 = vsel %vm2204_vm3, %v5663_v9, -inf  ;;  %v5662_v47 = vsel %vm11521_vm13, %v5534_v33, 0.0  ;;  %v693_v44 = vpop.permute.xlu0 %692  ;;  %vm11597_vm13 = vcmp.le.s32.totalorder %v4121_v49, %v9997_v21 }
 0x24d   :  { %v5930_v2 = vsel %vm2204_vm3, %v5662_v47, -inf  ;;  %2014 = vrot.lane.b32.xlu1 %v1759_v32, %s8961_s30  ;;  %2012 = vrot.lane.b32.xlu0 %v1757_v35, %s8961_s30  ;;  %v2284_v59 = vsel %vm2204_vm3, %v8908_v11, %v695_v28  ;;  %v8909_v32 = vld [vmem:[%s13924_s0 + $0x270] sm:$0xff]  ;;  %v483_v9 = vsel %vm278_vm1, %v480_v4, %v482_v62  ;;  %v481_v28 = vsel %vm278_vm1, %v478_v24, %v480_v4 }
 0x24e   :  { %v5929_v34 = vmax.f32 %v5927_v18, %v5928_v29  ;;  %v5932_v7 = vmax.f32 %v5930_v2, %v5931_v14  ;;  %v2283_v1 = vsel %vm2204_vm3, %v8909_v32, %v693_v44  ;;  %v1122_v14 = vrot.slane %v11578_v15, 2 }
 0x24f   :  { %v1337_v17 = vpop.permute.xlu1 %1336  ;;  %v4142_v44 = vand.u32 15, %v3740_v46  ;;  %v4135_v2 = vand.u32 15, %v3739_v6 }
 0x250   :  { %v5933_v10 = vrot.slane %v5932_v7, 4  ;;  %v1335_v23 = vpop.permute.xlu0 %1334  ;;  %v6447_v61 = vsel %vm6428_vm12, %v5929_v34, %v6446_v25  ;;  %v1760_v25 = vrot.slane %v11540_v51, 3  ;;  %v2413_v22 = vsel %vm2333_vm4, %v2284_v59, %v1337_v17 }
 0x251   :  { %734 = vrot.lane.b32.xlu1 %v479_v16, %s8960_s25  ;;  %732 = vrot.lane.b32.xlu0 %v477_v53, %s8960_s25  ;;  %v2412_v35 = vsel %vm2333_vm4, %v2283_v1, %v1335_v23  ;;  %v1764_v34 = vrot.slane %v11578_v15, 3  ;;  %v1125_v15 = vsel %vm920_vm0, %v1122_v14, %v1124_v60 }
 0x252   :  { %v5934_v8 = vmax.f32 %v5932_v7, %v5933_v10  ;;  %v8420_v39 = vpop.f32.mrb[42].mxu0  ;;  %v1763_v40 = vsel %vm1562_vm2, %v1760_v25, %v1762_v56  ;;  %v1761_v18 = vsel %vm1562_vm2, %v1758_v3, %v1760_v25  ;;  %v1766_v7 = vrot.slane %v11586_v19, 3 }
 0x253   :  { %v3271_v50 = vadd.f32 %v11389_v63, %v8420_v39  ;;  %v3265_v48 = vpop.f32.mrb[43].mxu0  ;;  %v1979_v43 = vpop.permute.xlu1 %1978  ;;  %v1765_v1 = vsel %vm1562_vm2, %v1762_v56, %v1764_v34 }
 0x254   :  { %v5935_v26 = vrot.slane %v5934_v8, 2  ;;  %v3266_v51 = vadd.f32 %v11389_v63, %v3265_v48  ;;  %v2542_v37 = vsel %vm2462_vm5, %v2413_v22, %v1979_v43  ;;  %v1977_v13 = vpop.permute.xlu0 %1976  ;;  %v11690_v22 = vld [vmem:[%s13924_s0 + $0x338] sm:$0xff] }
 0x255   :  { %v5537_v27 = vmax.f32 %v3271_v50, 0.0  ;;  %v2541_v42 = vsel %vm2462_vm5, %v2412_v35, %v1977_v13  ;;  %1376 = vrot.lane.b32.xlu1 %v1121_v36, %s8959_s24  ;;  %1374 = vrot.lane.b32.xlu0 %v1119_v38, %s8959_s24  ;;  %v1123_v36 = vsel %vm920_vm0, %v1120_v20, %v1122_v14  ;;  %v8911_v20 = vld [vmem:[%s13924_s0 + $0x280] sm:$0xff]  ;;  %v3741_v13 = vadd.s32 368, %v9973_v55 }
 0x256   :  { %v5936_v52 = vmax.f32 %v5934_v8, %v5935_v26  ;;  %v5536_v58 = vmax.f32 %v3266_v51, 0.0  ;;  %8472 = vmatprep.mubr.msk.f32.mxu0 %vm2604_vm6, %v2541_v42  ;;  %v1767_v8 = vsel %vm1562_vm2, %v1764_v34, %v1766_v7  ;;  %v11695_v50 = vld [vmem:[%s13924_s0 + $0x340] sm:$0xff]  ;;  %v484_v46 = vrot.slane %v11690_v22, 1 }
 0x257   :  { %v5665_v33 = vsel %vm11591_vm10, %v5537_v27, 0.0  ;;  %8473 = vmatmul.mubr.msk.f32.gmra.mrb[78].mxu0 %vm2604_vm6, %v2542_v37  ;;  %v699_v31 = vpop.permute.xlu1 %698  ;;  %vm11655_vm10 = vcmp.le.s32.totalorder %v4142_v44, %v9997_v21  ;;  %v3742_v37 = vadd.s32 376, %v9973_v55  ;;  %v486_v6 = vrot.slane %v11695_v50, 1 }
 0x258   :  { %v5937_v41 = vrot.slane %v5936_v52, 1  ;;  %v5940_v29 = vsel %vm2204_vm3, %v5665_v33, -inf  ;;  %v5664_v54 = vsel %vm11597_vm13, %v5536_v58, 0.0  ;;  %v697_v3 = vpop.permute.xlu0 %696  ;;  %vm11671_vm13 = vcmp.le.s32.totalorder %v4135_v2, %v9997_v21 }
 0x259   :  { %v5939_v47 = vsel %vm2204_vm3, %v5664_v54, -inf  ;;  %2018 = vrot.lane.b32.xlu1 %v1763_v40, %s8961_s30  ;;  %2016 = vrot.lane.b32.xlu0 %v1761_v18, %s8961_s30  ;;  %v2285_v11 = vsel %vm2204_vm3, %v8911_v20, %v697_v3  ;;  %v1126_v40 = vrot.slane %v11690_v22, 2  ;;  %v4149_v54 = vand.u32 15, %v3741_v13 }
 0x25a   :  { %v5938_v24 = vmax.f32 %v5936_v52, %v5937_v41  ;;  %v5941_v49 = vmax.f32 %v5939_v47, %v5940_v29  ;;  %v4156_v29 = vand.u32 15, %v3742_v37  ;;  %v487_v47 = vsel %vm278_vm1, %v484_v46, %v486_v6 }
 0x25b   :  { %v1341_v16 = vpop.permute.xlu1 %1340  ;;  %v485_v44 = vsel %vm278_vm1, %v482_v62, %v484_v46 }
 0x25c   :  { %v5942_v53 = vrot.slane %v5941_v49, 4  ;;  %v1339_v17 = vpop.permute.xlu0 %1338  ;;  %v6448_v10 = vsel %vm6430_vm7, %v5938_v24, %v6447_v61  ;;  %v8910_v61 = vld [vmem:[%s13924_s0 + $0x288] sm:$0xff] }
 0x25d   :  { %738 = vrot.lane.b32.xlu1 %v483_v9, %s8960_s25  ;;  %736 = vrot.lane.b32.xlu0 %v481_v28, %s8960_s25  ;;  %v2286_v5 = vsel %vm2204_vm3, %v8910_v61, %v699_v31  ;;  %v2414_v43 = vsel %vm2333_vm4, %v2285_v11, %v1339_v17  ;;  %v1128_v28 = vrot.slane %v11695_v50, 2  ;;  %v11728_v24 = vld [vmem:[%s13924_s0 + $0x348] sm:$0xff] }
 0x25e   :  { %v5943_v30 = vmax.f32 %v5941_v49, %v5942_v53  ;;  %v8423_v38 = vpop.f32.mrb[44].mxu0  ;;  %v2415_v59 = vsel %vm2333_vm4, %v2286_v5, %v1341_v16  ;;  %v11736_v53 = vld [vmem:[%s13924_s0 + $0x350] sm:$0xff]  ;;  %v488_v25 = vrot.slane %v11728_v24, 1 }
 0x25f   :  { %v3281_v39 = vadd.f32 %v11389_v63, %v8423_v38  ;;  %v3275_v4 = vpop.f32.mrb[45].mxu0  ;;  %v1983_v32 = vpop.permute.xlu1 %1982  ;;  %v1129_v16 = vsel %vm920_vm0, %v1126_v40, %v1128_v28  ;;  %v1770_v38 = vrot.slane %v11695_v50, 3 }
 0x260   :  { %v5944_v48 = vrot.slane %v5943_v30, 2  ;;  %v3276_v26 = vadd.f32 %v11389_v63, %v3275_v4  ;;  %v2544_v35 = vsel %vm2462_vm5, %v2415_v59, %v1983_v32  ;;  %v1981_v0 = vpop.permute.xlu0 %1980  ;;  %v490_v4 = vrot.slane %v11736_v53, 1 }
 0x261   :  { %v5539_v51 = vmax.f32 %v3281_v39, 0.0  ;;  %v2543_v56 = vsel %vm2462_vm5, %v2414_v43, %v1981_v0  ;;  %1380 = vrot.lane.b32.xlu1 %v1125_v15, %s8959_s24  ;;  %1378 = vrot.lane.b32.xlu0 %v1123_v36, %s8959_s24  ;;  %v1127_v15 = vsel %vm920_vm0, %v1124_v60, %v1126_v40  ;;  %v3744_v0 = vadd.s32 392, %v9973_v55 }
 0x262   :  { %v5945_v27 = vmax.f32 %v5943_v30, %v5944_v48  ;;  %v5538_v42 = vmax.f32 %v3276_v26, 0.0  ;;  %8475 = vmatprep.mubr.msk.f32.mxu0 %vm2604_vm6, %v2543_v56  ;;  %v8912_v30 = vld [vmem:[%s13924_s0 + $0x298] sm:$0xff] }
 0x263   :  { %v5667_v52 = vsel %vm11655_vm10, %v5539_v51, 0.0  ;;  %8476 = vmatmul.mubr.msk.f32.gmra.mrb[80].mxu0 %vm2604_vm6, %v2544_v35  ;;  %v703_v58 = vpop.permute.xlu1 %702  ;;  %vm11741_vm10 = vcmp.le.s32.totalorder %v4156_v29, %v9997_v21  ;;  %v3743_v51 = vadd.s32 384, %v9973_v55  ;;  %v1132_v29 = vrot.slane %v11736_v53, 2 }
 0x264   :  { %v5946_v18 = vrot.slane %v5945_v27, 1  ;;  %v5949_v33 = vsel %vm2204_vm3, %v5667_v52, -inf  ;;  %v5666_v31 = vsel %vm11671_vm13, %v5538_v42, 0.0  ;;  %v701_v9 = vpop.permute.xlu0 %700  ;;  %vm11747_vm13 = vcmp.le.s32.totalorder %v4149_v54, %v9997_v21 }
 0x265   :  { %v5948_v41 = vsel %vm2204_vm3, %v5666_v31, -inf  ;;  %2022 = vrot.lane.b32.xlu1 %v1767_v8, %s8961_s30  ;;  %2020 = vrot.lane.b32.xlu0 %v1765_v1, %s8961_s30  ;;  %v2288_v61 = vsel %vm2204_vm3, %v8912_v30, %v703_v58  ;;  %v8913_v8 = vld [vmem:[%s13924_s0 + $0x290] sm:$0xff]  ;;  %v491_v52 = vsel %vm278_vm1, %v488_v25, %v490_v4  ;;  %v489_v58 = vsel %vm278_vm1, %v486_v6, %v488_v25 }
 0x266   :  { %v5947_v3 = vmax.f32 %v5945_v27, %v5946_v18  ;;  %v5950_v14 = vmax.f32 %v5948_v41, %v5949_v33  ;;  %v2287_v60 = vsel %vm2204_vm3, %v8913_v8, %v701_v9  ;;  %v1130_v33 = vrot.slane %v11728_v24, 2 }
 0x267   :  { %v1345_v2 = vpop.permute.xlu1 %1344  ;;  %v4170_v9 = vand.u32 15, %v3744_v0  ;;  %v4163_v41 = vand.u32 15, %v3743_v51  ;;  %v1772_v54 = vrot.slane %v11728_v24, 3  ;;  %v3745_v0 = vadd.s32 400, %v9973_v55  ;;  %v11865_v51 = vld [vmem:[%s13924_s0 + $0x3a8] sm:$0xff] }
 0x268   :  { %v5951_v49 = vrot.slane %v5950_v14, 4  ;;  %v1343_v34 = vpop.permute.xlu0 %1342  ;;  %v6449_v17 = vsel %vm6432_vm11, %v5947_v3, %v6448_v10  ;;  %v1768_v10 = vrot.slane %v11690_v22, 3  ;;  %v2417_v20 = vsel %vm2333_vm4, %v2288_v61, %v1345_v2 }
 0x269   :  { %742 = vrot.lane.b32.xlu1 %v487_v47, %s8960_s25  ;;  %740 = vrot.lane.b32.xlu0 %v485_v44, %s8960_s25  ;;  %v2416_v1 = vsel %vm2333_vm4, %v2287_v60, %v1343_v34  ;;  %v1774_v3 = vrot.slane %v11736_v53, 3  ;;  %v1133_v24 = vsel %vm920_vm0, %v1130_v33, %v1132_v29  ;;  %v11839_v60 = vld [vmem:[%s13924_s0 + $0x358] sm:$0xff] }
 0x26a   :  { %v5952_v36 = vmax.f32 %v5950_v14, %v5951_v49  ;;  %v8426_v5 = vpop.f32.mrb[46].mxu0  ;;  %v1771_v13 = vsel %vm1562_vm2, %v1768_v10, %v1770_v38  ;;  %v1769_v27 = vsel %vm1562_vm2, %v1766_v7, %v1768_v10 }
 0x26b   :  { %v3291_v11 = vadd.f32 %v11389_v63, %v8426_v5  ;;  %v3285_v59 = vpop.f32.mrb[47].mxu0  ;;  %v1987_v39 = vpop.permute.xlu1 %1986 }
 0x26c   :  { %v5953_v32 = vrot.slane %v5952_v36, 2  ;;  %v3286_v22 = vadd.f32 %v11389_v63, %v3285_v59  ;;  %v2546_v48 = vsel %vm2462_vm5, %v2417_v20, %v1987_v39  ;;  %v1985_v43 = vpop.permute.xlu0 %1984  ;;  %v11844_v20 = vld [vmem:[%s13924_s0 + $0x360] sm:$0xff] }
 0x26d   :  { %v5541_v26 = vmax.f32 %v3291_v11, 0.0  ;;  %v2545_v35 = vsel %vm2462_vm5, %v2416_v1, %v1985_v43  ;;  %1384 = vrot.lane.b32.xlu1 %v1129_v16, %s8959_s24  ;;  %1382 = vrot.lane.b32.xlu0 %v1127_v15, %s8959_s24  ;;  %v1131_v16 = vsel %vm920_vm0, %v1128_v28, %v1130_v33  ;;  %v8915_v28 = vld [vmem:[%s13924_s0 + $0x2a0] sm:$0xff]  ;;  %v3746_v11 = vadd.s32 408, %v9973_v55 }
 0x26e   :  { %v5954_v56 = vmax.f32 %v5952_v36, %v5953_v32  ;;  %v5540_v37 = vmax.f32 %v3286_v22, 0.0  ;;  %8478 = vmatprep.mubr.msk.f32.mxu0 %vm2604_vm6, %v2545_v35  ;;  %v1775_v36 = vsel %vm1562_vm2, %v1772_v54, %v1774_v3  ;;  %v1773_v35 = vsel %vm1562_vm2, %v1770_v38, %v1772_v54 }
 0x26f   :  { %v5669_v42 = vsel %vm11741_vm10, %v5541_v26, 0.0  ;;  %8479 = vmatmul.mubr.msk.f32.gmra.mrb[82].mxu0 %vm2604_vm6, %v2546_v48  ;;  %v707_v46 = vpop.permute.xlu1 %706  ;;  %vm11807_vm10 = vcmp.le.s32.totalorder %v4170_v9, %v9997_v21  ;;  %v11853_v48 = vld [vmem:[%s13924_s0 + $0x3a0] sm:$0xff]  ;;  %v1134_v33 = vrot.slane %v11839_v60, 2 }
 0x270   :  { %v5955_v40 = vrot.slane %v5954_v56, 1  ;;  %v5958_v18 = vsel %vm2204_vm3, %v5669_v42, -inf  ;;  %v5668_v19 = vsel %vm11747_vm13, %v5540_v37, 0.0  ;;  %v705_v7 = vpop.permute.xlu0 %704  ;;  %vm11823_vm13 = vcmp.le.s32.totalorder %v4163_v41, %v9997_v21 }
 0x271   :  { %v5957_v31 = vsel %vm2204_vm3, %v5668_v19, -inf  ;;  %2026 = vrot.lane.b32.xlu1 %v1771_v13, %s8961_s30  ;;  %2024 = vrot.lane.b32.xlu0 %v1769_v27, %s8961_s30  ;;  %v2289_v30 = vsel %vm2204_vm3, %v8915_v28, %v705_v7  ;;  %v492_v13 = vrot.slane %v11839_v60, 1  ;;  %v494_v27 = vrot.slane %v11844_v20, 1 }
 0x272   :  { %v5959_v6 = vmax.f32 %v5957_v31, %v5958_v18  ;;  %v5956_v14 = vmax.f32 %v5954_v56, %v5955_v40  ;;  %v510_v42 = vrot.slane %v11853_v48, 1  ;;  %v4184_v40 = vand.u32 15, %v3746_v11 }
 0x273   :  { %v1349_v47 = vpop.permute.xlu1 %1348  ;;  %v512_v18 = vrot.slane %v11865_v51, 1  ;;  %v4177_v7 = vand.u32 15, %v3745_v0  ;;  %v495_v9 = vsel %vm278_vm1, %v492_v13, %v494_v27  ;;  %v493_v41 = vsel %vm278_vm1, %v490_v4, %v492_v13 }
 0x274   :  { %v5960_v44 = vrot.slane %v5959_v6, 4  ;;  %v1347_v2 = vpop.permute.xlu0 %1346  ;;  %v11803_v49 = vsel %vm6434_vm8, %v5956_v14, %v6449_v17  ;;  %v8914_v17 = vld [vmem:[%s13924_s0 + $0x2a8] sm:$0xff]  ;;  %v1135_v34 = vsel %vm920_vm0, %v1132_v29, %v1134_v33  ;;  %v1152_v10 = vrot.slane %v11853_v48, 2  ;;  %v8917_v29 = vld [vmem:[%s13924_s0 + $0x2b0] sm:$0xff] }
 0x275   :  { %746 = vrot.lane.b32.xlu1 %v491_v52, %s8960_s25  ;;  %744 = vrot.lane.b32.xlu0 %v489_v58, %s8960_s25  ;;  %v2290_v23 = vsel %vm2204_vm3, %v8914_v17, %v707_v46  ;;  %v2418_v39 = vsel %vm2333_vm4, %v2289_v30, %v1347_v2  ;;  %v8916_v17 = vld [vmem:[%s13924_s0 + $0x2b8] sm:$0xff] }
 0x276   :  { %v5961_v62 = vmax.f32 %v5959_v6, %v5960_v44  ;;  %v8429_v15 = vpop.f32.mrb[48].mxu0  ;;  %v2419_v61 = vsel %vm2333_vm4, %v2290_v23, %v1349_v47  ;;  %v513_v44 = vsel %vm278_vm1, %v510_v42, %v512_v18 }
 0x277   :  { %v3301_v5 = vadd.f32 %v11389_v63, %v8429_v15  ;;  %v3295_v25 = vpop.f32.mrb[49].mxu0  ;;  %v1991_v8 = vpop.permute.xlu1 %1990 }
 0x278   :  { %v5962_v59 = vrot.slane %v5961_v62, 2  ;;  %v3296_v32 = vadd.f32 %v11389_v63, %v3295_v25  ;;  %v2548_v1 = vsel %vm2462_vm5, %v2419_v61, %v1991_v8  ;;  %v1989_v22 = vpop.permute.xlu0 %1988  ;;  %v1154_v8 = vrot.slane %v11865_v51, 2 }
 0x279   :  { %v5543_v43 = vmax.f32 %v3301_v5, 0.0  ;;  %v2547_v26 = vsel %vm2462_vm5, %v2418_v39, %v1989_v22  ;;  %1388 = vrot.lane.b32.xlu1 %v1133_v24, %s8959_s24  ;;  %1386 = vrot.lane.b32.xlu0 %v1131_v16, %s8959_s24  ;;  %v1776_v24 = vrot.slane %v11839_v60, 3  ;;  %v1136_v16 = vrot.slane %v11844_v20, 2  ;;  %v11929_v60 = vld [vmem:[%s13924_s0 + $0x3b0] sm:$0xff] }
 0x27a   :  { %v5963_v56 = vmax.f32 %v5961_v62, %v5962_v59  ;;  %v5542_v37 = vmax.f32 %v3296_v32, 0.0  ;;  %8481 = vmatprep.mubr.msk.f32.mxu0 %vm2604_vm6, %v2547_v26  ;;  %v3748_v32 = vadd.s32 424, %v9973_v55  ;;  %v514_v13 = vrot.slane %v11929_v60, 1 }
 0x27b   :  { %v5671_v50 = vsel %vm11807_vm10, %v5543_v43, 0.0  ;;  %8482 = vmatmul.mubr.msk.f32.gmra.mrb[84].mxu0 %vm2604_vm6, %v2548_v1  ;;  %v711_v38 = vpop.permute.xlu1 %710  ;;  %vm11889_vm10 = vcmp.le.s32.totalorder %v4184_v40, %v9997_v21  ;;  %v11938_v1 = vld [vmem:[%s13924_s0 + $0x368] sm:$0xff]  ;;  %v1777_v26 = vsel %vm1562_vm2, %v1774_v3, %v1776_v24  ;;  %v1155_v3 = vsel %vm920_vm0, %v1152_v10, %v1154_v8 }
 0x27c   :  { %v5967_v46 = vsel %vm2204_vm3, %v5671_v50, -inf  ;;  %v5670_v52 = vsel %vm11823_vm13, %v5542_v37, 0.0  ;;  %v709_v58 = vpop.permute.xlu0 %708  ;;  %v5964_v6 = vrot.slane %v5963_v56, 1  ;;  %vm11901_vm13 = vcmp.le.s32.totalorder %v4177_v7, %v9997_v21 }
 0x27d   :  { %v5966_v19 = vsel %vm2204_vm3, %v5670_v52, -inf  ;;  %2030 = vrot.lane.b32.xlu1 %v1775_v36, %s8961_s30  ;;  %2028 = vrot.lane.b32.xlu0 %v1773_v35, %s8961_s30  ;;  %v2292_v23 = vsel %vm2204_vm3, %v8916_v17, %v711_v38  ;;  %v2291_v28 = vsel %vm2204_vm3, %v8917_v29, %v709_v58  ;;  %v3747_v35 = vadd.s32 416, %v9973_v55 }
 0x27e   :  { %v5968_v31 = vmax.f32 %v5966_v19, %v5967_v46  ;;  %v5965_v2 = vmax.f32 %v5963_v56, %v5964_v6  ;;  %v1137_v37 = vsel %vm920_vm0, %v1134_v33, %v1136_v16  ;;  %v496_v38 = vrot.slane %v11938_v1, 1 }
 0x27f   :  { %v1353_v54 = vpop.permute.xlu1 %1352  ;;  %v4198_v40 = vand.u32 15, %v3748_v32  ;;  %v1778_v19 = vrot.slane %v11844_v20, 3  ;;  %v4191_v33 = vand.u32 15, %v3747_v35  ;;  %v12123_v20 = vld [vmem:[%s13924_s0 + $0x378] sm:$0xff] }
 0x280   :  { %v1351_v14 = vpop.permute.xlu0 %1350  ;;  %v5969_v62 = vrot.slane %v5968_v31, 4  ;;  %v11917_v36 = vsel %vm6436_vm14, %v5965_v2, %v11803_v49  ;;  %v2421_v30 = vsel %vm2333_vm4, %v2292_v23, %v1353_v54  ;;  %v515_v54 = vsel %vm278_vm1, %v512_v18, %v514_v13  ;;  %v8918_v23 = vld [vmem:[%s13924_s0 + $0x2c8] sm:$0xff] }
 0x281   :  { %750 = vrot.lane.b32.xlu1 %v495_v9, %s8960_s25  ;;  %748 = vrot.lane.b32.xlu0 %v493_v41, %s8960_s25  ;;  %v2420_v49 = vsel %vm2333_vm4, %v2291_v28, %v1351_v14  ;;  %v1796_v9 = vrot.slane %v11865_v51, 3  ;;  %v1156_v14 = vrot.slane %v11929_v60, 2  ;;  %v497_v4 = vsel %vm278_vm1, %v494_v27, %v496_v38  ;;  %v8921_v51 = vld [vmem:[%s13924_s0 + $0x2d0] sm:$0xff] }
 0x282   :  { %v8432_v15 = vpop.f32.mrb[50].mxu0  ;;  %v5970_v0 = vmax.f32 %v5968_v31, %v5969_v62  ;;  %v1794_v31 = vrot.slane %v11853_v48, 3  ;;  %v8936_v48 = vld [vmem:[%s13924_s0 + $0x340] sm:$0xff] }
 0x283   :  { %v3311_v61 = vadd.f32 %v11389_v63, %v8432_v15  ;;  %v3305_v5 = vpop.f32.mrb[51].mxu0  ;;  %v1995_v25 = vpop.permute.xlu1 %1994  ;;  %v1157_v28 = vsel %vm920_vm0, %v1154_v8, %v1156_v14 }
 0x284   :  { %v3306_v11 = vadd.f32 %v11389_v63, %v3305_v5  ;;  %v2550_v59 = vsel %vm2462_vm5, %v2421_v30, %v1995_v25  ;;  %v1993_v39 = vpop.permute.xlu0 %1992  ;;  %v5971_v41 = vrot.slane %v5970_v0, 2  ;;  %v1797_v27 = vsel %vm1562_vm2, %v1794_v31, %v1796_v9  ;;  %v8919_v30 = vld [vmem:[%s13924_s0 + $0x2c0] sm:$0xff] }
 0x285   :  { %v5545_v22 = vmax.f32 %v3311_v61, 0.0  ;;  %v2549_v43 = vsel %vm2462_vm5, %v2420_v49, %v1993_v39  ;;  %768 = vrot.lane.b32.xlu1 %v513_v44, %s8960_s25  ;;  %1390 = vrot.lane.b32.xlu0 %v1135_v34, %s8959_s24  ;;  %v1779_v34 = vsel %vm1562_vm2, %v1776_v24, %v1778_v19  ;;  %v12016_v39 = vld [vmem:[%s13924_s0 + $0x370] sm:$0xff] }
 0x286   :  { %v5544_v56 = vmax.f32 %v3306_v11, 0.0  ;;  %8484 = vmatprep.mubr.msk.f32.mxu0 %vm2604_vm6, %v2549_v43  ;;  %v5972_v24 = vmax.f32 %v5970_v0, %v5971_v41 }
 0x287   :  { %v5673_v50 = vsel %vm11889_vm10, %v5545_v22, 0.0  ;;  %8485 = vmatmul.mubr.msk.f32.gmra.mrb[86].mxu0 %vm2604_vm6, %v2550_v59  ;;  %v715_v53 = vpop.permute.xlu1 %714  ;;  %vm11984_vm10 = vcmp.le.s32.totalorder %v4198_v40, %v9997_v21  ;;  %v1138_v59 = vrot.slane %v11938_v1, 2 }
 0x288   :  { %v5976_v46 = vsel %vm2204_vm3, %v5673_v50, -inf  ;;  %v5672_v52 = vsel %vm11901_vm13, %v5544_v56, 0.0  ;;  %v713_v58 = vpop.permute.xlu0 %712  ;;  %vm11990_vm13 = vcmp.le.s32.totalorder %v4191_v33, %v9997_v21  ;;  %v2294_v15 = vsel %vm2204_vm3, %v8918_v23, %v715_v53  ;;  %v12029_v50 = vld [vmem:[%s13924_s0 + $0x3b8] sm:$0xff] }
 0x289   :  { %v5975_v7 = vsel %vm2204_vm3, %v5672_v52, -inf  ;;  %2032 = vrot.lane.b32.xlu1 %v1777_v26, %s8961_s30  ;;  %1392 = vrot.lane.b32.xlu0 %v1137_v37, %s8959_s24  ;;  %v2293_v61 = vsel %vm2204_vm3, %v8919_v30, %v713_v58  ;;  %v3750_v56 = vadd.s32 440, %v9973_v55  ;;  %v3749_v37 = vadd.s32 432, %v9973_v55 }
 0x28a   :  { %v5977_v6 = vmax.f32 %v5975_v7, %v5976_v46  ;;  %v498_v46 = vrot.slane %v12016_v39, 1  ;;  %v1139_v40 = vsel %vm920_vm0, %v1136_v16, %v1138_v59  ;;  %v1780_v30 = vrot.slane %v11938_v1, 3 }
 0x28b   :  { %v1357_v47 = vpop.permute.xlu1 %1356 }
 0x28c   :  { %v5978_v44 = vrot.slane %v5977_v6, 4  ;;  %v1355_v2 = vpop.permute.xlu0 %1354  ;;  %v2423_v5 = vsel %vm2333_vm4, %v2294_v15, %v1357_v47  ;;  %v499_v62 = vsel %vm278_vm1, %v496_v38, %v498_v46 }
 0x28d   :  { %1410 = vrot.lane.b32.xlu1 %v1155_v3, %s8959_s24  ;;  %770 = vrot.lane.b32.xlu0 %v515_v54, %s8960_s25  ;;  %v2422_v32 = vsel %vm2333_vm4, %v2293_v61, %v1355_v2  ;;  %v516_v54 = vrot.slane %v12029_v50, 1  ;;  %v4205_v2 = vand.u32 15, %v3749_v37 }
 0x28e   :  { %v5979_v17 = vmax.f32 %v5977_v6, %v5978_v44  ;;  %v8435_v29 = vpop.f32.mrb[52].mxu0  ;;  %v4212_v44 = vand.u32 15, %v3750_v56 }
 0x28f   :  { %v3321_v25 = vadd.f32 %v11389_v63, %v8435_v29  ;;  %v3315_v49 = vpop.f32.mrb[53].mxu0  ;;  %v1999_v11 = vpop.permute.xlu1 %1998  ;;  %v12065_v29 = vld [vmem:[%s13924_s0 + $0x3c0] sm:$0xff] }
 0x290   :  { %v5980_v8 = vrot.slane %v5979_v17, 2  ;;  %v3316_v22 = vadd.f32 %v11389_v63, %v3315_v49  ;;  %v2552_v43 = vsel %vm2462_vm5, %v2423_v5, %v1999_v11  ;;  %v1997_v26 = vpop.permute.xlu0 %1996  ;;  %v5973_v63 = vrot.slane %v5972_v24, 1  ;;  %v8920_v5 = vld [vmem:[%s13924_s0 + $0x2d8] sm:$0xff] }
 0x291   :  { %v5547_v35 = vmax.f32 %v3321_v25, 0.0  ;;  %v2551_v0 = vsel %vm2462_vm5, %v2422_v32, %v1997_v26  ;;  %752 = vrot.lane.b32.xlu1 %v497_v4, %s8960_s25  ;;  %2034 = vrot.lane.b32.xlu0 %v1779_v34, %s8961_s30  ;;  %v1798_v4 = vrot.slane %v11929_v60, 3  ;;  %v1140_v11 = vrot.slane %v12016_v39, 2 }
 0x292   :  { %v5981_v53 = vmax.f32 %v5979_v17, %v5980_v8  ;;  %v5546_v3 = vmax.f32 %v3316_v22, 0.0  ;;  %8487 = vmatprep.mubr.msk.f32.mxu0 %vm2604_vm6, %v2551_v0  ;;  %v5974_v16 = vmax.f32 %v5972_v24, %v5973_v63  ;;  %v517_v24 = vsel %vm278_vm1, %v514_v13, %v516_v54  ;;  %v12099_v22 = vld [vmem:[%s13925_s2 + $0x40] ss:$0 sm:$0xff] }
 0x293   :  { %v5675_v52 = vsel %vm11984_vm10, %v5547_v35, 0.0  ;;  %8488 = vmatmul.mubr.msk.f32.gmra.mrb[88].mxu0 %vm2604_vm6, %v2552_v43  ;;  %v719_v58 = vpop.permute.xlu1 %718  ;;  %vm12069_vm10 = vcmp.le.s32.totalorder %v4212_v44, %v9997_v21  ;;  %v1799_v13 = vsel %vm1562_vm2, %v1796_v9, %v1798_v4  ;;  %v1158_v8 = vrot.slane %v12029_v50, 2 }
 0x294   :  { %v5982_v7 = vrot.slane %v5981_v53, 1  ;;  %v5985_v33 = vsel %vm2204_vm3, %v5675_v52, -inf  ;;  %v5674_v41 = vsel %vm11990_vm13, %v5546_v3, 0.0  ;;  %v717_v6 = vpop.permute.xlu0 %716  ;;  %vm12075_vm13 = vcmp.le.s32.totalorder %v4205_v2, %v9997_v21 }
 0x295   :  { %v5984_v47 = vsel %vm2204_vm3, %v5674_v41, -inf  ;;  %2052 = vrot.lane.b32.xlu1 %v1797_v27, %s8961_s30  ;;  %1412 = vrot.lane.b32.xlu0 %v1157_v28, %s8959_s24  ;;  %v2296_v25 = vsel %vm2204_vm3, %v8920_v5, %v719_v58  ;;  %v2295_v9 = vsel %vm2204_vm3, %v8921_v51, %v717_v6  ;;  %v518_v0 = vrot.slane %v12065_v29, 1 }
 0x296   :  { %v5983_v34 = vmax.f32 %v5981_v53, %v5982_v7  ;;  %v5986_v18 = vmax.f32 %v5984_v47, %v5985_v33  ;;  %v3752_v7 = vadd.s32 456, %v9973_v55  ;;  %v1141_v6 = vsel %vm920_vm0, %v1138_v59, %v1140_v11 }
 0x297   :  { %v1361_v17 = vpop.permute.xlu1 %1360  ;;  %v3751_v47 = vadd.s32 448, %v9973_v55  ;;  %v1159_v1 = vsel %vm920_vm0, %v1156_v14, %v1158_v8  ;;  %v1800_v28 = vrot.slane %v12029_v50, 3  ;;  %v8926_v50 = vld [vmem:[%s13924_s0 + $0x2f0] sm:$0xff] }
 0x298   :  { %v12055_v23 = vsel %vm6424_vm15, %v5983_v34, %v5974_v16  ;;  %v5987_v27 = vrot.slane %v5986_v18, 4  ;;  %v1359_v15 = vpop.permute.xlu0 %1358  ;;  %v2425_v32 = vsel %vm2333_vm4, %v2296_v25, %v1361_v17  ;;  %v4226_v14 = vand.u32 15, %v3752_v7 }
 0x299   :  { %1394 = vrot.lane.b32.xlu1 %v1139_v40, %s8959_s24  ;;  %754 = vrot.lane.b32.xlu0 %v499_v62, %s8960_s25  ;;  %v2424_v37 = vsel %vm2333_vm4, %v2295_v9, %v1359_v15  ;;  %v1781_v40 = vsel %vm1562_vm2, %v1778_v19, %v1780_v30  ;;  %v500_v17 = vrot.slane %v12123_v20, 1  ;;  %v4219_v38 = vand.u32 15, %v3751_v47 }
 0x29a   :  { %v5988_v61 = vmax.f32 %v5986_v18, %v5987_v27  ;;  %v8438_v49 = vpop.f32.mrb[54].mxu0  ;;  %v519_v18 = vsel %vm278_vm1, %v516_v54, %v518_v0  ;;  %v1782_v27 = vrot.slane %v12016_v39, 3  ;;  %v3753_v47 = vadd.s32 464, %v9973_v55 }
 0x29b   :  { %v3331_v43 = vadd.f32 %v12099_v22, %v8438_v49  ;;  %v3325_v26 = vpop.f32.mrb[55].mxu0  ;;  %v2003_v35 = vpop.permute.xlu1 %2002  ;;  %v501_v51 = vsel %vm278_vm1, %v498_v46, %v500_v17  ;;  %v1801_v46 = vsel %vm1562_vm2, %v1798_v4, %v1800_v28  ;;  %v12193_v4 = vld [vmem:[%s13924_s0 + $0x380] sm:$0xff] }
 0x29c   :  { %v5989_v56 = vrot.slane %v5988_v61, 2  ;;  %v3326_v63 = vadd.f32 %v12099_v22, %v3325_v26  ;;  %v2554_v53 = vsel %vm2462_vm5, %v2425_v32, %v2003_v35  ;;  %v2001_v3 = vpop.permute.xlu0 %2000  ;;  %v1783_v9 = vsel %vm1562_vm2, %v1780_v30, %v1782_v27  ;;  %v8923_v32 = vld [vmem:[%s13924_s0 + $0x2e8] sm:$0xff]  ;;  %v8924_v30 = vld [vmem:[%s13924_s0 + $0x2e0] sm:$0xff] }
 0x29d   :  { %v5549_v52 = vmax.f32 %v3331_v43, 0.0  ;;  %v2553_v58 = vsel %vm2462_vm5, %v2424_v37, %v2001_v3  ;;  %772 = vrot.lane.b32.xlu1 %v517_v24, %s8960_s25  ;;  %2054 = vrot.lane.b32.xlu0 %v1799_v13, %s8961_s30 }
 0x29e   :  { %v5990_v33 = vmax.f32 %v5988_v61, %v5989_v56  ;;  %v5548_v41 = vmax.f32 %v3326_v63, 0.0  ;;  %8490 = vmatprep.mubr.msk.f32.mxu0 %vm2604_vm6, %v2553_v58  ;;  %v1160_v61 = vrot.slane %v12065_v29, 2 }
 0x29f   :  { %v5677_v19 = vsel %vm12069_vm10, %v5549_v52, 0.0  ;;  %8491 = vmatmul.mubr.msk.f32.gmra.mrb[90].mxu0 %vm2604_vm6, %v2554_v53  ;;  %v723_v44 = vpop.permute.xlu1 %722  ;;  %vm12152_vm10 = vcmp.le.s32.totalorder %v4226_v14, %v9997_v21 }
 0x2a0   :  { %v5991_v59 = vrot.slane %v5990_v33, 1  ;;  %v5994_v2 = vsel %vm2204_vm3, %v5677_v19, -inf  ;;  %v5676_v16 = vsel %vm12075_vm13, %v5548_v41, 0.0  ;;  %v721_v34 = vpop.permute.xlu0 %720  ;;  %v2298_v43 = vsel %vm2204_vm3, %v8923_v32, %v723_v44  ;;  %v12206_v19 = vld [vmem:[%s13924_s0 + $0x3c8] sm:$0xff] }
 0x2a1   :  { %v5993_v62 = vsel %vm2204_vm3, %v5676_v16, -inf  ;;  %2036 = vrot.lane.b32.xlu1 %v1781_v40, %s8961_s30  ;;  %1396 = vrot.lane.b32.xlu0 %v1141_v6, %s8959_s24  ;;  %vm12170_vm13 = vcmp.le.s32.totalorder %v4219_v38, %v9997_v21  ;;  %v2297_v56 = vsel %vm2204_vm3, %v8924_v30, %v721_v34  ;;  %v1161_v60 = vsel %vm920_vm0, %v1158_v8, %v1160_v61 }
 0x2a2   :  { %v5992_v15 = vmax.f32 %v5990_v33, %v5991_v59  ;;  %v5995_v24 = vmax.f32 %v5993_v62, %v5994_v2  ;;  %v3754_v8 = vadd.s32 472, %v9973_v55  ;;  %v1142_v59 = vrot.slane %v12123_v20, 2 }
 0x2a3   :  { %v1365_v13 = vpop.permute.xlu1 %1364  ;;  %v502_v2 = vrot.slane %v12193_v4, 1 }
 0x2a4   :  { %v5996_v54 = vrot.slane %v5995_v24, 4  ;;  %v1363_v5 = vpop.permute.xlu0 %1362  ;;  %v6453_v25 = vsel %vm6426_vm9, %v5992_v15, %v12055_v23  ;;  %v2427_v37 = vsel %vm2333_vm4, %v2298_v43, %v1365_v13  ;;  %v4240_v13 = vand.u32 15, %v3754_v8 }
 0x2a5   :  { %1414 = vrot.lane.b32.xlu1 %v1159_v1, %s8959_s24  ;;  %774 = vrot.lane.b32.xlu0 %v519_v18, %s8960_s25  ;;  %v2426_v58 = vsel %vm2333_vm4, %v2297_v56, %v1363_v5  ;;  %v1802_v5 = vrot.slane %v12065_v29, 3 }
 0x2a6   :  { %v5997_v23 = vmax.f32 %v5995_v24, %v5996_v54  ;;  %v8441_v26 = vpop.f32.mrb[56].mxu0  ;;  %v520_v24 = vrot.slane %v12206_v19, 1  ;;  %v4233_v54 = vand.u32 15, %v3753_v47 }
 0x2a7   :  { %v3341_v63 = vadd.f32 %v12099_v22, %v8441_v26  ;;  %v3335_v53 = vpop.f32.mrb[57].mxu0  ;;  %v2007_v3 = vpop.permute.xlu1 %2006 }
 0x2a8   :  { %v5998_v52 = vrot.slane %v5997_v23, 2  ;;  %v3336_v40 = vadd.f32 %v12099_v22, %v3335_v53  ;;  %v2556_v7 = vsel %vm2462_vm5, %v2427_v37, %v2007_v3  ;;  %v2005_v33 = vpop.permute.xlu0 %2004  ;;  %v521_v35 = vsel %vm278_vm1, %v518_v0, %v520_v24  ;;  %v8925_v37 = vld [vmem:[%s13924_s0 + $0x2f8] sm:$0xff] }
 0x2a9   :  { %v5551_v41 = vmax.f32 %v3341_v63, 0.0  ;;  %v2555_v6 = vsel %vm2462_vm5, %v2426_v58, %v2005_v33  ;;  %756 = vrot.lane.b32.xlu1 %v501_v51, %s8960_s25  ;;  %2038 = vrot.lane.b32.xlu0 %v1783_v9, %s8961_s30  ;;  %v1143_v9 = vsel %vm920_vm0, %v1140_v11, %v1142_v59  ;;  %v1803_v0 = vsel %vm1562_vm2, %v1800_v28, %v1802_v5 }
 0x2aa   :  { %v5999_v44 = vmax.f32 %v5997_v23, %v5998_v52  ;;  %v5550_v1 = vmax.f32 %v3336_v40, 0.0  ;;  %8493 = vmatprep.mubr.msk.f32.mxu0 %vm2604_vm6, %v2555_v6  ;;  %v503_v23 = vsel %vm278_vm1, %v500_v17, %v502_v2  ;;  %v1144_v3 = vrot.slane %v12193_v4, 2 }
 0x2ab   :  { %v5679_v16 = vsel %vm12152_vm10, %v5551_v41, 0.0  ;;  %8494 = vmatmul.mubr.msk.f32.gmra.mrb[92].mxu0 %vm2604_vm6, %v2556_v7  ;;  %v727_v34 = vpop.permute.xlu1 %726  ;;  %vm12241_vm10 = vcmp.le.s32.totalorder %v4240_v13, %v9997_v21  ;;  %v1804_v17 = vrot.slane %v12206_v19, 3 }
 0x2ac   :  { %v6000_v18 = vrot.slane %v5999_v44, 1  ;;  %v6003_v62 = vsel %vm2204_vm3, %v5679_v16, -inf  ;;  %v5678_v14 = vsel %vm12170_vm13, %v5550_v1, 0.0  ;;  %v725_v15 = vpop.permute.xlu0 %724  ;;  %vm12247_vm13 = vcmp.le.s32.totalorder %v4233_v54, %v9997_v21 }
 0x2ad   :  { %v6002_v38 = vsel %vm2204_vm3, %v5678_v14, -inf  ;;  %2056 = vrot.lane.b32.xlu1 %v1801_v46, %s8961_s30  ;;  %1416 = vrot.lane.b32.xlu0 %v1161_v60, %s8959_s24  ;;  %v12236_v46 = vld [vmem:[%s13924_s0 + $0x3d0] sm:$0xff]  ;;  %v2300_v63 = vsel %vm2204_vm3, %v8925_v37, %v727_v34  ;;  %v1162_v60 = vrot.slane %v12206_v19, 2  ;;  %v2299_v28 = vsel %vm2204_vm3, %v8926_v50, %v725_v15 }
 0x2ae   :  { %v6001_v49 = vmax.f32 %v5999_v44, %v6000_v18  ;;  %v6004_v51 = vmax.f32 %v6002_v38, %v6003_v62  ;;  %v522_v7 = vrot.slane %v12236_v46, 1  ;;  %v3756_v34 = vadd.s32 488, %v9973_v55  ;;  %v12288_v38 = vld [vmem:[%s13924_s0 + $0x388] sm:$0xff] }
 0x2af   :  { %v1369_v32 = vpop.permute.xlu1 %1368  ;;  %v1145_v14 = vsel %vm920_vm0, %v1142_v59, %v1144_v3  ;;  %v3755_v15 = vadd.s32 480, %v9973_v55  ;;  %v1163_v13 = vsel %vm920_vm0, %v1160_v61, %v1162_v60  ;;  %v504_v61 = vrot.slane %v12288_v38, 1 }
 0x2b0   :  { %v6005_v43 = vrot.slane %v6004_v51, 4  ;;  %v1367_v26 = vpop.permute.xlu0 %1366  ;;  %v6454_v11 = vsel %vm6428_vm12, %v6001_v49, %v6453_v25  ;;  %v1784_v25 = vrot.slane %v12123_v20, 3  ;;  %v2429_v20 = vsel %vm2333_vm4, %v2300_v63, %v1369_v32 }
 0x2b1   :  { %1398 = vrot.lane.b32.xlu1 %v1143_v9, %s8959_s24  ;;  %758 = vrot.lane.b32.xlu0 %v503_v23, %s8960_s25  ;;  %v2428_v41 = vsel %vm2333_vm4, %v2299_v28, %v1367_v26  ;;  %v523_v9 = vsel %vm278_vm1, %v520_v24, %v522_v7  ;;  %v4254_v32 = vand.u32 15, %v3756_v34  ;;  %v4247_v30 = vand.u32 15, %v3755_v15 }
 0x2b2   :  { %v6006_v56 = vmax.f32 %v6004_v51, %v6005_v43  ;;  %v8444_v53 = vpop.f32.mrb[58].mxu0  ;;  %v1785_v16 = vsel %vm1562_vm2, %v1782_v27, %v1784_v25  ;;  %v1786_v43 = vrot.slane %v12193_v4, 3  ;;  %v1164_v28 = vrot.slane %v12236_v46, 2 }
 0x2b3   :  { %v3351_v52 = vadd.f32 %v12099_v22, %v8444_v53  ;;  %v3345_v58 = vpop.f32.mrb[59].mxu0  ;;  %v2011_v40 = vpop.permute.xlu1 %2010  ;;  %v505_v53 = vsel %vm278_vm1, %v502_v2, %v504_v61  ;;  %v1805_v2 = vsel %vm1562_vm2, %v1802_v5, %v1804_v17  ;;  %v1146_v29 = vrot.slane %v12288_v38, 2 }
 0x2b4   :  { %v6007_v33 = vrot.slane %v6006_v56, 2  ;;  %v3346_v6 = vadd.f32 %v12099_v22, %v3345_v58  ;;  %v2558_v8 = vsel %vm2462_vm5, %v2429_v20, %v2011_v40  ;;  %v2009_v47 = vpop.permute.xlu0 %2008  ;;  %v1787_v50 = vsel %vm1562_vm2, %v1784_v25, %v1786_v43  ;;  %v8927_v20 = vld [vmem:[%s13924_s0 + $0x308] sm:$0xff]  ;;  %v12342_v25 = vld [vmem:[%s13924_s0 + $0x390] sm:$0xff] }
 0x2b5   :  { %v5553_v44 = vmax.f32 %v3351_v52, 0.0  ;;  %v2557_v1 = vsel %vm2462_vm5, %v2428_v41, %v2009_v47  ;;  %776 = vrot.lane.b32.xlu1 %v521_v35, %s8960_s25  ;;  %2058 = vrot.lane.b32.xlu0 %v1803_v0, %s8961_s30  ;;  %v1165_v15 = vsel %vm920_vm0, %v1162_v60, %v1164_v28 }
 0x2b6   :  { %v6008_v18 = vmax.f32 %v6006_v56, %v6007_v33  ;;  %v5552_v62 = vmax.f32 %v3346_v6, 0.0  ;;  %8496 = vmatprep.mubr.msk.f32.mxu0 %vm2604_vm6, %v2557_v1  ;;  %v8928_v33 = vld [vmem:[%s13924_s0 + $0x300] sm:$0xff] }
 0x2b7   :  { %v5681_v39 = vsel %vm12241_vm10, %v5553_v44, 0.0  ;;  %8497 = vmatmul.mubr.msk.f32.gmra.mrb[94].mxu0 %vm2604_vm6, %v2558_v8  ;;  %v731_v27 = vpop.permute.xlu1 %730  ;;  %vm12313_vm10 = vcmp.le.s32.totalorder %v4254_v32, %v9997_v21 }
 0x2b8   :  { %v6009_v59 = vrot.slane %v6008_v18, 1  ;;  %v6012_v54 = vsel %vm2204_vm3, %v5681_v39, -inf  ;;  %v5680_v49 = vsel %vm12247_vm13, %v5552_v62, 0.0  ;;  %v729_v51 = vpop.permute.xlu0 %728  ;;  %v2302_v52 = vsel %vm2204_vm3, %v8927_v20, %v731_v27 }
 0x2b9   :  { %v6011_v23 = vsel %vm2204_vm3, %v5680_v49, -inf  ;;  %2040 = vrot.lane.b32.xlu1 %v1785_v16, %s8961_s30  ;;  %1400 = vrot.lane.b32.xlu0 %v1145_v14, %s8959_s24  ;;  %vm12330_vm13 = vcmp.le.s32.totalorder %v4247_v30, %v9997_v21  ;;  %v2301_v41 = vsel %vm2204_vm3, %v8928_v33, %v729_v51  ;;  %v506_v39 = vrot.slane %v12342_v25, 1  ;;  %v12369_v49 = vld [vmem:[%s13924_s0 + $0x3d8] sm:$0xff] }
 0x2ba   :  { %v6010_v26 = vmax.f32 %v6008_v18, %v6009_v59  ;;  %v6013_v35 = vmax.f32 %v6011_v23, %v6012_v54  ;;  %v3758_v59 = vadd.s32 504, %v9973_v55  ;;  %v3757_v54 = vadd.s32 496, %v9973_v55 }
 0x2bb   :  { %v1373_v0 = vpop.permute.xlu1 %1372  ;;  %v1148_v33 = vrot.slane %v12342_v25, 2 }
 0x2bc   :  { %v6014_v56 = vrot.slane %v6013_v35, 4  ;;  %v1371_v37 = vpop.permute.xlu0 %1370  ;;  %v6455_v24 = vsel %vm6430_vm7, %v6010_v26, %v6454_v11  ;;  %v2431_v6 = vsel %vm2333_vm4, %v2302_v52, %v1373_v0  ;;  %v507_v0 = vsel %vm278_vm1, %v504_v61, %v506_v39 }
 0x2bd   :  { %1418 = vrot.lane.b32.xlu1 %v1163_v13, %s8959_s24  ;;  %778 = vrot.lane.b32.xlu0 %v523_v9, %s8960_s25  ;;  %v2430_v1 = vsel %vm2333_vm4, %v2301_v41, %v1371_v37  ;;  %v1806_v37 = vrot.slane %v12236_v46, 3  ;;  %v1149_v4 = vsel %vm920_vm0, %v1146_v29, %v1148_v33  ;;  %v12532_v46 = vld [vmem:[%s13924_s0 + $0x3e8] sm:$0xff] }
 0x2be   :  { %v6015_v11 = vmax.f32 %v6013_v35, %v6014_v56  ;;  %v8447_v58 = vpop.f32.mrb[60].mxu0  ;;  %v1147_v35 = vsel %vm920_vm0, %v1144_v3, %v1146_v29  ;;  %v524_v56 = vrot.slane %v12369_v49, 1  ;;  %v1788_v3 = vrot.slane %v12288_v38, 3  ;;  %v8932_v38 = vld [vmem:[%s13924_s0 + $0x320] sm:$0xff] }
 0x2bf   :  { %v3361_v8 = vadd.f32 %v12099_v22, %v8447_v58  ;;  %v3355_v47 = vpop.f32.mrb[61].mxu0  ;;  %v2015_v44 = vpop.permute.xlu1 %2014 }
 0x2c0   :  { %v6016_v5 = vrot.slane %v6015_v11, 2  ;;  %v3356_v16 = vadd.f32 %v12099_v22, %v3355_v47  ;;  %v2560_v34 = vsel %vm2462_vm5, %v2431_v6, %v2015_v44  ;;  %v2013_v18 = vpop.permute.xlu0 %2012  ;;  %v525_v61 = vsel %vm278_vm1, %v522_v7, %v524_v56  ;;  %v8930_v7 = vld [vmem:[%s13924_s0 + $0x310] sm:$0xff] }
 0x2c1   :  { %v5555_v62 = vmax.f32 %v3361_v8, 0.0  ;;  %v2559_v14 = vsel %vm2462_vm5, %v2430_v1, %v2013_v18  ;;  %760 = vrot.lane.b32.xlu1 %v505_v53, %s8960_s25  ;;  %2042 = vrot.lane.b32.xlu0 %v1787_v50, %s8961_s30  ;;  %v4268_v50 = vand.u32 15, %v3758_v59  ;;  %v12433_v18 = vld [vmem:[%s13924_s0 + $0x3e0] sm:$0xff] }
 0x2c2   :  { %v6017_v27 = vmax.f32 %v6015_v11, %v6016_v5  ;;  %v5554_v13 = vmax.f32 %v3356_v16, 0.0  ;;  %8499 = vmatprep.mubr.msk.f32.mxu0 %vm2604_vm6, %v2559_v14  ;;  %v4261_v11 = vand.u32 15, %v3757_v54 }
 0x2c3   :  { %v5683_v51 = vsel %vm12313_vm10, %v5555_v62, 0.0  ;;  %8500 = vmatmul.mubr.msk.f32.gmra.mrb[96].mxu0 %vm2604_vm6, %v2560_v34  ;;  %v735_v60 = vpop.permute.xlu1 %734  ;;  %vm12410_vm10 = vcmp.le.s32.totalorder %v4268_v50, %v9997_v21  ;;  %v1789_v34 = vsel %vm1562_vm2, %v1786_v43, %v1788_v3  ;;  %v1166_v43 = vrot.slane %v12369_v49, 2 }
 0x2c4   :  { %v6018_v9 = vrot.slane %v6017_v27, 1  ;;  %v6021_v23 = vsel %vm2204_vm3, %v5683_v51, -inf  ;;  %v5682_v32 = vsel %vm12330_vm13, %v5554_v13, 0.0  ;;  %v733_v26 = vpop.permute.xlu0 %732  ;;  %vm12415_vm13 = vcmp.le.s32.totalorder %v4261_v11, %v9997_v21 }
 0x2c5   :  { %v6020_v30 = vsel %vm2204_vm3, %v5682_v32, -inf  ;;  %2060 = vrot.lane.b32.xlu1 %v1805_v2, %s8961_s30  ;;  %1420 = vrot.lane.b32.xlu0 %v1165_v15, %s8959_s24  ;;  %v1807_v2 = vsel %vm1562_vm2, %v1804_v17, %v1806_v37  ;;  %v2303_v17 = vsel %vm2204_vm3, %v8930_v7, %v733_v26  ;;  %v12453_v32 = vld [vmem:[%s13924_s0 + $0x398] sm:$0xff]  ;;  %v1167_v11 = vsel %vm920_vm0, %v1164_v28, %v1166_v43 }
 0x2c6   :  { %v6019_v63 = vmax.f32 %v6017_v27, %v6018_v9  ;;  %v6022_v53 = vmax.f32 %v6020_v30, %v6021_v23  ;;  %v3760_v9 = vadd.s32 520, %v9973_v55  ;;  %v526_v23 = vrot.slane %v12433_v18, 1 }
 0x2c7   :  { %v1377_v20 = vpop.permute.xlu1 %1376  ;;  %v1808_v7 = vrot.slane %v12369_v49, 3  ;;  %v12589_v49 = vld [vmem:[%s13924_s0 + $0x3f0] sm:$0xff] }
 0x2c8   :  { %v6023_v52 = vrot.slane %v6022_v53, 4  ;;  %v1375_v58 = vpop.permute.xlu0 %1374  ;;  %v6456_v40 = vsel %vm6432_vm11, %v6019_v63, %v6455_v24  ;;  %v8929_v24 = vld [vmem:[%s13924_s0 + $0x318] sm:$0xff] }
 0x2c9   :  { %1402 = vrot.lane.b32.xlu1 %v1147_v35, %s8959_s24  ;;  %762 = vrot.lane.b32.xlu0 %v507_v0, %s8960_s25  ;;  %v2304_v6 = vsel %vm2204_vm3, %v8929_v24, %v735_v60  ;;  %v2432_v14 = vsel %vm2333_vm4, %v2303_v17, %v1375_v58  ;;  %v3759_v35 = vadd.s32 512, %v9973_v55 }
 0x2ca   :  { %v6024_v41 = vmax.f32 %v6022_v53, %v6023_v52  ;;  %v8450_v8 = vpop.f32.mrb[62].mxu0  ;;  %v2433_v44 = vsel %vm2333_vm4, %v2304_v6, %v1377_v20  ;;  %v508_v20 = vrot.slane %v12453_v32, 1  ;;  %v1790_v52 = vrot.slane %v12342_v25, 3 }
 0x2cb   :  { %v3371_v5 = vadd.f32 %v12099_v22, %v8450_v8  ;;  %v3365_v1 = vpop.f32.mrb[63].mxu0  ;;  %v2019_v16 = vpop.permute.xlu1 %2018  ;;  %v4275_v6 = vand.u32 15, %v3759_v35  ;;  %v1170_v25 = vrot.slane %v12532_v46, 2 }
 0x2cc   :  { %v6025_v62 = vrot.slane %v6024_v41, 2  ;;  %v3366_v15 = vadd.f32 %v12099_v22, %v3365_v1  ;;  %v2562_v27 = vsel %vm2462_vm5, %v2433_v44, %v2019_v16  ;;  %v2017_v13 = vpop.permute.xlu0 %2016  ;;  %v509_v28 = vsel %vm278_vm1, %v506_v39, %v508_v20 }
 0x2cd   :  { %v5557_v59 = vmax.f32 %v3371_v5, 0.0  ;;  %v2561_v54 = vsel %vm2462_vm5, %v2432_v14, %v2017_v13  ;;  %780 = vrot.lane.b32.xlu1 %v525_v61, %s8960_s25  ;;  %2062 = vrot.lane.b32.xlu0 %v1807_v2, %s8961_s30  ;;  %v4282_v61 = vand.u32 15, %v3760_v9  ;;  %v527_v2 = vsel %vm278_vm1, %v524_v56, %v526_v23 }
 0x2ce   :  { %v6026_v51 = vmax.f32 %v6024_v41, %v6025_v62  ;;  %v5556_v60 = vmax.f32 %v3366_v15, 0.0  ;;  %8502 = vmatprep.mubr.msk.f32.mxu0 %vm2604_vm6, %v2561_v54  ;;  %v1791_v56 = vsel %vm1562_vm2, %v1788_v3, %v1790_v52  ;;  %v1168_v39 = vrot.slane %v12433_v18, 2 }
 0x2cf   :  { %v5685_v26 = vsel %vm12410_vm10, %v5557_v59, 0.0  ;;  %8503 = vmatmul.mubr.msk.f32.gmra.mrb[98].mxu0 %vm2604_vm6, %v2562_v27  ;;  %v739_v29 = vpop.permute.xlu1 %738  ;;  %vm12494_vm10 = vcmp.le.s32.totalorder %v4282_v61, %v9997_v21  ;;  %v1809_v9 = vsel %vm1562_vm2, %v1806_v37, %v1808_v7 }
 0x2d0   :  { %v6027_v30 = vrot.slane %v6026_v51, 1  ;;  %v6030_v0 = vsel %vm2204_vm3, %v5685_v26, -inf  ;;  %v5684_v63 = vsel %vm12415_vm13, %v5556_v60, 0.0  ;;  %v737_v53 = vpop.permute.xlu0 %736  ;;  %vm12506_vm13 = vcmp.le.s32.totalorder %v4275_v6, %v9997_v21 }
 0x2d1   :  { %v6029_v50 = vsel %vm2204_vm3, %v5684_v63, -inf  ;;  %2044 = vrot.lane.b32.xlu1 %v1789_v34, %s8961_s30  ;;  %1404 = vrot.lane.b32.xlu0 %v1149_v4, %s8959_s24  ;;  %v2305_v3 = vsel %vm2204_vm3, %v8932_v38, %v737_v53  ;;  %v1150_v26 = vrot.slane %v12453_v32, 2  ;;  %v3761_v53 = vadd.s32 528, %v9973_v55 }
 0x2d2   :  { %v6031_v58 = vmax.f32 %v6029_v50, %v6030_v0  ;;  %v6028_v41 = vmax.f32 %v6026_v51, %v6027_v30  ;;  %v1169_v30 = vsel %vm920_vm0, %v1166_v43, %v1168_v39  ;;  %v3762_v0 = vadd.s32 536, %v9973_v55 }
 0x2d3   :  { %v1381_v24 = vpop.permute.xlu1 %1380 }
 0x2d4   :  { %v6032_v8 = vrot.slane %v6031_v58, 4  ;;  %v1379_v47 = vpop.permute.xlu0 %1378  ;;  %v6457_v19 = vsel %vm6434_vm8, %v6028_v41, %v6456_v40  ;;  %v8931_v40 = vld [vmem:[%s13924_s0 + $0x328] sm:$0xff]  ;;  %v511_v41 = vsel %vm278_vm1, %v508_v20, %v510_v42  ;;  %v8933_v20 = vld [vmem:[%s13924_s0 + $0x338] sm:$0xff] }
 0x2d5   :  { %1422 = vrot.lane.b32.xlu1 %v1167_v11, %s8959_s24  ;;  %782 = vrot.lane.b32.xlu0 %v527_v2, %s8960_s25  ;;  %v2306_v44 = vsel %vm2204_vm3, %v8931_v40, %v739_v29  ;;  %v2434_v13 = vsel %vm2333_vm4, %v2305_v3, %v1379_v47  ;;  %v1151_v2 = vsel %vm920_vm0, %v1148_v33, %v1150_v26  ;;  %v1810_v47 = vrot.slane %v12433_v18, 3 }
 0x2d6   :  { %v6033_v17 = vmax.f32 %v6031_v58, %v6032_v8  ;;  %v8453_v5 = vpop.f32.mrb[64].mxu0  ;;  %v2435_v16 = vsel %vm2333_vm4, %v2306_v44, %v1381_v24  ;;  %v528_v24 = vrot.slane %v12532_v46, 1  ;;  %v4296_v8 = vand.u32 15, %v3762_v0 }
 0x2d7   :  { %v3381_v34 = vadd.f32 %v12099_v22, %v8453_v5  ;;  %v3375_v62 = vpop.f32.mrb[65].mxu0  ;;  %v2023_v15 = vpop.permute.xlu1 %2022  ;;  %v1792_v44 = vrot.slane %v12453_v32, 3 }
 0x2d8   :  { %v6034_v27 = vrot.slane %v6033_v17, 2  ;;  %v3376_v59 = vadd.f32 %v12099_v22, %v3375_v62  ;;  %v2564_v54 = vsel %vm2462_vm5, %v2435_v16, %v2023_v15  ;;  %v2021_v4 = vpop.permute.xlu0 %2020  ;;  %v529_v42 = vsel %vm278_vm1, %v526_v23, %v528_v24  ;;  %v8934_v23 = vld [vmem:[%s13924_s0 + $0x330] sm:$0xff] }
 0x2d9   :  { %v5559_v51 = vmax.f32 %v3381_v34, 0.0  ;;  %v2563_v60 = vsel %vm2462_vm5, %v2434_v13, %v2021_v4  ;;  %764 = vrot.lane.b32.xlu1 %v509_v28, %s8960_s25  ;;  %2046 = vrot.lane.b32.xlu0 %v1791_v56, %s8961_s30 }
 0x2da   :  { %v6035_v29 = vmax.f32 %v6033_v17, %v6034_v27  ;;  %v5558_v35 = vmax.f32 %v3376_v59, 0.0  ;;  %8505 = vmatprep.mubr.msk.f32.mxu0 %vm2604_vm6, %v2563_v60  ;;  %v4289_v17 = vand.u32 15, %v3761_v53  ;;  %v1153_v60 = vsel %vm920_vm0, %v1150_v26, %v1152_v10 }
 0x2db   :  { %v5687_v37 = vsel %vm12494_vm10, %v5559_v51, 0.0  ;;  %8506 = vmatmul.mubr.msk.f32.gmra.mrb[100].mxu0 %vm2604_vm6, %v2564_v54  ;;  %v743_v63 = vpop.permute.xlu1 %742  ;;  %vm12566_vm10 = vcmp.le.s32.totalorder %v4296_v8, %v9997_v21  ;;  %v1793_v54 = vsel %vm1562_vm2, %v1790_v52, %v1792_v44  ;;  %v530_v52 = vrot.slane %v12589_v49, 1 }
 0x2dc   :  { %v6039_v50 = vsel %vm2204_vm3, %v5687_v37, -inf  ;;  %v5686_v43 = vsel %vm12506_vm13, %v5558_v35, 0.0  ;;  %v741_v11 = vpop.permute.xlu0 %740  ;;  %v6036_v58 = vrot.slane %v6035_v29, 1  ;;  %v2308_v1 = vsel %vm2204_vm3, %v8933_v20, %v743_v63 }
 0x2dd   :  { %v6038_v61 = vsel %vm2204_vm3, %v5686_v43, -inf  ;;  %2064 = vrot.lane.b32.xlu1 %v1809_v9, %s8961_s30  ;;  %1424 = vrot.lane.b32.xlu0 %v1169_v30, %s8959_s24  ;;  %v2307_v3 = vsel %vm2204_vm3, %v8934_v23, %v741_v11  ;;  %vm12582_vm13 = vcmp.le.s32.totalorder %v4289_v17, %v9997_v21  ;;  %v3764_v9 = vadd.s32 552, %v9973_v55 }
 0x2de   :  { %v6040_v6 = vmax.f32 %v6038_v61, %v6039_v50  ;;  %v6037_v28 = vmax.f32 %v6035_v29, %v6036_v58  ;;  %v3763_v63 = vadd.s32 544, %v9973_v55  ;;  %v1172_v53 = vrot.slane %v12589_v49, 2 }
 0x2df   :  { %v1385_v56 = vpop.permute.xlu1 %1384  ;;  %v4310_v43 = vand.u32 15, %v3764_v9  ;;  %v1171_v61 = vsel %vm920_vm0, %v1168_v39, %v1170_v25  ;;  %v12635_v39 = vld [vmem:[%s13924_s0 + $0x400] sm:$0xff] }
 0x2e0   :  { %v1383_v40 = vpop.permute.xlu0 %1382  ;;  %v12554_v5 = vsel %vm6436_vm14, %v6037_v28, %v6457_v19  ;;  %v6041_v33 = vrot.slane %v6040_v6, 4  ;;  %v1811_v19 = vsel %vm1562_vm2, %v1808_v7, %v1810_v47  ;;  %v2437_v16 = vsel %vm2333_vm4, %v2308_v1, %v1385_v56 }
 0x2e1   :  { %1406 = vrot.lane.b32.xlu1 %v1151_v2, %s8959_s24  ;;  %766 = vrot.lane.b32.xlu0 %v511_v41, %s8960_s25  ;;  %v2436_v7 = vsel %vm2333_vm4, %v2307_v3, %v1383_v40  ;;  %v531_v2 = vsel %vm278_vm1, %v528_v24, %v530_v52  ;;  %v4303_v56 = vand.u32 15, %v3763_v63  ;;  %v1173_v17 = vsel %vm920_vm0, %v1170_v25, %v1172_v53  ;;  %v6327_v25 = vld [vmem:[%s13926_s3 + $0x8] sm:$0xff] }
 0x2e2   :  { %v8456_v38 = vpop.f32.mrb[66].mxu0  ;;  %v6042_v29 = vmax.f32 %v6040_v6, %v6041_v33  ;;  %v12627_v6 = vld [vmem:[%s13924_s0 + $0x3f8] sm:$0xff]  ;;  %v1795_v40 = vsel %vm1562_vm2, %v1792_v44, %v1794_v31  ;;  %v1814_v33 = vrot.slane %v12589_v49, 3 }
 0x2e3   :  { %v3391_v34 = vadd.f32 %v12099_v22, %v8456_v38  ;;  %v3385_v62 = vpop.f32.mrb[67].mxu0  ;;  %v2027_v15 = vpop.permute.xlu1 %2026  ;;  %v8935_v38 = vld [vmem:[%s13924_s0 + $0x348] sm:$0xff]  ;;  %v532_v23 = vrot.slane %v12627_v6, 1 }
 0x2e4   :  { %v3386_v27 = vadd.f32 %v12099_v22, %v3385_v62  ;;  %v2566_v13 = vsel %vm2462_vm5, %v2437_v16, %v2027_v15  ;;  %v2025_v59 = vpop.permute.xlu0 %2024  ;;  %v6043_v11 = vrot.slane %v6042_v29, 2  ;;  %v534_v62 = vrot.slane %v12635_v39, 1 }
 0x2e5   :  { %v5561_v4 = vmax.f32 %v3391_v34, 0.0  ;;  %v2565_v51 = vsel %vm2462_vm5, %v2436_v7, %v2025_v59  ;;  %784 = vrot.lane.b32.xlu1 %v529_v42, %s8960_s25  ;;  %2066 = vrot.lane.b32.xlu0 %v1811_v19, %s8961_s30  ;;  %v1812_v42 = vrot.slane %v12532_v46, 3 }
 0x2e6   :  { %v5560_v35 = vmax.f32 %v3386_v27, 0.0  ;;  %8508 = vmatprep.mubr.msk.f32.mxu0 %vm2604_vm6, %v2565_v51  ;;  %v6044_v20 = vmax.f32 %v6042_v29, %v6043_v11 }
 0x2e7   :  { %v5689_v30 = vsel %vm12566_vm10, %v5561_v4, 0.0  ;;  %8509 = vmatmul.mubr.msk.f32.gmra.mrb[102].mxu0 %vm2604_vm6, %v2566_v13  ;;  %v747_v0 = vpop.permute.xlu1 %746  ;;  %vm12639_vm10 = vcmp.le.s32.totalorder %v4310_v43, %v9997_v21  ;;  %v1815_v51 = vsel %vm1562_vm2, %v1812_v42, %v1814_v33  ;;  %v3766_v43 = vadd.s32 568, %v9973_v55 }
 0x2e8   :  { %v6048_v37 = vsel %vm2204_vm3, %v5689_v30, -inf  ;;  %v5688_v10 = vsel %vm12582_vm13, %v5560_v35, 0.0  ;;  %v745_v26 = vpop.permute.xlu0 %744  ;;  %v2310_v32 = vsel %vm2204_vm3, %v8935_v38, %v747_v0  ;;  %vm12665_vm13 = vcmp.le.s32.totalorder %v4303_v56, %v9997_v21  ;;  %v6329_v30 = vld [vmem:[%s13926_s3 + $0x18] sm:$0xff] }
 0x2e9   :  { %v6047_v50 = vsel %vm2204_vm3, %v5688_v10, -inf  ;;  %2048 = vrot.lane.b32.xlu1 %v1793_v54, %s8961_s30  ;;  %1408 = vrot.lane.b32.xlu0 %v1153_v60, %s8959_s24  ;;  %v2309_v31 = vsel %vm2204_vm3, %v8936_v48, %v745_v26  ;;  %v6045_v60 = vrot.slane %v6044_v20, 1  ;;  %v1813_v35 = vsel %vm1562_vm2, %v1810_v47, %v1812_v42 }
 0x2ea   :  { %v6049_v58 = vmax.f32 %v6047_v50, %v6048_v37  ;;  %v535_v10 = vsel %vm278_vm1, %v532_v23, %v534_v62  ;;  %v8591_v18 = vpack.c.bf16 %v6329_v30, %v6327_v25  ;;  %v533_v56 = vsel %vm278_vm1, %v530_v52, %v532_v23  ;;  %v8937_v52 = vld [vmem:[%s13924_s0 + $0x350] sm:$0xff] }
 0x2eb   :  { %v1389_v41 = vpop.permute.xlu1 %1388  ;;  %v3768_v25 = vadd.s32 584, %v9973_v55 }
 0x2ec   :  { %v6050_v8 = vrot.slane %v6049_v58, 4  ;;  %v1387_v28 = vpop.permute.xlu0 %1386  ;;  %v2439_v44 = vsel %vm2333_vm4, %v2310_v32, %v1389_v41  ;;  %v6046_v41 = vmax.f32 %v6044_v20, %v6045_v60  ;;  %8592 = vmatprep.subr.bf16.mxu1 %v8591_v18 }
 0x2ed   :  { %1426 = vrot.lane.b32.xlu1 %v1171_v61, %s8959_s24  ;;  %786 = vrot.lane.b32.xlu0 %v531_v2, %s8960_s25  ;;  %v2438_v15 = vsel %vm2333_vm4, %v2309_v31, %v1387_v28  ;;  %v1174_v61 = vrot.slane %v12627_v6, 2  ;;  %v1176_v2 = vrot.slane %v12635_v39, 2  ;;  %v1816_v31 = vrot.slane %v12627_v6, 3 }
 0x2ee   :  { %v6051_v1 = vmax.f32 %v6049_v58, %v6050_v8  ;;  %v8459_v19 = vpop.f32.mrb[68].mxu0  ;;  %v3765_v58 = vadd.s32 560, %v9973_v55 }
 0x2ef   :  { %v3401_v3 = vadd.f32 %v12099_v22, %v8459_v19  ;;  %v3395_v16 = vpop.f32.mrb[69].mxu0  ;;  %v2031_v34 = vpop.permute.xlu1 %2030  ;;  %v1177_v20 = vsel %vm920_vm0, %v1174_v61, %v1176_v2  ;;  %v1175_v32 = vsel %vm920_vm0, %v1172_v53, %v1174_v61  ;;  %v1817_v54 = vsel %vm1562_vm2, %v1814_v33, %v1816_v31  ;;  %v8938_v33 = vld [vmem:[%s13924_s0 + $0x358] sm:$0xff] }
 0x2f0   :  { %v6052_v14 = vrot.slane %v6051_v1, 2  ;;  %v3396_v7 = vadd.f32 %v12099_v22, %v3395_v16  ;;  %v2568_v27 = vsel %vm2462_vm5, %v2439_v44, %v2031_v34  ;;  %v2029_v13 = vpop.permute.xlu0 %2028  ;;  %v4317_v38 = vand.u32 15, %v3765_v58 }
 0x2f1   :  { %v5563_v59 = vmax.f32 %v3401_v3, 0.0  ;;  %v2567_v4 = vsel %vm2462_vm5, %v2438_v15, %v2029_v13  ;;  %1428 = vrot.lane.b32.xlu1 %v1173_v17, %s8959_s24  ;;  %2050 = vrot.lane.b32.xlu0 %v1795_v40, %s8961_s30  ;;  %v1818_v44 = vrot.slane %v12635_v39, 3 }
 0x2f2   :  { %v6053_v9 = vmax.f32 %v6051_v1, %v6052_v14  ;;  %v5562_v29 = vmax.f32 %v3396_v7, 0.0  ;;  %8511 = vmatprep.mubr.msk.f32.mxu0 %vm2604_vm6, %v2567_v4  ;;  %v4324_v1 = vand.u32 15, %v3766_v43  ;;  %vm5436_vm1 = vcmp.le.s32.totalorder %v4317_v38, %v9997_v21 }
 0x2f3   :  { %v5691_v0 = vsel %vm12639_vm10, %v5563_v59, 0.0  ;;  %8512 = vmatmul.mubr.msk.f32.gmra.mrb[104].mxu0 %vm2604_vm6, %v2568_v27  ;;  %v12688_v37 = vpop.permute.xlu1 %750  ;;  %v1819_v59 = vsel %vm1562_vm2, %v1816_v31, %v1818_v44  ;;  %v4338_v43 = vand.u32 15, %v3768_v25  ;;  %v6326_v44 = vld [vmem:[%s13926_s3] sm:$0xff] }
 0x2f4   :  { %v6054_v26 = vrot.slane %v6053_v9, 1  ;;  %v6057_v47 = vsel %vm2204_vm3, %v5691_v0, -inf  ;;  %v5690_v63 = vsel %vm12665_vm13, %v5562_v29, 0.0  ;;  %v749_v50 = vpop.permute.xlu0 %748  ;;  %vm5437_vm0 = vcmp.le.s32.totalorder %v4324_v1, %v9997_v21  ;;  %v8941_v25 = vld [vmem:[%s13924_s0 + $0x360] sm:$0xff] }
 0x2f5   :  { %v6056_v11 = vsel %vm2204_vm3, %v5690_v63, -inf  ;;  %2070 = vrot.lane.b32.xlu1 %v1815_v51, %s8961_s30  ;;  %2068 = vrot.lane.b32.xlu0 %v1813_v35, %s8961_s30  ;;  %v2311_v23 = vsel %vm2204_vm3, %v8937_v52, %v749_v50  ;;  %v3767_v0 = vadd.s32 576, %v9973_v55  ;;  %v2312_v18 = vsel %vm2204_vm3, %v8938_v33, %v12688_v37  ;;  %v8939_v37 = vld [vmem:[%s13924_s0 + $0x3a0] sm:$0xff] }
 0x2f6   :  { %v6055_v8 = vmax.f32 %v6053_v9, %v6054_v26  ;;  %v6058_v28 = vmax.f32 %v6056_v11, %v6057_v47  ;;  %vm5439_vm2 = vcmp.le.s32.totalorder %v4338_v43, %v9997_v21  ;;  %v12802_v33 = vld [vmem:[%s13925_s2 + $0x40] ss:$0 sm:$0xff] }
 0x2f7   :  { %v769_v17 = vpop.permute.xlu1 %768  ;;  %v4331_v61 = vand.u32 15, %v3767_v0 }
 0x2f8   :  { %v6459_v24 = vsel %vm6424_vm15, %v6055_v8, %v6046_v41  ;;  %v6059_v40 = vrot.slane %v6058_v28, 4  ;;  %v1391_v42 = vpop.permute.xlu0 %1390  ;;  %v2321_v2 = vsel %vm2204_vm3, %v8939_v37, %v769_v17 }
 0x2f9   :  { %790 = vrot.lane.b32.xlu1 %v535_v10, %s8960_s25  ;;  %788 = vrot.lane.b32.xlu0 %v533_v56, %s8960_s25  ;;  %v2440_v3 = vsel %vm2333_vm4, %v2311_v23, %v1391_v42  ;;  %vm5438_vm10 = vcmp.le.s32.totalorder %v4331_v61, %v9997_v21 }
 0x2fa   :  { %v6060_v19 = vmax.f32 %v6058_v28, %v6059_v40  ;;  %v8462_v48 = vpop.f32.mrb[70].mxu0 }
 0x2fb   :  { %v3411_v16 = vadd.f32 %v12099_v22, %v8462_v48  ;;  %v3405_v34 = vpop.f32.mrb[71].mxu0  ;;  %v2033_v62 = vpop.permute.xlu1 %2032 }
 0x2fc   :  { %v6061_v14 = vrot.slane %v6060_v19, 2  ;;  %v3406_v53 = vadd.f32 %v12099_v22, %v3405_v34  ;;  %v2569_v15 = vsel %vm2462_vm5, %v2440_v3, %v2033_v62  ;;  %v1393_v7 = vpop.permute.xlu0 %1392  ;;  %v6333_v34 = vld [vmem:[%s13926_s3 + $0x38] sm:$0xff] }
 0x2fd   :  { %v5565_v27 = vmax.f32 %v3411_v16, 0.0  ;;  %1432 = vrot.lane.b32.xlu1 %v1177_v20, %s8959_s24  ;;  %1430 = vrot.lane.b32.xlu0 %v1175_v32, %s8959_s24  ;;  %v2441_v63 = vsel %vm2333_vm4, %v2312_v18, %v1393_v7  ;;  %v6331_v16 = vld [vmem:[%s13926_s3 + $0x28] sm:$0xff] }
 0x2fe   :  { %v6062_v39 = vmax.f32 %v6060_v19, %v6061_v14  ;;  %v5564_v13 = vmax.f32 %v3406_v53, 0.0  ;;  %8514 = vmatprep.mubr.msk.f32.mxu0 %vm2604_vm6, %v2569_v15  ;;  %v8940_v53 = vld [vmem:[%s13924_s0 + $0x3a8] sm:$0xff] }
 0x2ff   :  { %v5693_v4 = vsel %vm5437_vm0, %v5565_v27, 0.0  ;;  %v1411_v51 = vpop.permute.xlu1 %1410 }
 0x300   :  { %v6063_v60 = vrot.slane %v6062_v39, 1  ;;  %v6066_v9 = vsel %vm2204_vm3, %v5693_v4, -inf  ;;  %v5692_v29 = vsel %vm5436_vm1, %v5564_v13, 0.0  ;;  %v771_v35 = vpop.permute.xlu0 %770  ;;  %v2450_v28 = vsel %vm2333_vm4, %v2321_v2, %v1411_v51 }
 0x301   :  { %v6065_v30 = vsel %vm2204_vm3, %v5692_v29, -inf  ;;  %2074 = vrot.lane.b32.xlu1 %v1819_v59, %s8961_s30  ;;  %2072 = vrot.lane.b32.xlu0 %v1817_v54, %s8961_s30  ;;  %v2322_v15 = vsel %vm2204_vm3, %v8940_v53, %v771_v35  ;;  %v8595_v51 = vpack.c.bf16 %v6333_v34, %v6331_v16 }
 0x302   :  { %v6064_v49 = vmax.f32 %v6062_v39, %v6063_v60  ;;  %v6067_v10 = vmax.f32 %v6065_v30, %v6066_v9  ;;  %v6330_v60 = vld [vmem:[%s13926_s3 + $0x20] sm:$0xff]  ;;  %v6332_v9 = vld [vmem:[%s13926_s3 + $0x30] sm:$0xff] }
 0x303   :  { %v753_v26 = vpop.permute.xlu1 %752 }
 0x304   :  { %v6068_v47 = vrot.slane %v6067_v10, 4  ;;  %v2035_v50 = vpop.permute.xlu0 %2034  ;;  %v6460_v11 = vsel %vm6426_vm9, %v6064_v49, %v6459_v24  ;;  %v2313_v30 = vsel %vm2204_vm3, %v8941_v25, %v753_v26  ;;  %v3774_v25 = vadd.s32 632, %v9973_v55 }
 0x305   :  { %v2570_v58 = vsel %vm2462_vm5, %v2441_v63, %v2035_v50  ;;  %6489 = vrot.lane.b32.xlu1 %v11291_v57, %s8960_s25  ;;  %6487 = vrot.lane.b32.xlu0 %v10679_v12, %s8960_s25  ;;  %v8597_v50 = vpack.c.bf16 %v6332_v9, %v6330_v60 }
 0x306   :  { %v6069_v41 = vmax.f32 %v6067_v10, %v6068_v47  ;;  %v8465_v8 = vpop.f32.mrb[72].mxu0  ;;  %8515 = vmatmul.mubr.msk.f32.gmra.mrb[106].mxu0 %vm2604_vm6, %v2570_v58 }
 0x307   :  { %v3421_v56 = vadd.f32 %v12099_v22, %v8465_v8  ;;  %v3415_v24 = vpop.f32.mrb[73].mxu0  ;;  %v2053_v57 = vpop.permute.xlu1 %2052 }
 0x308   :  { %v6070_v40 = vrot.slane %v6069_v41, 2  ;;  %v3416_v12 = vadd.f32 %v12099_v22, %v3415_v24  ;;  %v1413_v42 = vpop.permute.xlu0 %1412  ;;  %v2579_v1 = vsel %vm2462_vm5, %v2450_v28, %v2053_v57  ;;  %v3770_v22 = vadd.s32 600, %v9973_v55 }
 0x309   :  { %v5567_v38 = vmax.f32 %v3421_v56, 0.0  ;;  %8529 = vmatprep.mubr.msk.f32.mxu1 %vm2604_vm6, %v2579_v1  ;;  %6493 = vrot.lane.b32.xlu1 %v12554_v5, %s8960_s25  ;;  %v6328_v5 = vld [vmem:[%s13926_s3 + $0x10] sm:$0xff]  ;;  %v2451_v59 = vsel %vm2333_vm4, %v2322_v15, %v1413_v42  ;;  %v3771_v42 = vadd.s32 608, %v9973_v55 }
 0x30a   :  { %v6071_v17 = vmax.f32 %v6069_v41, %v6070_v40  ;;  %v5566_v20 = vmax.f32 %v3416_v12, 0.0  ;;  %6491 = vrot.lane.b32.xlu0 %v11917_v36, %s8960_s25  ;;  %v3769_v36 = vadd.s32 592, %v9973_v55  ;;  %v4352_v27 = vand.u32 15, %v3770_v22 }
 0x30b   :  { %v5695_v32 = vsel %vm5439_vm2, %v5567_v38, 0.0  ;;  %v1395_v19 = vpop.permute.xlu1 %1394  ;;  %v8593_v39 = vpack.c.bf16 %v6328_v5, %v6326_v44  ;;  %v3772_v40 = vadd.s32 616, %v9973_v55  ;;  %v4359_v5 = vand.u32 15, %v3771_v42 }
 0x30c   :  { %v6072_v52 = vrot.slane %v6071_v17, 1  ;;  %v6075_v23 = vsel %vm2204_vm3, %v5695_v32, -inf  ;;  %v5694_v48 = vsel %vm5438_vm10, %v5566_v20, 0.0  ;;  %v755_v31 = vpop.permute.xlu0 %754  ;;  %v4345_v35 = vand.u32 15, %v3769_v36 }
 0x30d   :  { %v6074_v3 = vsel %vm2204_vm3, %v5694_v48, -inf  ;;  %v2442_v10 = vsel %vm2333_vm4, %v2313_v30, %v1395_v19  ;;  %vm5441_vm13 = vcmp.le.s32.totalorder %v4352_v27, %v9997_v21  ;;  %vm5442_vm2 = vcmp.le.s32.totalorder %v4359_v5, %v9997_v21 }
 0x30e   :  { %v6073_v62 = vmax.f32 %v6071_v17, %v6072_v52  ;;  %v6076_v14 = vmax.f32 %v6074_v3, %v6075_v23  ;;  %vm5440_vm0 = vcmp.le.s32.totalorder %v4345_v35, %v9997_v21  ;;  %v8943_v17 = vld [vmem:[%s13924_s0 + $0x368] sm:$0xff]  ;;  %v4366_v23 = vand.u32 15, %v3772_v40  ;;  %v8944_v3 = vld [vmem:[%s13924_s0 + $0x3b0] sm:$0xff] }
 0x30f   :  { %v773_v7 = vpop.permute.xlu1 %772  ;;  %v2314_v20 = vsel %vm2204_vm3, %v8943_v17, %v755_v31  ;;  %v3776_v5 = vadd.s32 648, %v9973_v55 }
 0x310   :  { %v6077_v13 = vrot.slane %v6076_v14, 4  ;;  %v2055_v54 = vpop.permute.xlu0 %2054  ;;  %v6461_v4 = vsel %vm6428_vm12, %v6073_v62, %v6460_v11  ;;  %v2323_v36 = vsel %vm2204_vm3, %v8944_v3, %v773_v7  ;;  %vm5443_vm1 = vcmp.le.s32.totalorder %v4366_v23, %v9997_v21 }
 0x311   :  { %v2580_v29 = vsel %vm2462_vm5, %v2451_v59, %v2055_v54 }
 0x312   :  { %v6078_v0 = vmax.f32 %v6076_v14, %v6077_v13  ;;  %v8468_v49 = vpop.f32.mrb[74].mxu0  ;;  %8530 = vmatmul.mubr.msk.f32.vlgmr.msra.gmra.mrb[0].mxu1 %vm2604_vm6, %v2580_v29 }
 0x313   :  { %v3431_v18 = vadd.f32 %v12802_v33, %v8468_v49  ;;  %v3425_v47 = vpop.f32.mrb[75].mxu0  ;;  %v2037_v63 = vpop.permute.xlu1 %2036  ;;  %8594 = vmatpush1.bf16.msra.mxu1 %v8593_v39 }
 0x314   :  { %v6079_v43 = vrot.slane %v6078_v0, 2  ;;  %v3426_v26 = vadd.f32 %v12802_v33, %v3425_v47  ;;  %v2571_v11 = vsel %vm2462_vm5, %v2442_v10, %v2037_v63  ;;  %v1397_v58 = vpop.permute.xlu0 %1396  ;;  %8596 = vmatprep.subr.bf16.mxu1 %v8595_v51 }
 0x315   :  { %v5569_v61 = vmax.f32 %v3431_v18, 0.0  ;;  %8517 = vmatprep.mubr.msk.f32.mxu0 %vm2604_vm6, %v2571_v11  ;;  %v2443_v22 = vsel %vm2333_vm4, %v2314_v20, %v1397_v58  ;;  %v8945_v18 = vld [vmem:[%s13924_s0 + $0x3b8] sm:$0xff]  ;;  %v4380_v11 = vand.u32 15, %v3774_v25 }
 0x316   :  { %v6080_v37 = vmax.f32 %v6078_v0, %v6079_v43  ;;  %v5568_v2 = vmax.f32 %v3426_v26, 0.0  ;;  %v3773_v0 = vadd.s32 624, %v9973_v55 }
 0x317   :  { %v5697_v41 = vsel %vm5441_vm13, %v5569_v61, 0.0  ;;  %v1415_v8 = vpop.permute.xlu1 %1414  ;;  %8598 = vmatpush1.bf16.msra.mxu1 %v8597_v50  ;;  %vm5445_vm10 = vcmp.le.s32.totalorder %v4380_v11, %v9997_v21 }
 0x318   :  { %v6081_v28 = vrot.slane %v6080_v37, 1  ;;  %v6084_v56 = vsel %vm2204_vm3, %v5697_v41, -inf  ;;  %v5696_v24 = vsel %vm5440_vm0, %v5568_v2, 0.0  ;;  %v775_v57 = vpop.permute.xlu0 %774  ;;  %v2452_v31 = vsel %vm2333_vm4, %v2323_v36, %v1415_v8  ;;  %v8946_v2 = vld [vmem:[%s13924_s0 + $0x370] sm:$0xff] }
 0x319   :  { %v6083_v12 = vsel %vm2204_vm3, %v5696_v24, -inf  ;;  %v2324_v47 = vsel %vm2204_vm3, %v8945_v18, %v775_v57  ;;  %v3775_v36 = vadd.s32 640, %v9973_v55 }
 0x31a   :  { %v6082_v1 = vmax.f32 %v6080_v37, %v6081_v28  ;;  %v6085_v38 = vmax.f32 %v6083_v12, %v6084_v56  ;;  %v4373_v37 = vand.u32 15, %v3773_v0 }
 0x31b   :  { %v757_v32 = vpop.permute.xlu1 %756 }
 0x31c   :  { %v6086_v19 = vrot.slane %v6085_v38, 4  ;;  %v2039_v52 = vpop.permute.xlu0 %2038  ;;  %v6462_v48 = vsel %vm6430_vm7, %v6082_v1, %v6461_v4  ;;  %v2315_v41 = vsel %vm2204_vm3, %v8946_v2, %v757_v32  ;;  %vm5444_vm13 = vcmp.le.s32.totalorder %v4373_v37, %v9997_v21 }
 0x31d   :  { %v2572_v44 = vsel %vm2462_vm5, %v2443_v22, %v2039_v52  ;;  %v3778_v37 = vadd.s32 664, %v9973_v55 }
 0x31e   :  { %v6087_v16 = vmax.f32 %v6085_v38, %v6086_v19  ;;  %v8471_v34 = vpop.f32.mrb[76].mxu0  ;;  %8518 = vmatmul.mubr.msk.f32.gmra.mrb[108].mxu0 %vm2604_vm6, %v2572_v44 }
 0x31f   :  { %v3441_v62 = vadd.f32 %v12802_v33, %v8471_v34  ;;  %v3435_v14 = vpop.f32.mrb[77].mxu0  ;;  %v2057_v53 = vpop.permute.xlu1 %2056 }
 0x320   :  { %v6088_v15 = vrot.slane %v6087_v16, 2  ;;  %v3436_v27 = vadd.f32 %v12802_v33, %v3435_v14  ;;  %v2581_v39 = vsel %vm2462_vm5, %v2452_v31, %v2057_v53  ;;  %v1417_v13 = vpop.permute.xlu0 %1416  ;;  %v8947_v31 = vld [vmem:[%s13924_s0 + $0x378] sm:$0xff] }
 0x321   :  { %v5571_v59 = vmax.f32 %v3441_v62, 0.0  ;;  %8532 = vmatprep.mubr.msk.f32.mxu1 %vm2604_vm6, %v2581_v39  ;;  %v2453_v43 = vsel %vm2333_vm4, %v2324_v47, %v1417_v13  ;;  %v4394_v39 = vand.u32 15, %v3776_v5 }
 0x322   :  { %v6089_v7 = vmax.f32 %v6087_v16, %v6088_v15  ;;  %v5570_v54 = vmax.f32 %v3436_v27, 0.0 }
 0x323   :  { %v5699_v4 = vsel %vm5443_vm1, %v5571_v59, 0.0  ;;  %v1399_v51 = vpop.permute.xlu1 %1398  ;;  %vm5447_vm0 = vcmp.le.s32.totalorder %v4394_v39, %v9997_v21  ;;  %v3780_v39 = vadd.s32 680, %v9973_v55 }
 0x324   :  { %v6090_v60 = vrot.slane %v6089_v7, 1  ;;  %v6093_v9 = vsel %vm2204_vm3, %v5699_v4, -inf  ;;  %v5698_v29 = vsel %vm5442_vm2, %v5570_v54, 0.0  ;;  %v759_v35 = vpop.permute.xlu0 %758  ;;  %v2444_v56 = vsel %vm2333_vm4, %v2315_v41, %v1399_v51  ;;  %v8948_v54 = vld [vmem:[%s13924_s0 + $0x3c0] sm:$0xff] }
 0x325   :  { %v6092_v30 = vsel %vm2204_vm3, %v5698_v29, -inf  ;;  %v2316_v62 = vsel %vm2204_vm3, %v8947_v31, %v759_v35  ;;  %v3777_v41 = vadd.s32 656, %v9973_v55 }
 0x326   :  { %v6091_v49 = vmax.f32 %v6089_v7, %v6090_v60  ;;  %v6094_v10 = vmax.f32 %v6092_v30, %v6093_v9  ;;  %v4387_v7 = vand.u32 15, %v3775_v36 }
 0x327   :  { %v777_v63 = vpop.permute.xlu1 %776 }
 0x328   :  { %v6095_v50 = vrot.slane %v6094_v10, 4  ;;  %v2059_v26 = vpop.permute.xlu0 %2058  ;;  %v6463_v58 = vsel %vm6432_vm11, %v6091_v49, %v6462_v48  ;;  %v2325_v4 = vsel %vm2204_vm3, %v8948_v54, %v777_v63  ;;  %vm5446_vm1 = vcmp.le.s32.totalorder %v4387_v7, %v9997_v21 }
 0x329   :  { %v2582_v61 = vsel %vm2462_vm5, %v2453_v43, %v2059_v26 }
 0x32a   :  { %v6096_v8 = vmax.f32 %v6094_v10, %v6095_v50  ;;  %v8474_v28 = vpop.f32.mrb[78].mxu0  ;;  %8533 = vmatmul.mubr.msk.f32.gmra.mrb[2].mxu1 %vm2604_vm6, %v2582_v61 }
 0x32b   :  { %v3451_v24 = vadd.f32 %v12802_v33, %v8474_v28  ;;  %v3445_v57 = vpop.f32.mrb[79].mxu0  ;;  %v2041_v40 = vpop.permute.xlu1 %2040 }
 0x32c   :  { %v6097_v12 = vrot.slane %v6096_v8, 2  ;;  %v3446_v42 = vadd.f32 %v12802_v33, %v3445_v57  ;;  %v2573_v1 = vsel %vm2462_vm5, %v2444_v56, %v2041_v40  ;;  %v1401_v38 = vpop.permute.xlu0 %1400  ;;  %v8949_v56 = vld [vmem:[%s13924_s0 + $0x3c8] sm:$0xff] }
 0x32d   :  { %v5573_v17 = vmax.f32 %v3451_v24, 0.0  ;;  %8520 = vmatprep.mubr.msk.f32.mxu0 %vm2604_vm6, %v2573_v1  ;;  %v2445_v15 = vsel %vm2333_vm4, %v2316_v62, %v1401_v38  ;;  %v4408_v1 = vand.u32 15, %v3778_v37 }
 0x32e   :  { %v6098_v20 = vmax.f32 %v6096_v8, %v6097_v12  ;;  %v5572_v32 = vmax.f32 %v3446_v42, 0.0 }
 0x32f   :  { %v5701_v19 = vsel %vm5445_vm10, %v5573_v17, 0.0  ;;  %v1419_v22 = vpop.permute.xlu1 %1418  ;;  %v4401_v17 = vand.u32 15, %v3777_v41  ;;  %vm5449_vm2 = vcmp.le.s32.totalorder %v4408_v1, %v9997_v21 }
 0x330   :  { %v6099_v52 = vrot.slane %v6098_v20, 1  ;;  %v6102_v23 = vsel %vm2204_vm3, %v5701_v19, -inf  ;;  %v5700_v48 = vsel %vm5444_vm13, %v5572_v32, 0.0  ;;  %v779_v44 = vpop.permute.xlu0 %778  ;;  %v2454_v9 = vsel %vm2333_vm4, %v2325_v4, %v1419_v22  ;;  %v8951_v4 = vld [vmem:[%s13924_s0 + $0x388] sm:$0xff] }
 0x331   :  { %v6101_v3 = vsel %vm2204_vm3, %v5700_v48, -inf  ;;  %v2326_v24 = vsel %vm2204_vm3, %v8949_v56, %v779_v44  ;;  %vm5448_vm10 = vcmp.le.s32.totalorder %v4401_v17, %v9997_v21 }
 0x332   :  { %v6103_v16 = vmax.f32 %v6101_v3, %v6102_v23  ;;  %v6100_v34 = vmax.f32 %v6098_v20, %v6099_v52  ;;  %v8950_v20 = vld [vmem:[%s13924_s0 + $0x380] sm:$0xff] }
 0x333   :  { %v761_v14 = vpop.permute.xlu1 %760 }
 0x334   :  { %v6104_v53 = vrot.slane %v6103_v16, 4  ;;  %v2043_v27 = vpop.permute.xlu0 %2042  ;;  %v6464_v13 = vsel %vm6434_vm8, %v6100_v34, %v6463_v58  ;;  %v2317_v32 = vsel %vm2204_vm3, %v8950_v20, %v761_v14  ;;  %v3781_v20 = vadd.s32 688, %v9973_v55 }
 0x335   :  { %v2574_v59 = vsel %vm2462_vm5, %v2445_v15, %v2043_v27 }
 0x336   :  { %v6105_v51 = vmax.f32 %v6103_v16, %v6104_v53  ;;  %v8477_v60 = vpop.f32.mrb[80].mxu0  ;;  %8521 = vmatmul.mubr.msk.f32.gmra.mrb[110].mxu0 %vm2604_vm6, %v2574_v59  ;;  %v3779_v59 = vadd.s32 672, %v9973_v55 }
 0x337   :  { %v3461_v29 = vadd.f32 %v12802_v33, %v8477_v60  ;;  %v3455_v35 = vpop.f32.mrb[81].mxu0  ;;  %v2061_v25 = vpop.permute.xlu1 %2060 }
 0x338   :  { %v6106_v30 = vrot.slane %v6105_v51, 2  ;;  %v3456_v0 = vadd.f32 %v12802_v33, %v3455_v35  ;;  %v2583_v49 = vsel %vm2462_vm5, %v2454_v9, %v2061_v25  ;;  %v1421_v10 = vpop.permute.xlu0 %1420  ;;  %v4422_v25 = vand.u32 15, %v3780_v39 }
 0x339   :  { %v5575_v18 = vmax.f32 %v3461_v29, 0.0  ;;  %8535 = vmatprep.mubr.msk.f32.mxu1 %vm2604_vm6, %v2583_v49  ;;  %v2455_v40 = vsel %vm2333_vm4, %v2326_v24, %v1421_v10  ;;  %v8952_v10 = vld [vmem:[%s13924_s0 + $0x3d0] sm:$0xff] }
 0x33a   :  { %v6107_v47 = vmax.f32 %v6105_v51, %v6106_v30  ;;  %v5574_v63 = vmax.f32 %v3456_v0, 0.0  ;;  %v4415_v0 = vand.u32 15, %v3779_v59  ;;  %vm5451_vm13 = vcmp.le.s32.totalorder %v4422_v25, %v9997_v21 }
 0x33b   :  { %v5703_v50 = vsel %vm5447_vm0, %v5575_v18, 0.0  ;;  %v1403_v43 = vpop.permute.xlu1 %1402 }
 0x33c   :  { %v6111_v26 = vsel %vm2204_vm3, %v5703_v50, -inf  ;;  %v5702_v11 = vsel %vm5446_vm1, %v5574_v63, 0.0  ;;  %v763_v58 = vpop.permute.xlu0 %762  ;;  %v6108_v61 = vrot.slane %v6107_v47, 1  ;;  %v2446_v52 = vsel %vm2333_vm4, %v2317_v32, %v1403_v43 }
 0x33d   :  { %v6110_v2 = vsel %vm2204_vm3, %v5702_v11, -inf  ;;  %v2318_v51 = vsel %vm2204_vm3, %v8951_v4, %v763_v58  ;;  %vm5450_vm0 = vcmp.le.s32.totalorder %v4415_v0, %v9997_v21 }
 0x33e   :  { %v6112_v8 = vmax.f32 %v6110_v2, %v6111_v26  ;;  %v6109_v28 = vmax.f32 %v6107_v47, %v6108_v61 }
 0x33f   :  { %v781_v57 = vpop.permute.xlu1 %780 }
 0x340   :  { %v2063_v12 = vpop.permute.xlu0 %2062  ;;  %v6465_v42 = vsel %vm6436_vm14, %v6109_v28, %v6464_v13  ;;  %v6113_v19 = vrot.slane %v6112_v8, 4  ;;  %v2327_v18 = vsel %vm2204_vm3, %v8952_v10, %v781_v57 }
 0x341   :  { %v2584_v38 = vsel %vm2462_vm5, %v2455_v40, %v2063_v12  ;;  %6495 = vrot.lane.b32.xlu0 %v6465_v42, %s8960_s25 }
 0x342   :  { %v8480_v22 = vpop.f32.mrb[82].mxu0  ;;  %8536 = vmatmul.mubr.msk.f32.gmra.mrb[4].mxu1 %vm2604_vm6, %v2584_v38  ;;  %v6114_v34 = vmax.f32 %v6112_v8, %v6113_v19  ;;  %v3782_v38 = vadd.s32 696, %v9973_v55 }
 0x343   :  { %v3471_v23 = vadd.f32 %v12802_v33, %v8480_v22  ;;  %v3465_v48 = vpop.f32.mrb[83].mxu0  ;;  %v2045_v44 = vpop.permute.xlu1 %2044 }
 0x344   :  { %v3466_v5 = vadd.f32 %v12802_v33, %v3465_v48  ;;  %v2575_v3 = vsel %vm2462_vm5, %v2446_v52, %v2045_v44  ;;  %v1405_v36 = vpop.permute.xlu0 %1404  ;;  %v6115_v7 = vrot.slane %v6114_v34, 2  ;;  %v8953_v52 = vld [vmem:[%s13924_s0 + $0x3d8] sm:$0xff] }
 0x345   :  { %v5577_v16 = vmax.f32 %v3471_v23, 0.0  ;;  %8523 = vmatprep.mubr.msk.f32.mxu0 %vm2604_vm6, %v2575_v3  ;;  %v2447_v29 = vsel %vm2333_vm4, %v2318_v51, %v1405_v36 }
 0x346   :  { %v5576_v31 = vmax.f32 %v3466_v5, 0.0  ;;  %v6116_v49 = vmax.f32 %v6114_v34, %v6115_v7 }
 0x347   :  { %v5705_v62 = vsel %vm5449_vm2, %v5577_v16, 0.0  ;;  %v1423_v14 = vpop.permute.xlu1 %1422  ;;  %v4436_v16 = vand.u32 15, %v3782_v38 }
 0x348   :  { %v6120_v53 = vsel %vm2204_vm3, %v5705_v62, -inf  ;;  %v5704_v15 = vsel %vm5448_vm10, %v5576_v31, 0.0  ;;  %v783_v27 = vpop.permute.xlu0 %782  ;;  %v2456_v50 = vsel %vm2333_vm4, %v2327_v18, %v1423_v14  ;;  %v6117_v8 = vrot.slane %v6116_v49, 1  ;;  %v8954_v62 = vld [vmem:[%s13924_s0 + $0x390] sm:$0xff] }
 0x349   :  { %v6119_v13 = vsel %vm2204_vm3, %v5704_v15, -inf  ;;  %v2328_v23 = vsel %vm2204_vm3, %v8953_v52, %v783_v27  ;;  %v4429_v31 = vand.u32 15, %v3781_v20  ;;  %vm5453_vm1 = vcmp.le.s32.totalorder %v4436_v16, %v9997_v21 }
 0x34a   :  { %v6121_v54 = vmax.f32 %v6119_v13, %v6120_v53  ;;  %v6118_v32 = vmax.f32 %v6116_v49, %v6117_v8  ;;  %v3786_v16 = vadd.s32 728, %v9973_v55 }
 0x34b   :  { %v765_v60 = vpop.permute.xlu1 %764  ;;  %vm5452_vm2 = vcmp.le.s32.totalorder %v4429_v31, %v9997_v21 }
 0x34c   :  { %v6122_v9 = vrot.slane %v6121_v54, 4  ;;  %v2047_v35 = vpop.permute.xlu0 %2046  ;;  %v2319_v14 = vsel %vm2204_vm3, %v8954_v62, %v765_v60 }
 0x34d   :  { %v2576_v30 = vsel %vm2462_vm5, %v2447_v29, %v2047_v35 }
 0x34e   :  { %v6123_v47 = vmax.f32 %v6121_v54, %v6122_v9  ;;  %v8483_v63 = vpop.f32.mrb[84].mxu0  ;;  %8524 = vmatmul.mubr.msk.f32.gmra.mrb[112].mxu0 %vm2604_vm6, %v2576_v30  ;;  %v3784_v30 = vadd.s32 712, %v9973_v55 }
 0x34f   :  { %v3481_v43 = vadd.f32 %v12802_v33, %v8483_v63  ;;  %v3475_v26 = vpop.f32.mrb[85].mxu0  ;;  %v2065_v11 = vpop.permute.xlu1 %2064  ;;  %v3783_v63 = vadd.s32 704, %v9973_v55 }
 0x350   :  { %v6124_v58 = vrot.slane %v6123_v47, 2  ;;  %v3476_v61 = vadd.f32 %v12802_v33, %v3475_v26  ;;  %v2585_v37 = vsel %vm2462_vm5, %v2456_v50, %v2065_v11  ;;  %v1425_v2 = vpop.permute.xlu0 %1424  ;;  %v8955_v26 = vld [vmem:[%s13924_s0 + $0x398] sm:$0xff] }
 0x351   :  { %v5579_v41 = vmax.f32 %v3481_v43, 0.0  ;;  %8538 = vmatprep.mubr.msk.f32.mxu1 %vm2604_vm6, %v2585_v37  ;;  %v2457_v3 = vsel %vm2333_vm4, %v2328_v23, %v1425_v2 }
 0x352   :  { %v6125_v28 = vmax.f32 %v6123_v47, %v6124_v58  ;;  %v5578_v56 = vmax.f32 %v3476_v61, 0.0  ;;  %v4450_v61 = vand.u32 15, %v3784_v30 }
 0x353   :  { %v5707_v24 = vsel %vm5451_vm13, %v5579_v41, 0.0  ;;  %v1407_v57 = vpop.permute.xlu1 %1406 }
 0x354   :  { %v6126_v40 = vrot.slane %v6125_v28, 1  ;;  %v6129_v12 = vsel %vm2204_vm3, %v5707_v24, -inf  ;;  %v5706_v42 = vsel %vm5450_vm0, %v5578_v56, 0.0  ;;  %v767_v1 = vpop.permute.xlu0 %766  ;;  %v2448_v27 = vsel %vm2333_vm4, %v2319_v14, %v1407_v57 }
 0x355   :  { %v6128_v17 = vsel %vm2204_vm3, %v5706_v42, -inf  ;;  %v2320_v11 = vsel %vm2204_vm3, %v8955_v26, %v767_v1  ;;  %v4443_v56 = vand.u32 15, %v3783_v63  ;;  %vm5455_vm10 = vcmp.le.s32.totalorder %v4450_v61, %v9997_v21 }
 0x356   :  { %v6127_v19 = vmax.f32 %v6125_v28, %v6126_v40  ;;  %v6130_v22 = vmax.f32 %v6128_v17, %v6129_v12  ;;  %v8956_v12 = vld [vmem:[%s13924_s0 + $0x3e0] sm:$0xff] }
 0x357   :  { %v785_v48 = vpop.permute.xlu1 %784  ;;  %vm5454_vm13 = vcmp.le.s32.totalorder %v4443_v56, %v9997_v21 }
 0x358   :  { %v6466_v44 = vsel %vm6424_vm15, %v6127_v19, %v6118_v32  ;;  %v6131_v5 = vrot.slane %v6130_v22, 4  ;;  %v2067_v36 = vpop.permute.xlu0 %2066  ;;  %v2329_v42 = vsel %vm2204_vm3, %v8956_v12, %v785_v48 }
 0x359   :  { %v2586_v34 = vsel %vm2462_vm5, %v2457_v3, %v2067_v36 }
 0x35a   :  { %v6132_v53 = vmax.f32 %v6130_v22, %v6131_v5  ;;  %v8486_v15 = vpop.f32.mrb[86].mxu0  ;;  %8539 = vmatmul.mubr.msk.f32.gmra.mrb[6].mxu1 %vm2604_vm6, %v2586_v34 }
 0x35b   :  { %v3491_v39 = vadd.f32 %v12802_v33, %v8486_v15  ;;  %v3485_v13 = vpop.f32.mrb[87].mxu0  ;;  %v2049_v59 = vpop.permute.xlu1 %2048  ;;  %v3785_v15 = vadd.s32 720, %v9973_v55 }
 0x35c   :  { %v6133_v7 = vrot.slane %v6132_v53, 2  ;;  %v3486_v54 = vadd.f32 %v12802_v33, %v3485_v13  ;;  %v2577_v4 = vsel %vm2462_vm5, %v2448_v27, %v2049_v59  ;;  %v1409_v51 = vpop.permute.xlu0 %1408  ;;  %v4464_v59 = vand.u32 15, %v3786_v16 }
 0x35d   :  { %v5581_v9 = vmax.f32 %v3491_v39, 0.0  ;;  %8526 = vmatprep.mubr.msk.f32.mxu0 %vm2604_vm6, %v2577_v4  ;;  %v2449_v2 = vsel %vm2333_vm4, %v2320_v11, %v1409_v51  ;;  %v4457_v51 = vand.u32 15, %v3785_v15  ;;  %v6355_v15 = vld [vmem:[%s13927_s1 + $0x18] sm:$0xff] }
 0x35e   :  { %v6134_v60 = vmax.f32 %v6132_v53, %v6133_v7  ;;  %v5580_v29 = vmax.f32 %v3486_v54, 0.0  ;;  %vm12990_vm0 = vcmp.le.s32.totalorder %v4464_v59, %v9997_v21 }
 0x35f   :  { %v5709_v35 = vsel %vm5453_vm1, %v5581_v9, 0.0  ;;  %v1427_v25 = vpop.permute.xlu1 %1426  ;;  %vm5456_vm1 = vcmp.le.s32.totalorder %v4457_v51, %v9997_v21  ;;  %v3789_v51 = vadd.s32 752, %v9973_v55 }
 0x360   :  { %v6135_v0 = vrot.slane %v6134_v60, 1  ;;  %v6138_v49 = vsel %vm2204_vm3, %v5709_v35, -inf  ;;  %v5708_v10 = vsel %vm5452_vm2, %v5580_v29, 0.0  ;;  %v787_v18 = vpop.permute.xlu0 %786  ;;  %v8957_v35 = vld [vmem:[%s13924_s0 + $0x3f0] sm:$0xff] }
 0x361   :  { %v6137_v47 = vsel %vm2204_vm3, %v5708_v10, -inf  ;;  %v2330_v57 = vsel %vm2204_vm3, %v12532_v46, %v787_v18  ;;  %v2458_v46 = vsel %vm2333_vm4, %v2329_v42, %v1427_v25  ;;  %v3787_v42 = vadd.s32 736, %v9973_v55 }
 0x362   :  { %v6136_v50 = vmax.f32 %v6134_v60, %v6135_v0  ;;  %v6139_v43 = vmax.f32 %v6137_v47, %v6138_v49 }
 0x363   :  { %v1429_v58 = vpop.permute.xlu1 %1428 }
 0x364   :  { %v6140_v37 = vrot.slane %v6139_v43, 4  ;;  %v2051_v41 = vpop.permute.xlu0 %2050  ;;  %v6467_v8 = vsel %vm6426_vm9, %v6136_v50, %v6466_v44  ;;  %v2459_v1 = vsel %vm2333_vm4, %v2330_v57, %v1429_v58  ;;  %v3788_v57 = vadd.s32 744, %v9973_v55 }
 0x365   :  { %v2578_v28 = vsel %vm2462_vm5, %v2449_v2, %v2051_v41 }
 0x366   :  { %v6141_v24 = vmax.f32 %v6139_v43, %v6140_v37  ;;  %v8489_v40 = vpop.f32.mrb[88].mxu0  ;;  %8527 = vmatmul.mubr.msk.f32.gmra.mrb[114].mxu0 %vm2604_vm6, %v2578_v28  ;;  %v6352_v37 = vld [vmem:[%s13927_s1] sm:$0xff] }
 0x367   :  { %v3501_v38 = vadd.f32 %v12802_v33, %v8489_v40  ;;  %v3495_v17 = vpop.f32.mrb[89].mxu0  ;;  %v2071_v20 = vpop.permute.xlu1 %2070 }
 0x368   :  { %v6142_v32 = vrot.slane %v6141_v24, 2  ;;  %v3496_v19 = vadd.f32 %v12802_v33, %v3495_v17  ;;  %v2588_v22 = vsel %vm2462_vm5, %v2459_v1, %v2071_v20  ;;  %v2069_v52 = vpop.permute.xlu0 %2068  ;;  %v6353_v17 = vld [vmem:[%s13927_s1 + $0x8] sm:$0xff] }
 0x369   :  { %v5583_v23 = vmax.f32 %v3501_v38, 0.0  ;;  %v2587_v48 = vsel %vm2462_vm5, %v2458_v46, %v2069_v52  ;;  %v4478_v46 = vand.u32 15, %v3788_v57 }
 0x36a   :  { %v6143_v44 = vmax.f32 %v6141_v24, %v6142_v32  ;;  %v5582_v5 = vmax.f32 %v3496_v19, 0.0  ;;  %8541 = vmatprep.mubr.msk.f32.mxu1 %vm2604_vm6, %v2587_v48  ;;  %v13930_v24 = vmov 0.0  }
 0x36b   :  { %v5711_v3 = vsel %vm5455_vm10, %v5583_v23, 0.0  ;;  %8542 = vmatmul.mubr.msk.f32.gmra.mrb[8].mxu1 %vm2604_vm6, %v2588_v22  ;;  %v791_v36 = vpop.permute.xlu1 %790  ;;  %v4471_v22 = vand.u32 15, %v3787_v42 }
 0x36c   :  { %v6144_v34 = vrot.slane %v6143_v44, 1  ;;  %v6147_v31 = vsel %vm2204_vm3, %v5711_v3, -inf  ;;  %v5710_v62 = vsel %vm5454_vm13, %v5582_v5, 0.0  ;;  %v789_v14 = vpop.permute.xlu0 %788  ;;  %v2332_v60 = vsel %vm2204_vm3, %v12627_v6, %v791_v36 }
 0x36d   :  { %v6146_v53 = vsel %vm2204_vm3, %v5710_v62, -inf  ;;  %v2331_v25 = vsel %vm2204_vm3, %v8957_v35, %v789_v14  ;;  %vm5458_vm2 = vcmp.le.s32.totalorder %v4471_v22, %v9997_v21 }
 0x36e   :  { %v6145_v27 = vmax.f32 %v6143_v44, %v6144_v34  ;;  %v6148_v39 = vmax.f32 %v6146_v53, %v6147_v31  ;;  %v6354_v44 = vld [vmem:[%s13927_s1 + $0x10] sm:$0xff] }
 0x36f   :  { %v1433_v13 = vpop.permute.xlu1 %1432 }
 0x370   :  { %v6149_v7 = vrot.slane %v6148_v39, 4  ;;  %v1431_v54 = vpop.permute.xlu0 %1430  ;;  %v6468_v4 = vsel %vm6428_vm12, %v6145_v27, %v6467_v8  ;;  %v2461_v30 = vsel %vm2333_vm4, %v2332_v60, %v1433_v13 }
 0x371   :  { %v2460_v6 = vsel %vm2333_vm4, %v2331_v25, %v1431_v54  ;;  %v3790_v54 = vadd.s32 760, %v9973_v55 }
 0x372   :  { %v6150_v9 = vmax.f32 %v6148_v39, %v6149_v7  ;;  %v8492_v29 = vpop.f32.mrb[90].mxu0 }
 0x373   :  { %v3511_v0 = vadd.f32 %v12802_v33, %v8492_v29  ;;  %v3505_v10 = vpop.f32.mrb[91].mxu0  ;;  %v2075_v18 = vpop.permute.xlu1 %2074  ;;  %v4492_v25 = vand.u32 15, %v3790_v54 }
 0x374   :  { %v6151_v47 = vrot.slane %v6150_v9, 2  ;;  %v3506_v63 = vadd.f32 %v12802_v33, %v3505_v10  ;;  %v2590_v50 = vsel %vm2462_vm5, %v2461_v30, %v2075_v18  ;;  %v2073_v43 = vpop.permute.xlu0 %2072 }
 0x375   :  { %v5585_v26 = vmax.f32 %v3511_v0, 0.0  ;;  %v2589_v11 = vsel %vm2462_vm5, %v2460_v6, %v2073_v43  ;;  %vm5459_vm5 = vcmp.le.s32.totalorder %v4478_v46, %v9997_v21  ;;  %v4485_v0 = vand.u32 15, %v3789_v51 }
 0x376   :  { %v6152_v58 = vmax.f32 %v6150_v9, %v6151_v47  ;;  %v5584_v61 = vmax.f32 %v3506_v63, 0.0  ;;  %8544 = vmatprep.mubr.msk.f32.mxu1 %vm2604_vm6, %v2589_v11  ;;  %vm5461_vm10 = vcmp.le.s32.totalorder %v4492_v25, %v9997_v21  ;;  %v3795_v25 = vadd.s32 800, %v9973_v55 }
 0x377   :  { %v5713_v2 = vsel %vm12990_vm0, %v5585_v26, 0.0  ;;  %8545 = vmatmul.mubr.msk.f32.gmra.mrb[10].mxu1 %vm2604_vm6, %v2590_v50  ;;  %v6490_v20 = vpop.permute.xlu1 %6489  ;;  %vm5460_vm13 = vcmp.le.s32.totalorder %v4485_v0, %v9997_v21 }
 0x378   :  { %v6153_v41 = vrot.slane %v6152_v58, 1  ;;  %v6156_v8 = vsel %vm2204_vm3, %v5713_v2, -inf  ;;  %v5712_v28 = vsel %vm5456_vm1, %v5584_v61, 0.0  ;;  %v6488_v56 = vpop.permute.xlu0 %6487  ;;  %6615 = vmatprep.mubr.f32.mxu1 %v13930_v24  ;;  %v6512_v23 = vsel %vm2204_vm3, %v6353_v17, %v6490_v20 }
 0x379   :  { %v6155_v40 = vsel %vm2204_vm3, %v5712_v28, -inf  ;;  %v6511_v12 = vsel %vm2204_vm3, %v6352_v37, %v6488_v56  ;;  %v3792_v2 = vadd.s32 776, %v9973_v55 }
 0x37a   :  { %v6154_v1 = vmax.f32 %v6152_v58, %v6153_v41  ;;  %v6157_v38 = vmax.f32 %v6155_v40, %v6156_v8  ;;  %v3791_v8 = vadd.s32 768, %v9973_v55 }
 0x37b   :  { %8140 = vmatmul.mubr.msk.f32.vlgmr.msra.gmra.mrb[12].mxu1 %vm2333_vm4, %v6511_v12  ;;  %v6494_v27 = vpop.permute.xlu1 %6493  ;;  %v4506_v40 = vand.u32 15, %v3792_v2 }
 0x37c   :  { %v6158_v32 = vrot.slane %v6157_v38, 4  ;;  %6621 = vmatprep.mubr.f32.mxu1 %v13930_v24  ;;  %v6469_v19 = vsel %vm6430_vm7, %v6154_v1, %v6468_v4  ;;  %v6492_v5 = vpop.permute.xlu0 %6491  ;;  %v6514_v60 = vsel %vm2204_vm3, %v6355_v15, %v6494_v27  ;;  %v4499_v42 = vand.u32 15, %v3791_v8 }
 0x37d   :  { %v6513_v14 = vsel %vm2204_vm3, %v6354_v44, %v6492_v5  ;;  %vm5463_vm0 = vcmp.le.s32.totalorder %v4506_v40, %v9997_v21 }
 0x37e   :  { %v6159_v52 = vmax.f32 %v6157_v38, %v6158_v32  ;;  %v8495_v48 = vpop.f32.mrb[92].mxu0  ;;  %vm5462_vm1 = vcmp.le.s32.totalorder %v4499_v42, %v9997_v21 }
 0x37f   :  { %v3521_v3 = vadd.f32 %v12802_v33, %v8495_v48  ;;  %v3515_v36 = vpop.f32.mrb[93].mxu0  ;;  %8141 = vmatmul.mubr.msk.f32.gmra.mrb[14].mxu1 %vm2333_vm4, %v6512_v23 }
 0x380   :  { %v6160_v16 = vrot.slane %v6159_v52, 2  ;;  %v3516_v34 = vadd.f32 %v12802_v33, %v3515_v36  ;;  %6627 = vmatprep.mubr.f32.mxu1 %v13930_v24 }
 0x381   :  { %v5587_v31 = vmax.f32 %v3521_v3, 0.0  ;;  %v3794_v3 = vadd.s32 792, %v9973_v55 }
 0x382   :  { %v6161_v62 = vmax.f32 %v6159_v52, %v6160_v16  ;;  %v5586_v53 = vmax.f32 %v3516_v34, 0.0  ;;  %v3793_v16 = vadd.s32 784, %v9973_v55 }
 0x383   :  { %v5715_v39 = vsel %vm5459_vm5, %v5587_v31, 0.0  ;;  %8142 = vmatmul.mubr.msk.f32.gmra.mrb[16].mxu1 %vm2333_vm4, %v6513_v14  ;;  %v4520_v14 = vand.u32 15, %v3794_v3 }
 0x384   :  { %v6162_v13 = vrot.slane %v6161_v62, 1  ;;  %v6165_v59 = vsel %vm2204_vm3, %v5715_v39, -inf  ;;  %v5714_v7 = vsel %vm5458_vm2, %v5586_v53, 0.0  ;;  %6633 = vmatprep.mubr.f32.mxu1 %v13930_v24  ;;  %v4513_v53 = vand.u32 15, %v3793_v16 }
 0x385   :  { %v6164_v4 = vsel %vm2204_vm3, %v5714_v7, -inf  ;;  %vm5465_vm5 = vcmp.le.s32.totalorder %v4520_v14, %v9997_v21 }
 0x386   :  { %v6163_v9 = vmax.f32 %v6161_v62, %v6162_v13  ;;  %v6166_v29 = vmax.f32 %v6164_v4, %v6165_v59  ;;  %vm5464_vm2 = vcmp.le.s32.totalorder %v4513_v53, %v9997_v21 }
 0x387   :  { %8143 = vmatmul.mubr.msk.f32.gmra.mrb[18].mxu1 %vm2333_vm4, %v6514_v60 }
 0x388   :  { %v6167_v35 = vrot.slane %v6166_v29, 4  ;;  %v6470_v30 = vsel %vm6432_vm11, %v6163_v9, %v6469_v19  ;;  %6639 = vmatprep.mubr.f32.mxu1 %v13930_v24 }
 0x38a   :  { %v6168_v49 = vmax.f32 %v6166_v29, %v6167_v35  ;;  %v8498_v10 = vpop.f32.mrb[94].mxu0  ;;  %v3796_v29 = vadd.s32 808, %v9973_v55 }
 0x38b   :  { %v3531_v18 = vadd.f32 %v12802_v33, %v8498_v10  ;;  %v3525_v47 = vpop.f32.mrb[95].mxu0 }
 0x38c   :  { %v6169_v6 = vrot.slane %v6168_v49, 2  ;;  %v3526_v63 = vadd.f32 %v12802_v33, %v3525_v47  ;;  %v4534_v10 = vand.u32 15, %v3796_v29  ;;  %v13096_v29 = vld [vmem:[%s13925_s2 + $0x40] ss:$0 sm:$0xff] }
 0x38d   :  { %v5589_v50 = vmax.f32 %v3531_v18, 0.0  ;;  %v4527_v18 = vand.u32 15, %v3795_v25 }
 0x38e   :  { %v6170_v43 = vmax.f32 %v6168_v49, %v6169_v6  ;;  %v5588_v26 = vmax.f32 %v3526_v63, 0.0 }
 0x38f   :  { %v5717_v11 = vsel %vm5461_vm10, %v5589_v50, 0.0  ;;  %vm5467_vm10 = vcmp.le.s32.totalorder %v4534_v10, %v9997_v21 }
 0x390   :  { %v6171_v58 = vrot.slane %v6170_v43, 1  ;;  %v6174_v61 = vsel %vm2204_vm3, %v5717_v11, -inf  ;;  %v5716_v37 = vsel %vm5460_vm13, %v5588_v26, 0.0  ;;  %vm5466_vm13 = vcmp.le.s32.totalorder %v4527_v18, %v9997_v21 }
 0x391   :  { %v6173_v41 = vsel %vm2204_vm3, %v5716_v37, -inf }
 0x392   :  { %v6175_v28 = vmax.f32 %v6173_v41, %v6174_v61  ;;  %v6172_v56 = vmax.f32 %v6170_v43, %v6171_v58  ;;  %v6356_v61 = vld [vmem:[%s13927_s1 + $0x20] sm:$0xff] }
 0x394   :  { %v6176_v57 = vrot.slane %v6175_v28, 4  ;;  %v6471_v12 = vsel %vm6434_vm8, %v6172_v56, %v6470_v30  ;;  %v3798_v56 = vadd.s32 824, %v9973_v55 }
 0x396   :  { %v6177_v1 = vmax.f32 %v6175_v28, %v6176_v57  ;;  %v8501_v38 = vpop.f32.mrb[96].mxu0 }
 0x397   :  { %v3541_v17 = vadd.f32 %v12802_v33, %v8501_v38  ;;  %v3535_v20 = vpop.f32.mrb[97].mxu0  ;;  %v3797_v38 = vadd.s32 816, %v9973_v55 }
 0x398   :  { %v6178_v32 = vrot.slane %v6177_v1, 2  ;;  %v3536_v46 = vadd.f32 %v12802_v33, %v3535_v20 }
 0x399   :  { %v5591_v19 = vmax.f32 %v3541_v17, 0.0 }
 0x39a   :  { %v6179_v22 = vmax.f32 %v6177_v1, %v6178_v32  ;;  %v5590_v52 = vmax.f32 %v3536_v46, 0.0 }
 0x39b   :  { %v5719_v23 = vsel %vm5463_vm0, %v5591_v19, 0.0 }
 0x39c   :  { %v6183_v48 = vsel %vm2204_vm3, %v5719_v23, -inf  ;;  %v5718_v44 = vsel %vm5462_vm1, %v5590_v52, 0.0  ;;  %v6180_v5 = vrot.slane %v6179_v22, 1  ;;  %v4541_v52 = vand.u32 15, %v3797_v38 }
 0x39d   :  { %v6182_v36 = vsel %vm2204_vm3, %v5718_v44, -inf }
 0x39e   :  { %v6184_v34 = vmax.f32 %v6182_v36, %v6183_v48  ;;  %v6181_v31 = vmax.f32 %v6179_v22, %v6180_v5  ;;  %v4548_v22 = vand.u32 15, %v3798_v56  ;;  %vm5468_vm1 = vcmp.le.s32.totalorder %v4541_v52, %v9997_v21 }
 0x3a0   :  { %v6472_v62 = vsel %vm6436_vm14, %v6181_v31, %v6471_v12  ;;  %v6185_v15 = vrot.slane %v6184_v34, 4  ;;  %vm5469_vm0 = vcmp.le.s32.totalorder %v4548_v22, %v9997_v21 }
 0x3a1   :  { %6497 = vrot.lane.b32.xlu1 %v6472_v62, %s8960_s25 }
 0x3a2   :  { %v8504_v27 = vpop.f32.mrb[98].mxu0  ;;  %v6186_v54 = vmax.f32 %v6184_v34, %v6185_v15 }
 0x3a3   :  { %v3551_v39 = vadd.f32 %v12802_v33, %v8504_v27  ;;  %v3545_v13 = vpop.f32.mrb[99].mxu0  ;;  %v3800_v27 = vadd.s32 840, %v9973_v55 }
 0x3a4   :  { %v3546_v59 = vadd.f32 %v12802_v33, %v3545_v13  ;;  %v6187_v30 = vrot.slane %v6186_v54, 2  ;;  %v3799_v13 = vadd.s32 832, %v9973_v55 }
 0x3a5   :  { %v5593_v7 = vmax.f32 %v3551_v39, 0.0 }
 0x3a6   :  { %v5592_v4 = vmax.f32 %v3546_v59, 0.0  ;;  %v6188_v47 = vmax.f32 %v6186_v54, %v6187_v30 }
 0x3a7   :  { %v5721_v51 = vsel %vm5465_vm5, %v5593_v7, 0.0 }
 0x3a8   :  { %v6192_v9 = vsel %vm2204_vm3, %v5721_v51, -inf  ;;  %v5720_v60 = vsel %vm5464_vm2, %v5592_v4, 0.0  ;;  %v6189_v37 = vrot.slane %v6188_v47, 1  ;;  %v4555_v51 = vand.u32 15, %v3799_v13 }
 0x3a9   :  { %v6191_v35 = vsel %vm2204_vm3, %v5720_v60, -inf }
 0x3aa   :  { %v6193_v0 = vmax.f32 %v6191_v35, %v6192_v9  ;;  %v6190_v17 = vmax.f32 %v6188_v47, %v6189_v37  ;;  %vm5470_vm2 = vcmp.le.s32.totalorder %v4555_v51, %v9997_v21 }
 0x3ac   :  { %v6194_v49 = vrot.slane %v6193_v0, 4 }
 0x3ae   :  { %v6195_v6 = vmax.f32 %v6193_v0, %v6194_v49  ;;  %v8507_v63 = vpop.f32.mrb[100].mxu0 }
 0x3af   :  { %v3561_v50 = vadd.f32 %v12802_v33, %v8507_v63  ;;  %v3555_v43 = vpop.f32.mrb[101].mxu0 }
 0x3b0   :  { %v6196_v26 = vrot.slane %v6195_v6, 2  ;;  %v3556_v11 = vadd.f32 %v12802_v33, %v3555_v43 }
 0x3b1   :  { %v5595_v58 = vmax.f32 %v3561_v50, 0.0 }
 0x3b2   :  { %v6197_v2 = vmax.f32 %v6195_v6, %v6196_v26  ;;  %v5594_v41 = vmax.f32 %v3556_v11, 0.0 }
 0x3b3   :  { %v5723_v8 = vsel %vm5467_vm10, %v5595_v58, 0.0  ;;  %v6496_v28 = vpop.permute.xlu0 %6495 }
 0x3b4   :  { %v6198_v57 = vrot.slane %v6197_v2, 1  ;;  %v6201_v40 = vsel %vm2204_vm3, %v5723_v8, -inf  ;;  %v5722_v12 = vsel %vm5466_vm13, %v5594_v41, 0.0  ;;  %v6515_v42 = vsel %vm2204_vm3, %v6356_v61, %v6496_v28 }
 0x3b5   :  { %v6200_v1 = vsel %vm2204_vm3, %v5722_v12, -inf  ;;  %8144 = vmatmul.mubr.msk.f32.gmra.mrb[20].mxu1 %vm2333_vm4, %v6515_v42  ;;  %v3801_v8 = vadd.s32 848, %v9973_v55 }
 0x3b6   :  { %v6199_v20 = vmax.f32 %v6197_v2, %v6198_v57  ;;  %v6202_v32 = vmax.f32 %v6200_v1, %v6201_v40  ;;  %6645 = vmatprep.mubr.f32.mxu1 %v13930_v24  ;;  %v3802_v2 = vadd.s32 856, %v9973_v55 }
 0x3b7   :  { %v4569_v40 = vand.u32 15, %v3801_v8 }
 0x3b8   :  { %v6473_v46 = vsel %vm6424_vm15, %v6199_v20, %v6190_v17  ;;  %v6203_v19 = vrot.slane %v6202_v32, 4  ;;  %v4576_v56 = vand.u32 15, %v3802_v2 }
 0x3b9   :  { %vm5472_vm13 = vcmp.le.s32.totalorder %v4569_v40, %v9997_v21 }
 0x3ba   :  { %v6204_v23 = vmax.f32 %v6202_v32, %v6203_v19  ;;  %v8510_v48 = vpop.f32.mrb[102].mxu0  ;;  %vm5473_vm10 = vcmp.le.s32.totalorder %v4576_v56, %v9997_v21 }
 0x3bb   :  { %v3571_v44 = vadd.f32 %v12802_v33, %v8510_v48  ;;  %v3565_v5 = vpop.f32.mrb[103].mxu0 }
 0x3bc   :  { %v6205_v3 = vrot.slane %v6204_v23, 2  ;;  %v3566_v36 = vadd.f32 %v12802_v33, %v3565_v5  ;;  %v4562_v33 = vand.u32 15, %v3800_v27 }
 0x3bd   :  { %v5597_v16 = vmax.f32 %v3571_v44, 0.0  ;;  %v3811_v44 = vadd.s32 928, %v9973_v55 }
 0x3be   :  { %v6206_v34 = vmax.f32 %v6204_v23, %v6205_v3  ;;  %v5596_v31 = vmax.f32 %v3566_v36, 0.0  ;;  %vm5471_vm5 = vcmp.le.s32.totalorder %v4562_v33, %v9997_v21  ;;  %v3812_v23 = vadd.s32 936, %v9973_v55 }
 0x3bf   :  { %v5725_v62 = vsel %vm5469_vm0, %v5597_v16, 0.0  ;;  %v4639_v16 = vand.u32 15, %v3811_v44 }
 0x3c0   :  { %v6207_v14 = vrot.slane %v6206_v34, 1  ;;  %v6210_v53 = vsel %vm2204_vm3, %v5725_v62, -inf  ;;  %v5724_v15 = vsel %vm5468_vm1, %v5596_v31, 0.0  ;;  %v4646_v36 = vand.u32 15, %v3812_v23 }
 0x3c1   :  { %v6209_v39 = vsel %vm2204_vm3, %v5724_v15, -inf  ;;  %vm5482_vm1 = vcmp.le.s32.totalorder %v4639_v16, %v9997_v21  ;;  %v3805_v23 = vadd.s32 880, %v9973_v55 }
 0x3c2   :  { %v6208_v59 = vmax.f32 %v6206_v34, %v6207_v14  ;;  %v6211_v7 = vmax.f32 %v6209_v39, %v6210_v53  ;;  %vm5483_vm0 = vcmp.le.s32.totalorder %v4646_v36, %v9997_v21 }
 0x3c3   :  { %v4597_v36 = vand.u32 15, %v3805_v23 }
 0x3c4   :  { %v6212_v54 = vrot.slane %v6211_v7, 4  ;;  %v6474_v4 = vsel %vm6426_vm9, %v6208_v59, %v6473_v46 }
 0x3c6   :  { %v6213_v9 = vmax.f32 %v6211_v7, %v6212_v54  ;;  %v8513_v60 = vpop.f32.mrb[104].mxu0 }
 0x3c7   :  { %v3581_v35 = vadd.f32 %v13096_v29, %v8513_v60  ;;  %v3575_v25 = vpop.f32.mrb[105].mxu0 }
 0x3c8   :  { %v6214_v30 = vrot.slane %v6213_v9, 2  ;;  %v3576_v0 = vadd.f32 %v13096_v29, %v3575_v25 }
 0x3c9   :  { %v5599_v49 = vmax.f32 %v3581_v35, 0.0 }
 0x3ca   :  { %v6215_v10 = vmax.f32 %v6213_v9, %v6214_v30  ;;  %v5598_v18 = vmax.f32 %v3576_v0, 0.0  ;;  %v3803_v9 = vadd.s32 864, %v9973_v55 }
 0x3cb   :  { %v5727_v47 = vsel %vm5471_vm5, %v5599_v49, 0.0 }
 0x3cc   :  { %v6216_v6 = vrot.slane %v6215_v10, 1  ;;  %v6219_v63 = vsel %vm2204_vm3, %v5727_v47, -inf  ;;  %v5726_v50 = vsel %vm5470_vm2, %v5598_v18, 0.0  ;;  %v4583_v0 = vand.u32 15, %v3803_v9 }
 0x3cd   :  { %v6218_v43 = vsel %vm2204_vm3, %v5726_v50, -inf }
 0x3ce   :  { %v6217_v26 = vmax.f32 %v6215_v10, %v6216_v6  ;;  %v6220_v11 = vmax.f32 %v6218_v43, %v6219_v63  ;;  %vm5474_vm2 = vcmp.le.s32.totalorder %v4583_v0, %v9997_v21 }
 0x3d0   :  { %v6221_v58 = vrot.slane %v6220_v11, 4  ;;  %v6475_v61 = vsel %vm6428_vm12, %v6217_v26, %v6474_v4  ;;  %v3804_v4 = vadd.s32 872, %v9973_v55 }
 0x3d2   :  { %v6222_v37 = vmax.f32 %v6220_v11, %v6221_v58  ;;  %v4590_v25 = vand.u32 15, %v3804_v4  ;;  %v3814_v11 = vadd.s32 952, %v9973_v55 }
 0x3d4   :  { %v6223_v41 = vrot.slane %v6222_v37, 2  ;;  %vm5475_vm5 = vcmp.le.s32.totalorder %v4590_v25, %v9997_v21 }
 0x3d6   :  { %v6224_v28 = vmax.f32 %v6222_v37, %v6223_v41  ;;  %v4660_v41 = vand.u32 15, %v3814_v11 }
 0x3d8   :  { %v6225_v57 = vrot.slane %v6224_v28, 1 }
 0x3d9   :  { %v8516_v12 = vpop.f32.mrb[106].mxu0 }
 0x3da   :  { %v6226_v42 = vmax.f32 %v6224_v28, %v6225_v57  ;;  %v3591_v1 = vadd.f32 %v13096_v29, %v8516_v12  ;;  %v3585_v38 = vpop.f32.mrb[107].mxu0 }
 0x3db   :  { %v3586_v17 = vadd.f32 %v13096_v29, %v3585_v38 }
 0x3dc   :  { %v5601_v20 = vmax.f32 %v3591_v1, 0.0  ;;  %v6476_v32 = vsel %vm6430_vm7, %v6226_v42, %v6475_v61  ;;  %v3813_v61 = vadd.s32 944, %v9973_v55 }
 0x3dd   :  { %v5600_v46 = vmax.f32 %v3586_v17, 0.0 }
 0x3de   :  { %v5729_v19 = vsel %vm5473_vm10, %v5601_v20, 0.0  ;;  %v4653_v8 = vand.u32 15, %v3813_v61  ;;  %vm5485_vm10 = vcmp.le.s32.totalorder %v4660_v41, %v9997_v21  ;;  %v3808_v61 = vadd.s32 904, %v9973_v55 }
 0x3df   :  { %v6228_v22 = vsel %vm2204_vm3, %v5729_v19, -inf  ;;  %v5728_v52 = vsel %vm5472_vm13, %v5600_v46, 0.0 }
 0x3e0   :  { %v6227_v48 = vsel %vm2204_vm3, %v5728_v52, -inf  ;;  %vm5484_vm13 = vcmp.le.s32.totalorder %v4653_v8, %v9997_v21 }
 0x3e1   :  { %v6229_v5 = vmax.f32 %v6227_v48, %v6228_v22  ;;  %v3806_v22 = vadd.s32 888, %v9973_v55 }
 0x3e3   :  { %v6230_v3 = vrot.slane %v6229_v5, 4 }
 0x3e5   :  { %v6231_v34 = vmax.f32 %v6229_v5, %v6230_v3  ;;  %v8531_v31 = vpop.f32.mrb[0].mxu1  ;;  %v4604_v5 = vand.u32 15, %v3806_v22 }
 0x3e6   :  { %v3641_v62 = vadd.f32 %v13096_v29, %v8531_v31  ;;  %v3635_v14 = vpop.f32.mrb[1].mxu1 }
 0x3e7   :  { %v6232_v53 = vrot.slane %v6231_v34, 2  ;;  %v3636_v15 = vadd.f32 %v13096_v29, %v3635_v14 }
 0x3e8   :  { %v5611_v27 = vmax.f32 %v3641_v62, 0.0 }
 0x3e9   :  { %v6233_v39 = vmax.f32 %v6231_v34, %v6232_v53  ;;  %v5610_v13 = vmax.f32 %v3636_v15, 0.0 }
 0x3ea   :  { %v5739_v59 = vsel %vm5483_vm0, %v5611_v27, 0.0  ;;  %vm5477_vm0 = vcmp.le.s32.totalorder %v4604_v5, %v9997_v21 }
 0x3eb   :  { %v6234_v7 = vrot.slane %v6233_v39, 1  ;;  %v6273_v54 = vsel %vm2204_vm3, %v5739_v59, -inf  ;;  %v5738_v33 = vsel %vm5482_vm1, %v5610_v13, 0.0  ;;  %vm5476_vm1 = vcmp.le.s32.totalorder %v4597_v36, %v9997_v21 }
 0x3ec   :  { %v6272_v51 = vsel %vm2204_vm3, %v5738_v33, -inf  ;;  %v3816_v13 = vadd.s32 968, %v9973_v55  ;;  %v6357_v33 = vld [vmem:[%s13927_s1 + $0x28] sm:$0xff] }
 0x3ed   :  { %v6235_v60 = vmax.f32 %v6233_v39, %v6234_v7  ;;  %v13124_v35 = vmax.f32 %v6272_v51, %v6273_v54  ;;  %v3815_v7 = vadd.s32 960, %v9973_v55 }
 0x3ee   :  { %v4674_v9 = vand.u32 15, %v3816_v13  ;;  %v3809_v13 = vadd.s32 912, %v9973_v55 }
 0x3ef   :  { %v6477_v30 = vsel %vm6432_vm11, %v6235_v60, %v6476_v32  ;;  %v4667_v25 = vand.u32 15, %v3815_v7  ;;  %v3820_v7 = vadd.s32 1000, %v9973_v55 }
 0x3f1   :  { %v8519_v49 = vpop.f32.mrb[108].mxu0 }
 0x3f2   :  { %v3601_v10 = vadd.f32 %v13096_v29, %v8519_v49  ;;  %v3595_v18 = vpop.f32.mrb[109].mxu0 }
 0x3f3   :  { %v3596_v47 = vadd.f32 %v13096_v29, %v3595_v18 }
 0x3f4   :  { %v5603_v6 = vmax.f32 %v3601_v10, 0.0 }
 0x3f5   :  { %v5602_v63 = vmax.f32 %v3596_v47, 0.0 }
 0x3f6   :  { %v5731_v50 = vsel %vm5475_vm5, %v5603_v6, 0.0  ;;  %vm5487_vm5 = vcmp.le.s32.totalorder %v4674_v9, %v9997_v21 }
 0x3f7   :  { %v6237_v43 = vsel %vm2204_vm3, %v5731_v50, -inf  ;;  %v5730_v26 = vsel %vm5474_vm2, %v5602_v63, 0.0  ;;  %vm5486_vm2 = vcmp.le.s32.totalorder %v4667_v25, %v9997_v21 }
 0x3f8   :  { %v6236_v58 = vsel %vm2204_vm3, %v5730_v26, -inf }
 0x3f9   :  { %v6238_v37 = vmax.f32 %v6236_v58, %v6237_v43 }
 0x3fb   :  { %v6239_v2 = vrot.slane %v6238_v37, 4 }
 0x3fd   :  { %v6240_v28 = vmax.f32 %v6238_v37, %v6239_v2  ;;  %v8534_v56 = vpop.f32.mrb[2].mxu1  ;;  %v3807_v2 = vadd.s32 896, %v9973_v55 }
 0x3fe   :  { %v3651_v57 = vadd.f32 %v13096_v29, %v8534_v56  ;;  %v3645_v40 = vpop.f32.mrb[3].mxu1  ;;  %v4618_v56 = vand.u32 15, %v3808_v61 }
 0x3ff   :  { %v6241_v12 = vrot.slane %v6240_v28, 2  ;;  %v3646_v42 = vadd.f32 %v13096_v29, %v3645_v40 }
 0x400   :  { %v5613_v1 = vmax.f32 %v3651_v57, 0.0  ;;  %v4611_v57 = vand.u32 15, %v3807_v2 }
 0x401   :  { %v6242_v38 = vmax.f32 %v6240_v28, %v6241_v12  ;;  %v5612_v17 = vmax.f32 %v3646_v42, 0.0 }
 0x402   :  { %v5741_v20 = vsel %vm5485_vm10, %v5613_v1, 0.0  ;;  %vm5479_vm10 = vcmp.le.s32.totalorder %v4618_v56, %v9997_v21 }
 0x403   :  { %v6243_v32 = vrot.slane %v6242_v38, 1  ;;  %v6282_v46 = vsel %vm2204_vm3, %v5741_v20, -inf  ;;  %v5740_v19 = vsel %vm5484_vm13, %v5612_v17, 0.0  ;;  %vm5478_vm13 = vcmp.le.s32.totalorder %v4611_v57, %v9997_v21 }
 0x404   :  { %v6281_v52 = vsel %vm2204_vm3, %v5740_v19, -inf  ;;  %v3818_v19 = vadd.s32 984, %v9973_v55 }
 0x405   :  { %v13143_v48 = vmax.f32 %v6281_v52, %v6282_v46  ;;  %v6244_v44 = vmax.f32 %v6242_v38, %v6243_v32  ;;  %v3817_v52 = vadd.s32 976, %v9973_v55 }
 0x407   :  { %v6478_v3 = vsel %vm6434_vm8, %v6244_v44, %v6477_v30  ;;  %v4688_v44 = vand.u32 15, %v3818_v19  ;;  %v4681_v5 = vand.u32 15, %v3817_v52 }
 0x409   :  { %v8522_v16 = vpop.f32.mrb[110].mxu0 }
 0x40a   :  { %v3611_v34 = vadd.f32 %v13096_v29, %v8522_v16  ;;  %v3605_v31 = vpop.f32.mrb[111].mxu0 }
 0x40b   :  { %v3606_v62 = vadd.f32 %v13096_v29, %v3605_v31 }
 0x40c   :  { %v5605_v14 = vmax.f32 %v3611_v34, 0.0 }
 0x40d   :  { %v5604_v53 = vmax.f32 %v3606_v62, 0.0 }
 0x40e   :  { %v5733_v15 = vsel %vm5477_vm0, %v5605_v14, 0.0  ;;  %vm5489_vm0 = vcmp.le.s32.totalorder %v4688_v44, %v9997_v21 }
 0x40f   :  { %v6246_v27 = vsel %vm2204_vm3, %v5733_v15, -inf  ;;  %v5732_v39 = vsel %vm5476_vm1, %v5604_v53, 0.0  ;;  %vm5488_vm1 = vcmp.le.s32.totalorder %v4681_v5, %v9997_v21 }
 0x410   :  { %v6245_v59 = vsel %vm2204_vm3, %v5732_v39, -inf }
 0x411   :  { %v6247_v54 = vmax.f32 %v6245_v59, %v6246_v27  ;;  %v3810_v27 = vadd.s32 920, %v9973_v55 }
 0x413   :  { %v6248_v4 = vrot.slane %v6247_v54, 4  ;;  %v6498_v51 = vpop.permute.xlu1 %6497 }
 0x414   :  { %v6516_v60 = vsel %vm2204_vm3, %v6357_v33, %v6498_v51  ;;  %v4625_v33 = vand.u32 15, %v3809_v13 }
 0x415   :  { %v6249_v30 = vmax.f32 %v6247_v54, %v6248_v4  ;;  %v8537_v0 = vpop.f32.mrb[4].mxu1  ;;  %8145 = vmatmul.mubr.msk.f32.gmra.mrb[22].mxu1 %vm2333_vm4, %v6516_v60  ;;  %v4632_v54 = vand.u32 15, %v3810_v27  ;;  %v3819_v4 = vadd.s32 992, %v9973_v55 }
 0x416   :  { %v3661_v49 = vadd.f32 %v13096_v29, %v8537_v0  ;;  %v3655_v10 = vpop.f32.mrb[5].mxu1  ;;  %6651 = vmatprep.mubr.f32.mxu1 %v13930_v24  ;;  %v6275_v0 = vrot.slane %v13124_v35, 4 }
 0x417   :  { %v6250_v18 = vrot.slane %v6249_v30, 2  ;;  %v3656_v47 = vadd.f32 %v13096_v29, %v3655_v10  ;;  %v6284_v10 = vrot.slane %v13143_v48, 4 }
 0x418   :  { %v5615_v6 = vmax.f32 %v3661_v49, 0.0  ;;  %v6276_v61 = vmax.f32 %v13124_v35, %v6275_v0 }
 0x419   :  { %v6251_v63 = vmax.f32 %v6249_v30, %v6250_v18  ;;  %v5614_v50 = vmax.f32 %v3656_v47, 0.0  ;;  %v4702_v30 = vand.u32 15, %v3820_v7  ;;  %v4695_v47 = vand.u32 15, %v3819_v4 }
 0x41a   :  { %v5743_v43 = vsel %vm5487_vm5, %v5615_v6, 0.0  ;;  %vm5481_vm5 = vcmp.le.s32.totalorder %v4632_v54, %v9997_v21  ;;  %v6285_v56 = vmax.f32 %v13143_v48, %v6284_v10  ;;  %v3822_v48 = vadd.s32 1016, %v9973_v55 }
 0x41b   :  { %v6291_v26 = vsel %vm2204_vm3, %v5743_v43, -inf  ;;  %v5742_v11 = vsel %vm5486_vm2, %v5614_v50, 0.0  ;;  %v6252_v58 = vrot.slane %v6251_v63, 1  ;;  %vm5480_vm2 = vcmp.le.s32.totalorder %v4625_v33, %v9997_v21 }
 0x41c   :  { %v6290_v37 = vsel %vm2204_vm3, %v5742_v11, -inf  ;;  %v6286_v19 = vrot.slane %v6285_v56, 2 }
 0x41d   :  { %v13168_v41 = vmax.f32 %v6290_v37, %v6291_v26  ;;  %v6253_v8 = vmax.f32 %v6251_v63, %v6252_v58 }
 0x41f   :  { %v6479_v28 = vsel %vm6436_vm14, %v6253_v8, %v6478_v3  ;;  %v6293_v6 = vrot.slane %v13168_v41, 4 }
 0x420   :  { %6499 = vrot.lane.b32.xlu0 %v6479_v28, %s8960_s25 }
 0x421   :  { %v8525_v40 = vpop.f32.mrb[112].mxu0 }
 0x422   :  { %v3621_v12 = vadd.f32 %v13096_v29, %v8525_v40  ;;  %v3615_v42 = vpop.f32.mrb[113].mxu0 }
 0x423   :  { %v3616_v1 = vadd.f32 %v13096_v29, %v3615_v42 }
 0x424   :  { %v5607_v38 = vmax.f32 %v3621_v12, 0.0  ;;  %v6294_v12 = vmax.f32 %v13168_v41, %v6293_v6 }
 0x425   :  { %v5606_v17 = vmax.f32 %v3616_v1, 0.0 }
 0x426   :  { %v5735_v20 = vsel %vm5479_vm10, %v5607_v38, 0.0  ;;  %vm13198_vm10 = vcmp.le.s32.totalorder %v4702_v30, %v9997_v21  ;;  %v6295_v44 = vrot.slane %v6294_v12, 2 }
 0x427   :  { %v6255_v32 = vsel %vm2204_vm3, %v5735_v20, -inf  ;;  %v5734_v46 = vsel %vm5478_vm13, %v5606_v17, 0.0  ;;  %vm5490_vm13 = vcmp.le.s32.totalorder %v4695_v47, %v9997_v21  ;;  %v6277_v20 = vrot.slane %v6276_v61, 2 }
 0x428   :  { %v6254_v22 = vsel %vm2204_vm3, %v5734_v46, -inf  ;;  %v6296_v27 = vmax.f32 %v6294_v12, %v6295_v44 }
 0x429   :  { %v6256_v23 = vmax.f32 %v6254_v22, %v6255_v32 }
 0x42b   :  { %v6257_v51 = vrot.slane %v6256_v23, 4 }
 0x42d   :  { %v8540_v3 = vpop.f32.mrb[6].mxu1  ;;  %v6258_v63 = vmax.f32 %v6256_v23, %v6257_v51  ;;  %v3821_v23 = vadd.s32 1008, %v9973_v55 }
 0x42e   :  { %v3671_v36 = vadd.f32 %v13096_v29, %v8540_v3  ;;  %v3665_v16 = vpop.f32.mrb[7].mxu1 }
 0x42f   :  { %v3666_v34 = vadd.f32 %v13096_v29, %v3665_v16  ;;  %v6259_v42 = vrot.slane %v6258_v63, 2 }
 0x430   :  { %v5617_v31 = vmax.f32 %v3671_v36, 0.0 }
 0x431   :  { %v5616_v62 = vmax.f32 %v3666_v34, 0.0  ;;  %v6260_v41 = vmax.f32 %v6258_v63, %v6259_v42  ;;  %v6278_v34 = vmax.f32 %v6276_v61, %v6277_v20  ;;  %v13244_v42 = vld [vmem:[%s13926_s3 + $0xc0] ss:$0 sm:$0xff] }
 0x432   :  { %v5745_v14 = vsel %vm5489_vm0, %v5617_v31, 0.0 }
 0x433   :  { %v6300_v53 = vsel %vm2204_vm3, %v5745_v14, -inf  ;;  %v5744_v15 = vsel %vm5488_vm1, %v5616_v62, 0.0  ;;  %v4716_v62 = vand.u32 15, %v3822_v48  ;;  %v6287_v14 = vmax.f32 %v6285_v56, %v6286_v19  ;;  %v13238_v56 = vld [vmem:[%s13926_s3 + $0xc8] ss:$0 sm:$0xff] }
 0x434   :  { %v6299_v39 = vsel %vm2204_vm3, %v5744_v15, -inf  ;;  %v4709_v15 = vand.u32 15, %v3821_v23  ;;  %v6279_v55 = vrot.slane %v6278_v34, 1 }
 0x435   :  { %v6301_v59 = vmax.f32 %v6299_v39, %v6300_v53  ;;  %v6261_v39 = vrot.slane %v6260_v41, 1  ;;  %vm13218_vm0 = vcmp.le.s32.totalorder %v4716_v62, %v9997_v21 }
 0x436   :  { %vm13224_vm1 = vcmp.le.s32.totalorder %v4709_v15, %v9997_v21 }
 0x437   :  { %v6302_v43 = vrot.slane %v6301_v59, 4  ;;  %v6262_v10 = vmax.f32 %v6260_v41, %v6261_v39 }
 0x439   :  { %v8528_v9 = vpop.f32.mrb[114].mxu0  ;;  %v6303_v35 = vmax.f32 %v6301_v59, %v6302_v43 }
 0x43a   :  { %v3631_v60 = vadd.f32 %v13096_v29, %v8528_v9  ;;  %v3625_v25 = vpop.f32.mrb[115].mxu0 }
 0x43b   :  { %v3626_v49 = vadd.f32 %v13096_v29, %v3625_v25  ;;  %v6304_v36 = vrot.slane %v6303_v35, 2 }
 0x43c   :  { %v5609_v18 = vmax.f32 %v3631_v60, 0.0  ;;  %v6288_v60 = vrot.slane %v6287_v14, 1 }
 0x43d   :  { %v5608_v50 = vmax.f32 %v3626_v49, 0.0  ;;  %v6305_v59 = vmax.f32 %v6303_v35, %v6304_v36  ;;  %v6297_v49 = vrot.slane %v6296_v27, 1 }
 0x43e   :  { %v5737_v26 = vsel %vm5481_vm5, %v5609_v18, 0.0  ;;  %v8543_v11 = vpop.f32.mrb[8].mxu1  ;;  %v6289_v61 = vmax.f32 %v6287_v14, %v6288_v60  ;;  %v6359_v60 = vld [vmem:[%s13927_s1 + $0x38] sm:$0xff] }
 0x43f   :  { %v6264_v37 = vsel %vm2204_vm3, %v5737_v26, -inf  ;;  %v5736_v2 = vsel %vm5480_vm2, %v5608_v50, 0.0  ;;  %v3681_v8 = vadd.f32 %v13096_v29, %v8543_v11  ;;  %v3675_v28 = vpop.f32.mrb[9].mxu1  ;;  %v6306_v6 = vrot.slane %v6305_v59, 1 }
 0x440   :  { %v6263_v57 = vsel %vm2204_vm3, %v5736_v2, -inf  ;;  %v3676_v40 = vadd.f32 %v13096_v29, %v3675_v28  ;;  %v6280_v26 = vmax.f32 %v6278_v34, %v6279_v55 }
 0x441   :  { %v6265_v1 = vmax.f32 %v6263_v57, %v6264_v37  ;;  %v5619_v38 = vmax.f32 %v3681_v8, 0.0  ;;  %v6298_v8 = vmax.f32 %v6296_v27, %v6297_v49 }
 0x442   :  { %v5618_v17 = vmax.f32 %v3676_v40, 0.0  ;;  %v6307_v40 = vmax.f32 %v6305_v59, %v6306_v6 }
 0x443   :  { %v6266_v32 = vrot.slane %v6265_v1, 4  ;;  %v5747_v46 = vsel %vm13198_vm10, %v5619_v38, 0.0 }
 0x444   :  { %v6309_v22 = vsel %vm2204_vm3, %v5747_v46, -inf  ;;  %v5746_v52 = vsel %vm5490_vm13, %v5618_v17, 0.0 }
 0x445   :  { %v6267_v5 = vmax.f32 %v6265_v1, %v6266_v32  ;;  %v6308_v3 = vsel %vm2204_vm3, %v5746_v52, -inf }
 0x446   :  { %v6310_v16 = vmax.f32 %v6308_v3, %v6309_v22 }
 0x447   :  { %v6268_v31 = vrot.slane %v6267_v5, 2 }
 0x448   :  { %v6311_v53 = vrot.slane %v6310_v16, 4 }
 0x449   :  { %v6269_v13 = vmax.f32 %v6267_v5, %v6268_v31 }
 0x44a   :  { %v6312_v7 = vmax.f32 %v6310_v16, %v6311_v53  ;;  %v8546_v54 = vpop.f32.mrb[10].mxu1 }
 0x44b   :  { %v6270_v33 = vrot.slane %v6269_v13, 1  ;;  %v3691_v4 = vadd.f32 %v13096_v29, %v8546_v54  ;;  %v3685_v9 = vpop.f32.mrb[11].mxu1 }
 0x44c   :  { %v6313_v25 = vrot.slane %v6312_v7, 2  ;;  %v3686_v30 = vadd.f32 %v13096_v29, %v3685_v9 }
 0x44d   :  { %v6271_v18 = vmax.f32 %v6269_v13, %v6270_v33  ;;  %v5621_v47 = vmax.f32 %v3691_v4, 0.0  ;;  %v6358_v4 = vld [vmem:[%s13927_s1 + $0x30] sm:$0xff] }
 0x44e   :  { %v6314_v63 = vmax.f32 %v6312_v7, %v6313_v25  ;;  %v5620_v50 = vmax.f32 %v3686_v30, 0.0  ;;  %v6617_v43 = vpop.f32.mrb[12].mxu1 }
 0x44f   :  { %v6480_v11 = vsel %vm6424_vm15, %v6271_v18, %v6262_v10  ;;  %v5749_v58 = vsel %vm13218_vm0, %v5621_v47, 0.0  ;;  %v6619_v29 = vpop.f32.mrb[13].mxu1  ;;  %v13259_v52 = vadd.f32 %v13244_v42, %v6617_v43 }
 0x450   :  { %v6315_v21 = vrot.slane %v6314_v63, 1  ;;  %v6318_v37 = vsel %vm2204_vm3, %v5749_v58, -inf  ;;  %v5748_v2 = vsel %vm13224_vm1, %v5620_v50, 0.0  ;;  %v6481_v57 = vsel %vm6426_vm9, %v6280_v26, %v6480_v11 }
 0x451   :  { %v6317_v28 = vsel %vm2204_vm3, %v5748_v2, -inf  ;;  %v6482_v35 = vsel %vm6428_vm12, %v6289_v61, %v6481_v57  ;;  %v13252_v48 = vadd.f32 %v13238_v56, %v6619_v29  ;;  %v6335_v61 = vld [vmem:[%s13926_s3 + $0x48] sm:$0xff] }
 0x452   :  { %v6319_v12 = vmax.f32 %v6317_v28, %v6318_v37  ;;  %v6623_v1 = vpop.f32.mrb[14].mxu1  ;;  %v6316_v38 = vmax.f32 %v6314_v63, %v6315_v21  ;;  %v6483_v32 = vsel %vm6430_vm7, %v6298_v8, %v6482_v35  ;;  %v6337_v21 = vld [vmem:[%s13926_s3 + $0x58] sm:$0xff] }
 0x453   :  { %v13248_v17 = vadd.f32 %v13244_v42, %v6623_v1  ;;  %v6625_v20 = vpop.f32.mrb[15].mxu1  ;;  %v6484_v22 = vsel %vm6432_vm11, %v6307_v40, %v6483_v32  ;;  %v13332_v57 = vpack.c.bf16 %v6337_v21, %v6335_v61  ;;  %v6334_v40 = vld [vmem:[%s13926_s3 + $0x40] sm:$0xff]  ;;  %v6341_v1 = vld [vmem:[%s13926_s3 + $0x78] sm:$0xff] }
 0x454   :  { %v6320_v46 = vrot.slane %v6319_v12, 4  ;;  %v13255_v19 = vadd.f32 %v13238_v56, %v6625_v20  ;;  %v6485_v23 = vsel %vm6434_vm8, %v6316_v38, %v6484_v22  ;;  %v13351_v38 = vld [vmem:[%s13928_s4] sm:$0xff]  ;;  %v6343_v22 = vld [vmem:[%s13926_s3 + $0x88] sm:$0xff] }
 0x455   :  { %v8601_v3 = vpack.c.bf16 %v13248_v17, %v13259_v52  ;;  %v6338_v32 = vld [vmem:[%s13926_s3 + $0x60] sm:$0xff] }
 0x456   :  { %v6321_v44 = vmax.f32 %v6319_v12, %v6320_v46  ;;  %v8599_v41 = vpack.c.bf16 %v13255_v19, %v13252_v48  ;;  %v6629_v5 = vpop.f32.mrb[16].mxu1  ;;  %v6336_v12 = vld [vmem:[%s13926_s3 + $0x50] sm:$0xff] }
 0x457   :  { %v6631_v36 = vpop.f32.mrb[17].mxu1  ;;  %v13276_v39 = vadd.f32 %v13244_v42, %v6629_v5  ;;  %v13353_v35 = vpack.c.bf16 %v6336_v12, %v6334_v40  ;;  %v6340_v46 = vld [vmem:[%s13926_s3 + $0x70] sm:$0xff] }
 0x458   :  { %v6322_v16 = vrot.slane %v6321_v44, 2  ;;  %8600 = vmatprep.subr.bf16.mxu1 %v8599_v41  ;;  %v13270_v53 = vadd.f32 %v13238_v56, %v6631_v36  ;;  %v13379_v41 = vpack.c.bf16 %v6340_v46, %v6338_v32  ;;  %v6344_v36 = vld [vmem:[%s13926_s3 + $0x90] sm:$0xff] }
 0x459   :  { %8602 = vmatpush1.bf16.msra.mxu1 %v8601_v3  ;;  %v6342_v3 = vld [vmem:[%s13926_s3 + $0x80] sm:$0xff] }
 0x45a   :  { %v6323_v34 = vmax.f32 %v6321_v44, %v6322_v16  ;;  %v6635_v31 = vpop.f32.mrb[18].mxu1  ;;  %v13376_v44 = vld [vmem:[%s13928_s4 + $0x8] sm:$0xff] }
 0x45b   :  { %v13267_v62 = vadd.f32 %v13244_v42, %v6635_v31  ;;  %v6637_v14 = vpop.f32.mrb[19].mxu1  ;;  %v6347_v16 = vld [vmem:[%s13926_s3 + $0xa8] sm:$0xff]  ;;  %v13402_v31 = vld [vmem:[%s13928_s4 + $0x10] sm:$0xff] }
 0x45c   :  { %v13273_v15 = vadd.f32 %v13238_v56, %v6637_v14  ;;  %v6324_v27 = vrot.slane %v6323_v34, 1  ;;  %v13405_v14 = vpack.c.bf16 %v6344_v36, %v6342_v3 }
 0x45d   :  { %v8605_v7 = vpack.c.bf16 %v13267_v62, %v13276_v39 }
 0x45e   :  { %v8603_v13 = vpack.c.bf16 %v13273_v15, %v13270_v53  ;;  %v6325_v59 = vmax.f32 %v6323_v34, %v6324_v27  ;;  %v6349_v34 = vld [vmem:[%s13926_s3 + $0xb8] sm:$0xff] }
 0x45f   :  { %v13408_v27 = vpack.c.bf16 %v6349_v34, %v6347_v16 }
 0x460   :  { %8604 = vmatprep.subr.bf16.mxu1 %v8603_v13  ;;  %v6486_v54 = vsel %vm6436_vm14, %v6325_v59, %v6485_v23  ;;  %v6345_v23 = vld [vmem:[%s13926_s3 + $0x98] sm:$0xff]  ;;  %v6346_v13 = vld [vmem:[%s13926_s3 + $0xa0] sm:$0xff]  ;;  %v6348_v59 = vld [vmem:[%s13926_s3 + $0xb0] sm:$0xff] }
 0x461   :  { %6501 = vrot.lane.b32.xlu1 %v6486_v54, %s8960_s25  ;;  %8606 = vmatpush1.bf16.msra.mxu1 %v8605_v7  ;;  %v13382_v5 = vpack.c.bf16 %v6345_v23, %v6343_v22  ;;  %v13422_v7 = vld [vmem:[%s13928_s4 + $0x18] sm:$0xff]  ;;  %v13425_v54 = vpack.c.bf16 %v6348_v59, %v6346_v13 }
 0x488   :  { %v6641_v55 = vpop.f32.mrb[20].mxu1 }
 0x489   :  { %v6643_v33 = vpop.f32.mrb[21].mxu1  ;;  %v13306_v6 = vadd.f32 %v13244_v42, %v6641_v55  ;;  %v13434_v55 = vld [vmem:[%s13928_s4 + $0x20] sm:$0xff] }
 0x48a   :  { %v13300_v18 = vadd.f32 %v13238_v56, %v6643_v33  ;;  %v13444_v33 = vld [vmem:[%s13928_s4 + $0x28] sm:$0xff] }
 0x492   :  { %v6500_v51 = vpop.permute.xlu0 %6499 }
 0x493   :  { %v6517_v9 = vsel %vm2204_vm3, %v6358_v4, %v6500_v51  ;;  %v13452_v4 = vld [vmem:[%s13928_s4 + $0x30] sm:$0xff]  ;;  %v13460_v51 = vld [vmem:[%s13928_s4 + $0x38] sm:$0xff]  ;;  %s8965_s4 = smov 64  }
 0x494   :  { %8146 = vmatmul.mubr.msk.f32.gmra.mrb[24].mxu1 %vm2333_vm4, %v6517_v9  ;;  %v6856_v9 = vsel %vm2604_vm6, %v13351_v38, 0.0 }
 0x495   :  { %6657 = vmatprep.mubr.f32.mxu1 %v13930_v24  ;;  %6857 = vadd.xlane.f32.xlu0 %v6856_v9 }
 0x4d3   :  { %v6502_v25 = vpop.permute.xlu1 %6501 }
 0x4d4   :  { %v6518_v30 = vsel %vm2204_vm3, %v6359_v60, %v6502_v25  ;;  %v6809_v60 = vadd.s32 128, %v9949_v45 }
 0x4d5   :  { %8147 = vmatmul.mubr.msk.f32.gmra.mrb[26].mxu1 %vm2333_vm4, %v6518_v30  ;;  %v6814_v30 = vand.u32 63, %v9949_v45 }
 0x4d6   :  { %6760 = vmatprep.mubr.f32.mxu1 %v13930_v24  ;;  %vm6891_vm9 = vcmp.lt.s32.totalorder %v6809_v60, 192 }
 0x4d7   :  { %vm13481_vm3 = vcmp.lt.s32.totalorder %v6814_v30, 32 }
 0x4e8   :  { %v6647_v0 = vpop.f32.mrb[22].mxu1 }
 0x4e9   :  { %v13297_v49 = vadd.f32 %v13244_v42, %v6647_v0  ;;  %v6649_v10 = vpop.f32.mrb[23].mxu1 }
 0x4ea   :  { %v13303_v47 = vadd.f32 %v13238_v56, %v6649_v10  ;;  %v6821_v10 = vand.u32 63, %v6809_v60 }
 0x4eb   :  { %v8609_v50 = vpack.c.bf16 %v13297_v49, %v13306_v6 }
 0x4ec   :  { %v8607_v63 = vpack.c.bf16 %v13303_v47, %v13300_v18  ;;  %vm13487_vm15 = vcmp.lt.s32.totalorder %v6821_v10, 32 }
 0x4ee   :  { %8608 = vmatprep.subr.bf16.mxu1 %v8607_v63 }
 0x4ef   :  { %8610 = vmatpush1.bf16.msra.mxu1 %v8609_v50 }
 0x567   :  { %v6653_v43 = vpop.f32.mrb[24].mxu1 }
 0x568   :  { %v6655_v26 = vpop.f32.mrb[25].mxu1  ;;  %v13328_v8 = vadd.f32 %v13244_v42, %v6653_v43 }
 0x569   :  { %v13322_v37 = vadd.f32 %v13238_v56, %v6655_v26 }
 0x5a8   :  { %v6659_v11 = vpop.f32.mrb[26].mxu1 }
 0x5a9   :  { %v13313_v58 = vadd.f32 %v13244_v42, %v6659_v11  ;;  %v6661_v29 = vpop.f32.mrb[27].mxu1  ;;  %v6339_v42 = vld [vmem:[%s13926_s3 + $0x68] sm:$0xff] }
 0x5aa   :  { %v13325_v2 = vadd.f32 %v13238_v56, %v6661_v29  ;;  %v13356_v20 = vpack.c.bf16 %v6341_v1, %v6339_v42  ;;  %v8964_v42 = vmov 1.0  }
 0x5ab   :  { %v8613_v56 = vpack.c.bf16 %v13313_v58, %v13328_v8 }
 0x5ac   :  { %v8611_v28 = vpack.c.bf16 %v13325_v2, %v13322_v37 }
 0x5ae   :  { %8612 = vmatprep.subr.bf16.mxu1 %v8611_v28 }
 0x5af   :  { %8614 = vmatpush1.bf16.msra.mxu1 %v8613_v56  ;;  %v13578_v56 = vsel %vm6891_vm9, 2.0, %v8964_v42 }
 0x5b0   :  { %8616 = vmatprep.subr.bf16.mxu1 %v13332_v57 }
 0x5b2   :  { %8148 = vmatmul.mubr.msk.f32.vlgmr.msra.gmra.mrb[28].mxu1 %vm2604_vm6, %v13351_v38 }
 0x5b3   :  { %6766 = vmatprep.mubr.f32.mxu1 %v13930_v24  ;;  %8618 = vmatpush1.bf16.msra.mxu1 %v13353_v35 }
 0x5b4   :  { %8620 = vmatprep.subr.bf16.mxu1 %v13356_v20 }
 0x5b6   :  { %8149 = vmatmul.mubr.msk.f32.gmra.mrb[30].mxu1 %vm2604_vm6, %v13376_v44 }
 0x5b7   :  { %6772 = vmatprep.mubr.f32.mxu1 %v13930_v24  ;;  %8622 = vmatpush1.bf16.msra.mxu1 %v13379_v41 }
 0x5b8   :  { %8624 = vmatprep.subr.bf16.mxu1 %v13382_v5 }
 0x5ba   :  { %8150 = vmatmul.mubr.msk.f32.gmra.mrb[32].mxu1 %vm2604_vm6, %v13402_v31 }
 0x5bb   :  { %6778 = vmatprep.mubr.f32.mxu1 %v13930_v24  ;;  %8626 = vmatpush1.bf16.msra.mxu1 %v13405_v14 }
 0x5bc   :  { %8628 = vmatprep.subr.bf16.mxu1 %v13408_v27 }
 0x5be   :  { %8151 = vmatmul.mubr.msk.f32.gmra.mrb[34].mxu1 %vm2604_vm6, %v13422_v7 }
 0x5bf   :  { %6784 = vmatprep.mubr.f32.mxu1 %v13930_v24  ;;  %8630 = vmatpush1.bf16.msra.mxu1 %v13425_v54 }
 0x5c0   :  { %8632 = vmatprep.subr.bf16.mxu1 %v13332_v57 }
 0x5c2   :  { %8152 = vmatmul.mubr.msk.f32.gmra.mrb[36].mxu1 %vm2604_vm6, %v13434_v55 }
 0x5c3   :  { %6790 = vmatprep.mubr.f32.mxu1 %v13930_v24 }
 0x5c6   :  { %8153 = vmatmul.mubr.msk.f32.gmra.mrb[38].mxu1 %vm2604_vm6, %v13444_v33 }
 0x5c7   :  { %6796 = vmatprep.mubr.f32.mxu1 %v13930_v24 }
 0x5ca   :  { %8154 = vmatmul.mubr.msk.f32.gmra.mrb[40].mxu1 %vm2604_vm6, %v13452_v4 }
 0x5cb   :  { %6802 = vmatprep.mubr.f32.mxu1 %v13930_v24 }
 0x5ce   :  { %8155 = vmatmul.mubr.msk.f32.gmra.mrb[42].mxu1 %vm2604_vm6, %v13460_v51 }
 0x5cf   :  { %6965 = vmatprep.mubr.f32.mxu1 %v13930_v24 }
 0x5d2   :  { %6966 = vmatmul.mubr.f32.vlgmr.msra.gmra.mrb[44].mxu1 %v13930_v24 }
 0x5d3   :  { %8634 = vmatpush1.bf16.msra.mxu1 %v13353_v35  ;;  %7074 = vmatprep.mubr.f32.mxu1 %v13930_v24 }
 0x5d4   :  { %8636 = vmatprep.subr.bf16.mxu1 %v13356_v20 }
 0x5d7   :  { %8638 = vmatpush1.bf16.msra.mxu1 %v13379_v41 }
 0x5d8   :  { %8640 = vmatprep.subr.bf16.mxu1 %v13382_v5 }
 0x5db   :  { %8642 = vmatpush1.bf16.msra.mxu1 %v13405_v14 }
 0x5dc   :  { %8644 = vmatprep.subr.bf16.mxu1 %v13408_v27 }
 0x5df   :  { %8646 = vmatpush1.bf16.msra.mxu1 %v13425_v54 }
 0x5e0   :  { %8648 = vmatprep.subr.bf16.mxu1 %v13332_v57 }
 0x685   :  { %v6762_v25 = vpop.f32.mrb[28].mxu1 }
 0x686   :  { %v6764_v0 = vpop.f32.mrb[29].mxu1  ;;  %v6840_v36 = vsel %vm13481_vm3, %v13259_v52, %v6762_v25 }
 0x687   :  { %v6841_v46 = vsel %vm13487_vm15, %v13252_v48, %v6764_v0  ;;  %v13583_v48 = vsel %vm6891_vm9, 1.0, %v13930_v24 }
 0x689   :  { %v13479_v63 = vpop.f32.mrb[30].mxu1 }
 0x68a   :  { %v13485_v43 = vpop.f32.mrb[31].mxu1 }
 0x68d   :  { %v13499_v29 = vpop.f32.mrb[32].mxu1 }
 0x68e   :  { %v13501_v61 = vpop.f32.mrb[33].mxu1 }
 0x691   :  { %v13511_v40 = vpop.f32.mrb[34].mxu1 }
 0x692   :  { %v13513_v12 = vpop.f32.mrb[35].mxu1 }
 0x695   :  { %v13523_v1 = vpop.f32.mrb[36].mxu1 }
 0x696   :  { %v13525_v32 = vpop.f32.mrb[37].mxu1 }
 0x699   :  { %v13535_v23 = vpop.f32.mrb[38].mxu1 }
 0x69a   :  { %v13537_v3 = vpop.f32.mrb[39].mxu1 }
 0x69d   :  { %v13547_v34 = vpop.f32.mrb[40].mxu1 }
 0x69e   :  { %v13549_v13 = vpop.f32.mrb[41].mxu1 }
 0x6a1   :  { %v13559_v30 = vpop.f32.mrb[42].mxu1 }
 0x6a2   :  { %v13561_v10 = vpop.f32.mrb[43].mxu1 }
 0x6a5   :  { %v6967_v9 = vpop.f32.mrb[44].mxu1 }
 0x6a6   :  { %v6972_v22 = vadd.f32 %v6967_v9, %v6840_v36  ;;  %v6969_v16 = vpop.f32.mrb[45].mxu1 }
 0x6a7   :  { %v6973_v28 = vadd.f32 %v6969_v16, %v6841_v46 }
 0x6a8   :  { %v8156_v21 = vmul.f32 -1.442695, %v6972_v22 }
 0x6a9   :  { %v6975_v45 = vmul.f32 %v6973_v28, %v13578_v56 }
 0x6aa   :  { %8794 = vpow2.f32 %v8156_v21 }
 0x6ab   :  { %v8157_v59 = vmul.f32 -1.442695, %v6975_v45  ;;  %v13588_v45 = vpop.xlane.xlu0 %6857 }
 0x6ac   :  { %vm6880_vm12 = vcmp.gt.f32.partialorder %v13588_v45, 0.5 }
 0x6ad   :  { %8796 = vpow2.f32 %v8157_v59 }
 0x6b4   :  { %v8795_v11 = vpop.eup %8794 }
 0x6b5   :  { %v6982_v36 = vadd.f32 1.0, %v8795_v11 }
 0x6b7   :  { %v8797_v52 = vpop.eup %8796 }
 0x6b8   :  { %v6983_v25 = vadd.f32 1.0, %v8797_v52 }
 0x6ba   :  { %8798 = vrcp.f32 %v6983_v25 }
 0x6bb   :  { %8800 = vrcp.f32 %v6982_v36  ;;  %v6859_v36 = vsel %vm2604_vm6, %v13376_v44, 0.0 }
 0x6c4   :  { %v8799_v9 = vpop.eup %8798 }
 0x6c5   :  { %v6989_v0 = vmul.f32 %v8799_v9, %v13578_v56  ;;  %v8801_v46 = vpop.eup %8800 }
 0x6c6   :  { %v6992_v21 = vmul.f32 0.0, %v8801_v46 }
 0x6c7   :  { %v6991_v42 = vsub.f32 %v6989_v0, %v13583_v48  ;;  %v14084_v0 = vsel %vm13481_vm3, %v13248_v17, %v13479_v63 }
 0x6c9   :  { %v6993_v28 = vmul.f32 %v8801_v46, %v6991_v42 }
 0x6cb   :  { %6995 = vrot.lane.b32.xlu1 %v6993_v28, %s8965_s4  ;;  %v14085_v28 = vsel %vm13487_vm15, %v13255_v19, %v13485_v43 }
 0x73d   :  { %v6996_v11 = vpop.permute.xlu1 %6995 }
 0x73e   :  { %v6998_v22 = vadd.f32 %v6996_v11, %v6992_v21 }
 0x740   :  { %8802 = vtanh.f32 %v6998_v22  ;;  %v7004_v60 = vsel %vm6880_vm12, %v6998_v22, 0.0 }
 0x74a   :  { %v8803_v16 = vpop.eup %8802 }
 0x74b   :  { %v7000_v59 = vmul.f32 %v8803_v16, %v6991_v42 }
 0x74d   :  { %v13591_v52 = vsel %vm6880_vm12, %v7000_v59, 0.0 }
 0x74e   :  { %7006 = vrot.lane.b32.xlu1 %v13591_v52, %s8965_s4 }
 0x772   :  { %6860 = vadd.xlane.f32.xlu1 %v6859_v36 }
 0x7c0   :  { %v7007_v25 = vpop.permute.xlu1 %7006 }
 0x7c1   :  { %8158 = vmatmul.mubr.msk.f32.vlgmr.msra.gmra.mrb[46].mxu1 %vm2604_vm6, %v7007_v25 }
 0x7c2   :  { %8650 = vmatpush1.bf16.msra.mxu1 %v13353_v35  ;;  %7183 = vmatprep.mubr.f32.mxu1 %v13930_v24 }
 0x7c3   :  { %8652 = vmatprep.subr.bf16.mxu1 %v13356_v20 }
 0x7c6   :  { %8654 = vmatpush1.bf16.msra.mxu1 %v13379_v41 }
 0x7c7   :  { %8656 = vmatprep.subr.bf16.mxu1 %v13382_v5 }
 0x7ca   :  { %8658 = vmatpush1.bf16.msra.mxu1 %v13405_v14 }
 0x7cb   :  { %8660 = vmatprep.subr.bf16.mxu1 %v13408_v27 }
 0x7ce   :  { %8662 = vmatpush1.bf16.msra.mxu1 %v13425_v54 }
 0x7cf   :  { %8664 = vmatprep.subr.bf16.mxu1 %v13332_v57 }
 0x7ff   :  { %v13621_v43 = vpop.xlane.xlu1 %6860 }
 0x800   :  { %vm6881_vm7 = vcmp.gt.f32.partialorder %v13621_v43, 0.5 }
 0x894   :  { %v7076_v9 = vpop.f32.mrb[46].mxu1 }
 0x895   :  { %v7081_v42 = vadd.f32 %v7076_v9, %v14084_v0  ;;  %v7078_v46 = vpop.f32.mrb[47].mxu1 }
 0x896   :  { %v7082_v21 = vadd.f32 %v7078_v46, %v14085_v28 }
 0x897   :  { %v8159_v11 = vmul.f32 -1.442695, %v7081_v42 }
 0x898   :  { %v7084_v22 = vmul.f32 %v7082_v21, %v13578_v56 }
 0x899   :  { %8804 = vpow2.f32 %v8159_v11 }
 0x89a   :  { %v8160_v16 = vmul.f32 -1.442695, %v7084_v22 }
 0x89c   :  { %8806 = vpow2.f32 %v8160_v16 }
 0x8a3   :  { %v8805_v59 = vpop.eup %8804 }
 0x8a4   :  { %v7091_v24 = vadd.f32 1.0, %v8805_v59  ;;  %v14086_v59 = vmov 0.0  }
 0x8a6   :  { %v8807_v25 = vpop.eup %8806 }
 0x8a7   :  { %v7092_v36 = vadd.f32 1.0, %v8807_v25 }
 0x8a9   :  { %8808 = vrcp.f32 %v7092_v36  ;;  %v14087_v36 = vsel %vm13481_vm3, %v13276_v39, %v13499_v29 }
 0x8aa   :  { %8810 = vrcp.f32 %v7091_v24 }
 0x8b3   :  { %v8809_v17 = vpop.eup %8808 }
 0x8b4   :  { %v7098_v63 = vmul.f32 %v8809_v17, %v13578_v56  ;;  %v8811_v0 = vpop.eup %8810 }
 0x8b5   :  { %v7101_v42 = vmul.f32 %v8811_v0, %v7004_v60 }
 0x8b6   :  { %v7100_v9 = vsub.f32 %v7098_v63, %v13583_v48 }
 0x8b8   :  { %v7102_v19 = vmul.f32 %v8811_v0, %v7100_v9 }
 0x8ba   :  { %7104 = vrot.lane.b32.xlu0 %v7102_v19, %s8965_s4 }
 0x92c   :  { %v7105_v46 = vpop.permute.xlu0 %7104 }
 0x92d   :  { %v7107_v28 = vadd.f32 %v7105_v46, %v7101_v42 }
 0x92f   :  { %8812 = vtanh.f32 %v7107_v28  ;;  %v7113_v21 = vsel %vm6881_vm7, %v7107_v28, %v7004_v60  ;;  %v6862_v60 = vsel %vm2604_vm6, %v13402_v31, 0.0 }
 0x930   :  { %6863 = vadd.xlane.f32.xlu0 %v6862_v60 }
 0x939   :  { %v8813_v11 = vpop.eup %8812 }
 0x93a   :  { %v7109_v24 = vmul.f32 %v8813_v11, %v7100_v9  ;;  %v14088_v9 = vsel %vm13487_vm15, %v13270_v53, %v13501_v61 }
 0x93c   :  { %v13625_v22 = vsel %vm6881_vm7, %v7109_v24, %v13591_v52 }
 0x93d   :  { %7115 = vrot.lane.b32.xlu1 %v13625_v22, %s8965_s4 }
 0x9af   :  { %v7116_v16 = vpop.permute.xlu1 %7115 }
 0x9b0   :  { %8161 = vmatmul.mubr.msk.f32.vlgmr.msra.gmra.mrb[48].mxu1 %vm2604_vm6, %v7116_v16 }
 0x9b1   :  { %8666 = vmatpush1.bf16.msra.mxu1 %v13353_v35  ;;  %7292 = vmatprep.mubr.f32.mxu1 %v14086_v59 }
 0x9b2   :  { %8668 = vmatprep.subr.bf16.mxu1 %v13356_v20 }
 0x9b5   :  { %8670 = vmatpush1.bf16.msra.mxu1 %v13379_v41 }
 0x9b6   :  { %8672 = vmatprep.subr.bf16.mxu1 %v13382_v5 }
 0x9b9   :  { %8674 = vmatpush1.bf16.msra.mxu1 %v13405_v14 }
 0x9ba   :  { %8676 = vmatprep.subr.bf16.mxu1 %v13408_v27 }
 0x9bd   :  { %8678 = vmatpush1.bf16.msra.mxu1 %v13425_v54  ;;  %v13655_v61 = vpop.xlane.xlu0 %6863 }
 0x9be   :  { %8680 = vmatprep.subr.bf16.mxu1 %v13332_v57  ;;  %vm6882_vm11 = vcmp.gt.f32.partialorder %v13655_v61, 0.5 }
 0xa83   :  { %v7185_v25 = vpop.f32.mrb[48].mxu1 }
 0xa84   :  { %v7190_v17 = vadd.f32 %v7185_v25, %v14087_v36  ;;  %v7187_v63 = vpop.f32.mrb[49].mxu1 }
 0xa85   :  { %v7191_v0 = vadd.f32 %v7187_v63, %v14088_v9 }
 0xa86   :  { %v8162_v19 = vmul.f32 -1.442695, %v7190_v17 }
 0xa87   :  { %v7193_v42 = vmul.f32 %v7191_v0, %v13578_v56 }
 0xa88   :  { %8814 = vpow2.f32 %v8162_v19 }
 0xa89   :  { %v8163_v46 = vmul.f32 -1.442695, %v7193_v42 }
 0xa8b   :  { %8816 = vpow2.f32 %v8163_v46 }
 0xa92   :  { %v8815_v28 = vpop.eup %8814 }
 0xa93   :  { %v7200_v16 = vadd.f32 1.0, %v8815_v28 }
 0xa95   :  { %v8817_v11 = vpop.eup %8816 }
 0xa96   :  { %v7201_v24 = vadd.f32 1.0, %v8817_v11  ;;  %v14089_v11 = vsel %vm13481_vm3, %v13267_v62, %v13511_v40 }
 0xa98   :  { %8818 = vrcp.f32 %v7201_v24 }
 0xa99   :  { %8820 = vrcp.f32 %v7200_v16 }
 0xaa2   :  { %v8819_v39 = vpop.eup %8818 }
 0xaa3   :  { %v7207_v29 = vmul.f32 %v8819_v39, %v13578_v56  ;;  %v8821_v25 = vpop.eup %8820  ;;  %v14090_v39 = vsel %vm13487_vm15, %v13273_v15, %v13513_v12 }
 0xaa4   :  { %v7210_v36 = vmul.f32 %v8821_v25, %v7113_v21 }
 0xaa5   :  { %v7209_v60 = vsub.f32 %v7207_v29, %v13583_v48 }
 0xaa7   :  { %v7211_v53 = vmul.f32 %v8821_v25, %v7209_v60 }
 0xaa9   :  { %7213 = vrot.lane.b32.xlu1 %v7211_v53, %s8965_s4 }
 0xb1b   :  { %v7214_v17 = vpop.permute.xlu1 %7213 }
 0xb1c   :  { %v7216_v63 = vadd.f32 %v7214_v17, %v7210_v36 }
 0xb1e   :  { %8822 = vtanh.f32 %v7216_v63  ;;  %v7222_v9 = vsel %vm6882_vm11, %v7216_v63, %v7113_v21  ;;  %v6865_v21 = vsel %vm2604_vm6, %v13422_v7, 0.0 }
 0xb28   :  { %v8823_v0 = vpop.eup %8822 }
 0xb29   :  { %v7218_v19 = vmul.f32 %v8823_v0, %v7209_v60 }
 0xb2b   :  { %v13659_v42 = vsel %vm6882_vm11, %v7218_v19, %v13625_v22 }
 0xb2c   :  { %7224 = vrot.lane.b32.xlu1 %v13659_v42, %s8965_s4 }
 0xb50   :  { %6866 = vadd.xlane.f32.xlu1 %v6865_v21 }
 0xb9e   :  { %v7225_v46 = vpop.permute.xlu1 %7224 }
 0xb9f   :  { %8164 = vmatmul.mubr.msk.f32.vlgmr.msra.gmra.mrb[50].mxu1 %vm2604_vm6, %v7225_v46 }
 0xba0   :  { %8682 = vmatpush1.bf16.msra.mxu1 %v13353_v35  ;;  %7401 = vmatprep.mubr.f32.mxu1 %v14086_v59 }
 0xba1   :  { %8684 = vmatprep.subr.bf16.mxu1 %v13356_v20 }
 0xba4   :  { %8686 = vmatpush1.bf16.msra.mxu1 %v13379_v41 }
 0xba5   :  { %8688 = vmatprep.subr.bf16.mxu1 %v13382_v5 }
 0xba8   :  { %8690 = vmatpush1.bf16.msra.mxu1 %v13405_v14 }
 0xba9   :  { %8692 = vmatprep.subr.bf16.mxu1 %v13408_v27 }
 0xbac   :  { %8694 = vmatpush1.bf16.msra.mxu1 %v13425_v54 }
 0xbad   :  { %8696 = vmatprep.subr.bf16.mxu1 %v13332_v57 }
 0xbdd   :  { %v13689_v12 = vpop.xlane.xlu1 %6866 }
 0xbde   :  { %vm6883_vm8 = vcmp.gt.f32.partialorder %v13689_v12, 0.5 }
 0xc72   :  { %v7294_v28 = vpop.f32.mrb[50].mxu1 }
 0xc73   :  { %v7299_v24 = vadd.f32 %v7294_v28, %v14089_v11  ;;  %v7296_v16 = vpop.f32.mrb[51].mxu1 }
 0xc74   :  { %v7300_v29 = vadd.f32 %v7296_v16, %v14090_v39 }
 0xc75   :  { %v8165_v60 = vmul.f32 -1.442695, %v7299_v24 }
 0xc76   :  { %v7302_v25 = vmul.f32 %v7300_v29, %v13578_v56 }
 0xc77   :  { %8824 = vpow2.f32 %v8165_v60 }
 0xc78   :  { %v8166_v53 = vmul.f32 -1.442695, %v7302_v25 }
 0xc7a   :  { %8826 = vpow2.f32 %v8166_v53  ;;  %v14091_v53 = vsel %vm13481_vm3, %v13306_v6, %v13523_v1 }
 0xc81   :  { %v8825_v36 = vpop.eup %8824 }
 0xc82   :  { %v7309_v0 = vadd.f32 1.0, %v8825_v36 }
 0xc84   :  { %v8827_v17 = vpop.eup %8826 }
 0xc85   :  { %v7310_v63 = vadd.f32 1.0, %v8827_v17 }
 0xc87   :  { %8828 = vrcp.f32 %v7310_v63  ;;  %v14092_v63 = vsel %vm13487_vm15, %v13300_v18, %v13525_v32 }
 0xc88   :  { %8830 = vrcp.f32 %v7309_v0 }
 0xc91   :  { %v8829_v62 = vpop.eup %8828 }
 0xc92   :  { %v7316_v40 = vmul.f32 %v8829_v62, %v13578_v56  ;;  %v8831_v46 = vpop.eup %8830 }
 0xc93   :  { %v7319_v21 = vmul.f32 %v8831_v46, %v7222_v9 }
 0xc94   :  { %v7318_v19 = vsub.f32 %v7316_v40, %v13583_v48 }
 0xc96   :  { %v7320_v15 = vmul.f32 %v8831_v46, %v7318_v19 }
 0xc98   :  { %7322 = vrot.lane.b32.xlu0 %v7320_v15, %s8965_s4 }
 0xd0a   :  { %v7323_v28 = vpop.permute.xlu0 %7322 }
 0xd0b   :  { %v7325_v11 = vadd.f32 %v7323_v28, %v7319_v21 }
 0xd0d   :  { %8832 = vtanh.f32 %v7325_v11  ;;  %v7331_v24 = vsel %vm6883_vm8, %v7325_v11, %v7222_v9  ;;  %v6868_v9 = vsel %vm2604_vm6, %v13434_v55, 0.0 }
 0xd0e   :  { %6869 = vadd.xlane.f32.xlu0 %v6868_v9 }
 0xd17   :  { %v8833_v16 = vpop.eup %8832 }
 0xd18   :  { %v7327_v39 = vmul.f32 %v8833_v16, %v7318_v19 }
 0xd1a   :  { %v13693_v29 = vsel %vm6883_vm8, %v7327_v39, %v13659_v42 }
 0xd1b   :  { %7333 = vrot.lane.b32.xlu1 %v13693_v29, %s8965_s4 }
 0xd8d   :  { %v7334_v60 = vpop.permute.xlu1 %7333 }
 0xd8e   :  { %8167 = vmatmul.mubr.msk.f32.vlgmr.msra.gmra.mrb[52].mxu1 %vm2604_vm6, %v7334_v60 }
 0xd8f   :  { %8698 = vmatpush1.bf16.msra.mxu1 %v13353_v35  ;;  %7510 = vmatprep.mubr.f32.mxu1 %v14086_v59 }
 0xd90   :  { %8700 = vmatprep.subr.bf16.mxu1 %v13356_v20 }
 0xd93   :  { %8702 = vmatpush1.bf16.msra.mxu1 %v13379_v41 }
 0xd94   :  { %8704 = vmatprep.subr.bf16.mxu1 %v13382_v5 }
 0xd97   :  { %8706 = vmatpush1.bf16.msra.mxu1 %v13405_v14 }
 0xd98   :  { %8708 = vmatprep.subr.bf16.mxu1 %v13408_v27 }
 0xd9b   :  { %8710 = vmatpush1.bf16.msra.mxu1 %v13425_v54  ;;  %v13723_v32 = vpop.xlane.xlu0 %6869 }
 0xd9c   :  { %8712 = vmatprep.subr.bf16.mxu1 %v13332_v57  ;;  %vm6884_vm14 = vcmp.gt.f32.partialorder %v13723_v32, 0.5 }
 0xe61   :  { %v7403_v25 = vpop.f32.mrb[52].mxu1 }
 0xe62   :  { %v7408_v36 = vadd.f32 %v7403_v25, %v14091_v53  ;;  %v7405_v17 = vpop.f32.mrb[53].mxu1 }
 0xe63   :  { %v7409_v0 = vadd.f32 %v7405_v17, %v14092_v63 }
 0xe64   :  { %v8168_v62 = vmul.f32 -1.442695, %v7408_v36 }
 0xe65   :  { %v7411_v40 = vmul.f32 %v7409_v0, %v13578_v56 }
 0xe66   :  { %8834 = vpow2.f32 %v8168_v62  ;;  %v14093_v62 = vsel %vm13481_vm3, %v13297_v49, %v13535_v23 }
 0xe67   :  { %v8169_v19 = vmul.f32 -1.442695, %v7411_v40 }
 0xe69   :  { %8836 = vpow2.f32 %v8169_v19 }
 0xe70   :  { %v8835_v46 = vpop.eup %8834 }
 0xe71   :  { %v7418_v28 = vadd.f32 1.0, %v8835_v46  ;;  %v14094_v46 = vsel %vm13487_vm15, %v13303_v47, %v13537_v3 }
 0xe73   :  { %v8837_v15 = vpop.eup %8836 }
 0xe74   :  { %v7419_v21 = vadd.f32 1.0, %v8837_v15 }
 0xe76   :  { %8838 = vrcp.f32 %v7419_v21 }
 0xe77   :  { %8840 = vrcp.f32 %v7418_v28 }
 0xe80   :  { %v8839_v6 = vpop.eup %8838 }
 0xe81   :  { %v7425_v1 = vmul.f32 %v8839_v6, %v13578_v56  ;;  %v8841_v16 = vpop.eup %8840 }
 0xe82   :  { %v7428_v39 = vmul.f32 %v8841_v16, %v7331_v24 }
 0xe83   :  { %v7427_v11 = vsub.f32 %v7425_v1, %v13583_v48 }
 0xe85   :  { %v7429_v18 = vmul.f32 %v8841_v16, %v7427_v11 }
 0xe87   :  { %7431 = vrot.lane.b32.xlu1 %v7429_v18, %s8965_s4 }
 0xef9   :  { %v7432_v60 = vpop.permute.xlu1 %7431 }
 0xefa   :  { %v7434_v9 = vadd.f32 %v7432_v60, %v7428_v39 }
 0xefc   :  { %8842 = vtanh.f32 %v7434_v9  ;;  %v7440_v25 = vsel %vm6884_vm14, %v7434_v9, %v7331_v24  ;;  %v6871_v24 = vsel %vm2604_vm6, %v13444_v33, 0.0 }
 0xf06   :  { %v8843_v53 = vpop.eup %8842 }
 0xf07   :  { %v7436_v36 = vmul.f32 %v8843_v53, %v7427_v11 }
 0xf09   :  { %v13727_v17 = vsel %vm6884_vm14, %v7436_v36, %v13693_v29 }
 0xf0a   :  { %7442 = vrot.lane.b32.xlu1 %v13727_v17, %s8965_s4 }
 0xf2e   :  { %6872 = vadd.xlane.f32.xlu1 %v6871_v24 }
 0xf7c   :  { %v7443_v63 = vpop.permute.xlu1 %7442 }
 0xf7d   :  { %8170 = vmatmul.mubr.msk.f32.vlgmr.msra.gmra.mrb[54].mxu1 %vm2604_vm6, %v7443_v63 }
 0xf7e   :  { %8714 = vmatpush1.bf16.msra.mxu1 %v13353_v35  ;;  %7619 = vmatprep.mubr.f32.mxu1 %v14086_v59 }
 0xf7f   :  { %8716 = vmatprep.subr.bf16.mxu1 %v13356_v20 }
 0xf82   :  { %8718 = vmatpush1.bf16.msra.mxu1 %v13379_v41 }
 0xf83   :  { %8720 = vmatprep.subr.bf16.mxu1 %v13382_v5 }
 0xf86   :  { %8722 = vmatpush1.bf16.msra.mxu1 %v13405_v14 }
 0xf87   :  { %8724 = vmatprep.subr.bf16.mxu1 %v13408_v27 }
 0xf8a   :  { %8726 = vmatpush1.bf16.msra.mxu1 %v13425_v54 }
 0xf8b   :  { %8728 = vmatprep.subr.bf16.mxu1 %v13332_v57 }
 0xfbb   :  { %v13757_v3 = vpop.xlane.xlu1 %6872 }
 0xfbc   :  { %vm6885_vm5 = vcmp.gt.f32.partialorder %v13757_v3, 0.5 }
0x1050   :  { %v7512_v0 = vpop.f32.mrb[54].mxu1 }
0x1051   :  { %v7517_v40 = vadd.f32 %v7512_v0, %v14093_v62  ;;  %v7514_v19 = vpop.f32.mrb[55].mxu1 }
0x1052   :  { %v7518_v15 = vadd.f32 %v7514_v19, %v14094_v46 }
0x1053   :  { %v8171_v21 = vmul.f32 -1.442695, %v7517_v40 }
0x1054   :  { %v7520_v57 = vmul.f32 %v7518_v15, %v13578_v56 }
0x1055   :  { %8844 = vpow2.f32 %v8171_v21 }
0x1056   :  { %v8172_v28 = vmul.f32 -1.442695, %v7520_v57 }
0x1058   :  { %8846 = vpow2.f32 %v8172_v28 }
0x105f   :  { %v8845_v6 = vpop.eup %8844 }
0x1060   :  { %v7527_v16 = vadd.f32 1.0, %v8845_v6 }
0x1062   :  { %v8847_v1 = vpop.eup %8846 }
0x1063   :  { %v7528_v11 = vadd.f32 1.0, %v8847_v1 }
0x1065   :  { %8848 = vrcp.f32 %v7528_v11 }
0x1066   :  { %8850 = vrcp.f32 %v7527_v16 }
0x106f   :  { %v8849_v49 = vpop.eup %8848 }
0x1070   :  { %v7534_v23 = vmul.f32 %v8849_v49, %v13578_v56  ;;  %v8851_v39 = vpop.eup %8850 }
0x1071   :  { %v7537_v60 = vmul.f32 %v8851_v39, %v7440_v25 }
0x1072   :  { %v7536_v18 = vsub.f32 %v7534_v23, %v13583_v48 }
0x1074   :  { %v7538_v47 = vmul.f32 %v8851_v39, %v7536_v18  ;;  %v6877_v39 = vsel %vm2604_vm6, %v13460_v51, 0.0 }
0x1076   :  { %7540 = vrot.lane.b32.xlu0 %v7538_v47, %s8965_s4 }
0x10e8   :  { %v7541_v9 = vpop.permute.xlu0 %7540 }
0x10e9   :  { %v7543_v53 = vadd.f32 %v7541_v9, %v7537_v60  ;;  %v7772_v60 = vmul.f32 %v13727_v17, %v13723_v32 }
0x10eb   :  { %8852 = vtanh.f32 %v7543_v53  ;;  %v7549_v36 = vsel %vm6885_vm5, %v7543_v53, %v7440_v25  ;;  %v6874_v25 = vsel %vm2604_vm6, %v13452_v4, 0.0 }
0x10f5   :  { %v8853_v63 = vpop.eup %8852 }
0x10f6   :  { %v7545_v24 = vmul.f32 %v8853_v63, %v7536_v18  ;;  %v14097_v63 = vsel %vm13481_vm3, %v13313_v58, %v13559_v30 }
0x10f8   :  { %v13761_v0 = vsel %vm6885_vm5, %v7545_v24, %v13727_v17 }
0x10f9   :  { %7551 = vrot.lane.b32.xlu0 %v13761_v0, %s8965_s4  ;;  %v8784_v47 = vpack.i.bf16 %v13761_v0, %v13727_v17  ;;  %v14098_v17 = vsel %vm13487_vm15, %v13325_v2, %v13561_v10  ;;  %v8774_v10 = vpack.i.bf16 %v13625_v22, %v13591_v52 }
0x1118   :  { %6875 = vadd.xlane.f32.xlu0 %v6874_v25 }
0x116b   :  { %v7552_v62 = vpop.permute.xlu0 %7551 }
0x116c   :  { %8173 = vmatmul.mubr.msk.f32.vlgmr.msra.gmra.mrb[56].mxu1 %vm2604_vm6, %v7552_v62 }
0x116d   :  { %8730 = vmatpush1.bf16.msra.mxu1 %v13353_v35  ;;  %7728 = vmatprep.mubr.f32.mxu1 %v14086_v59  ;;  %v14095_v35 = vsel %vm13481_vm3, %v13328_v8, %v13547_v34 }
0x116e   :  { %8732 = vmatprep.subr.bf16.mxu1 %v13356_v20 }
0x1171   :  { %8734 = vmatpush1.bf16.msra.mxu1 %v13379_v41 }
0x1172   :  { %8736 = vmatprep.subr.bf16.mxu1 %v13382_v5  ;;  %v14096_v5 = vsel %vm13487_vm15, %v13322_v37, %v13549_v13 }
0x1175   :  { %8738 = vmatpush1.bf16.msra.mxu1 %v13405_v14 }
0x1176   :  { %8740 = vmatprep.subr.bf16.mxu1 %v13408_v27 }
0x1179   :  { %8742 = vmatpush1.bf16.msra.mxu1 %v13425_v54 }
0x11a5   :  { %v6876_v13 = vpop.xlane.xlu0 %6875 }
0x11a6   :  { %vm6886_vm2 = vcmp.gt.f32.partialorder %v6876_v13, 0.5 }
0x123f   :  { %v7621_v40 = vpop.f32.mrb[56].mxu1 }
0x1240   :  { %v7626_v20 = vadd.f32 %v7621_v40, %v14095_v35  ;;  %v7623_v41 = vpop.f32.mrb[57].mxu1 }
0x1241   :  { %v7627_v14 = vadd.f32 %v7623_v41, %v14096_v5 }
0x1242   :  { %v8174_v27 = vmul.f32 -1.442695, %v7626_v20 }
0x1243   :  { %v7629_v54 = vmul.f32 %v7627_v14, %v13578_v56  ;;  %v8779_v14 = vpack.i.bf16 %v13693_v29, %v13659_v42 }
0x1244   :  { %8854 = vpow2.f32 %v8174_v27 }
0x1245   :  { %v8175_v59 = vmul.f32 -1.442695, %v7629_v54 }
0x1247   :  { %8856 = vpow2.f32 %v8175_v59 }
0x124e   :  { %v8855_v19 = vpop.eup %8854 }
0x124f   :  { %v7636_v21 = vadd.f32 1.0, %v8855_v19 }
0x1251   :  { %v8857_v46 = vpop.eup %8856 }
0x1252   :  { %v7637_v15 = vadd.f32 1.0, %v8857_v46 }
0x1254   :  { %8858 = vrcp.f32 %v7637_v15 }
0x1255   :  { %8860 = vrcp.f32 %v7636_v21 }
0x125e   :  { %v8859_v8 = vpop.eup %8858 }
0x125f   :  { %v7643_v34 = vmul.f32 %v8859_v8, %v13578_v56  ;;  %v8861_v28 = vpop.eup %8860 }
0x1260   :  { %v7646_v6 = vmul.f32 %v8861_v28, %v7549_v36 }
0x1261   :  { %v7645_v57 = vsub.f32 %v7643_v34, %v13583_v48 }
0x1263   :  { %v7647_v37 = vmul.f32 %v8861_v28, %v7645_v57 }
0x1265   :  { %7649 = vrot.lane.b32.xlu1 %v7647_v37, %s8965_s4 }
0x12d7   :  { %v7650_v1 = vpop.permute.xlu1 %7649 }
0x12d8   :  { %v7652_v11 = vadd.f32 %v7650_v1, %v7646_v6 }
0x12da   :  { %8862 = vtanh.f32 %v7652_v11  ;;  %v7658_v16 = vsel %vm6886_vm2, %v7652_v11, %v7549_v36 }
0x12e4   :  { %v8863_v49 = vpop.eup %8862 }
0x12e5   :  { %v7654_v23 = vmul.f32 %v8863_v49, %v7645_v57 }
0x12e7   :  { %v13791_v18 = vsel %vm6886_vm2, %v7654_v23, %v13761_v0 }
0x12e8   :  { %7660 = vrot.lane.b32.xlu1 %v13791_v18, %s8965_s4  ;;  %v7774_v9 = vmul.f32 %v13791_v18, %v6876_v13 }
0x130c   :  { %6878 = vadd.xlane.f32.xlu1 %v6877_v39  ;;  %v7768_v39 = vmul.f32 %v13591_v52, %v13588_v45  ;;  %v7773_v45 = vmul.f32 %v13761_v0, %v13757_v3 }
0x131d   :  { %8785 = vrot.lane.b32.xlu1 %v8784_v47, %s8959_s24  ;;  %v7769_v47 = vmul.f32 %v13625_v22, %v13621_v43 }
0x1321   :  { %7922 = vrot.lane.b32.xlu1 %v7772_v60, %s8965_s4  ;;  %v7770_v60 = vmul.f32 %v13659_v42, %v13655_v61 }
0x1325   :  { %7926 = vrot.lane.b32.xlu1 %v7774_v9, %s8965_s4 }
0x135a   :  { %v7661_v53 = vpop.permute.xlu1 %7660 }
0x135b   :  { %8176 = vmatmul.mubr.msk.f32.vlgmr.msra.gmra.mrb[58].mxu1 %vm2604_vm6, %v7661_v53 }
0x135c   :  { %8563 = vmatprep.mubr.msk.f32.mxu1 %vm2604_vm6, %v13351_v38 }
0x1399   :  { %v6879_v27 = vpop.xlane.xlu1 %6878 }
0x139a   :  { %vm6887_vm10 = vcmp.gt.f32.partialorder %v6879_v27, 0.5 }
0x139d   :  { %v8786_v21 = vpop.permute.xlu1 %8785 }
0x139e   :  { %v8788_v57 = vunpack.i.h.bf16 %v8786_v21  ;;  %v8787_v28 = vunpack.i.l.bf16 %v8786_v21 }
0x13a0   :  { %v8751_v11 = vpack.c.bf16 %v8788_v57, %v8787_v28 }
0x142e   :  { %v7730_v36 = vpop.f32.mrb[58].mxu1 }
0x142f   :  { %v7735_v24 = vadd.f32 %v7730_v36, %v14097_v63  ;;  %v7732_v32 = vpop.f32.mrb[59].mxu1  ;;  %v7923_v36 = vpop.permute.xlu1 %7922 }
0x1430   :  { %v7736_v62 = vadd.f32 %v7732_v32, %v14098_v17 }
0x1431   :  { %v8177_v25 = vmul.f32 -1.442695, %v7735_v24 }
0x1432   :  { %v7738_v40 = vmul.f32 %v7736_v62, %v13578_v56 }
0x1433   :  { %8864 = vpow2.f32 %v8177_v25  ;;  %v7927_v24 = vpop.permute.xlu1 %7926 }
0x1434   :  { %v8178_v35 = vmul.f32 -1.442695, %v7738_v40 }
0x1436   :  { %8866 = vpow2.f32 %v8178_v35 }
0x143d   :  { %v8865_v38 = vpop.eup %8864 }
0x143e   :  { %v7745_v41 = vadd.f32 1.0, %v8865_v38 }
0x1440   :  { %v8867_v20 = vpop.eup %8866 }
0x1441   :  { %v7746_v50 = vadd.f32 1.0, %v8867_v20 }
0x1443   :  { %8868 = vrcp.f32 %v7746_v50 }
0x1444   :  { %8870 = vrcp.f32 %v7745_v41 }
0x144d   :  { %v8869_v58 = vpop.eup %8868 }
0x144e   :  { %v7752_v30 = vmul.f32 %v8869_v58, %v13578_v56  ;;  %v8871_v5 = vpop.eup %8870 }
0x144f   :  { %v7755_v54 = vmul.f32 %v8871_v5, %v7658_v16 }
0x1450   :  { %v7754_v26 = vsub.f32 %v7752_v30, %v13583_v48 }
0x1452   :  { %v7756_v2 = vmul.f32 %v8871_v5, %v7754_v26 }
0x1454   :  { %7758 = vrot.lane.b32.xlu0 %v7756_v2, %s8965_s4 }
0x1458   :  { %8775 = vrot.lane.b32.xlu0 %v8774_v10, %s8959_s24 }
0x145c   :  { %8780 = vrot.lane.b32.xlu0 %v8779_v14, %s8959_s24 }
0x14c6   :  { %v7759_v56 = vpop.permute.xlu0 %7758 }
0x14c7   :  { %v7761_v59 = vadd.f32 %v7759_v56, %v7755_v54 }
0x14c9   :  { %8872 = vtanh.f32 %v7761_v59  ;;  %v13829_v48 = vsel %vm6887_vm10, %v7761_v59, %v7658_v16 }
0x14ca   :  { %v8776_v19 = vpop.permute.xlu0 %8775 }
0x14cb   :  { %v8778_v46 = vunpack.i.h.bf16 %v8776_v19  ;;  %v8777_v15 = vunpack.i.l.bf16 %v8776_v19 }
0x14cd   :  { %v8743_v8 = vpack.c.bf16 %v8778_v46, %v8777_v15 }
0x14ce   :  { %v8781_v34 = vpop.permute.xlu0 %8780 }
0x14cf   :  { %v8783_v37 = vunpack.i.h.bf16 %v8781_v34  ;;  %v8782_v13 = vunpack.i.l.bf16 %v8781_v34  ;;  %8744 = vmatprep.subr.bf16.mxu1 %v8743_v8 }
0x14d0   :  { %8746 = vmatpush3.bf16.msra.mxu1 %v8743_v8 }
0x14d1   :  { %v8747_v6 = vpack.c.bf16 %v8783_v37, %v8782_v13 }
0x14d3   :  { %v8873_v1 = vpop.eup %8872  ;;  %8748 = vmatprep.subr.bf16.mxu1 %v8747_v6 }
0x14d4   :  { %v7763_v49 = vmul.f32 %v8873_v1, %v7754_v26  ;;  %8750 = vmatpush3.bf16.msra.mxu1 %v8747_v6 }
0x14d5   :  { %8752 = vmatprep.subr.bf16.mxu1 %v8751_v11 }
0x14d6   :  { %v7766_v16 = vsel %vm6887_vm10, %v7763_v49, %v13791_v18 }
0x14d7   :  { %v8789_v23 = vpack.i.bf16 %v7766_v16, %v13791_v18  ;;  %v7771_v18 = vmul.f32 %v13693_v29, %v13689_v12  ;;  %v7775_v52 = vmul.f32 %v7766_v16, %v6879_v27 }
0x14d8   :  { %8754 = vmatpush3.bf16.msra.mxu1 %v8751_v11 }
0x14d9   :  { %8790 = vrot.lane.b32.xlu0 %v8789_v23, %s8959_s24 }
0x14dd   :  { %7914 = vrot.lane.b32.xlu0 %v7768_v39, %s8965_s4 }
0x14e1   :  { %7916 = vrot.lane.b32.xlu0 %v7769_v47, %s8965_s4 }
0x14e5   :  { %7918 = vrot.lane.b32.xlu0 %v7770_v60, %s8965_s4 }
0x14e9   :  { %7920 = vrot.lane.b32.xlu0 %v7771_v18, %s8965_s4 }
0x14ed   :  { %7924 = vrot.lane.b32.xlu0 %v7773_v45, %s8965_s4 }
0x14f1   :  { %7928 = vrot.lane.b32.xlu0 %v7775_v52, %s8965_s4 }
0x154b   :  { %v8791_v43 = vpop.permute.xlu0 %8790 }
0x154c   :  { %v8793_v22 = vunpack.i.h.bf16 %v8791_v43  ;;  %v8792_v9 = vunpack.i.l.bf16 %v8791_v43 }
0x154e   :  { %v8755_v53 = vpack.c.bf16 %v8793_v22, %v8792_v9 }
0x154f   :  { %v7915_v42 = vpop.permute.xlu0 %7914 }
0x1550   :  { %8756 = vmatprep.subr.bf16.mxu1 %v8755_v53 }
0x1551   :  { %8758 = vmatpush3.bf16.msra.mxu1 %v8755_v53 }
0x1553   :  { %v7917_v12 = vpop.permute.xlu0 %7916 }
0x1554   :  { %8564 = vmatmul.mubr.msk.f32.vlgmr.msra.gmra.mrb[60].mxu1 %vm2604_vm6, %v13376_v44 }
0x1555   :  { %8566 = vmatprep.mubr.msk.f32.mxu1 %vm2604_vm6, %v13402_v31 }
0x1557   :  { %v7919_v29 = vpop.permute.xlu0 %7918 }
0x1558   :  { %8567 = vmatmul.mubr.msk.f32.gmra.mrb[62].mxu1 %vm2604_vm6, %v13422_v7 }
0x1559   :  { %8569 = vmatprep.mubr.msk.f32.mxu1 %vm2604_vm6, %v13434_v55 }
0x155b   :  { %v7921_v3 = vpop.permute.xlu0 %7920 }
0x155c   :  { %8570 = vmatmul.mubr.msk.f32.gmra.mrb[64].mxu1 %vm2604_vm6, %v13444_v33 }
0x155d   :  { %8572 = vmatprep.mubr.msk.f32.mxu1 %vm2604_vm6, %v13452_v4 }
0x155f   :  { %v7925_v0 = vpop.permute.xlu0 %7924 }
0x1560   :  { %8573 = vmatmul.mubr.msk.f32.gmra.mrb[66].mxu1 %vm2604_vm6, %v13460_v51 }
0x1563   :  { %v7929_v63 = vpop.permute.xlu0 %7928 }
0x1627   :  { %v8565_v61 = vpop.f32.mrb[60].mxu1 }
0x1628   :  { %v7867_v44 = vpop.f32.mrb[61].mxu1  ;;  %7948 = vrot.lane.b32.xlu0 %v8565_v61, %s8959_s24 }
0x1629   :  { %7946 = vrot.lane.b32.xlu1 %v7867_v44, %s8959_s24 }
0x162b   :  { %v8568_v31 = vpop.f32.mrb[62].mxu1 }
0x162c   :  { %v7877_v7 = vpop.f32.mrb[63].mxu1  ;;  %7952 = vrot.lane.b32.xlu0 %v8568_v31, %s8959_s24 }
0x162d   :  { %7950 = vrot.lane.b32.xlu1 %v7877_v7, %s8959_s24 }
0x162f   :  { %v8571_v55 = vpop.f32.mrb[64].mxu1 }
0x1630   :  { %v7887_v33 = vpop.f32.mrb[65].mxu1  ;;  %7956 = vrot.lane.b32.xlu0 %v8571_v55, %s8959_s24 }
0x1631   :  { %7954 = vrot.lane.b32.xlu1 %v7887_v33, %s8959_s24 }
0x1633   :  { %v8574_v4 = vpop.f32.mrb[66].mxu1 }
0x1634   :  { %v7897_v51 = vpop.f32.mrb[67].mxu1  ;;  %7960 = vrot.lane.b32.xlu0 %v8574_v4, %s8959_s24 }
0x1635   :  { %7958 = vrot.lane.b32.xlu1 %v7897_v51, %s8959_s24 }
0x1638   :  { %7982 = vrot.lane.b32.xlu0 %v13829_v48, %s8965_s4 }
0x1639   :  { %7978 = vrot.lane.b32.xlu1 %v7766_v16, %s8965_s4 }
0x169a   :  { %v7949_v32 = vpop.permute.xlu0 %7948 }
0x169b   :  { %v7971_v17 = vsel %vm2333_vm4, %v7917_v12, %v7949_v32  ;;  %v7947_v62 = vpop.permute.xlu1 %7946 }
0x169c   :  { %v7986_v25 = vsel %vm2604_vm6, %v7971_v17, 0.0  ;;  %v7970_v40 = vsel %vm2333_vm4, %v7915_v42, %v7947_v62 }
0x169d   :  { %7996 = vst [vmem:[%s13929_s5 + $0x8] sm:$0xff] %v7986_v25  ;;  %v7985_v35 = vsel %vm2604_vm6, %v7970_v40, 0.0 }
0x169e   :  { %7995 = vst [vmem:[%s13929_s5] sm:$0xff] %v7985_v35  ;;  %v7953_v38 = vpop.permute.xlu0 %7952 }
0x169f   :  { %v7973_v20 = vsel %vm2333_vm4, %v7921_v3, %v7953_v38  ;;  %v7951_v50 = vpop.permute.xlu1 %7950 }
0x16a0   :  { %v7988_v41 = vsel %vm2604_vm6, %v7973_v20, 0.0  ;;  %v7972_v58 = vsel %vm2333_vm4, %v7919_v29, %v7951_v50 }
0x16a1   :  { %7998 = vst [vmem:[%s13929_s5 + $0x18] sm:$0xff] %v7988_v41  ;;  %v7987_v30 = vsel %vm2604_vm6, %v7972_v58, 0.0 }
0x16a2   :  { %7997 = vst [vmem:[%s13929_s5 + $0x10] sm:$0xff] %v7987_v30  ;;  %v7957_v26 = vpop.permute.xlu0 %7956 }
0x16a3   :  { %v7975_v5 = vsel %vm2333_vm4, %v7925_v0, %v7957_v26  ;;  %v7955_v2 = vpop.permute.xlu1 %7954 }
0x16a4   :  { %v7990_v10 = vsel %vm2604_vm6, %v7975_v5, 0.0  ;;  %v7974_v14 = vsel %vm2333_vm4, %v7923_v36, %v7955_v2 }
0x16a5   :  { %8000 = vst [vmem:[%s13929_s5 + $0x28] sm:$0xff] %v7990_v10  ;;  %v7989_v27 = vsel %vm2604_vm6, %v7974_v14, 0.0 }
0x16a6   :  { %7999 = vst [vmem:[%s13929_s5 + $0x20] sm:$0xff] %v7989_v27  ;;  %v7961_v54 = vpop.permute.xlu0 %7960 }
0x16a7   :  { %v7977_v56 = vsel %vm2333_vm4, %v7929_v63, %v7961_v54  ;;  %v7959_v59 = vpop.permute.xlu1 %7958 }
0x16a8   :  { %v7992_v48 = vsel %vm2604_vm6, %v7977_v56, 0.0  ;;  %v7976_v19 = vsel %vm2333_vm4, %v7927_v24, %v7959_v59 }
0x16a9   :  { %8002 = vst [vmem:[%s13929_s5 + $0x38] sm:$0xff] %v7992_v48  ;;  %v7991_v46 = vsel %vm2604_vm6, %v7976_v19, 0.0 }
0x16aa   :  { %8001 = vst [vmem:[%s13929_s5 + $0x30] sm:$0xff] %v7991_v46  ;;  %v7983_v15 = vpop.permute.xlu0 %7982 }
0x16ab   :  { %v7994_v21 = vsel %vm2604_vm6, %v7983_v15, 0.0  ;;  %v7979_v8 = vpop.permute.xlu1 %7978 }
0x16ac   :  { %8004 = vst [vmem:[%s13929_s5 + $0x48] sm:$0xff] %v7994_v21  ;;  %v7993_v34 = vsel %vm2604_vm6, %v7979_v8, 0.0 }
0x16ad   :  { %8003 = vst [vmem:[%s13929_s5 + $0x40] sm:$0xff] %v7993_v34 }

</bundles_post_ra>
